<compile_context>
chip_gen: v5e
topology: v5e:2x2
jax: 0.10.0
libtpu: 0.0.40
codegen_flags: <defaults>
</compile_context>

<pallas_src>
import jax
import jax.numpy as jnp
from jax.experimental import pallas as pl
from jax.experimental.pallas import tpu as pltpu

_LANE = 128


def _round_up(n, k):
    return (n + k - 1) // k * k


def _vmem_capacity_bytes():
    """Physical VMEM per TensorCore; conservative fallback if unavailable."""
    try:
        cap = getattr(pltpu.get_tpu_info(), "vmem_capacity_bytes", None)
        if cap:
            return int(cap)
    except Exception:
        pass
    return 64 * 1024 * 1024  # v7x-sized fallback: safe on every generation


def _num_tensorcores():
    """Best-effort TensorCore count (v7x has 2); default 1 if unknown."""
    try:
        info = pltpu.get_tpu_info()
        for attr in ("num_cores", "tensorcores_per_chip", "core_count"):
            v = getattr(info, attr, None)
            if v:
                return int(v)
    except Exception:
        pass
    return 1


def _vmem_bytes(tm, th, D, out_bytes, nh):
    """Rough per-step VMEM footprint for the tiling (tm, th)."""
    wbuf = 1 if nh == 1 else 2                 # constant weights fetched once
    x_b = 2 * tm * D * 2                       # bf16 x tile, double-buffered
    o_b = 2 * tm * D * out_bytes               # output tile, double-buffered
    acc_b = tm * D * 4 if nh > 1 else 0        # f32 accumulator scratch
    w_b = wbuf * (2 * th * D + th * D) * 2     # [gate|up] + down weight tiles
    tmp_b = tm * th * 12                       # (tm,2th) f32 hw + (tm,th) gated
    return x_b + o_b + acc_b + w_b + tmp_b + (2 << 20)  # + headroom


def plan_ffn(M, D, H, out_dtype=jnp.bfloat16):
    """Pick (tm, th, Hp, vmem_limit) from the hardware VMEM budget."""
    budget = int(_vmem_capacity_bytes() * 0.8)
    out_bytes = jnp.dtype(out_dtype).itemsize

    # H tile: pad H to a multiple of th instead of requiring a divisor; cap th
    # so double-buffered weight tiles stay within ~half the VMEM budget.
    Hp_lane = _round_up(H, _LANE)
    w_budget = budget // 2
    th_cap = max(_LANE, (w_budget // (12 * D)) // _LANE * _LANE)
    th = min(Hp_lane, 2048, th_cap)
    Hp = _round_up(H, th)
    nh = Hp // th

    # Token tile: largest multiple of 128 (<= 1024) that fits the byte model.
    Mp_lane = _round_up(M, _LANE)
    tm = min(1024, Mp_lane)
    while tm > _LANE and _vmem_bytes(tm, th, D, out_bytes, nh) > budget:
        tm -= _LANE

    # Keep both TensorCores busy on multi-core chips (v7x): >=2 token tiles.
    if _num_tensorcores() >= 2 and Mp_lane >= 2 * _LANE:
        tm = min(tm, max(_LANE, (Mp_lane // 2) // _LANE * _LANE))

    return dict(tm=tm, th=th, Hp=Hp, out_dtype=out_dtype,
                vmem_limit_bytes=budget)


def prepare_ffn_params(w1, w3, w2, plan, dtype=jnp.bfloat16):
    """One-time parameter prep (load time, NOT per forward call).

    w1, w3: (H, D) and w2: (D, H) in PyTorch (out_features, in_features) layout.
    Returns (w13, w2t):
      w13: (D, 2*Hp) bf16 laid out per H-tile as [gate tile | up tile],
      w2t: (Hp, D) bf16 (zero-padded rows beyond H).
    """
    H, D = w1.shape
    th, Hp = plan["th"], plan["Hp"]
    assert Hp % th == 0 and th % _LANE == 0
    nh = Hp // th

    w1t = w1.T.astype(dtype)            # (D, H)
    w3t = w3.T.astype(dtype)            # (D, H)
    w2t = w2.T.astype(dtype)            # (H, D)
    if Hp != H:
        pad = Hp - H                    # zero pad: silu(0)*0 = 0, no effect
        w1t = jnp.pad(w1t, ((0, 0), (0, pad)))
        w3t = jnp.pad(w3t, ((0, 0), (0, pad)))
        w2t = jnp.pad(w2t, ((0, pad), (0, 0)))

    w1b = w1t.reshape(D, nh, th)
    w3b = w3t.reshape(D, nh, th)
    w13 = jnp.stack([w1b, w3b], axis=2).reshape(D, 2 * Hp)
    return w13, w2t


def _swiglu_block(x, w13, w2, th):
    # Fused gate+up projection: one (tm, D) x (D, 2*th) MXU matmul, f32 accum.
    hw = jnp.dot(x, w13, preferred_element_type=jnp.float32)
    gate = hw[:, :th]                   # static, lane-aligned slices
    up = hw[:, th:]
    gated = (gate * jax.nn.sigmoid(gate)) * up       # silu(gate) * up, f32
    # Down projection for this H tile, f32 accumulation.
    return jnp.dot(gated.astype(jnp.bfloat16), w2,
                   preferred_element_type=jnp.float32)


def _ffn_kernel_single(x_ref, w13_ref, w2_ref, o_ref):
    # Whole intermediate dim resident: no accumulator, write output directly.
    th = w2_ref.shape[0]
    o_ref[...] = _swiglu_block(x_ref[...], w13_ref[...], w2_ref[...],
                               th).astype(o_ref.dtype)


def _ffn_kernel_acc(x_ref, w13_ref, w2_ref, o_ref, acc_ref):
    # x_ref:   (tm, D)      bf16 token tile (constant along the h axis)
    # w13_ref: (D, 2*th)    bf16 [gate | up] weight tile for this h step
    # w2_ref:  (th, D)      bf16 down-proj weight tile for this h step
    # o_ref:   (tm, D)      output tile (written on the last h step)
    # acc_ref: (tm, D) f32  VMEM accumulator, resident across the h axis
    h = pl.program_id(1)
    th = w2_ref.shape[0]
    prod = _swiglu_block(x_ref[...], w13_ref[...], w2_ref[...], th)

    @pl.when(h == 0)
    def _():
        acc_ref[...] = prod             # no separate zero-init pass

    @pl.when(h > 0)
    def _():
        acc_ref[...] += prod

    @pl.when(h == pl.num_programs(1) - 1)
    def _():
        o_ref[...] = acc_ref[...].astype(o_ref.dtype)


def feedforward_pallas(x, w13, w2t, plan):
    """x: (B, S, D).  w13: (D, 2*Hp), w2t: (Hp, D) pre-prepped bf16 weights."""
    B, S, D = x.shape
    tm, th, Hp = plan["tm"], plan["th"], plan["Hp"]
    out_dtype = plan["out_dtype"]
    assert Hp % th == 0, "Hp must be a multiple of th (see plan_ffn)"
    nh = Hp // th
    assert w13.shape == (D, 2 * Hp) and w2t.shape == (Hp, D)

    M = B * S
    Mp = _round_up(M, tm)

    # TODO(synk): keep activations bf16 upstream to avoid this cast/pad copy.
    x2d = x.reshape(M, D).astype(jnp.bfloat16)
    if Mp != M:
        x2d = jnp.pad(x2d, ((0, Mp - M), (0, 0)))

    if nh == 1:
        grid = (Mp // tm,)
        in_specs = [
            pl.BlockSpec((tm, D), lambda i: (i, 0)),           # x tile
            pl.BlockSpec((D, 2 * th), lambda i: (0, 0)),       # [gate|up] W
            pl.BlockSpec((th, D), lambda i: (0, 0)),           # down W
        ]
        out_specs = pl.BlockSpec((tm, D), lambda i: (i, 0))
        scratch = []
        kernel = _ffn_kernel_single
        dims = ("parallel",)
    else:
        grid = (Mp // tm, nh)                        # reduction (H) axis last
        in_specs = [
            pl.BlockSpec((tm, D), lambda i, h: (i, 0)),        # x tile
            pl.BlockSpec((D, 2 * th), lambda i, h: (0, h)),    # [gate|up] W
            pl.BlockSpec((th, D), lambda i, h: (h, 0)),        # down W
        ]
        out_specs = pl.BlockSpec((tm, D), lambda i, h: (i, 0))
        scratch = [pltpu.VMEM((tm, D), jnp.float32)]
        kernel = _ffn_kernel_acc
        dims = ("parallel", "arbitrary")

    out = pl.pallas_call(
        kernel,
        out_shape=jax.ShapeDtypeStruct((Mp, D), out_dtype),
        grid_spec=pltpu.PrefetchScalarGridSpec(
            num_scalar_prefetch=0,
            grid=grid,
            in_specs=in_specs,
            out_specs=out_specs,
            scratch_shapes=scratch,
        ),
        compiler_params=pltpu.CompilerParams(
            dimension_semantics=dims,
            vmem_limit_bytes=plan["vmem_limit_bytes"],
        ),
    )(x2d, w13, w2t)

    return out[:M].reshape(B, S, D)


def feedforward_ref(x, w1, w3, w2):
    h1 = jnp.einsum("bsd,hd->bsh", x, w1)
    h3 = jnp.einsum("bsd,hd->bsh", x, w3)
    g = (h1 * jax.nn.sigmoid(h1)) * h3
    return jnp.einsum("bsh,dh->bsd", g, w2)


if __name__ == "__main__":
    # Small config consistent with ModelArgs(dim=256):
    #   intermediate_size = find_multiple(int(2*4*256/3), 256) = 768
    B, S, D, H = 2, 64, 256, 768

    key = jax.random.PRNGKey(0)
    kx, k1, k3, k2 = jax.random.split(key, 4)
    x = jax.random.normal(kx, (B, S, D), dtype=jnp.float32)
    # PyTorch Linear layout: (out_features, in_features)
    w1 = jax.random.normal(k1, (H, D), dtype=jnp.float32) * (1.0 / D ** 0.5)
    w3 = jax.random.normal(k3, (H, D), dtype=jnp.float32) * (1.0 / D ** 0.5)
    w2 = jax.random.normal(k2, (D, H), dtype=jnp.float32) * (1.0 / H ** 0.5)

    # One-time plan + weight prep (transpose + fuse + pad + bf16 cast).
    plan = plan_ffn(B * S, D, H)
    w13, w2t = prepare_ffn_params(w1, w3, w2, plan)

    y = feedforward_pallas(x, w13, w2t, plan)
    y = jax.block_until_ready(y)

    y_ref = feedforward_ref(x, w1, w3, w2)
    assert y.shape == (B, S, D)
    # bf16 operands + bf16 output (f32 accumulation) -> relaxed tolerance.
    y32 = y.astype(jnp.float32)
    rel = jnp.linalg.norm(y32 - y_ref) / jnp.linalg.norm(y_ref)
    assert rel < 2e-2, f"mismatch vs reference: rel L2 err = {rel}"

    print("KERNEL_OK")
</pallas_src>

<mosaic_0001>
module attributes {stable_mosaic.version = 11 : i64} {
  func.func @_ffn_kernel_single(%arg0: i32, %arg1: memref<128x256xbf16, #tpu.memory_space<vmem>>, %arg2: memref<256x1536xbf16, #tpu.memory_space<vmem>>, %arg3: memref<768x256xbf16, #tpu.memory_space<vmem>>, %arg4: memref<128x256xbf16, #tpu.memory_space<vmem>>) attributes {dimension_semantics = [#tpu.dimension_semantics<parallel>], iteration_bounds = array<i64: 1>, scalar_prefetch = 0 : i64, scratch_operands = 0 : i64, tpu.core_type = #tpu.core_type<tc>, window_params = [{transform_indices = @transform_0, window_bounds = array<i64: 128, 256>}, {pipeline_mode = #tpu.pipeline_mode<synchronous>, transform_indices = @transform_1, window_bounds = array<i64: 256, 1536>}, {pipeline_mode = #tpu.pipeline_mode<synchronous>, transform_indices = @transform_2, window_bounds = array<i64: 768, 256>}, {transform_indices = @transform_3, window_bounds = array<i64: 128, 256>}]} {
    %c0 = arith.constant 0 : index
    %c0_0 = arith.constant 0 : index
    %0 = vector.load %arg1[%c0, %c0_0] : memref<128x256xbf16, #tpu.memory_space<vmem>>, vector<128x256xbf16>
    %c0_1 = arith.constant 0 : index
    %c0_2 = arith.constant 0 : index
    %1 = vector.load %arg2[%c0_1, %c0_2] : memref<256x1536xbf16, #tpu.memory_space<vmem>>, vector<256x1536xbf16>
    %c0_3 = arith.constant 0 : index
    %c0_4 = arith.constant 0 : index
    %2 = vector.load %arg3[%c0_3, %c0_4] : memref<768x256xbf16, #tpu.memory_space<vmem>>, vector<768x256xbf16>
    %cst = arith.constant dense<0.000000e+00> : vector<128x1536xf32>
    %3 = tpu.matmul %0, %1, %cst {dimension_numbers = #tpu.dot_dimension_numbers<[1], [0], [0], [1], [0, 0, 1, 1], [], []>} : vector<128x256xbf16>, vector<256x1536xbf16>, vector<128x1536xf32> -> vector<128x1536xf32>
    %4 = vector.extract_strided_slice %3 {offsets = [0, 0], sizes = [128, 768], strides = [1, 1]} : vector<128x1536xf32> to vector<128x768xf32>
    %5 = vector.extract_strided_slice %3 {offsets = [0, 768], sizes = [128, 768], strides = [1, 1]} : vector<128x1536xf32> to vector<128x768xf32>
    %6 = arith.negf %4 : vector<128x768xf32>
    %7 = math.exp %6 : vector<128x768xf32>
    %cst_5 = arith.constant 1.000000e+00 : f32
    %8 = vector.broadcast %cst_5 : f32 to vector<128x768xf32>
    %9 = arith.addf %8, %7 : vector<128x768xf32>
    %10 = arith.divf %8, %9 : vector<128x768xf32>
    %11 = arith.mulf %4, %10 : vector<128x768xf32>
    %12 = arith.mulf %11, %5 : vector<128x768xf32>
    %13 = arith.truncf %12 : vector<128x768xf32> to vector<128x768xbf16>
    %cst_6 = arith.constant dense<0.000000e+00> : vector<128x256xf32>
    %14 = tpu.matmul %13, %2, %cst_6 {dimension_numbers = #tpu.dot_dimension_numbers<[1], [0], [0], [1], [0, 0, 1, 1], [], []>} : vector<128x768xbf16>, vector<768x256xbf16>, vector<128x256xf32> -> vector<128x256xf32>
    %15 = arith.truncf %14 : vector<128x256xf32> to vector<128x256xbf16>
    %c0_7 = arith.constant 0 : index
    %c0_8 = arith.constant 0 : index
    %16 = vector.load %arg4[%c0_7, %c0_8] : memref<128x256xbf16, #tpu.memory_space<vmem>>, vector<128x256xbf16>
    tpu.vector_store %arg4[%c0_7, %c0_8], %15 {strides = array<i32>} : memref<128x256xbf16, #tpu.memory_space<vmem>>, vector<128x256xbf16>,
    return
  }
  func.func @transform_0(%arg0: i32) -> (i32, i32) {
    %c0_i32 = arith.constant 0 : i32
    %c0_i32_0 = arith.constant 0 : i32
    return %arg0, %c0_i32 : i32, i32
  }
  func.func @transform_1(%arg0: i32) -> (i32, i32) {
    %c0_i32 = arith.constant 0 : i32
    %c0_i32_0 = arith.constant 0 : i32
    %c0_i32_1 = arith.constant 0 : i32
    return %c0_i32, %c0_i32_0 : i32, i32
  }
  func.func @transform_2(%arg0: i32) -> (i32, i32) {
    %c0_i32 = arith.constant 0 : i32
    %c0_i32_0 = arith.constant 0 : i32
    %c0_i32_1 = arith.constant 0 : i32
    return %c0_i32, %c0_i32_0 : i32, i32
  }
  func.func @transform_3(%arg0: i32) -> (i32, i32) {
    %c0_i32 = arith.constant 0 : i32
    %c0_i32_0 = arith.constant 0 : i32
    return %arg0, %c0_i32 : i32, i32
  }
}

</mosaic_0001>

<bundles_post_ra>
// kernel: tpu_custom_call.1
= control target key start
LH: loop header
LB: loop body
LE: loop exit
PB: predicated region body
PF: predicated region fallthrough
CT: control target
= control target key end

     0   :  { %8 = vsyncpa [#allocation3], 0  ;;  %s12586_s0 = inlined_call_operand.hbm [shape: bf16[128,256], index: 0, kind: input, shape index: {}]   ;;  %s12587_s1 = inlined_call_operand.hbm [shape: bf16[256,1536], index: 1, kind: input, shape index: {}]   ;;  %s12588_s2 = inlined_call_operand.hbm [shape: bf16[768,256], index: 2, kind: input, shape index: {}]   ;;  %s12589_s3 = inlined_call_operand.hbm [shape: bf16[128,256], index: 3, kind: output, shape index: {}]  }
   0x1   :  { %9 = vsyncpa [#allocation6], 0  ;;  %s28_s14 = sshll.u32 %s12587_s1, 4  ;;  %s29_s14 = int_to_ptr.hbm [resolvable:$true] %s28_s14 }
   0x2   :  { %10 = vsyncpa [#allocation4], 0  ;;  %s7876_s15 = smov [#allocation5]   ;;  %s15_s19 = sshll.u32 %s12586_s0, 4  ;;  %s16_s19 = int_to_ptr.hbm [resolvable:$true] %s15_s19 }
   0x3   :  { %s30_s16 = sshll.u32 %s7876_s15, 4  ;;  %s7877_s20 = smov 768   ;;  %s31_s16 = int_to_ptr.vmem [resolvable:$true] %s30_s16 }
   0x4   :  { %s7878_s21 = smov 48   ;;  %s7879_s22 = smov [#allocation2]  }
   0x5   :  { %36 = dma.hbm_to_vmem [thread:$0]  %s29_s14, 24576, %s31_s16, [#allocation6], %s7877_s20, %s7877_s20, %s7878_s21  }
   0x6   :  { %s17_s23 = sshll.u32 %s7879_s22, 4  ;;  %s7880_s24 = smov 128   ;;  %s18_s23 = int_to_ptr.vmem [resolvable:$true] %s17_s23 }
   0x7   :  { %s7881_s25 = smov 8   ;;  %s41_s27 = sshll.u32 %s12588_s2, 4  ;;  %s42_s27 = int_to_ptr.hbm [resolvable:$true] %s41_s27 }
   0x8   :  { %23 = dma.hbm_to_vmem [thread:$0]  %s16_s19, 2048, %s18_s23, [#allocation3], %s7880_s24, %s7880_s24, %s7881_s25  }
   0x9   :  { %s7882_s28 = smov [#allocation7]  }
   0xa   :  { %s43_s0 = sshll.u32 %s7882_s28, 4  ;;  %s44_s0 = int_to_ptr.vmem [resolvable:$true] %s43_s0 }
   0xb   :  { %49 = dma.hbm_to_vmem [thread:$0]  %s42_s27, 12288, %s44_s0, [#allocation6], %s7880_s24, %s7880_s24, %s7881_s25  }
   0xc   :  { %7870 = dma.done.wait [#allocation3], 2048  }
   0xd   :  { %7871 = vsyncadd [#allocation3], 4294965248 }
   0xe   :  { %7872 = dma.done.wait [#allocation6], 36864  }
   0xf   :  { %7873 = vsyncadd [#allocation6], 4294930432  ;;  %v6168_v0 = vld [vmem:[#allocation5 + $0x2a0] sm:$0xf]  ;;  %v7184_v1 = vld [vmem:[#allocation5 + $0x2cc] sm:$0xf0] }
  0x10   :  { %v6552_v2 = vld [vmem:[#allocation5 + $0x5a0] sm:$0xf]  ;;  %v6169_v3 = vor.u32 %v7184_v1, %v6168_v0  ;;  %v7280_v4 = vld [vmem:[#allocation5 + $0x5cc] sm:$0xf0]  ;;  %v7178_v5 = vld [vmem:[#allocation5 + $0x2a4] sm:$0xf] }
  0x11   :  { %v6170_v6 = vld [vmem:[#allocation5 + $0x2d0] sm:$0xf0]  ;;  %v6553_v7 = vor.u32 %v7280_v4, %v6552_v2  ;;  %v7274_v9 = vld [vmem:[#allocation5 + $0x5a4] sm:$0xf]  ;;  %v6120_v11 = vld [vmem:[#allocation5 + $0x240] sm:$0xf] }
  0x12   :  { %v6173_v8 = vor.u32 %v7178_v5, %v6170_v6  ;;  %v6554_v10 = vld [vmem:[#allocation5 + $0x5d0] sm:$0xf0]  ;;  %1406 = vmatpush.bf16.msra.mxu0 %v6169_v3  ;;  %v7172_v13 = vld [vmem:[#allocation5 + $0x26c] sm:$0xf0]  ;;  %v6504_v14 = vld [vmem:[#allocation5 + $0x540] sm:$0xf] }
  0x13   :  { %v6557_v12 = vor.u32 %v7274_v9, %v6554_v10  ;;  %v7268_v15 = vld [vmem:[#allocation5 + $0x56c] sm:$0xf0]  ;;  %1455 = vmatpush.bf16.msra.mxu1 %v6553_v7  ;;  %v6121_v16 = vor.u32 %v7172_v13, %v6120_v11  ;;  %v7166_v18 = vld [vmem:[#allocation5 + $0x244] sm:$0xf]  ;;  %v6122_v19 = vld [vmem:[#allocation5 + $0x270] sm:$0xf0] }
  0x14   :  { %1504 = vmatpush.bf16.msra.mxu2 %v6173_v8  ;;  %v6505_v17 = vor.u32 %v7268_v15, %v6504_v14  ;;  %v7262_v20 = vld [vmem:[#allocation5 + $0x544] sm:$0xf]  ;;  %v6125_v21 = vor.u32 %v7166_v18, %v6122_v19  ;;  %v6506_v22 = vld [vmem:[#allocation5 + $0x570] sm:$0xf0]  ;;  %v6072_v23 = vld [vmem:[#allocation5 + $0x1e0] sm:$0xf] }
  0x15   :  { %1553 = vmatpush.bf16.msra.mxu3 %v6557_v12  ;;  %v7160_v24 = vld [vmem:[#allocation5 + $0x20c] sm:$0xf0]  ;;  %v6509_v25 = vor.u32 %v7262_v20, %v6506_v22  ;;  %v6456_v26 = vld [vmem:[#allocation5 + $0x4e0] sm:$0xf]  ;;  %v7154_v28 = vld [vmem:[#allocation5 + $0x1e4] sm:$0xf] }
  0x16   :  { %v7256_v27 = vld [vmem:[#allocation5 + $0x50c] sm:$0xf0]  ;;  %1407 = vmatpush.bf16.msra.mxu0 %v6121_v16  ;;  %v6073_v29 = vor.u32 %v7160_v24, %v6072_v23  ;;  %v6074_v30 = vld [vmem:[#allocation5 + $0x210] sm:$0xf0]  ;;  %v7250_v31 = vld [vmem:[#allocation5 + $0x4e4] sm:$0xf] }
  0x17   :  { %v6458_v32 = vld [vmem:[#allocation5 + $0x510] sm:$0xf0]  ;;  %1456 = vmatpush.bf16.msra.mxu1 %v6505_v17  ;;  %v6457_v33 = vor.u32 %v7256_v27, %v6456_v26  ;;  %v6077_v34 = vor.u32 %v7154_v28, %v6074_v30  ;;  %v6024_v35 = vld [vmem:[#allocation5 + $0x180] sm:$0xf]  ;;  %v7148_v36 = vld [vmem:[#allocation5 + $0x1ac] sm:$0xf0] }
  0x18   :  { %1505 = vmatpush.bf16.msra.mxu2 %v6125_v21  ;;  %v6408_v37 = vld [vmem:[#allocation5 + $0x480] sm:$0xf]  ;;  %v6461_v38 = vor.u32 %v7250_v31, %v6458_v32  ;;  %v7244_v39 = vld [vmem:[#allocation5 + $0x4ac] sm:$0xf0]  ;;  %v7142_v40 = vld [vmem:[#allocation5 + $0x184] sm:$0xf]  ;;  %v6025_v44 = vor.u32 %v7148_v36, %v6024_v35 }
  0x19   :  { %1554 = vmatpush.bf16.msra.mxu3 %v6509_v25  ;;  %v6026_v41 = vld [vmem:[#allocation5 + $0x1b0] sm:$0xf0]  ;;  %v7238_v42 = vld [vmem:[#allocation5 + $0x484] sm:$0xf]  ;;  %v6409_v45 = vor.u32 %v7244_v39, %v6408_v37  ;;  %v5976_v47 = vld [vmem:[#allocation5 + $0x120] sm:$0xf] }
  0x1a   :  { %v6410_v43 = vld [vmem:[#allocation5 + $0x4b0] sm:$0xf0]  ;;  %1408 = vmatpush.bf16.msra.mxu0 %v6073_v29  ;;  %v6029_v46 = vor.u32 %v7142_v40, %v6026_v41  ;;  %v7136_v48 = vld [vmem:[#allocation5 + $0x14c] sm:$0xf0]  ;;  %v6360_v49 = vld [vmem:[#allocation5 + $0x420] sm:$0xf] }
  0x1b   :  { %1457 = vmatpush.bf16.msra.mxu1 %v6457_v33  ;;  %v6413_v50 = vor.u32 %v7238_v42, %v6410_v43  ;;  %v7232_v51 = vld [vmem:[#allocation5 + $0x44c] sm:$0xf0]  ;;  %v7130_v52 = vld [vmem:[#allocation5 + $0x124] sm:$0xf]  ;;  %v5978_v53 = vld [vmem:[#allocation5 + $0x150] sm:$0xf0]  ;;  %v5977_v56 = vor.u32 %v7136_v48, %v5976_v47 }
  0x1c   :  { %1506 = vmatpush.bf16.msra.mxu2 %v6077_v34  ;;  %v7226_v54 = vld [vmem:[#allocation5 + $0x424] sm:$0xf]  ;;  %v6362_v55 = vld [vmem:[#allocation5 + $0x450] sm:$0xf0]  ;;  %v6361_v57 = vor.u32 %v7232_v51, %v6360_v49  ;;  %v5981_v58 = vor.u32 %v7130_v52, %v5978_v53  ;;  %v5928_v59 = vld [vmem:[#allocation5 + $0xc0] sm:$0xf] }
  0x1d   :  { %1555 = vmatpush.bf16.msra.mxu3 %v6461_v38  ;;  %v7124_v60 = vld [vmem:[#allocation5 + $0xec] sm:$0xf0]  ;;  %v6312_v61 = vld [vmem:[#allocation5 + $0x3c0] sm:$0xf]  ;;  %v6365_v62 = vor.u32 %v7226_v54, %v6362_v55  ;;  %v7118_v0 = vld [vmem:[#allocation5 + $0xc4] sm:$0xf] }
  0x1e   :  { %1409 = vmatpush.bf16.msra.mxu0 %v6025_v44  ;;  %v7220_v63 = vld [vmem:[#allocation5 + $0x3ec] sm:$0xf0]  ;;  %v5930_v1 = vld [vmem:[#allocation5 + $0xf0] sm:$0xf0]  ;;  %v7214_v2 = vld [vmem:[#allocation5 + $0x3c4] sm:$0xf]  ;;  %v5929_v4 = vor.u32 %v7124_v60, %v5928_v59 }
  0x1f   :  { %1458 = vmatpush.bf16.msra.mxu1 %v6409_v45  ;;  %v6314_v3 = vld [vmem:[#allocation5 + $0x3f0] sm:$0xf0]  ;;  %v6313_v5 = vor.u32 %v7220_v63, %v6312_v61  ;;  %v5933_v6 = vor.u32 %v7118_v0, %v5930_v1  ;;  %v5880_v7 = vld [vmem:[#allocation5 + $0x60] sm:$0xf]  ;;  %v7112_v8 = vld [vmem:[#allocation5 + $0x8c] sm:$0xf0] }
  0x20   :  { %1507 = vmatpush.bf16.msra.mxu2 %v6029_v46  ;;  %v6264_v9 = vld [vmem:[#allocation5 + $0x360] sm:$0xf]  ;;  %v6317_v10 = vor.u32 %v7214_v2, %v6314_v3  ;;  %v7208_v11 = vld [vmem:[#allocation5 + $0x38c] sm:$0xf0]  ;;  %v7106_v12 = vld [vmem:[#allocation5 + $0x64] sm:$0xf]  ;;  %v5881_v16 = vor.u32 %v7112_v8, %v5880_v7 }
  0x21   :  { %1556 = vmatpush.bf16.msra.mxu3 %v6413_v50  ;;  %v5882_v13 = vld [vmem:[#allocation5 + $0x90] sm:$0xf0]  ;;  %v7202_v14 = vld [vmem:[#allocation5 + $0x364] sm:$0xf]  ;;  %v5832_v17 = vld [vmem:[#allocation5] sm:$0xf]  ;;  %v6265_v19 = vor.u32 %v7208_v11, %v6264_v9 }
  0x22   :  { %1410 = vmatpush.bf16.msra.mxu0 %v5977_v56  ;;  %v6266_v15 = vld [vmem:[#allocation5 + $0x390] sm:$0xf0]  ;;  %v7100_v18 = vld [vmem:[#allocation5 + $0x2c] sm:$0xf0]  ;;  %v5885_v20 = vor.u32 %v7106_v12, %v5882_v13  ;;  %v6216_v21 = vld [vmem:[#allocation5 + $0x300] sm:$0xf] }
  0x23   :  { %1459 = vmatpush.bf16.msra.mxu1 %v6361_v57  ;;  %v7196_v22 = vld [vmem:[#allocation5 + $0x32c] sm:$0xf0]  ;;  %v7094_v23 = vld [vmem:[#allocation5 + $0x4] sm:$0xf]  ;;  %v6269_v24 = vor.u32 %v7202_v14, %v6266_v15  ;;  %v5834_v25 = vld [vmem:[#allocation5 + $0x30] sm:$0xf0]  ;;  %v5833_v31 = vor.u32 %v7100_v18, %v5832_v17 }
  0x24   :  { %1508 = vmatpush.bf16.msra.mxu2 %v5981_v58  ;;  %v7190_v26 = vld [vmem:[#allocation5 + $0x304] sm:$0xf]  ;;  %v6218_v27 = vld [vmem:[#allocation5 + $0x330] sm:$0xf0]  ;;  %v5768_v28 = vld [vmem:[#allocation2] sm:$0xf]  ;;  %v6217_v35 = vor.u32 %v7196_v22, %v6216_v21  ;;  %v5837_v36 = vor.u32 %v7094_v23, %v5834_v25 }
  0x25   :  { %1557 = vmatpush.bf16.msra.mxu3 %v6365_v62  ;;  %v7179_v29 = vld [vmem:[#allocation5 + $0x2ac] sm:$0xf]  ;;  %v6178_v30 = vld [vmem:[#allocation5 + $0x2d8] sm:$0xf0]  ;;  %v7079_v32 = vld [vmem:[#allocation2 + $0x4] sm:$0xf0]  ;;  %v6221_v39 = vor.u32 %v7190_v26, %v6218_v27 }
  0x26   :  { %1411 = vmatpush.bf16.msra.mxu0 %v5929_v4  ;;  %v7275_v33 = vld [vmem:[#allocation5 + $0x5ac] sm:$0xf]  ;;  %v6562_v34 = vld [vmem:[#allocation5 + $0x5d8] sm:$0xf0]  ;;  %v7078_v37 = vld [vmem:[#allocation2 + $0x4] sm:$0xf]  ;;  %v6181_v40 = vor.u32 %v7179_v29, %v6178_v30  ;;  %v7919_v44 = vor.u32 %v7079_v32, %v5768_v28 }
  0x27   :  { %1460 = vmatpush.bf16.msra.mxu1 %v6313_v5  ;;  %v5770_v38 = vld [vmem:[#allocation2 + $0x8] sm:$0xf0]  ;;  %v6176_v41 = vld [vmem:[#allocation5 + $0x2a8] sm:$0xf]  ;;  %v7185_v42 = vld [vmem:[#allocation5 + $0x2d4] sm:$0xf0]  ;;  %v6565_v45 = vor.u32 %v7275_v33, %v6562_v34 }
  0x28   :  { %1509 = vmatpush.bf16.msra.mxu2 %v5933_v6  ;;  %v6560_v43 = vld [vmem:[#allocation5 + $0x5a8] sm:$0xf]  ;;  %12740 = vst [vmem:[#allocation12_spill] sm:$0xff] %v7919_v44  ;;  %v7281_v46 = vld [vmem:[#allocation5 + $0x5d4] sm:$0xf0]  ;;  %v7921_v49 = vor.u32 %v7078_v37, %v5770_v38  ;;  %v6177_v52 = vor.u32 %v7185_v42, %v6176_v41  ;;  %s7883_s2 = smov [#allocation8]  }
  0x29   :  { %1558 = vmatpush.bf16.msra.mxu3 %v6317_v10  ;;  %v7167_v47 = vld [vmem:[#allocation5 + $0x24c] sm:$0xf]  ;;  %v6130_v48 = vld [vmem:[#allocation5 + $0x278] sm:$0xf0]  ;;  %v6561_v53 = vor.u32 %v7281_v46, %v6560_v43  ;;  %v6128_v55 = vld [vmem:[#allocation5 + $0x248] sm:$0xf] }
  0x2a   :  { %1412 = vmatpush.bf16.msra.mxu0 %v5881_v16  ;;  %12741 = vst [vmem:[#allocation13_spill] sm:$0xff] %v7921_v49  ;;  %v7263_v50 = vld [vmem:[#allocation5 + $0x54c] sm:$0xf]  ;;  %v6514_v51 = vld [vmem:[#allocation5 + $0x578] sm:$0xf0]  ;;  %v6133_v54 = vor.u32 %v7167_v47, %v6130_v48  ;;  %s5750_s29 = sshll.u32 %s7883_s2, 4  ;;  %s5751_s29 = int_to_ptr.vmem [resolvable:$true] %s5750_s29 }
  0x2b   :  { %1461 = vmatpush.bf16.msra.mxu1 %v6265_v19  ;;  %v7173_v56 = vld [vmem:[#allocation5 + $0x274] sm:$0xf0]  ;;  %v6517_v57 = vor.u32 %v7263_v50, %v6514_v51  ;;  %v6512_v58 = vld [vmem:[#allocation5 + $0x548] sm:$0xf]  ;;  %v7155_v61 = vld [vmem:[#allocation5 + $0x1ec] sm:$0xf] }
  0x2c   :  { %1510 = vmatpush.bf16.msra.mxu2 %v5885_v20  ;;  %v7269_v59 = vld [vmem:[#allocation5 + $0x574] sm:$0xf0]  ;;  %v6129_v60 = vor.u32 %v7173_v56, %v6128_v55  ;;  %v6082_v62 = vld [vmem:[#allocation5 + $0x218] sm:$0xf0]  ;;  %v6080_v63 = vld [vmem:[#allocation5 + $0x1e8] sm:$0xf] }
  0x2d   :  { %1559 = vmatpush.bf16.msra.mxu3 %v6269_v24  ;;  %v6513_v0 = vor.u32 %v7269_v59, %v6512_v58  ;;  %v6085_v1 = vor.u32 %v7155_v61, %v6082_v62  ;;  %v7161_v2 = vld [vmem:[#allocation5 + $0x214] sm:$0xf0]  ;;  %v7251_v3 = vld [vmem:[#allocation5 + $0x4ec] sm:$0xf]  ;;  %v6466_v4 = vld [vmem:[#allocation5 + $0x518] sm:$0xf0] }
  0x2e   :  { %1413 = vmatpush.bf16.msra.mxu0 %v5833_v31  ;;  %v6469_v5 = vor.u32 %v7251_v3, %v6466_v4  ;;  %v6464_v6 = vld [vmem:[#allocation5 + $0x4e8] sm:$0xf]  ;;  %v7257_v7 = vld [vmem:[#allocation5 + $0x514] sm:$0xf0]  ;;  %v6081_v8 = vor.u32 %v7161_v2, %v6080_v63  ;;  %v5776_v10 = vld [vmem:[#allocation2 + $0x10] sm:$0xf] }
  0x2f   :  { %1462 = vmatpush.bf16.msra.mxu1 %v6217_v35  ;;  %v6465_v9 = vor.u32 %v7257_v7, %v6464_v6  ;;  %v7081_v11 = vld [vmem:[#allocation2 + $0x14] sm:$0xf0]  ;;  %v7080_v12 = vld [vmem:[#allocation2 + $0x14] sm:$0xf]  ;;  %v5778_v13 = vld [vmem:[#allocation2 + $0x18] sm:$0xf0] }
  0x30   :  { %1511 = vmatpush.bf16.msra.mxu2 %v5837_v36  ;;  %v7927_v14 = vor.u32 %v7081_v11, %v5776_v10  ;;  %v7929_v15 = vor.u32 %v7080_v12, %v5778_v13  ;;  %v7143_v16 = vld [vmem:[#allocation5 + $0x18c] sm:$0xf]  ;;  %v6034_v17 = vld [vmem:[#allocation5 + $0x1b8] sm:$0xf0]  ;;  %v6032_v18 = vld [vmem:[#allocation5 + $0x188] sm:$0xf] }
  0x31   :  { %1560 = vmatpush.bf16.msra.mxu3 %v6221_v39  ;;  %1414 = vmatmul.bf16.vlgmr.msra.gmra.mxu0 %v7919_v44  ;;  %v6037_v19 = vor.u32 %v7143_v16, %v6034_v17  ;;  %v7149_v20 = vld [vmem:[#allocation5 + $0x1b4] sm:$0xf0]  ;;  %v7239_v21 = vld [vmem:[#allocation5 + $0x48c] sm:$0xf]  ;;  %v6418_v22 = vld [vmem:[#allocation5 + $0x4b8] sm:$0xf0] }
  0x32   :  { %1463 = vmatmul.bf16.vlgmr.msra.gmra.mxu1 %v7921_v49  ;;  %1602 = vmatpush.bf16.msrb.mxu0 %v6177_v52  ;;  %12742 = vst [vmem:[#allocation14_spill] sm:$0xff] %v7927_v14  ;;  %v6033_v23 = vor.u32 %v7149_v20, %v6032_v18  ;;  %v6421_v24 = vor.u32 %v7239_v21, %v6418_v22  ;;  %v6416_v25 = vld [vmem:[#allocation5 + $0x488] sm:$0xf]  ;;  %v7245_v26 = vld [vmem:[#allocation5 + $0x4b4] sm:$0xf0]  ;;  %s5752_s5 = sshll.u32 %s12589_s3, 4  ;;  %s5753_s5 = int_to_ptr.hbm [resolvable:$true] %s5752_s5 }
  0x33   :  { %1512 = vmatmul.bf16.vlgmr.msra.gmra.mxu2 %v7919_v44  ;;  %1651 = vmatpush.bf16.msrb.mxu1 %v6561_v53  ;;  %12743 = vst [vmem:[#allocation15_spill] sm:$0xff] %v7929_v15  ;;  %v6417_v27 = vor.u32 %v7245_v26, %v6416_v25  ;;  %v5784_v28 = vld [vmem:[#allocation2 + $0x20] sm:$0xf]  ;;  %v7083_v29 = vld [vmem:[#allocation2 + $0x24] sm:$0xf0] }
  0x34   :  { %1700 = vmatpush.bf16.msrb.mxu2 %v6181_v40  ;;  %1561 = vmatmul.bf16.vlgmr.msra.gmra.mxu3 %v7921_v49  ;;  %v7082_v30 = vld [vmem:[#allocation2 + $0x24] sm:$0xf]  ;;  %v5786_v31 = vld [vmem:[#allocation2 + $0x28] sm:$0xf0]  ;;  %v7935_v32 = vor.u32 %v7083_v29, %v5784_v28  ;;  %v5986_v35 = vld [vmem:[#allocation5 + $0x158] sm:$0xf0] }
  0x35   :  { %1749 = vmatpush.bf16.msrb.mxu3 %v6565_v45  ;;  %v7937_v33 = vor.u32 %v7082_v30, %v5786_v31  ;;  %v7131_v34 = vld [vmem:[#allocation5 + $0x12c] sm:$0xf]  ;;  %v5984_v36 = vld [vmem:[#allocation5 + $0x128] sm:$0xf]  ;;  %v7137_v38 = vld [vmem:[#allocation5 + $0x154] sm:$0xf0] }
  0x36   :  { %1603 = vmatpush.bf16.msrb.mxu0 %v6129_v60  ;;  %12744 = vst [vmem:[#allocation16_spill] sm:$0xff] %v7935_v32  ;;  %v5989_v37 = vor.u32 %v7131_v34, %v5986_v35  ;;  %v7227_v39 = vld [vmem:[#allocation5 + $0x42c] sm:$0xf]  ;;  %v6370_v40 = vld [vmem:[#allocation5 + $0x458] sm:$0xf0]  ;;  %v5985_v41 = vor.u32 %v7137_v38, %v5984_v36 }
  0x37   :  { %1652 = vmatpush.bf16.msrb.mxu1 %v6513_v0  ;;  %12745 = vst [vmem:[#allocation17_spill] sm:$0xff] %v7937_v33  ;;  %v6373_v42 = vor.u32 %v7227_v39, %v6370_v40  ;;  %v6368_v43 = vld [vmem:[#allocation5 + $0x428] sm:$0xf]  ;;  %v7233_v45 = vld [vmem:[#allocation5 + $0x454] sm:$0xf0] }
  0x38   :  { %1701 = vmatpush.bf16.msrb.mxu2 %v6133_v54  ;;  %v6369_v46 = vor.u32 %v7233_v45, %v6368_v43  ;;  %v5792_v47 = vld [vmem:[#allocation2 + $0x30] sm:$0xf]  ;;  %v7085_v48 = vld [vmem:[#allocation2 + $0x34] sm:$0xf0]  ;;  %v7084_v50 = vld [vmem:[#allocation2 + $0x34] sm:$0xf] }
  0x39   :  { %1750 = vmatpush.bf16.msrb.mxu3 %v6517_v57  ;;  %v5794_v51 = vld [vmem:[#allocation2 + $0x38] sm:$0xf0]  ;;  %v7943_v52 = vor.u32 %v7085_v48, %v5792_v47  ;;  %v7119_v54 = vld [vmem:[#allocation5 + $0xcc] sm:$0xf]  ;;  %v5936_v56 = vld [vmem:[#allocation5 + $0xc8] sm:$0xf] }
  0x3a   :  { %1604 = vmatpush.bf16.msrb.mxu0 %v6081_v8  ;;  %v7945_v53 = vor.u32 %v7084_v50, %v5794_v51  ;;  %v5938_v55 = vld [vmem:[#allocation5 + $0xf8] sm:$0xf0]  ;;  %v7125_v58 = vld [vmem:[#allocation5 + $0xf4] sm:$0xf0]  ;;  %v7215_v59 = vld [vmem:[#allocation5 + $0x3cc] sm:$0xf] }
  0x3b   :  { %1653 = vmatpush.bf16.msrb.mxu1 %v6465_v9  ;;  %12746 = vst [vmem:[#allocation18_spill] sm:$0xff] %v7943_v52  ;;  %v5941_v57 = vor.u32 %v7119_v54, %v5938_v55  ;;  %v6322_v60 = vld [vmem:[#allocation5 + $0x3f8] sm:$0xf0]  ;;  %v5937_v61 = vor.u32 %v7125_v58, %v5936_v56  ;;  %v6320_v63 = vld [vmem:[#allocation5 + $0x3c8] sm:$0xf] }
  0x3c   :  { %1702 = vmatpush.bf16.msrb.mxu2 %v6085_v1  ;;  %12747 = vst [vmem:[#allocation19_spill] sm:$0xff] %v7945_v53  ;;  %v6325_v62 = vor.u32 %v7215_v59, %v6322_v60  ;;  %v7221_v0 = vld [vmem:[#allocation5 + $0x3f4] sm:$0xf0]  ;;  %v5800_v2 = vld [vmem:[#allocation2 + $0x40] sm:$0xf] }
  0x3d   :  { %1751 = vmatpush.bf16.msrb.mxu3 %v6469_v5  ;;  %v6321_v1 = vor.u32 %v7221_v0, %v6320_v63  ;;  %v7087_v3 = vld [vmem:[#allocation2 + $0x44] sm:$0xf0]  ;;  %v7086_v4 = vld [vmem:[#allocation2 + $0x44] sm:$0xf]  ;;  %v5802_v5 = vld [vmem:[#allocation2 + $0x48] sm:$0xf0] }
  0x3e   :  { %1605 = vmatpush.bf16.msrb.mxu0 %v6033_v23  ;;  %v7951_v6 = vor.u32 %v7087_v3, %v5800_v2  ;;  %v7953_v7 = vor.u32 %v7086_v4, %v5802_v5  ;;  %v7107_v8 = vld [vmem:[#allocation5 + $0x6c] sm:$0xf]  ;;  %v5890_v9 = vld [vmem:[#allocation5 + $0x98] sm:$0xf0]  ;;  %v5888_v10 = vld [vmem:[#allocation5 + $0x68] sm:$0xf] }
  0x3f   :  { %1654 = vmatpush.bf16.msrb.mxu1 %v6417_v27  ;;  %v5893_v11 = vor.u32 %v7107_v8, %v5890_v9  ;;  %v7113_v12 = vld [vmem:[#allocation5 + $0x94] sm:$0xf0]  ;;  %v7203_v13 = vld [vmem:[#allocation5 + $0x36c] sm:$0xf]  ;;  %v6274_v16 = vld [vmem:[#allocation5 + $0x398] sm:$0xf0] }
  0x40   :  { %1703 = vmatpush.bf16.msrb.mxu2 %v6037_v19  ;;  %12748 = vst [vmem:[#allocation20_spill] sm:$0xff] %v7951_v6  ;;  %v5889_v17 = vor.u32 %v7113_v12, %v5888_v10  ;;  %v6277_v18 = vor.u32 %v7203_v13, %v6274_v16  ;;  %v6272_v19 = vld [vmem:[#allocation5 + $0x368] sm:$0xf]  ;;  %v7209_v20 = vld [vmem:[#allocation5 + $0x394] sm:$0xf0] }
  0x41   :  { %1419 = vmatmul.bf16.gmra.mxu0 %v7927_v14  ;;  %1752 = vmatpush.bf16.msrb.mxu3 %v6421_v24  ;;  %12749 = vst [vmem:[#allocation21_spill] sm:$0xff] %v7953_v7  ;;  %v6273_v21 = vor.u32 %v7209_v20, %v6272_v19  ;;  %v5808_v22 = vld [vmem:[#allocation2 + $0x50] sm:$0xf]  ;;  %v7089_v23 = vld [vmem:[#allocation2 + $0x54] sm:$0xf0] }
  0x42   :  { %1468 = vmatmul.bf16.gmra.mxu1 %v7929_v15  ;;  %1606 = vmatpush.bf16.msrb.mxu0 %v5985_v41  ;;  %v7088_v24 = vld [vmem:[#allocation2 + $0x54] sm:$0xf]  ;;  %v5810_v25 = vld [vmem:[#allocation2 + $0x58] sm:$0xf0]  ;;  %v7959_v26 = vor.u32 %v7089_v23, %v5808_v22  ;;  %v7095_v28 = vld [vmem:[#allocation5 + $0xc] sm:$0xf] }
  0x43   :  { %1517 = vmatmul.bf16.gmra.mxu2 %v7927_v14  ;;  %1655 = vmatpush.bf16.msrb.mxu1 %v6369_v46  ;;  %v7961_v27 = vor.u32 %v7088_v24, %v5810_v25  ;;  %v5842_v29 = vld [vmem:[#allocation5 + $0x38] sm:$0xf0]  ;;  %v5840_v30 = vld [vmem:[#allocation5 + $0x8] sm:$0xf]  ;;  %v7101_v34 = vld [vmem:[#allocation5 + $0x34] sm:$0xf0] }
  0x44   :  { %1566 = vmatmul.bf16.gmra.mxu3 %v7929_v15  ;;  %1704 = vmatpush.bf16.msrb.mxu2 %v5989_v37  ;;  %12750 = vst [vmem:[#allocation22_spill] sm:$0xff] %v7959_v26  ;;  %v5845_v31 = vor.u32 %v7095_v28, %v5842_v29  ;;  %v7191_v35 = vld [vmem:[#allocation5 + $0x30c] sm:$0xf]  ;;  %v6226_v36 = vld [vmem:[#allocation5 + $0x338] sm:$0xf0]  ;;  %v5841_v37 = vor.u32 %v7101_v34, %v5840_v30 }
  0x45   :  { %1753 = vmatpush.bf16.msrb.mxu3 %v6373_v42  ;;  %12751 = vst [vmem:[#allocation23_spill] sm:$0xff] %v7961_v27  ;;  %v6229_v38 = vor.u32 %v7191_v35, %v6226_v36  ;;  %v6224_v39 = vld [vmem:[#allocation5 + $0x308] sm:$0xf]  ;;  %v7197_v40 = vld [vmem:[#allocation5 + $0x334] sm:$0xf0] }
  0x46   :  { %1607 = vmatpush.bf16.msrb.mxu0 %v5937_v61  ;;  %v6225_v41 = vor.u32 %v7197_v40, %v6224_v39  ;;  %v5816_v42 = vld [vmem:[#allocation2 + $0x60] sm:$0xf]  ;;  %v7091_v43 = vld [vmem:[#allocation2 + $0x64] sm:$0xf0]  ;;  %v7090_v45 = vld [vmem:[#allocation2 + $0x64] sm:$0xf] }
  0x47   :  { %1656 = vmatpush.bf16.msrb.mxu1 %v6321_v1  ;;  %v5818_v46 = vld [vmem:[#allocation2 + $0x68] sm:$0xf0]  ;;  %v7967_v47 = vor.u32 %v7091_v43, %v5816_v42  ;;  %v5824_v50 = vld [vmem:[#allocation2 + $0x70] sm:$0xf]  ;;  %v7093_v51 = vld [vmem:[#allocation2 + $0x74] sm:$0xf0] }
  0x48   :  { %1705 = vmatpush.bf16.msrb.mxu2 %v5941_v57  ;;  %v7969_v48 = vor.u32 %v7090_v45, %v5818_v46  ;;  %v7092_v54 = vld [vmem:[#allocation2 + $0x74] sm:$0xf]  ;;  %v5826_v55 = vld [vmem:[#allocation2 + $0x78] sm:$0xf0]  ;;  %v7975_v56 = vor.u32 %v7093_v51, %v5824_v50  ;;  %v6186_v60 = vld [vmem:[#allocation5 + $0x2e0] sm:$0xf0] }
  0x49   :  { %1754 = vmatpush.bf16.msrb.mxu3 %v6325_v62  ;;  %12752 = vst [vmem:[#allocation24_spill] sm:$0xff] %v7967_v47  ;;  %v7977_v57 = vor.u32 %v7092_v54, %v5826_v55  ;;  %v7180_v59 = vld [vmem:[#allocation5 + $0x2b4] sm:$0xf]  ;;  %v6184_v61 = vld [vmem:[#allocation5 + $0x2b0] sm:$0xf] }
  0x4a   :  { %1608 = vmatpush.bf16.msrb.mxu0 %v5889_v17  ;;  %12753 = vst [vmem:[#allocation25_spill] sm:$0xff] %v7969_v48  ;;  %v6189_v63 = vor.u32 %v7180_v59, %v6186_v60  ;;  %v7186_v0 = vld [vmem:[#allocation5 + $0x2dc] sm:$0xf0]  ;;  %v7276_v1 = vld [vmem:[#allocation5 + $0x5b4] sm:$0xf] }
  0x4b   :  { %1657 = vmatpush.bf16.msrb.mxu1 %v6273_v21  ;;  %12754 = vst [vmem:[#allocation26_spill] sm:$0xff] %v7975_v56  ;;  %v6570_v2 = vld [vmem:[#allocation5 + $0x5e0] sm:$0xf0]  ;;  %v6185_v4 = vor.u32 %v7186_v0, %v6184_v61  ;;  %v6568_v9 = vld [vmem:[#allocation5 + $0x5b0] sm:$0xf] }
  0x4c   :  { %1706 = vmatpush.bf16.msrb.mxu2 %v5893_v11  ;;  %12755 = vst [vmem:[#allocation27_spill] sm:$0xff] %v7977_v57  ;;  %v6573_v5 = vor.u32 %v7276_v1, %v6570_v2  ;;  %v7282_v10 = vld [vmem:[#allocation5 + $0x5dc] sm:$0xf0]  ;;  %v7168_v25 = vld [vmem:[#allocation5 + $0x254] sm:$0xf] }
  0x4d   :  { %1755 = vmatpush.bf16.msrb.mxu3 %v6277_v18  ;;  %v6569_v12 = vor.u32 %v7282_v10, %v6568_v9  ;;  %v6138_v28 = vld [vmem:[#allocation5 + $0x280] sm:$0xf0]  ;;  %v6136_v30 = vld [vmem:[#allocation5 + $0x250] sm:$0xf]  ;;  %v7264_v34 = vld [vmem:[#allocation5 + $0x554] sm:$0xf] }
  0x4e   :  { %1609 = vmatpush.bf16.msrb.mxu0 %v5841_v37  ;;  %v6141_v29 = vor.u32 %v7168_v25, %v6138_v28  ;;  %v6522_v35 = vld [vmem:[#allocation5 + $0x580] sm:$0xf0]  ;;  %v6520_v43 = vld [vmem:[#allocation5 + $0x550] sm:$0xf]  ;;  %v7270_v45 = vld [vmem:[#allocation5 + $0x57c] sm:$0xf0] }
  0x4f   :  { %1658 = vmatpush.bf16.msrb.mxu1 %v6225_v41  ;;  %v6525_v40 = vor.u32 %v7264_v34, %v6522_v35  ;;  %v6521_v50 = vor.u32 %v7270_v45, %v6520_v43  ;;  %v7156_v61 = vld [vmem:[#allocation5 + $0x1f4] sm:$0xf]  ;;  %v7162_v0 = vld [vmem:[#allocation5 + $0x21c] sm:$0xf0]  ;;  %v6040_v43 = vld [vmem:[#allocation5 + $0x190] sm:$0xf] }
  0x50   :  { %1707 = vmatpush.bf16.msrb.mxu2 %v5845_v31  ;;  %v7174_v31 = vld [vmem:[#allocation5 + $0x27c] sm:$0xf0] }
  0x51   :  { %1424 = vmatmul.bf16.gmra.mxu0 %v7935_v32  ;;  %1756 = vmatpush.bf16.msrb.mxu3 %v6229_v38  ;;  %v6137_v39 = vor.u32 %v7174_v31, %v6136_v30  ;;  %v7150_v45 = vld [vmem:[#allocation5 + $0x1bc] sm:$0xf0] }
  0x52   :  { %1473 = vmatmul.bf16.gmra.mxu1 %v7937_v33  ;;  %1798 = vmatpush.bf16.msra.mxu0 %v6185_v4 }
  0x53   :  { %1522 = vmatmul.bf16.gmra.mxu2 %v7935_v32  ;;  %1847 = vmatpush.bf16.msra.mxu1 %v6569_v12 }
  0x54   :  { %1571 = vmatmul.bf16.gmra.mxu3 %v7937_v33  ;;  %1896 = vmatpush.bf16.msra.mxu2 %v6189_v63  ;;  %v6088_v63 = vld [vmem:[#allocation5 + $0x1f0] sm:$0xf] }
  0x55   :  { %1945 = vmatpush.bf16.msra.mxu3 %v6573_v5  ;;  %v6089_v4 = vor.u32 %v7162_v0, %v6088_v63  ;;  %v7252_v5 = vld [vmem:[#allocation5 + $0x4f4] sm:$0xf]  ;;  %v7246_v63 = vld [vmem:[#allocation5 + $0x4bc] sm:$0xf0] }
  0x56   :  { %1799 = vmatpush.bf16.msra.mxu0 %v6137_v39 }
  0x57   :  { %1848 = vmatpush.bf16.msra.mxu1 %v6521_v50  ;;  %v6041_v50 = vor.u32 %v7150_v45, %v6040_v43 }
  0x58   :  { %1897 = vmatpush.bf16.msra.mxu2 %v6141_v29 }
  0x59   :  { %1946 = vmatpush.bf16.msra.mxu3 %v6525_v40 }
  0x5a   :  { %1800 = vmatpush.bf16.msra.mxu0 %v6089_v4 }
  0x5e   :  { %1801 = vmatpush.bf16.msra.mxu0 %v6041_v50 }
  0x61   :  { %1429 = vmatmul.bf16.gmra.mxu0 %v7943_v52 }
  0x62   :  { %1478 = vmatmul.bf16.gmra.mxu1 %v7945_v53 }
  0x63   :  { %1527 = vmatmul.bf16.gmra.mxu2 %v7943_v52 }
  0x64   :  { %1576 = vmatmul.bf16.gmra.mxu3 %v7945_v53 }
  0x71   :  { %1434 = vmatmul.bf16.gmra.mxu0 %v7951_v6 }
  0x72   :  { %1483 = vmatmul.bf16.gmra.mxu1 %v7953_v7 }
  0x73   :  { %1532 = vmatmul.bf16.gmra.mxu2 %v7951_v6 }
  0x74   :  { %1581 = vmatmul.bf16.gmra.mxu3 %v7953_v7 }
  0x81   :  { %1439 = vmatmul.bf16.gmra.mxu0 %v7959_v26 }
  0x82   :  { %1488 = vmatmul.bf16.gmra.mxu1 %v7961_v27 }
  0x83   :  { %1537 = vmatmul.bf16.gmra.mxu2 %v7959_v26 }
  0x84   :  { %1586 = vmatmul.bf16.gmra.mxu3 %v7961_v27 }
  0x91   :  { %1444 = vmatmul.bf16.gmra.mxu0 %v7967_v47 }
  0x92   :  { %1493 = vmatmul.bf16.gmra.mxu1 %v7969_v48 }
  0x93   :  { %1542 = vmatmul.bf16.gmra.mxu2 %v7967_v47 }
  0x94   :  { %1591 = vmatmul.bf16.gmra.mxu3 %v7969_v48 }
  0xa1   :  { %1449 = vmatmul.bf16.gmra.mxu0 %v7975_v56 }
  0xa2   :  { %1498 = vmatmul.bf16.gmra.mxu1 %v7977_v57 }
  0xa3   :  { %1547 = vmatmul.bf16.gmra.mxu2 %v7975_v56 }
  0xa4   :  { %1596 = vmatmul.bf16.gmra.mxu3 %v7977_v57 }
  0xae   :  { %v1415_v58 = vpop.f32.mrf.mxu0 }
  0xaf   :  { %v1464_v62 = vpop.f32.mrf.mxu1 }
  0xb0   :  { %v7983_v3 = vadd.f32 %v1464_v62, %v1415_v58  ;;  %v6090_v62 = vld [vmem:[#allocation5 + $0x220] sm:$0xf0] }
  0xb1   :  { %1610 = vmatmul.bf16.vlgmr.msrb.gmra.mxu0 %v7919_v44  ;;  %v6093_v2 = vor.u32 %v7156_v61, %v6090_v62  ;;  %v6424_v62 = vld [vmem:[#allocation5 + $0x490] sm:$0xf] }
  0xb2   :  { %1659 = vmatmul.bf16.vlgmr.msrb.gmra.mxu1 %v7921_v49 }
  0xb3   :  { %1708 = vmatmul.bf16.vlgmr.msrb.gmra.mxu2 %v7919_v44 }
  0xb4   :  { %1757 = vmatmul.bf16.vlgmr.msrb.gmra.mxu3 %v7921_v49  ;;  %1898 = vmatpush.bf16.msra.mxu2 %v6093_v2  ;;  %v6425_v2 = vor.u32 %v7246_v63, %v6424_v62 }
  0xb6   :  { %v1513_v8 = vpop.f32.mrf.mxu2  ;;  %v1417_v13 = vpop.f32.mrf.mxu0 }
  0xb7   :  { %v1562_v11 = vpop.f32.mrf.mxu3  ;;  %v1466_v17 = vpop.f32.mrf.mxu1 }
  0xb8   :  { %v7989_v16 = vadd.f32 %v1562_v11, %v1513_v8  ;;  %v7991_v18 = vadd.f32 %v1466_v17, %v1417_v13  ;;  %v6474_v8 = vld [vmem:[#allocation5 + $0x520] sm:$0xf0] }
  0xb9   :  { %v6477_v12 = vor.u32 %v7252_v5, %v6474_v8 }
  0xbb   :  { %1947 = vmatpush.bf16.msra.mxu3 %v6477_v12 }
  0xbe   :  { %v1515_v19 = vpop.f32.mrf.mxu2  ;;  %v1420_v21 = vpop.f32.mrf.mxu0 }
  0xbf   :  { %v1564_v20 = vpop.f32.mrf.mxu3  ;;  %v1469_v23 = vpop.f32.mrf.mxu1 }
  0xc0   :  { %v7993_v22 = vadd.f32 %v1564_v20, %v1515_v19  ;;  %v7995_v24 = vadd.f32 %v1469_v23, %v1420_v21  ;;  %v6472_v19 = vld [vmem:[#allocation5 + $0x4f0] sm:$0xf]  ;;  %v7258_v20 = vld [vmem:[#allocation5 + $0x51c] sm:$0xf0] }
  0xc1   :  { %1615 = vmatmul.bf16.gmra.mxu0 %v7927_v14  ;;  %v6473_v21 = vor.u32 %v7258_v20, %v6472_v19  ;;  %v7132_v20 = vld [vmem:[#allocation5 + $0x134] sm:$0xf] }
  0xc2   :  { %1664 = vmatmul.bf16.gmra.mxu1 %v7929_v15 }
  0xc3   :  { %1713 = vmatmul.bf16.gmra.mxu2 %v7927_v14  ;;  %1849 = vmatpush.bf16.msra.mxu1 %v6473_v21  ;;  %v5994_v21 = vld [vmem:[#allocation5 + $0x160] sm:$0xf0] }
  0xc4   :  { %1762 = vmatmul.bf16.gmra.mxu3 %v7929_v15 }
  0xc6   :  { %v1518_v36 = vpop.f32.mrf.mxu2  ;;  %v1422_v38 = vpop.f32.mrf.mxu0 }
  0xc7   :  { %v1567_v37 = vpop.f32.mrf.mxu3  ;;  %v1471_v41 = vpop.f32.mrf.mxu1  ;;  %1850 = vmatpush.bf16.msra.mxu1 %v6425_v2 }
  0xc8   :  { %v8001_v42 = vadd.f32 %v1567_v37, %v1518_v36  ;;  %v8003_v46 = vadd.f32 %v1471_v41, %v1422_v38  ;;  %v7144_v37 = vld [vmem:[#allocation5 + $0x194] sm:$0xf]  ;;  %v6042_v38 = vld [vmem:[#allocation5 + $0x1c0] sm:$0xf0] }
  0xc9   :  { %v6045_v41 = vor.u32 %v7144_v37, %v6042_v38  ;;  %v6376_v38 = vld [vmem:[#allocation5 + $0x430] sm:$0xf] }
  0xca   :  { %12756 = vst [vmem:[#allocation28_spill] sm:$0xff] %v8003_v46 }
  0xcb   :  { %1899 = vmatpush.bf16.msra.mxu2 %v6045_v41 }
  0xce   :  { %v1520_v51 = vpop.f32.mrf.mxu2  ;;  %v1425_v55 = vpop.f32.mrf.mxu0 }
  0xcf   :  { %v1569_v54 = vpop.f32.mrf.mxu3  ;;  %v1474_v59 = vpop.f32.mrf.mxu1 }
  0xd0   :  { %v8005_v58 = vadd.f32 %v1569_v54, %v1520_v51  ;;  %v8008_v60 = vadd.f32 %v1474_v59, %v1425_v55  ;;  %v7240_v51 = vld [vmem:[#allocation5 + $0x494] sm:$0xf]  ;;  %v6426_v54 = vld [vmem:[#allocation5 + $0x4c0] sm:$0xf0] }
  0xd1   :  { %1620 = vmatmul.bf16.gmra.mxu0 %v7935_v32 }
  0xd2   :  { %12757 = vst [vmem:[#allocation29_spill] sm:$0xff] %v8005_v58  ;;  %1669 = vmatmul.bf16.gmra.mxu1 %v7937_v33 }
  0xd3   :  { %12758 = vst [vmem:[#allocation30_spill] sm:$0xff] %v8008_v60  ;;  %1718 = vmatmul.bf16.gmra.mxu2 %v7935_v32 }
  0xd4   :  { %1767 = vmatmul.bf16.gmra.mxu3 %v7937_v33 }
  0xd6   :  { %v1523_v1 = vpop.f32.mrf.mxu2  ;;  %v1427_v10 = vpop.f32.mrf.mxu0 }
  0xd7   :  { %v1572_v9 = vpop.f32.mrf.mxu3  ;;  %v1476_v11 = vpop.f32.mrf.mxu1 }
  0xd8   :  { %v8013_v13 = vadd.f32 %v1572_v9, %v1523_v1  ;;  %v8015_v17 = vadd.f32 %v1476_v11, %v1427_v10  ;;  %v6429_v1 = vor.u32 %v7240_v51, %v6426_v54 }
  0xda   :  { %12759 = vst [vmem:[#allocation31_spill] sm:$0xff] %v8013_v13  ;;  %1948 = vmatpush.bf16.msra.mxu3 %v6429_v1 }
  0xde   :  { %v1525_v23 = vpop.f32.mrf.mxu2  ;;  %v1430_v28 = vpop.f32.mrf.mxu0 }
  0xdf   :  { %v1574_v25 = vpop.f32.mrf.mxu3  ;;  %v1479_v29 = vpop.f32.mrf.mxu1 }
  0xe0   :  { %v8021_v30 = vadd.f32 %v1574_v25, %v1525_v23  ;;  %v8023_v31 = vadd.f32 %v1479_v29, %v1430_v28  ;;  %v5997_v23 = vor.u32 %v7132_v20, %v5994_v21  ;;  %v5992_v25 = vld [vmem:[#allocation5 + $0x130] sm:$0xf]  ;;  %v7138_v28 = vld [vmem:[#allocation5 + $0x15c] sm:$0xf0]  ;;  %v7228_v29 = vld [vmem:[#allocation5 + $0x434] sm:$0xf] }
  0xe1   :  { %1625 = vmatmul.bf16.gmra.mxu0 %v7943_v52  ;;  %v5993_v43 = vor.u32 %v7138_v28, %v5992_v25  ;;  %v5946_v20 = vld [vmem:[#allocation5 + $0x100] sm:$0xf0]  ;;  %v5944_v21 = vld [vmem:[#allocation5 + $0xd0] sm:$0xf]  ;;  %v7216_v25 = vld [vmem:[#allocation5 + $0x3d4] sm:$0xf] }
  0xe2   :  { %1674 = vmatmul.bf16.gmra.mxu1 %v7945_v53  ;;  %1900 = vmatpush.bf16.msra.mxu2 %v5997_v23  ;;  %v7126_v23 = vld [vmem:[#allocation5 + $0xfc] sm:$0xf0]  ;;  %v6330_v28 = vld [vmem:[#allocation5 + $0x400] sm:$0xf0] }
  0xe3   :  { %1723 = vmatmul.bf16.gmra.mxu2 %v7943_v52  ;;  %1802 = vmatpush.bf16.msra.mxu0 %v5993_v43  ;;  %v6333_v43 = vor.u32 %v7216_v25, %v6330_v28 }
  0xe4   :  { %1772 = vmatmul.bf16.gmra.mxu3 %v7945_v53 }
  0xe6   :  { %v1528_v34 = vpop.f32.mrf.mxu2  ;;  %v1432_v36 = vpop.f32.mrf.mxu0 }
  0xe7   :  { %v1577_v35 = vpop.f32.mrf.mxu3  ;;  %v1481_v40 = vpop.f32.mrf.mxu1 }
  0xe8   :  { %v8025_v39 = vadd.f32 %v1577_v35, %v1528_v34  ;;  %v8030_v4 = vadd.f32 %v1481_v40, %v1432_v36  ;;  %v6378_v34 = vld [vmem:[#allocation5 + $0x460] sm:$0xf0]  ;;  %v7234_v40 = vld [vmem:[#allocation5 + $0x45c] sm:$0xf0] }
  0xe9   :  { %v6381_v45 = vor.u32 %v7228_v29, %v6378_v34  ;;  %v6377_v50 = vor.u32 %v7234_v40, %v6376_v38 }
  0xeb   :  { %1949 = vmatpush.bf16.msra.mxu3 %v6381_v45  ;;  %1851 = vmatpush.bf16.msra.mxu1 %v6377_v50  ;;  %v7108_v50 = vld [vmem:[#allocation5 + $0x74] sm:$0xf] }
  0xee   :  { %v1530_v55 = vpop.f32.mrf.mxu2  ;;  %v1435_v61 = vpop.f32.mrf.mxu0 }
  0xef   :  { %v1579_v59 = vpop.f32.mrf.mxu3  ;;  %v1484_v0 = vpop.f32.mrf.mxu1  ;;  %1950 = vmatpush.bf16.msra.mxu3 %v6333_v43 }
  0xf0   :  { %v8032_v5 = vadd.f32 %v1579_v59, %v1530_v55  ;;  %v8039_v12 = vadd.f32 %v1484_v0, %v1435_v61 }
  0xf1   :  { %1630 = vmatmul.bf16.gmra.mxu0 %v7951_v6 }
  0xf2   :  { %1679 = vmatmul.bf16.gmra.mxu1 %v7953_v7 }
  0xf3   :  { %1728 = vmatmul.bf16.gmra.mxu2 %v7951_v6 }
  0xf4   :  { %1777 = vmatmul.bf16.gmra.mxu3 %v7953_v7 }
  0xf6   :  { %v1533_v8 = vpop.f32.mrf.mxu2  ;;  %v8035_v10 = vpop.f32.mrf.mxu0 }
  0xf7   :  { %v1582_v9 = vpop.f32.mrf.mxu3  ;;  %12760 = vst [vmem:[#allocation32_spill] sm:$0xff] %v8035_v10  ;;  %v8037_v11 = vpop.f32.mrf.mxu1 }
  0xf8   :  { %12761 = vst [vmem:[#allocation33_spill] sm:$0xff] %v8037_v11  ;;  %v8041_v19 = vadd.f32 %v1582_v9, %v1533_v8  ;;  %v7120_v9 = vld [vmem:[#allocation5 + $0xd4] sm:$0xf] }
  0xf9   :  { %v5949_v34 = vor.u32 %v7120_v9, %v5946_v20  ;;  %v6282_v9 = vld [vmem:[#allocation5 + $0x3a0] sm:$0xf0] }
  0xfb   :  { %1901 = vmatpush.bf16.msra.mxu2 %v5949_v34  ;;  %v6280_v34 = vld [vmem:[#allocation5 + $0x370] sm:$0xf] }
  0xfe   :  { %v1535_v35 = vpop.f32.mrf.mxu2  ;;  %v1440_v37 = vpop.f32.mrf.mxu0 }
  0xff   :  { %v1584_v36 = vpop.f32.mrf.mxu3  ;;  %v1489_v41 = vpop.f32.mrf.mxu1 }
 0x100   :  { %v8047_v51 = vadd.f32 %v1584_v36, %v1535_v35  ;;  %v8053_v62 = vadd.f32 %v1489_v41, %v1440_v37  ;;  %v5945_v35 = vor.u32 %v7126_v23, %v5944_v21  ;;  %v6328_v36 = vld [vmem:[#allocation5 + $0x3d0] sm:$0xf]  ;;  %v7222_v37 = vld [vmem:[#allocation5 + $0x3fc] sm:$0xf0] }
 0x101   :  { %1635 = vmatmul.bf16.gmra.mxu0 %v7959_v26  ;;  %v6329_v45 = vor.u32 %v7222_v37, %v6328_v36 }
 0x102   :  { %1684 = vmatmul.bf16.gmra.mxu1 %v7961_v27  ;;  %12762 = vst [vmem:[#allocation34_spill] sm:$0xff] %v8047_v51  ;;  %1803 = vmatpush.bf16.msra.mxu0 %v5945_v35  ;;  %v7210_v35 = vld [vmem:[#allocation5 + $0x39c] sm:$0xf0] }
 0x103   :  { %1733 = vmatmul.bf16.gmra.mxu2 %v7959_v26  ;;  %12765 = vst [vmem:[#allocation37_spill] sm:$0xff] %v8053_v62  ;;  %1852 = vmatpush.bf16.msra.mxu1 %v6329_v45  ;;  %v6281_v43 = vor.u32 %v7210_v35, %v6280_v34  ;;  %v7096_v34 = vld [vmem:[#allocation5 + $0x14] sm:$0xf]  ;;  %v5850_v35 = vld [vmem:[#allocation5 + $0x40] sm:$0xf0] }
 0x104   :  { %1782 = vmatmul.bf16.gmra.mxu3 %v7961_v27 }
 0x106   :  { %v1538_v54 = vpop.f32.mrf.mxu2  ;;  %v8049_v59 = vpop.f32.mrf.mxu0 }
 0x107   :  { %v1587_v55 = vpop.f32.mrf.mxu3  ;;  %12763 = vst [vmem:[#allocation35_spill] sm:$0xff] %v8049_v59  ;;  %v8051_v61 = vpop.f32.mrf.mxu1  ;;  %1853 = vmatpush.bf16.msra.mxu1 %v6281_v43  ;;  %v7192_v43 = vld [vmem:[#allocation5 + $0x314] sm:$0xf] }
 0x108   :  { %12764 = vst [vmem:[#allocation36_spill] sm:$0xff] %v8051_v61  ;;  %v8055_v63 = vadd.f32 %v1587_v55, %v1538_v54  ;;  %v5898_v54 = vld [vmem:[#allocation5 + $0xa0] sm:$0xf0]  ;;  %v5896_v55 = vld [vmem:[#allocation5 + $0x70] sm:$0xf] }
 0x109   :  { %v7204_v61 = vld [vmem:[#allocation5 + $0x374] sm:$0xf] }
 0x10a   :  { %12766 = vst [vmem:[#allocation38_spill] sm:$0xff] %v8055_v63  ;;  %v7114_v63 = vld [vmem:[#allocation5 + $0x9c] sm:$0xf0]  ;;  %v6285_v36 = vor.u32 %v7204_v61, %v6282_v9 }
 0x10b   :  { %v5897_v28 = vor.u32 %v7114_v63, %v5896_v55 }
 0x10c   :  { %1951 = vmatpush.bf16.msra.mxu3 %v6285_v36  ;;  %v7102_v36 = vld [vmem:[#allocation5 + $0x3c] sm:$0xf0] }
 0x10d   :  { %1804 = vmatpush.bf16.msra.mxu0 %v5897_v28  ;;  %v5848_v28 = vld [vmem:[#allocation5 + $0x10] sm:$0xf] }
 0x10e   :  { %v1540_v0 = vpop.f32.mrf.mxu2  ;;  %v1445_v2 = vpop.f32.mrf.mxu0 }
 0x10f   :  { %v1589_v1 = vpop.f32.mrf.mxu3  ;;  %v1494_v8 = vpop.f32.mrf.mxu1 }
 0x110   :  { %v8065_v59 = vadd.f32 %v1589_v1, %v1540_v0 }
 0x111   :  { %1640 = vmatmul.bf16.gmra.mxu0 %v7967_v47 }
 0x112   :  { %1689 = vmatmul.bf16.gmra.mxu1 %v7969_v48  ;;  %12769 = vst [vmem:[#allocation41_spill] sm:$0xff] %v8065_v59 }
 0x113   :  { %1738 = vmatmul.bf16.gmra.mxu2 %v7967_v47 }
 0x114   :  { %1787 = vmatmul.bf16.gmra.mxu3 %v7969_v48 }
 0x116   :  { %v1543_v29 = vpop.f32.mrf.mxu2  ;;  %v8061_v40 = vpop.f32.mrf.mxu0 }
 0x117   :  { %v1592_v38 = vpop.f32.mrf.mxu3  ;;  %12767 = vst [vmem:[#allocation39_spill] sm:$0xff] %v8061_v40  ;;  %v8063_v41 = vpop.f32.mrf.mxu1  ;;  %v8067_v40 = vadd.f32 %v1494_v8, %v1445_v2 }
 0x118   :  { %12768 = vst [vmem:[#allocation40_spill] sm:$0xff] %v8063_v41  ;;  %v5901_v41 = vor.u32 %v7108_v50, %v5898_v54  ;;  %v8070_v37 = vadd.f32 %v1592_v38, %v1543_v29 }
 0x119   :  { %12770 = vst [vmem:[#allocation42_spill] sm:$0xff] %v8067_v40 }
 0x11a   :  { %1902 = vmatpush.bf16.msra.mxu2 %v5901_v41  ;;  %12771 = vst [vmem:[#allocation43_spill] sm:$0xff] %v8070_v37 }
 0x11e   :  { %v1545_v20 = vpop.f32.mrf.mxu2  ;;  %v1450_v23 = vpop.f32.mrf.mxu0 }
 0x11f   :  { %v1594_v21 = vpop.f32.mrf.mxu3  ;;  %v1499_v25 = vpop.f32.mrf.mxu1 }
 0x120   :  { %v8079_v63 = vadd.f32 %v1594_v21, %v1545_v20  ;;  %v8081_v45 = vadd.f32 %v1499_v25, %v1450_v23  ;;  %v6232_v20 = vld [vmem:[#allocation5 + $0x310] sm:$0xf]  ;;  %v7198_v21 = vld [vmem:[#allocation5 + $0x33c] sm:$0xf0] }
 0x121   :  { %1645 = vmatmul.bf16.gmra.mxu0 %v7975_v56  ;;  %v6233_v25 = vor.u32 %v7198_v21, %v6232_v20 }
 0x122   :  { %1694 = vmatmul.bf16.gmra.mxu1 %v7977_v57  ;;  %12774 = vst [vmem:[#allocation46_spill] sm:$0xff] %v8079_v63  ;;  %v5849_v63 = vor.u32 %v7102_v36, %v5848_v28  ;;  %v6576_v36 = vld [vmem:[#allocation5 + $0x5b8] sm:$0xf] }
 0x123   :  { %1743 = vmatmul.bf16.gmra.mxu2 %v7975_v56  ;;  %12775 = vst [vmem:[#allocation47_spill] sm:$0xff] %v8081_v45  ;;  %1854 = vmatpush.bf16.msra.mxu1 %v6233_v25 }
 0x124   :  { %1792 = vmatmul.bf16.gmra.mxu3 %v7977_v57  ;;  %1805 = vmatpush.bf16.msra.mxu0 %v5849_v63 }
 0x126   :  { %v1548_v0 = vpop.f32.mrf.mxu2  ;;  %v8075_v2 = vpop.f32.mrf.mxu0 }
 0x127   :  { %v1597_v1 = vpop.f32.mrf.mxu3  ;;  %12772 = vst [vmem:[#allocation44_spill] sm:$0xff] %v8075_v2  ;;  %v8077_v61 = vpop.f32.mrf.mxu1  ;;  %v5853_v2 = vor.u32 %v7096_v34, %v5850_v35  ;;  %v7187_v34 = vld [vmem:[#allocation5 + $0x2e4] sm:$0xf0] }
 0x128   :  { %12773 = vst [vmem:[#allocation45_spill] sm:$0xff] %v8077_v61  ;;  %v6234_v61 = vld [vmem:[#allocation5 + $0x340] sm:$0xf0]  ;;  %v8087_v23 = vadd.f32 %v1597_v1, %v1548_v0 }
 0x129   :  { %v6237_v37 = vor.u32 %v7192_v43, %v6234_v61  ;;  %1903 = vmatpush.bf16.msra.mxu2 %v5853_v2  ;;  %v7181_v61 = vld [vmem:[#allocation5 + $0x2bc] sm:$0xf]  ;;  %v7283_v43 = vld [vmem:[#allocation5 + $0x5e4] sm:$0xf0] }
 0x12a   :  { %12778 = vst [vmem:[#allocation50_spill] sm:$0xff] %v8087_v23  ;;  %v7253_v23 = vld [vmem:[#allocation5 + $0x4fc] sm:$0xf] }
 0x12b   :  { %1952 = vmatpush.bf16.msra.mxu3 %v6237_v37 }
 0x12e   :  { %v1550_v8 = vpop.f32.mrf.mxu2  ;;  %v1611_v29 = vpop.f32.mrf.mxu0 }
 0x12f   :  { %v1599_v41 = vpop.f32.mrf.mxu3  ;;  %v1660_v38 = vpop.f32.mrf.mxu1 }
 0x130   :  { %v8089_v59 = vadd.f32 %v1599_v41, %v1550_v8  ;;  %v8092_v62 = vadd.f32 %v1660_v38, %v1611_v29  ;;  %v6194_v29 = vld [vmem:[#allocation5 + $0x2e8] sm:$0xf0]  ;;  %v6192_v38 = vld [vmem:[#allocation5 + $0x2b8] sm:$0xf] }
 0x131   :  { %1806 = vmatmul.bf16.vlgmr.msra.gmra.mxu0 %v7919_v44  ;;  %v6197_v35 = vor.u32 %v7181_v61, %v6194_v29  ;;  %v6193_v28 = vor.u32 %v7187_v34, %v6192_v38  ;;  %v7169_v29 = vld [vmem:[#allocation5 + $0x25c] sm:$0xf] }
 0x132   :  { %12779 = vst [vmem:[#allocation51_spill] sm:$0xff] %v8089_v59  ;;  %1855 = vmatmul.bf16.vlgmr.msra.gmra.mxu1 %v7921_v49 }
 0x133   :  { %1904 = vmatmul.bf16.vlgmr.msra.gmra.mxu2 %v7919_v44  ;;  %12780 = vst [vmem:[#allocation52_spill] sm:$0xff] %v8092_v62  ;;  %1994 = vmatpush.bf16.msrb.mxu0 %v6193_v28 }
 0x134   :  { %1953 = vmatmul.bf16.vlgmr.msra.gmra.mxu3 %v7921_v49  ;;  %2092 = vmatpush.bf16.msrb.mxu2 %v6197_v35  ;;  %v6146_v35 = vld [vmem:[#allocation5 + $0x288] sm:$0xf0] }
 0x135   :  { %v6149_v28 = vor.u32 %v7169_v29, %v6146_v35 }
 0x136   :  { %v1709_v50 = vpop.f32.mrf.mxu2  ;;  %v8083_v55 = vpop.f32.mrf.mxu0 }
 0x137   :  { %v1758_v54 = vpop.f32.mrf.mxu3  ;;  %12776 = vst [vmem:[#allocation48_spill] sm:$0xff] %v8083_v55  ;;  %v8085_v9 = vpop.f32.mrf.mxu1 }
 0x138   :  { %12777 = vst [vmem:[#allocation49_spill] sm:$0xff] %v8085_v9  ;;  %v8096_v0 = vadd.f32 %v1758_v54, %v1709_v50  ;;  %v7277_v50 = vld [vmem:[#allocation5 + $0x5bc] sm:$0xf]  ;;  %v6578_v54 = vld [vmem:[#allocation5 + $0x5e8] sm:$0xf0]  ;;  %2093 = vmatpush.bf16.msrb.mxu2 %v6149_v28 }
 0x139   :  { %v6581_v20 = vor.u32 %v7277_v50, %v6578_v54  ;;  %v6144_v50 = vld [vmem:[#allocation5 + $0x258] sm:$0xf]  ;;  %v7175_v54 = vld [vmem:[#allocation5 + $0x284] sm:$0xf0] }
 0x13a   :  { %12781 = vst [vmem:[#allocation53_spill] sm:$0xff] %v8096_v0 }
 0x13b   :  { %2141 = vmatpush.bf16.msrb.mxu3 %v6581_v20  ;;  %v6145_v20 = vor.u32 %v7175_v54, %v6144_v50 }
 0x13d   :  { %1995 = vmatpush.bf16.msrb.mxu0 %v6145_v20 }
 0x13e   :  { %v1711_v45 = vpop.f32.mrf.mxu2  ;;  %v1616_v9 = vpop.f32.mrf.mxu0 }
 0x13f   :  { %v1760_v55 = vpop.f32.mrf.mxu3  ;;  %v1665_v40 = vpop.f32.mrf.mxu1 }
 0x140   :  { %v8101_v63 = vadd.f32 %v1760_v55, %v1711_v45  ;;  %v8103_v8 = vadd.f32 %v1665_v40, %v1616_v9  ;;  %v6577_v45 = vor.u32 %v7283_v43, %v6576_v36  ;;  %v7265_v36 = vld [vmem:[#allocation5 + $0x55c] sm:$0xf]  ;;  %v6530_v43 = vld [vmem:[#allocation5 + $0x588] sm:$0xf0] }
 0x141   :  { %1811 = vmatmul.bf16.gmra.mxu0 %v7927_v14 }
 0x142   :  { %12783 = vst [vmem:[#allocation55_spill] sm:$0xff] %v8101_v63  ;;  %2043 = vmatpush.bf16.msrb.mxu1 %v6577_v45  ;;  %v6533_v45 = vor.u32 %v7265_v36, %v6530_v43  ;;  %v7157_v36 = vld [vmem:[#allocation5 + $0x1fc] sm:$0xf]  ;;  %v6098_v43 = vld [vmem:[#allocation5 + $0x228] sm:$0xf0] }
 0x143   :  { %12784 = vst [vmem:[#allocation56_spill] sm:$0xff] %v8103_v8  ;;  %1909 = vmatmul.bf16.gmra.mxu2 %v7927_v14  ;;  %1860 = vmatmul.bf16.gmra.mxu1 %v7929_v15  ;;  %v7271_v8 = vld [vmem:[#allocation5 + $0x584] sm:$0xf0]  ;;  %v6101_v62 = vor.u32 %v7157_v36, %v6098_v43 }
 0x144   :  { %1958 = vmatmul.bf16.gmra.mxu3 %v7929_v15 }
 0x145   :  { %2142 = vmatpush.bf16.msrb.mxu3 %v6533_v45  ;;  %v6096_v45 = vld [vmem:[#allocation5 + $0x1f8] sm:$0xf]  ;;  %2094 = vmatpush.bf16.msrb.mxu2 %v6101_v62 }
 0x146   :  { %v1714_v1 = vpop.f32.mrf.mxu2  ;;  %v8099_v2 = vpop.f32.mrf.mxu0 }
 0x147   :  { %v1763_v37 = vpop.f32.mrf.mxu3  ;;  %12782 = vst [vmem:[#allocation54_spill] sm:$0xff] %v8099_v2  ;;  %v8105_v41 = vpop.f32.mrf.mxu1  ;;  %v6528_v2 = vld [vmem:[#allocation5 + $0x558] sm:$0xf] }
 0x148   :  { %12785 = vst [vmem:[#allocation57_spill] sm:$0xff] %v8105_v41  ;;  %v8111_v41 = vadd.f32 %v1763_v37, %v1714_v1  ;;  %v6529_v63 = vor.u32 %v7271_v8, %v6528_v2 }
 0x14a   :  { %12786 = vst [vmem:[#allocation58_spill] sm:$0xff] %v8111_v41  ;;  %2044 = vmatpush.bf16.msrb.mxu1 %v6529_v63  ;;  %v7163_v41 = vld [vmem:[#allocation5 + $0x224] sm:$0xf0]  ;;  %v6482_v63 = vld [vmem:[#allocation5 + $0x528] sm:$0xf0] }
 0x14b   :  { %v6097_v59 = vor.u32 %v7163_v41, %v6096_v45 }
 0x14d   :  { %1996 = vmatpush.bf16.msrb.mxu0 %v6097_v59 }
 0x14e   :  { %v1716_v21 = vpop.f32.mrf.mxu2  ;;  %v1621_v40 = vpop.f32.mrf.mxu0 }
 0x14f   :  { %v1765_v25 = vpop.f32.mrf.mxu3  ;;  %v1670_v55 = vpop.f32.mrf.mxu1 }
 0x150   :  { %v8117_v1 = vadd.f32 %v1765_v25, %v1716_v21  ;;  %v8119_v54 = vadd.f32 %v1670_v55, %v1621_v40  ;;  %v6485_v21 = vor.u32 %v7253_v23, %v6482_v63  ;;  %v6480_v25 = vld [vmem:[#allocation5 + $0x4f8] sm:$0xf]  ;;  %v7259_v40 = vld [vmem:[#allocation5 + $0x524] sm:$0xf0]  ;;  %v7145_v63 = vld [vmem:[#allocation5 + $0x19c] sm:$0xf] }
 0x151   :  { %1816 = vmatmul.bf16.gmra.mxu0 %v7935_v32  ;;  %v6481_v55 = vor.u32 %v7259_v40, %v6480_v25  ;;  %v6048_v40 = vld [vmem:[#allocation5 + $0x198] sm:$0xf] }
 0x152   :  { %12787 = vst [vmem:[#allocation59_spill] sm:$0xff] %v8117_v1  ;;  %2143 = vmatpush.bf16.msrb.mxu3 %v6485_v21 }
 0x153   :  { %1914 = vmatmul.bf16.gmra.mxu2 %v7935_v32  ;;  %1865 = vmatmul.bf16.gmra.mxu1 %v7937_v33  ;;  %12788 = vst [vmem:[#allocation60_spill] sm:$0xff] %v8119_v54 }
 0x154   :  { %1963 = vmatmul.bf16.gmra.mxu3 %v7937_v33  ;;  %2045 = vmatpush.bf16.msrb.mxu1 %v6481_v55  ;;  %v7151_v55 = vld [vmem:[#allocation5 + $0x1c4] sm:$0xf0] }
 0x155   :  { %v6049_v51 = vor.u32 %v7151_v55, %v6048_v40 }
 0x156   :  { %v1719_v9 = vpop.f32.mrf.mxu2  ;;  %v1623_v38 = vpop.f32.mrf.mxu0 }
 0x157   :  { %v1768_v61 = vpop.f32.mrf.mxu3  ;;  %v1672_v34 = vpop.f32.mrf.mxu1  ;;  %1997 = vmatpush.bf16.msrb.mxu0 %v6049_v51 }
 0x158   :  { %v8121_v2 = vadd.f32 %v1768_v61, %v1719_v9  ;;  %v8127_v62 = vadd.f32 %v1672_v34, %v1623_v38  ;;  %v7241_v38 = vld [vmem:[#allocation5 + $0x49c] sm:$0xf]  ;;  %v6434_v34 = vld [vmem:[#allocation5 + $0x4c8] sm:$0xf0] }
 0x15a   :  { %12789 = vst [vmem:[#allocation61_spill] sm:$0xff] %v8121_v2  ;;  %v6050_v2 = vld [vmem:[#allocation5 + $0x1c8] sm:$0xf0] }
 0x15b   :  { %12790 = vst [vmem:[#allocation62_spill] sm:$0xff] %v8127_v62  ;;  %v6053_v1 = vor.u32 %v7145_v63, %v6050_v2 }
 0x15d   :  { %2095 = vmatpush.bf16.msrb.mxu2 %v6053_v1  ;;  %v7133_v1 = vld [vmem:[#allocation5 + $0x13c] sm:$0xf] }
 0x15e   :  { %v1721_v0 = vpop.f32.mrf.mxu2  ;;  %v1626_v35 = vpop.f32.mrf.mxu0 }
 0x15f   :  { %v1770_v29 = vpop.f32.mrf.mxu3  ;;  %v1675_v28 = vpop.f32.mrf.mxu1 }
 0x160   :  { %v8129_v59 = vadd.f32 %v1770_v29, %v1721_v0  ;;  %v8131_v45 = vadd.f32 %v1675_v28, %v1626_v35  ;;  %v6437_v0 = vor.u32 %v7241_v38, %v6434_v34  ;;  %v6432_v29 = vld [vmem:[#allocation5 + $0x498] sm:$0xf]  ;;  %v7247_v35 = vld [vmem:[#allocation5 + $0x4c4] sm:$0xf0]  ;;  %v6002_v38 = vld [vmem:[#allocation5 + $0x168] sm:$0xf0] }
 0x161   :  { %1821 = vmatmul.bf16.gmra.mxu0 %v7943_v52  ;;  %v6433_v28 = vor.u32 %v7247_v35, %v6432_v29  ;;  %v7229_v35 = vld [vmem:[#allocation5 + $0x43c] sm:$0xf] }
 0x162   :  { %12791 = vst [vmem:[#allocation63_spill] sm:$0xff] %v8129_v59  ;;  %2144 = vmatpush.bf16.msrb.mxu3 %v6437_v0  ;;  %v6005_v0 = vor.u32 %v7133_v1, %v6002_v38 }
 0x163   :  { %1919 = vmatmul.bf16.gmra.mxu2 %v7943_v52  ;;  %1870 = vmatmul.bf16.gmra.mxu1 %v7945_v53  ;;  %12792 = vst [vmem:[#allocation64_spill] sm:$0xff] %v8131_v45 }
 0x164   :  { %1968 = vmatmul.bf16.gmra.mxu3 %v7945_v53  ;;  %2046 = vmatpush.bf16.msrb.mxu1 %v6433_v28  ;;  %v6386_v28 = vld [vmem:[#allocation5 + $0x468] sm:$0xf0] }
 0x165   :  { %2096 = vmatpush.bf16.msrb.mxu2 %v6005_v0  ;;  %v5954_v0 = vld [vmem:[#allocation5 + $0x108] sm:$0xf0] }
 0x166   :  { %v1724_v37 = vpop.f32.mrf.mxu2  ;;  %v1628_v8 = vpop.f32.mrf.mxu0 }
 0x167   :  { %v1773_v50 = vpop.f32.mrf.mxu3  ;;  %v1677_v20 = vpop.f32.mrf.mxu1 }
 0x168   :  { %v8133_v54 = vadd.f32 %v1773_v50, %v1724_v37  ;;  %v8147_v40 = vadd.f32 %v1677_v20, %v1628_v8 }
 0x16a   :  { %12793 = vst [vmem:[#allocation65_spill] sm:$0xff] %v8133_v54  ;;  %v7211_v54 = vld [vmem:[#allocation5 + $0x3a4] sm:$0xf0] }
 0x16b   :  { %12798 = vst [vmem:[#allocation70_spill] sm:$0xff] %v8147_v40  ;;  %v6288_v40 = vld [vmem:[#allocation5 + $0x378] sm:$0xf] }
 0x16c   :  { %v6289_v45 = vor.u32 %v7211_v54, %v6288_v40 }
 0x16e   :  { %v1726_v9 = vpop.f32.mrf.mxu2  ;;  %v1631_v41 = vpop.f32.mrf.mxu0 }
 0x16f   :  { %v1775_v61 = vpop.f32.mrf.mxu3  ;;  %v1680_v36 = vpop.f32.mrf.mxu1 }
 0x170   :  { %v8149_v55 = vadd.f32 %v1775_v61, %v1726_v9  ;;  %v8153_v51 = vadd.f32 %v1680_v36, %v1631_v41  ;;  %v6000_v9 = vld [vmem:[#allocation5 + $0x138] sm:$0xf]  ;;  %v7139_v61 = vld [vmem:[#allocation5 + $0x164] sm:$0xf0]  ;;  %v6389_v41 = vor.u32 %v7229_v35, %v6386_v28 }
 0x171   :  { %1826 = vmatmul.bf16.gmra.mxu0 %v7951_v6  ;;  %v6001_v29 = vor.u32 %v7139_v61, %v6000_v9  ;;  %v6384_v36 = vld [vmem:[#allocation5 + $0x438] sm:$0xf]  ;;  %v7121_v61 = vld [vmem:[#allocation5 + $0xdc] sm:$0xf] }
 0x172   :  { %12799 = vst [vmem:[#allocation71_spill] sm:$0xff] %v8149_v55  ;;  %2145 = vmatpush.bf16.msrb.mxu3 %v6389_v41  ;;  %v5952_v41 = vld [vmem:[#allocation5 + $0xd8] sm:$0xf] }
 0x173   :  { %1924 = vmatmul.bf16.gmra.mxu2 %v7951_v6  ;;  %1875 = vmatmul.bf16.gmra.mxu1 %v7953_v7  ;;  %12800 = vst [vmem:[#allocation72_spill] sm:$0xff] %v8153_v51 }
 0x174   :  { %1973 = vmatmul.bf16.gmra.mxu3 %v7953_v7  ;;  %1998 = vmatpush.bf16.msrb.mxu0 %v6001_v29 }
 0x176   :  { %v1729_v23 = vpop.f32.mrf.mxu2  ;;  %v8135_v21 = vpop.f32.mrf.mxu0 }
 0x177   :  { %v1778_v43 = vpop.f32.mrf.mxu3  ;;  %12794 = vst [vmem:[#allocation66_spill] sm:$0xff] %v8135_v21  ;;  %v8137_v25 = vpop.f32.mrf.mxu1 }
 0x178   :  { %12795 = vst [vmem:[#allocation67_spill] sm:$0xff] %v8137_v25  ;;  %v8155_v34 = vadd.f32 %v1778_v43, %v1729_v23  ;;  %v7235_v23 = vld [vmem:[#allocation5 + $0x464] sm:$0xf0] }
 0x179   :  { %v6385_v43 = vor.u32 %v7235_v23, %v6384_v36  ;;  %v7127_v36 = vld [vmem:[#allocation5 + $0x104] sm:$0xf0]  ;;  %v5957_v23 = vor.u32 %v7121_v61, %v5954_v0  ;;  %v7109_v61 = vld [vmem:[#allocation5 + $0x7c] sm:$0xf]  ;;  %v5906_v0 = vld [vmem:[#allocation5 + $0xa8] sm:$0xf0] }
 0x17a   :  { %12801 = vst [vmem:[#allocation73_spill] sm:$0xff] %v8155_v34 }
 0x17b   :  { %2047 = vmatpush.bf16.msrb.mxu1 %v6385_v43  ;;  %v5953_v43 = vor.u32 %v7127_v36, %v5952_v41  ;;  %2097 = vmatpush.bf16.msrb.mxu2 %v5957_v23  ;;  %v7115_v41 = vld [vmem:[#allocation5 + $0xa4] sm:$0xf0]  ;;  %v7205_v36 = vld [vmem:[#allocation5 + $0x37c] sm:$0xf] }
 0x17d   :  { %1999 = vmatpush.bf16.msrb.mxu0 %v5953_v43  ;;  %v6290_v43 = vld [vmem:[#allocation5 + $0x3a8] sm:$0xf0] }
 0x17e   :  { %v8143_v37 = vpop.f32.mrf.mxu2  ;;  %v1636_v2 = vpop.f32.mrf.mxu0 }
 0x17f   :  { %12796 = vst [vmem:[#allocation68_spill] sm:$0xff] %v8143_v37  ;;  %v8145_v50 = vpop.f32.mrf.mxu3  ;;  %v1685_v63 = vpop.f32.mrf.mxu1 }
 0x180   :  { %12797 = vst [vmem:[#allocation69_spill] sm:$0xff] %v8145_v50  ;;  %v8171_v9 = vadd.f32 %v1685_v63, %v1636_v2  ;;  %v6336_v2 = vld [vmem:[#allocation5 + $0x3d8] sm:$0xf]  ;;  %v7223_v63 = vld [vmem:[#allocation5 + $0x404] sm:$0xf0] }
 0x181   :  { %1831 = vmatmul.bf16.gmra.mxu0 %v7959_v26 }
 0x182   :  { %12806 = vst [vmem:[#allocation78_spill] sm:$0xff] %v8171_v9  ;;  %v6337_v9 = vor.u32 %v7223_v63, %v6336_v2 }
 0x183   :  { %1929 = vmatmul.bf16.gmra.mxu2 %v7959_v26  ;;  %1880 = vmatmul.bf16.gmra.mxu1 %v7961_v27 }
 0x184   :  { %1978 = vmatmul.bf16.gmra.mxu3 %v7961_v27  ;;  %2048 = vmatpush.bf16.msrb.mxu1 %v6337_v9  ;;  %v5909_v9 = vor.u32 %v7109_v61, %v5906_v0  ;;  %v7097_v0 = vld [vmem:[#allocation5 + $0x1c] sm:$0xf] }
 0x186   :  { %v1734_v25 = vpop.f32.mrf.mxu2  ;;  %v8159_v8 = vpop.f32.mrf.mxu0  ;;  %2098 = vmatpush.bf16.msrb.mxu2 %v5909_v9 }
 0x187   :  { %v1783_v21 = vpop.f32.mrf.mxu3  ;;  %12802 = vst [vmem:[#allocation74_spill] sm:$0xff] %v8159_v8  ;;  %v8161_v20 = vpop.f32.mrf.mxu1 }
 0x188   :  { %12803 = vst [vmem:[#allocation75_spill] sm:$0xff] %v8161_v20  ;;  %v8173_v29 = vadd.f32 %v1783_v21, %v1734_v25  ;;  %2049 = vmatpush.bf16.msrb.mxu1 %v6289_v45 }
 0x18a   :  { %12807 = vst [vmem:[#allocation79_spill] sm:$0xff] %v8173_v29  ;;  %v6293_v29 = vor.u32 %v7205_v36, %v6290_v43  ;;  %v7199_v43 = vld [vmem:[#allocation5 + $0x344] sm:$0xf0] }
 0x18e   :  { %v8163_v50 = vpop.f32.mrf.mxu2  ;;  %v1641_v8 = vpop.f32.mrf.mxu0 }
 0x18f   :  { %12804 = vst [vmem:[#allocation76_spill] sm:$0xff] %v8163_v50  ;;  %v8165_v37 = vpop.f32.mrf.mxu3  ;;  %v1690_v20 = vpop.f32.mrf.mxu1  ;;  %v6338_v50 = vld [vmem:[#allocation5 + $0x408] sm:$0xf0] }
 0x190   :  { %12805 = vst [vmem:[#allocation77_spill] sm:$0xff] %v8165_v37  ;;  %v7217_v37 = vld [vmem:[#allocation5 + $0x3dc] sm:$0xf]  ;;  %v8183_v23 = vadd.f32 %v1690_v20, %v1641_v8 }
 0x191   :  { %1836 = vmatmul.bf16.gmra.mxu0 %v7967_v47  ;;  %v6341_v34 = vor.u32 %v7217_v37, %v6338_v50 }
 0x192   :  { %12810 = vst [vmem:[#allocation82_spill] sm:$0xff] %v8183_v23 }
 0x193   :  { %1934 = vmatmul.bf16.gmra.mxu2 %v7967_v47  ;;  %1885 = vmatmul.bf16.gmra.mxu1 %v7969_v48 }
 0x194   :  { %1983 = vmatmul.bf16.gmra.mxu3 %v7969_v48 }
 0x195   :  { %2146 = vmatpush.bf16.msrb.mxu3 %v6341_v34  ;;  %v5904_v34 = vld [vmem:[#allocation5 + $0x78] sm:$0xf] }
 0x196   :  { %v1739_v1 = vpop.f32.mrf.mxu2  ;;  %v8175_v35 = vpop.f32.mrf.mxu0 }
 0x197   :  { %v1788_v38 = vpop.f32.mrf.mxu3  ;;  %12808 = vst [vmem:[#allocation80_spill] sm:$0xff] %v8175_v35  ;;  %v8177_v28 = vpop.f32.mrf.mxu1 }
 0x198   :  { %12809 = vst [vmem:[#allocation81_spill] sm:$0xff] %v8177_v28  ;;  %v5905_v28 = vor.u32 %v7115_v41, %v5904_v34  ;;  %v8189_v55 = vadd.f32 %v1788_v38, %v1739_v1  ;;  %v7103_v41 = vld [vmem:[#allocation5 + $0x44] sm:$0xf0] }
 0x199   :  { %2147 = vmatpush.bf16.msrb.mxu3 %v6293_v29  ;;  %v6242_v29 = vld [vmem:[#allocation5 + $0x348] sm:$0xf0] }
 0x19a   :  { %2000 = vmatpush.bf16.msrb.mxu0 %v5905_v28  ;;  %12813 = vst [vmem:[#allocation85_spill] sm:$0xff] %v8189_v55  ;;  %v7193_v28 = vld [vmem:[#allocation5 + $0x31c] sm:$0xf] }
 0x19b   :  { %v6245_v40 = vor.u32 %v7193_v28, %v6242_v29  ;;  %v7182_v28 = vld [vmem:[#allocation5 + $0x2c4] sm:$0xf]  ;;  %v6202_v29 = vld [vmem:[#allocation5 + $0x2f0] sm:$0xf0] }
 0x19d   :  { %2148 = vmatpush.bf16.msrb.mxu3 %v6245_v40 }
 0x19e   :  { %v1741_v51 = vpop.f32.mrf.mxu2  ;;  %v1646_v25 = vpop.f32.mrf.mxu0 }
 0x19f   :  { %v1790_v21 = vpop.f32.mrf.mxu3  ;;  %v1695_v35 = vpop.f32.mrf.mxu1 }
 0x1a0   :  { %v8191_v61 = vadd.f32 %v1790_v21, %v1741_v51  ;;  %v8193_v1 = vadd.f32 %v1695_v35, %v1646_v25  ;;  %v6240_v21 = vld [vmem:[#allocation5 + $0x318] sm:$0xf] }
 0x1a1   :  { %1841 = vmatmul.bf16.gmra.mxu0 %v7975_v56  ;;  %v6241_v35 = vor.u32 %v7199_v43, %v6240_v21  ;;  %v6200_v43 = vld [vmem:[#allocation5 + $0x2c0] sm:$0xf] }
 0x1a2   :  { %12814 = vst [vmem:[#allocation86_spill] sm:$0xff] %v8191_v61 }
 0x1a3   :  { %1939 = vmatmul.bf16.gmra.mxu2 %v7975_v56  ;;  %1890 = vmatmul.bf16.gmra.mxu1 %v7977_v57  ;;  %12815 = vst [vmem:[#allocation87_spill] sm:$0xff] %v8193_v1  ;;  %v6586_v1 = vld [vmem:[#allocation5 + $0x5f0] sm:$0xf0] }
 0x1a4   :  { %1988 = vmatmul.bf16.gmra.mxu3 %v7977_v57  ;;  %2050 = vmatpush.bf16.msrb.mxu1 %v6241_v35  ;;  %v7188_v35 = vld [vmem:[#allocation5 + $0x2ec] sm:$0xf0] }
 0x1a6   :  { %v1744_v37 = vpop.f32.mrf.mxu2  ;;  %v8185_v2 = vpop.f32.mrf.mxu0 }
 0x1a7   :  { %v1793_v50 = vpop.f32.mrf.mxu3  ;;  %12811 = vst [vmem:[#allocation83_spill] sm:$0xff] %v8185_v2  ;;  %v8187_v63 = vpop.f32.mrf.mxu1  ;;  %v5858_v2 = vld [vmem:[#allocation5 + $0x48] sm:$0xf0] }
 0x1a8   :  { %12812 = vst [vmem:[#allocation84_spill] sm:$0xff] %v8187_v63  ;;  %v5856_v63 = vld [vmem:[#allocation5 + $0x18] sm:$0xf]  ;;  %v5861_v38 = vor.u32 %v7097_v0, %v5858_v2  ;;  %v8199_v51 = vadd.f32 %v1793_v50, %v1744_v37 }
 0x1a9   :  { %v5857_v45 = vor.u32 %v7103_v41, %v5856_v63 }
 0x1aa   :  { %2099 = vmatpush.bf16.msrb.mxu2 %v5861_v38  ;;  %12818 = vst [vmem:[#allocation90_spill] sm:$0xff] %v8199_v51  ;;  %v7278_v51 = vld [vmem:[#allocation5 + $0x5c4] sm:$0xf] }
 0x1ab   :  { %2001 = vmatpush.bf16.msrb.mxu0 %v5857_v45 }
 0x1ae   :  { %v1746_v59 = vpop.f32.mrf.mxu2  ;;  %v1807_v8 = vpop.f32.mrf.mxu0 }
 0x1af   :  { %v1795_v62 = vpop.f32.mrf.mxu3  ;;  %v1856_v20 = vpop.f32.mrf.mxu1 }
 0x1b0   :  { %v8205_v63 = vadd.f32 %v1795_v62, %v1746_v59  ;;  %v8207_v41 = vadd.f32 %v1856_v20, %v1807_v8  ;;  %v6589_v62 = vor.u32 %v7278_v51, %v6586_v1  ;;  %v6598_v59 = vmul.f32 -1.442695, %v7983_v3  ;;  %v6584_v8 = vld [vmem:[#allocation5 + $0x5c0] sm:$0xf]  ;;  %v7284_v20 = vld [vmem:[#allocation5 + $0x5ec] sm:$0xf0] }
 0x1b1   :  { %2002 = vmatmul.bf16.vlgmr.msrb.gmra.mxu0 %v7919_v44  ;;  %v6604_v51 = vmul.f32 -1.442695, %v7991_v18 }
 0x1b2   :  { %12819 = vst [vmem:[#allocation91_spill] sm:$0xff] %v8205_v63  ;;  %2337 = vmatpush.bf16.msra.mxu3 %v6589_v62  ;;  %7390 = vpow2.f32 %v6598_v59 }
 0x1b3   :  { %2100 = vmatmul.bf16.vlgmr.msrb.gmra.mxu2 %v7919_v44  ;;  %2051 = vmatmul.bf16.vlgmr.msrb.gmra.mxu1 %v7921_v49  ;;  %12820 = vst [vmem:[#allocation92_spill] sm:$0xff] %v8207_v41 }
 0x1b4   :  { %2149 = vmatmul.bf16.vlgmr.msrb.gmra.mxu3 %v7921_v49 }
 0x1b6   :  { %v1905_v9 = vpop.f32.mrf.mxu2  ;;  %v8195_v36 = vpop.f32.mrf.mxu0 }
 0x1b7   :  { %v1954_v34 = vpop.f32.mrf.mxu3  ;;  %12816 = vst [vmem:[#allocation88_spill] sm:$0xff] %v8195_v36  ;;  %v8197_v54 = vpop.f32.mrf.mxu1  ;;  %v6201_v36 = vor.u32 %v7188_v35, %v6200_v43 }
 0x1b8   :  { %12817 = vst [vmem:[#allocation89_spill] sm:$0xff] %v8197_v54  ;;  %v8209_v45 = vadd.f32 %v1954_v34, %v1905_v9  ;;  %v6205_v54 = vor.u32 %v7182_v28, %v6202_v29  ;;  %v6585_v9 = vor.u32 %v7284_v20, %v6584_v8  ;;  %v7170_v20 = vld [vmem:[#allocation5 + $0x264] sm:$0xf] }
 0x1b9   :  { %2190 = vmatpush.bf16.msra.mxu0 %v6201_v36  ;;  %v6599_v36 = vmul.f32 -1.442695, %v7989_v16 }
 0x1ba   :  { %12821 = vst [vmem:[#allocation93_spill] sm:$0xff] %v8209_v45  ;;  %2288 = vmatpush.bf16.msra.mxu2 %v6205_v54  ;;  %2239 = vmatpush.bf16.msra.mxu1 %v6585_v9  ;;  %v7391_v54 = vpop.eup %7390  ;;  %v6154_v9 = vld [vmem:[#allocation5 + $0x290] sm:$0xf0]  ;;  %v6605_v45 = vmul.f32 -1.442695, %v7993_v22 }
 0x1bb   :  { %7392 = vpow2.f32 %v6599_v36  ;;  %v6157_v41 = vor.u32 %v7170_v20, %v6154_v9  ;;  %v6610_v36 = vmul.f32 -1.442695, %v7995_v24 }
 0x1bc   :  { %7394 = vpow2.f32 %v6604_v51  ;;  %v7272_v51 = vld [vmem:[#allocation5 + $0x58c] sm:$0xf0] }
 0x1be   :  { %v1907_v25 = vpop.f32.mrf.mxu2  ;;  %v1812_v0 = vpop.f32.mrf.mxu0  ;;  %2289 = vmatpush.bf16.msra.mxu2 %v6157_v41 }
 0x1bf   :  { %v1956_v2 = vpop.f32.mrf.mxu3 }
 0x1c0   :  { %v1861_v38 = vpop.f32.mrf.mxu1  ;;  %v8224_v1 = vadd.f32 %v1956_v2, %v1907_v25  ;;  %v8239_v2 = vadd.f32 1.0, %v7391_v54  ;;  %v6536_v54 = vld [vmem:[#allocation5 + $0x560] sm:$0xf] }
 0x1c1   :  { %2007 = vmatmul.bf16.gmra.mxu0 %v7927_v14  ;;  %v8231_v8 = vadd.f32 %v1861_v38, %v1812_v0  ;;  %v7266_v0 = vld [vmem:[#allocation5 + $0x564] sm:$0xf]  ;;  %v6538_v38 = vld [vmem:[#allocation5 + $0x590] sm:$0xf0] }
 0x1c2   :  { %12824 = vst [vmem:[#allocation96_spill] sm:$0xff] %v8224_v1  ;;  %v7176_v1 = vld [vmem:[#allocation5 + $0x28c] sm:$0xf0]  ;;  %7396 = vrcp.f32 %v8239_v2  ;;  %vm2971_vm1 = vweird.f32 %v8239_v2 }
 0x1c3   :  { %2105 = vmatmul.bf16.gmra.mxu2 %v7927_v14  ;;  %2056 = vmatmul.bf16.gmra.mxu1 %v7929_v15  ;;  %12825 = vst [vmem:[#allocation97_spill] sm:$0xff] %v8231_v8  ;;  %7398 = vpow2.f32 %v6605_v45  ;;  %v6490_v14 = vld [vmem:[#allocation5 + $0x530] sm:$0xf0] }
 0x1c4   :  { %2154 = vmatmul.bf16.gmra.mxu3 %v7929_v15  ;;  %7400 = vpow2.f32 %v6610_v36  ;;  %v7254_v15 = vld [vmem:[#allocation5 + $0x504] sm:$0xf] }
 0x1c6   :  { %v1910_v37 = vpop.f32.mrf.mxu2  ;;  %v8211_v40 = vpop.f32.mrf.mxu0 }
 0x1c7   :  { %v1959_v50 = vpop.f32.mrf.mxu3  ;;  %12822 = vst [vmem:[#allocation94_spill] sm:$0xff] %v8211_v40  ;;  %v6152_v40 = vld [vmem:[#allocation5 + $0x260] sm:$0xf] }
 0x1c8   :  { %v8213_v21 = vpop.f32.mrf.mxu1  ;;  %v6153_v63 = vor.u32 %v7176_v1, %v6152_v40  ;;  %v6537_v40 = vor.u32 %v7272_v51, %v6536_v54  ;;  %v6611_v54 = vmul.f32 -1.442695, %v8001_v42 }
 0x1c9   :  { %12823 = vst [vmem:[#allocation95_spill] sm:$0xff] %v8213_v21  ;;  %v8233_v21 = vadd.f32 %v1959_v50, %v1910_v37  ;;  %v6541_v37 = vor.u32 %v7266_v0, %v6538_v38  ;;  %v7393_v50 = vpop.eup %7392 }
 0x1ca   :  { %2191 = vmatpush.bf16.msra.mxu0 %v6153_v63  ;;  %v7395_v20 = vpop.eup %7394  ;;  %v8251_v41 = vadd.f32 1.0, %v7393_v50  ;;  %2240 = vmatpush.bf16.msra.mxu1 %v6537_v40 }
 0x1cb   :  { %12826 = vst [vmem:[#allocation98_spill] sm:$0xff] %v8233_v21  ;;  %2338 = vmatpush.bf16.msra.mxu3 %v6541_v37  ;;  %v8257_v0 = vpop.eup %7396  ;;  %v8259_v38 = vadd.f32 1.0, %v7395_v20 }
 0x1cc   :  { %v7399_v37 = vpop.eup %7398  ;;  %v2967_v51 = vmul.f32 %v8257_v0, %v8239_v2  ;;  %7402 = vrcp.f32 %v8251_v41  ;;  %vm2972_vm0 = vweird.f32 %v8257_v0  ;;  %vm2986_vm4 = vweird.f32 %v8251_v41 }
 0x1cd   :  { %7404 = vrcp.f32 %v8259_v38  ;;  %v8268_v40 = vadd.f32 1.0, %v7399_v37  ;;  %v7401_v21 = vpop.eup %7400  ;;  %v7158_v37 = vld [vmem:[#allocation5 + $0x204] sm:$0xf]  ;;  %vm8332_vm3 = vmor %vm2971_vm1, %vm2972_vm0  ;;  %vm3061_vm5 = vweird.f32 %v8259_v38  ;;  %v3065_v56 = vand.u32 2147483647, %v8259_v38 }
 0x1ce   :  { %v1912_v34 = vpop.f32.mrf.mxu2  ;;  %v8219_v29 = vpop.f32.mrf.mxu0  ;;  %7406 = vpow2.f32 %v6611_v54  ;;  %v2968_v8 = vsub.f32 1.0, %v2967_v51  ;;  %v8292_v23 = vadd.f32 1.0, %v7401_v21 }
 0x1cf   :  { %v1961_v28 = vpop.f32.mrf.mxu3  ;;  %7408 = vrcp.f32 %v8268_v40  ;;  %vm8378_vm9 = vcmp.eq.f32.partialorder %v3065_v56, 8.507059e+37  ;;  %vm3076_vm11 = vweird.f32 %v8268_v40 }
 0x1d0   :  { %v8221_v43 = vpop.f32.mrf.mxu1  ;;  %v8265_v50 = vadd.f32 %v1961_v28, %v1912_v34  ;;  %v6616_v34 = vmul.f32 -1.442695, %v8003_v46  ;;  %vm3151_vm0 = vweird.f32 %v8292_v23 }
 0x1d1   :  { %2012 = vmatmul.bf16.gmra.mxu0 %v7935_v32  ;;  %v8281_v28 = vadd.f32 %v8221_v43, %v8219_v29  ;;  %v6617_v29 = vmul.f32 -1.442695, %v8005_v58 }
 0x1d2   :  { %12827 = vst [vmem:[#allocation99_spill] sm:$0xff] %v8265_v50  ;;  %v6106_v50 = vld [vmem:[#allocation5 + $0x230] sm:$0xf0]  ;;  %v8290_v55 = vpop.eup %7402  ;;  %7410 = vpow2.f32 %v6616_v34 }
 0x1d3   :  { %2110 = vmatmul.bf16.gmra.mxu2 %v7935_v32  ;;  %2061 = vmatmul.bf16.gmra.mxu1 %v7937_v33  ;;  %12828 = vst [vmem:[#allocation100_spill] sm:$0xff] %v8281_v28  ;;  %v8294_v32 = vpop.eup %7404  ;;  %v6109_v43 = vor.u32 %v7158_v37, %v6106_v50  ;;  %v2982_v21 = vmul.f32 %v8290_v55, %v8251_v41  ;;  %7412 = vrcp.f32 %v8292_v23  ;;  %v7260_v37 = vld [vmem:[#allocation5 + $0x52c] sm:$0xf0]  ;;  %vm2987_vm6 = vweird.f32 %v8290_v55 }
 0x1d4   :  { %2159 = vmatmul.bf16.gmra.mxu3 %v7937_v33  ;;  %v7164_v33 = vld [vmem:[#allocation5 + $0x22c] sm:$0xf0]  ;;  %v3057_v49 = vmul.f32 %v8294_v32, %v8259_v38  ;;  %v6493_v50 = vor.u32 %v7254_v15, %v6490_v14  ;;  %7414 = vpow2.f32 %v6617_v29  ;;  %vm3062_vm8 = vweird.f32 %v8294_v32  ;;  %vm8418_vm10 = vmor %vm2986_vm4, %vm2987_vm6 }
 0x1d5   :  { %2290 = vmatpush.bf16.msra.mxu2 %v6109_v43  ;;  %v2983_v44 = vsub.f32 1.0, %v2982_v21  ;;  %v3067_v21 = vand.u32 2147483648, %v8259_v38  ;;  %vm8433_vm12 = vmor %vm3061_vm5, %vm3062_vm8 }
 0x1d6   :  { %v8228_v35 = vpop.f32.mrf.mxu2  ;;  %v8235_v59 = vpop.f32.mrf.mxu0  ;;  %2339 = vmatpush.bf16.msra.mxu3 %v6493_v50  ;;  %v3058_v57 = vsub.f32 1.0, %v3057_v49 }
 0x1d7   :  { %v1964_v62 = vpop.f32.mrf.mxu3  ;;  %v2984_v58 = vmul.f32 %v8290_v55, %v2983_v44 }
 0x1d8   :  { %v8237_v25 = vpop.f32.mrf.mxu1  ;;  %v8284_v54 = vadd.f32 %v1964_v62, %v8228_v35  ;;  %v6622_v35 = vmul.f32 -1.442695, %v8008_v60  ;;  %v7407_v62 = vpop.eup %7406  ;;  %v3059_v46 = vmul.f32 %v8294_v32, %v3058_v57  ;;  %v8365_v57 = vor.u32 1.1754944e-38, %v3067_v21 }
 0x1d9   :  { %v8309_v34 = vadd.f32 1.0, %v7407_v62  ;;  %v2985_v21 = vadd.f32 %v8290_v55, %v2984_v58  ;;  %v6629_v58 = vmul.f32 -1.442695, %v8021_v30 }
 0x1da   :  { %12829 = vst [vmem:[#allocation101_spill] sm:$0xff] %v8284_v54  ;;  %v2969_v54 = vmul.f32 %v8257_v0, %v2968_v8  ;;  %v2977_v8 = vand.u32 2147483648, %v8239_v2  ;;  %7416 = vpow2.f32 %v6622_v35  ;;  %v3060_v35 = vadd.f32 %v8294_v32, %v3059_v46 }
 0x1db   :  { %7418 = vrcp.f32 %v8309_v34 }
 0x1dc   :  { %v2970_v43 = vadd.f32 %v8257_v0, %v2969_v54  ;;  %v2978_v54 = vor.u32 1.1754944e-38, %v2977_v8 }
 0x1de   :  { %v8247_v1 = vpop.f32.mrf.mxu2  ;;  %v8253_v63 = vpop.f32.mrf.mxu0  ;;  %v2974_v8 = vsel %vm8332_vm3, %v8257_v0, %v2970_v43  ;;  %v6623_v0 = vmul.f32 -1.442695, %v8013_v13  ;;  %v8356_v43 = vadd.f32 %v8237_v25, %v8235_v59  ;;  %v6440_v25 = vld [vmem:[#allocation5 + $0x4a0] sm:$0xf]  ;;  %vm3166_vm3 = vweird.f32 %v8309_v34 }
 0x1df   :  { %v8249_v9 = vpop.f32.mrf.mxu3 }
 0x1e0   :  { %v8255_v45 = vpop.f32.mrf.mxu1  ;;  %12834 = vst [vmem:[#allocation102_spill] sm:$0xff] %v8356_v43  ;;  %v8360_v10 = vadd.f32 %v8249_v9, %v8247_v1  ;;  %v3080_v9 = vand.u32 2147483647, %v8268_v40  ;;  %v6058_v43 = vld [vmem:[#allocation5 + $0x1d0] sm:$0xf0] }
 0x1e1   :  { %2017 = vmatmul.bf16.gmra.mxu0 %v7943_v52  ;;  %v8401_v46 = vadd.f32 %v8255_v45, %v8253_v63  ;;  %v7248_v1 = vld [vmem:[#allocation5 + $0x4cc] sm:$0xf0] }
 0x1e2   :  { %12835 = vst [vmem:[#allocation103_spill] sm:$0xff] %v8360_v10  ;;  %v7146_v10 = vld [vmem:[#allocation5 + $0x1a4] sm:$0xf]  ;;  %vm8446_vm14 = vcmp.eq.f32.partialorder %v3080_v9, 8.507059e+37 }
 0x1e3   :  { %2115 = vmatmul.bf16.gmra.mxu2 %v7943_v52  ;;  %v6104_v52 = vld [vmem:[#allocation5 + $0x200] sm:$0xf]  ;;  %2066 = vmatmul.bf16.gmra.mxu1 %v7945_v53  ;;  %12840 = vst [vmem:[#allocation104_spill] sm:$0xff] %v8401_v46 }
 0x1e4   :  { %2164 = vmatmul.bf16.gmra.mxu3 %v7945_v53  ;;  %v6105_v28 = vor.u32 %v7164_v33, %v6104_v52  ;;  %v8305_v33 = vpop.eup %7408  ;;  %v2975_v52 = vand.u32 2147483647, %v8239_v2  ;;  %v2992_v2 = vand.u32 2147483648, %v8251_v41 }
 0x1e5   :  { %v3072_v29 = vmul.f32 %v8305_v33, %v8268_v40  ;;  %v7411_v62 = vpop.eup %7410  ;;  %vm3077_vm13 = vweird.f32 %v8305_v33 }
 0x1e6   :  { %v8271_v20 = vpop.f32.mrf.mxu2  ;;  %v8286_v61 = vpop.f32.mrf.mxu0  ;;  %2192 = vmatpush.bf16.msra.mxu0 %v6105_v28  ;;  %v6488_v28 = vld [vmem:[#allocation5 + $0x500] sm:$0xf]  ;;  %vm8320_vm2 = vcmp.eq.f32.partialorder %v2975_v52, 8.507059e+37  ;;  %v8349_v11 = vadd.f32 1.0, %v7411_v62  ;;  %v8363_v44 = vor.u32 1.1754944e-38, %v2992_v2  ;;  %vm8465_vm15 = vmor %vm3076_vm11, %vm3077_vm13 }
 0x1e7   :  { %v8273_v36 = vpop.f32.mrf.mxu3  ;;  %v6489_v14 = vor.u32 %v7260_v37, %v6488_v28  ;;  %v8328_v37 = vpop.eup %7412  ;;  %v3073_v48 = vsub.f32 1.0, %v3072_v29  ;;  %v2979_v59 = vsel %vm8320_vm2, %v2978_v54, %v2974_v8  ;;  %v3082_v54 = vand.u32 2147483648, %v8268_v40 }
 0x1e8   :  { %v8288_v51 = vpop.f32.mrf.mxu1  ;;  %v7415_v52 = vpop.eup %7414  ;;  %v3147_v49 = vmul.f32 %v8328_v37, %v8292_v23  ;;  %7420 = vrcp.f32 %v8349_v11  ;;  %vm3152_vm1 = vweird.f32 %v8328_v37  ;;  %v3172_v40 = vand.u32 2147483648, %v8309_v34 }
 0x1e9   :  { %2241 = vmatpush.bf16.msra.mxu1 %v6489_v14  ;;  %v2990_v14 = vand.u32 2147483647, %v8251_v41  ;;  %v7417_v60 = vpop.eup %7416  ;;  %v8367_v29 = vadd.f32 1.0, %v7415_v52  ;;  %v3074_v8 = vmul.f32 %v8305_v33, %v3073_v48  ;;  %7422 = vpow2.f32 %v6623_v0  ;;  %vm8514_vm4 = vmor %vm3151_vm0, %vm3152_vm1 }
 0x1ea   :  { %v8383_v62 = vadd.f32 1.0, %v7417_v60  ;;  %v8385_v2 = vpop.eup %7418  ;;  %v6628_v60 = vmul.f32 -1.442695, %v8015_v17  ;;  %v6061_v0 = vor.u32 %v7146_v10, %v6058_v43  ;;  %v3083_v10 = vor.u32 1.1754944e-38, %v3082_v54 }
 0x1eb   :  { %vm8373_vm7 = vcmp.eq.f32.partialorder %v2990_v14, 8.507059e+37  ;;  %v3148_v14 = vsub.f32 1.0, %v3147_v49  ;;  %7424 = vrcp.f32 %v8367_v29  ;;  %v8412_v49 = vmul.f32 %v2979_v59, %v7983_v3 }
 0x1ec   :  { %v3162_v45 = vmul.f32 %v8385_v2, %v8309_v34  ;;  %7426 = vrcp.f32 %v8383_v62  ;;  %v2989_v3 = vsel %vm8418_vm10, %v8290_v55, %v2985_v21  ;;  %v3064_v55 = vsel %vm8433_vm12, %v8294_v32, %v3060_v35  ;;  %2291 = vmatpush.bf16.msra.mxu2 %v6061_v0 }
 0x1ed   :  { %v3075_v21 = vadd.f32 %v8305_v33, %v3074_v8  ;;  %v3149_v38 = vmul.f32 %v8328_v37, %v3148_v14  ;;  %7428 = vpow2.f32 %v6628_v60  ;;  %v6634_v43 = vmul.f32 -1.442695, %v8023_v31 }
 0x1ee   :  { %v8313_v15 = vpop.f32.mrf.mxu2  ;;  %v8324_v50 = vpop.f32.mrf.mxu0  ;;  %7430 = vpow2.f32 %v6629_v58  ;;  %v3155_v32 = vand.u32 2147483647, %v8292_v23  ;;  %v3157_v35 = vand.u32 2147483648, %v8292_v23  ;;  %v3163_v8 = vsub.f32 1.0, %v3162_v45 }
 0x1ef   :  { %v8315_v53 = vpop.f32.mrf.mxu3  ;;  %v8444_v63 = vpop.eup %7420  ;;  %v2994_v9 = vsel %vm8373_vm7, %v8363_v44, %v2989_v3  ;;  %v3069_v54 = vsel %vm8378_vm9, %v8365_v57, %v3064_v55  ;;  %v3079_v44 = vsel %vm8465_vm15, %v8305_v33, %v3075_v21  ;;  %v3150_v57 = vadd.f32 %v8328_v37, %v3149_v38 }
 0x1f0   :  { %v8326_v28 = vpop.f32.mrf.mxu1  ;;  %v3237_v45 = vmul.f32 %v8444_v63, %v8349_v11  ;;  %7432 = vpow2.f32 %v6634_v43  ;;  %v6441_v3 = vor.u32 %v7248_v1, %v6440_v25  ;;  %vm8487_vm2 = vcmp.eq.f32.partialorder %v3155_v32, 8.507059e+37 }
 0x1f1   :  { %2022 = vmatmul.bf16.gmra.mxu0 %v7951_v6  ;;  %v3158_v55 = vor.u32 1.1754944e-38, %v3157_v35  ;;  %v3164_v21 = vmul.f32 %v8385_v2, %v3163_v8  ;;  %v8496_v43 = vmul.f32 %v2994_v9, %v7989_v16  ;;  %v3084_v58 = vsel %vm8446_vm14, %v3083_v10, %v3079_v44 }
 0x1f2   :  { %2242 = vmatpush.bf16.msra.mxu1 %v6441_v3  ;;  %v3173_v9 = vor.u32 1.1754944e-38, %v3172_v40  ;;  %v3247_v25 = vand.u32 2147483648, %v8349_v11  ;;  %v3238_v10 = vsub.f32 1.0, %v3237_v45  ;;  %vm3167_vm6 = vweird.f32 %v8385_v2 }
 0x1f3   :  { %2120 = vmatmul.bf16.gmra.mxu2 %v7951_v6  ;;  %v8405_v6 = vadd.f32 %v8273_v36, %v8271_v20  ;;  %v6056_v20 = vld [vmem:[#allocation5 + $0x1a0] sm:$0xf]  ;;  %v7152_v36 = vld [vmem:[#allocation5 + $0x1cc] sm:$0xf0]  ;;  %2071 = vmatmul.bf16.gmra.mxu1 %v7953_v7  ;;  %vm3241_vm7 = vweird.f32 %v8349_v11  ;;  %v8540_v45 = vadd.f32 %v8288_v51, %v8286_v61  ;;  %v8544_v3 = vadd.f32 %v8315_v53, %v8313_v15  ;;  %vm8557_vm9 = vmor %vm3166_vm3, %vm3167_vm6 }
 0x1f4   :  { %2169 = vmatmul.bf16.gmra.mxu3 %v7953_v7  ;;  %v6057_v59 = vor.u32 %v7152_v36, %v6056_v20  ;;  %v7423_v20 = vpop.eup %7422  ;;  %vm3256_vm8 = vweird.f32 %v8367_v29  ;;  %v3239_v53 = vmul.f32 %v8444_v63, %v3238_v10  ;;  %v3335_v15 = vand.u32 2147483647, %v8383_v62  ;;  %v7134_v10 = vld [vmem:[#allocation5 + $0x144] sm:$0xf] }
 0x1f5   :  { %12841 = vst [vmem:[#allocation105_spill] sm:$0xff] %v8405_v6  ;;  %v8453_v60 = vpop.eup %7424  ;;  %v8481_v36 = vadd.f32 1.0, %v7423_v20  ;;  %v3154_v6 = vsel %vm8514_vm4, %v8328_v37, %v3150_v57  ;;  %v6635_v57 = vmul.f32 -1.442695, %v8025_v39  ;;  %vm3242_vm10 = vweird.f32 %v8444_v63 }
 0x1f6   :  { %v8391_v52 = vpop.f32.mrf.mxu2  ;;  %v8407_v13 = vpop.f32.mrf.mxu0  ;;  %2193 = vmatpush.bf16.msra.mxu0 %v6057_v59  ;;  %v3252_v38 = vmul.f32 %v8453_v60, %v8367_v29  ;;  %12861 = vst [vmem:[#allocation111_spill] sm:$0xff] %v8540_v45  ;;  %v3240_v61 = vadd.f32 %v8444_v63, %v3239_v53  ;;  %vm3257_vm12 = vweird.f32 %v8453_v60  ;;  %vm8621_vm14 = vmor %vm3241_vm7, %vm3242_vm10  ;;  %vm3331_vm1 = vweird.f32 %v8383_v62 }
 0x1f7   :  { %v8393_v56 = vpop.f32.mrf.mxu3  ;;  %12842 = vst [vmem:[#allocation106_spill] sm:$0xff] %v8407_v13  ;;  %v6442_v13 = vld [vmem:[#allocation5 + $0x4d0] sm:$0xf0]  ;;  %7434 = vrcp.f32 %v8481_v36  ;;  %vm8634_vm0 = vmor %vm3256_vm8, %vm3257_vm12  ;;  %vm3346_vm4 = vweird.f32 %v8481_v36 }
 0x1f8   :  { %v8409_v48 = vpop.f32.mrf.mxu1  ;;  %v3253_v44 = vsub.f32 1.0, %v3252_v38  ;;  %12862 = vst [vmem:[#allocation112_spill] sm:$0xff] %v8544_v3  ;;  %v3260_v38 = vand.u32 2147483647, %v8367_v29 }
 0x1f9   :  { %12843 = vst [vmem:[#allocation107_spill] sm:$0xff] %v8409_v48  ;;  %v7242_v48 = vld [vmem:[#allocation5 + $0x4a4] sm:$0xf] }
 0x1fa   :  { %v6445_v14 = vor.u32 %v7242_v48, %v6442_v13  ;;  %v3170_v13 = vand.u32 2147483647, %v8309_v34  ;;  %v8471_v48 = vpop.eup %7426  ;;  %vm8625_vm15 = vcmp.eq.f32.partialorder %v3260_v38, 8.507059e+37  ;;  %v6647_v38 = vmul.f32 -1.442695, %v8041_v19 }
 0x1fb   :  { %v7429_v33 = vpop.eup %7428  ;;  %v3327_v32 = vmul.f32 %v8471_v48, %v8383_v62  ;;  %vm3332_vm13 = vweird.f32 %v8471_v48 }
 0x1fc   :  { %2340 = vmatpush.bf16.msra.mxu3 %v6445_v14  ;;  %v7431_v20 = vpop.eup %7430  ;;  %v8499_v14 = vmul.f32 %v3069_v54, %v7991_v18  ;;  %vm8518_vm5 = vcmp.eq.f32.partialorder %v3170_v13, 8.507059e+37  ;;  %v3245_v54 = vand.u32 2147483647, %v8349_v11  ;;  %v8528_v23 = vadd.f32 1.0, %v7429_v33  ;;  %vm8649_vm3 = vmor %vm3331_vm1, %vm3332_vm13 }
 0x1fd   :  { %v3165_v13 = vadd.f32 %v8385_v2, %v3164_v21  ;;  %v8534_v40 = vadd.f32 1.0, %v7431_v20  ;;  %v7433_v1 = vpop.eup %7432  ;;  %v3328_v37 = vsub.f32 1.0, %v3327_v32  ;;  %v8547_v33 = vmul.f32 %v3084_v58, %v7993_v22 }
 0x1fe   :  { %v8483_v41 = vpop.f32.mrf.mxu2  ;;  %12856 = vst [vmem:[#allocation110_spill] sm:$0xff] %v8499_v14  ;;  %v8504_v35 = vpop.f32.mrf.mxu0  ;;  %v8549_v21 = vor.u32 1.1754944e-38, %v3247_v25  ;;  %v3159_v20 = vsel %vm8487_vm2, %v3158_v55, %v3154_v6  ;;  %v3262_v22 = vand.u32 2147483648, %v8367_v29  ;;  %7436 = vrcp.f32 %v8528_v23 }
 0x1ff   :  { %12852 = vst [vmem:[#allocation108_spill] sm:$0xff] %v8483_v41  ;;  %v8485_v0 = vpop.f32.mrf.mxu3  ;;  %v3169_v51 = vsel %vm8557_vm9, %v8385_v2, %v3165_v13  ;;  %7438 = vrcp.f32 %v8534_v40  ;;  %v8569_v59 = vadd.f32 1.0, %v7433_v1  ;;  %v8575_v32 = vpop.eup %7434  ;;  %v3254_v58 = vmul.f32 %v8453_v60, %v3253_v44  ;;  %v6010_v13 = vld [vmem:[#allocation5 + $0x170] sm:$0xf0] }
 0x200   :  { %12853 = vst [vmem:[#allocation109_spill] sm:$0xff] %v8485_v0  ;;  %v8506_v8 = vpop.f32.mrf.mxu1  ;;  %v3329_v16 = vmul.f32 %v8471_v48, %v3328_v37  ;;  %7440 = vpow2.f32 %v6635_v57  ;;  %v6640_v25 = vmul.f32 -1.442695, %v8030_v4  ;;  %v3337_v2 = vand.u32 2147483648, %v8383_v62 }
 0x201   :  { %2027 = vmatmul.bf16.gmra.mxu0 %v7959_v26  ;;  %12863 = vst [vmem:[#allocation113_spill] sm:$0xff] %v8547_v33  ;;  %v8585_v6 = vadd.f32 %v8326_v28, %v8324_v50  ;;  %v8589_v44 = vadd.f32 %v8393_v56, %v8391_v52  ;;  %v3174_v57 = vsel %vm8518_vm5, %v3173_v9, %v3169_v51  ;;  %vm8598_vm11 = vcmp.eq.f32.partialorder %v3245_v54, 8.507059e+37  ;;  %v6008_v50 = vld [vmem:[#allocation5 + $0x140] sm:$0xf]  ;;  %v7140_v28 = vld [vmem:[#allocation5 + $0x16c] sm:$0xf0] }
 0x202   :  { %v3342_v52 = vmul.f32 %v8575_v32, %v8481_v36  ;;  %7442 = vrcp.f32 %v8569_v59  ;;  %v6013_v56 = vor.u32 %v7134_v10, %v6010_v13  ;;  %v6009_v18 = vor.u32 %v7140_v28, %v6008_v50  ;;  %v7230_v9 = vld [vmem:[#allocation5 + $0x444] sm:$0xf]  ;;  %v6394_v51 = vld [vmem:[#allocation5 + $0x470] sm:$0xf0]  ;;  %v12888_v10 = vld [vmem:[#allocation25_spill] sm:$0xff] }
 0x203   :  { %2125 = vmatmul.bf16.gmra.mxu2 %v7959_v26  ;;  %2076 = vmatmul.bf16.gmra.mxu1 %v7961_v27  ;;  %12866 = vst [vmem:[#allocation114_spill] sm:$0xff] %v8585_v6  ;;  %v3255_v54 = vadd.f32 %v8453_v60, %v3254_v58  ;;  %7444 = vpow2.f32 %v6640_v25  ;;  %v8615_v41 = vmul.f32 %v3159_v20, %v7995_v24  ;;  %v6646_v25 = vmul.f32 -1.442695, %v8039_v12  ;;  %v12911_v26 = vld [vmem:[#allocation26_spill] sm:$0xff] }
 0x204   :  { %2174 = vmatmul.bf16.gmra.mxu3 %v7961_v27  ;;  %12867 = vst [vmem:[#allocation115_spill] sm:$0xff] %v8589_v44  ;;  %v8607_v53 = vpop.eup %7436  ;;  %2292 = vmatpush.bf16.msra.mxu2 %v6013_v56  ;;  %vm8639_vm2 = vcmp.eq.f32.partialorder %v3335_v15, 8.507059e+37  ;;  %v6397_v20 = vor.u32 %v7230_v9, %v6394_v51  ;;  %v3338_v50 = vor.u32 1.1754944e-38, %v3337_v2  ;;  %v3343_v28 = vsub.f32 1.0, %v3342_v52  ;;  %v6392_v2 = vld [vmem:[#allocation5 + $0x440] sm:$0xf] }
 0x205   :  { %v8612_v44 = vpop.eup %7438  ;;  %12872 = vst [vmem:[#allocation118_spill] sm:$0xff] %v8615_v41  ;;  %2194 = vmatpush.bf16.msra.mxu0 %v6009_v18  ;;  %v3417_v62 = vmul.f32 %v8607_v53, %v8528_v23  ;;  %v3244_v15 = vsel %vm8621_vm14, %v8444_v63, %v3240_v61  ;;  %v7236_v52 = vld [vmem:[#allocation5 + $0x46c] sm:$0xf0]  ;;  %v3350_v24 = vand.u32 2147483647, %v8481_v36  ;;  %v3427_v0 = vand.u32 2147483648, %v8528_v23 }
 0x206   :  { %v8571_v34 = vpop.f32.mrf.mxu2  ;;  %v8591_v1 = vpop.f32.mrf.mxu0  ;;  %2341 = vmatpush.bf16.msra.mxu3 %v6397_v20  ;;  %v3432_v18 = vmul.f32 %v8612_v44, %v8534_v40  ;;  %v6393_v63 = vor.u32 %v7236_v52, %v6392_v2  ;;  %vm3421_vm5 = vweird.f32 %v8528_v23  ;;  %vm3347_vm6 = vweird.f32 %v8575_v32 }
 0x207   :  { %v8573_v55 = vpop.f32.mrf.mxu3  ;;  %12868 = vst [vmem:[#allocation116_spill] sm:$0xff] %v8591_v1  ;;  %v6641_v1 = vmul.f32 -1.442695, %v8032_v5  ;;  %v7441_v13 = vpop.eup %7440  ;;  %v3418_v20 = vsub.f32 1.0, %v3417_v62  ;;  %vm8710_vm7 = vcmp.eq.f32.partialorder %v3350_v24, 8.507059e+37  ;;  %vm3436_vm8 = vweird.f32 %v8534_v40  ;;  %vm8736_vm10 = vmor %vm3346_vm4, %vm3347_vm6 }
 0x208   :  { %v8593_v37 = vpop.f32.mrf.mxu1  ;;  %v8665_v56 = vpop.eup %7442  ;;  %v8669_v9 = vadd.f32 1.0, %v7441_v13  ;;  %v3344_v13 = vmul.f32 %v8575_v32, %v3343_v28  ;;  %2243 = vmatpush.bf16.msra.mxu1 %v6393_v63  ;;  %v12889_v63 = vld [vmem:[#allocation28_spill] sm:$0xff]  ;;  %vm3437_vm13 = vweird.f32 %v8612_v44  ;;  %v8765_v45 = vadd.f32 %v8506_v8, %v8504_v35  ;;  %v7128_v8 = vld [vmem:[#allocation5 + $0x10c] sm:$0xf0] }
 0x209   :  { %12869 = vst [vmem:[#allocation117_spill] sm:$0xff] %v8593_v37  ;;  %v3330_v37 = vadd.f32 %v8471_v48, %v3329_v16  ;;  %v3263_v16 = vor.u32 1.1754944e-38, %v3262_v22  ;;  %v8645_v22 = vmul.f32 %v3174_v57, %v8001_v42  ;;  %v3259_v42 = vsel %vm8634_vm0, %v8453_v60, %v3255_v54  ;;  %v7445_v51 = vpop.eup %7444  ;;  %v5960_v35 = vld [vmem:[#allocation5 + $0xe0] sm:$0xf] }
 0x20a   :  { %7446 = vpow2.f32 %v6641_v1  ;;  %v12886_v1 = vld [vmem:[#allocation32_spill] sm:$0xff]  ;;  %v3507_v28 = vmul.f32 %v8665_v56, %v8569_v59  ;;  %v8701_v62 = vadd.f32 1.0, %v7445_v51  ;;  %v3517_v27 = vand.u32 2147483648, %v8569_v59 }
 0x20b   :  { %12881 = vst [vmem:[#allocation119_spill] sm:$0xff] %v8645_v22  ;;  %v3334_v57 = vsel %vm8649_vm3, %v8471_v48, %v3330_v37  ;;  %7448 = vpow2.f32 %v6646_v25  ;;  %v3352_v48 = vand.u32 2147483648, %v8481_v36  ;;  %v12887_v37 = vld [vmem:[#allocation33_spill] sm:$0xff]  ;;  %v3249_v25 = vsel %vm8598_vm11, %v8549_v21, %v3244_v15  ;;  %v12935_v22 = vld [vmem:[#allocation40_spill] sm:$0xff] }
 0x20c   :  { %7450 = vpow2.f32 %v6647_v38  ;;  %v8679_v54 = vadd.f32 %v12887_v37, %v12886_v1  ;;  %v3264_v2 = vsel %vm8625_vm15, %v3263_v16, %v3259_v42  ;;  %v3339_v52 = vsel %vm8639_vm2, %v3338_v50, %v3334_v57  ;;  %vm8804_vm15 = vmor %vm3436_vm8, %vm3437_vm13 }
 0x20d   :  { %v3425_v1 = vand.u32 2147483647, %v8528_v23  ;;  %v3433_v21 = vsub.f32 1.0, %v3432_v18  ;;  %7452 = vrcp.f32 %v8669_v9  ;;  %v8704_v37 = vmul.f32 %v3249_v25, %v12889_v63  ;;  %v12893_v25 = vld [vmem:[#allocation29_spill] sm:$0xff]  ;;  %v12895_v63 = vld [vmem:[#allocation30_spill] sm:$0xff] }
 0x20e   :  { %v8671_v61 = vpop.f32.mrf.mxu2  ;;  %v8688_v29 = vpop.f32.mrf.mxu0  ;;  %v3353_v58 = vor.u32 1.1754944e-38, %v3352_v48  ;;  %v6652_v16 = vmul.f32 -1.442695, %v8679_v54  ;;  %v3345_v50 = vadd.f32 %v8575_v32, %v3344_v13  ;;  %v3419_v57 = vmul.f32 %v8607_v53, %v3418_v20  ;;  %12904 = vst [vmem:[#allocation29_spill] sm:$0xff] %v8765_v45  ;;  %v12918_v13 = vld [vmem:[#allocation36_spill] sm:$0xff] }
 0x20f   :  { %12884 = vst [vmem:[#allocation120_spill] sm:$0xff] %v8671_v61  ;;  %v8673_v60 = vpop.f32.mrf.mxu3  ;;  %v3440_v18 = vand.u32 2147483647, %v8534_v40  ;;  %v8717_v48 = vmul.f32 %v3264_v2, %v12893_v25  ;;  %v3428_v61 = vor.u32 1.1754944e-38, %v3427_v0  ;;  %vm8724_vm9 = vcmp.eq.f32.partialorder %v3425_v1, 8.507059e+37 }
 0x210   :  { %12885 = vst [vmem:[#allocation121_spill] sm:$0xff] %v8673_v60  ;;  %v8690_v38 = vpop.f32.mrf.mxu1  ;;  %v7447_v15 = vpop.eup %7446  ;;  %v8720_v60 = vmul.f32 %v3339_v52, %v12895_v63  ;;  %v3434_v24 = vmul.f32 %v8612_v44, %v3433_v21  ;;  %v3508_v20 = vsub.f32 1.0, %v3507_v28  ;;  %7454 = vrcp.f32 %v8701_v62  ;;  %v7122_v2 = vld [vmem:[#allocation5 + $0xe4] sm:$0xf] }
 0x211   :  { %2032 = vmatmul.bf16.gmra.mxu0 %v7967_v47  ;;  %12890 = vst [vmem:[#allocation32_spill] sm:$0xff] %v8704_v37  ;;  %v7449_v11 = vpop.eup %7448  ;;  %v8730_v6 = vadd.f32 1.0, %v7447_v15  ;;  %vm3422_vm11 = vweird.f32 %v8607_v53  ;;  %v3442_v52 = vand.u32 2147483648, %v8534_v40  ;;  %7456 = vpow2.f32 %v6652_v16  ;;  %v12903_v16 = vld [vmem:[#allocation34_spill] sm:$0xff]  ;;  %v7206_v37 = vld [vmem:[#allocation5 + $0x384] sm:$0xf] }
 0x212   :  { %v7451_v51 = vpop.eup %7450  ;;  %12894 = vst [vmem:[#allocation33_spill] sm:$0xff] %v8717_v48  ;;  %v8742_v1 = vadd.f32 1.0, %v7449_v11  ;;  %v3349_v36 = vsel %vm8736_vm10, %v8575_v32, %v3345_v50  ;;  %v3420_v15 = vadd.f32 %v8607_v53, %v3419_v57  ;;  %vm8754_vm12 = vcmp.eq.f32.partialorder %v3440_v18, 8.507059e+37  ;;  %v5962_v32 = vld [vmem:[#allocation5 + $0x110] sm:$0xf0]  ;;  %vm8783_vm14 = vmor %vm3421_vm5, %vm3422_vm11  ;;  %v12934_v48 = vld [vmem:[#allocation39_spill] sm:$0xff] }
 0x213   :  { %2130 = vmatmul.bf16.gmra.mxu2 %v7967_v47  ;;  %12896 = vst [vmem:[#allocation28_spill] sm:$0xff] %v8720_v60  ;;  %2081 = vmatmul.bf16.gmra.mxu1 %v12888_v10  ;;  %v8748_v28 = vpop.eup %7452  ;;  %v3515_v11 = vand.u32 2147483647, %v8569_v59  ;;  %v8759_v63 = vadd.f32 1.0, %v7451_v51  ;;  %v6653_v3 = vmul.f32 -1.442695, %v12903_v16  ;;  %v8769_v50 = vadd.f32 %v8573_v55, %v8571_v34 }
 0x214   :  { %2179 = vmatmul.bf16.gmra.mxu3 %v12888_v10  ;;  %v3435_v51 = vadd.f32 %v8612_v44, %v3434_v24  ;;  %v3509_v46 = vmul.f32 %v8665_v56, %v3508_v20  ;;  %7458 = vrcp.f32 %v8730_v6  ;;  %v12908_v10 = vld [vmem:[#allocation37_spill] sm:$0xff]  ;;  %v3522_v55 = vmul.f32 %v8748_v28, %v8669_v9 }
 0x215   :  { %12905 = vst [vmem:[#allocation30_spill] sm:$0xff] %v8769_v50  ;;  %v6658_v47 = vmul.f32 -1.442695, %v12908_v10  ;;  %7460 = vrcp.f32 %v8742_v1  ;;  %v5965_v24 = vor.u32 %v7122_v2, %v5962_v32  ;;  %v5961_v20 = vor.u32 %v7128_v8, %v5960_v35 }
 0x216   :  { %v8744_v0 = vpop.f32.mrf.mxu2  ;;  %v8771_v57 = vpop.f32.mrf.mxu0  ;;  %v3424_v45 = vsel %vm8783_vm14, %v8607_v53, %v3420_v15  ;;  %v3443_v23 = vor.u32 1.1754944e-38, %v3442_v52  ;;  %7462 = vrcp.f32 %v8759_v63  ;;  %v3354_v2 = vsel %vm8710_vm7, %v3353_v58, %v3349_v36 }
 0x217   :  { %v8746_v21 = vpop.f32.mrf.mxu3  ;;  %12906 = vst [vmem:[#allocation34_spill] sm:$0xff] %v8771_v57  ;;  %v6346_v57 = vld [vmem:[#allocation5 + $0x410] sm:$0xf0]  ;;  %v8790_v50 = vpop.eup %7454  ;;  %vm3512_vm0 = vweird.f32 %v8665_v56  ;;  %vm8809_vm1 = vcmp.eq.f32.partialorder %v3515_v11, 8.507059e+37  ;;  %7464 = vpow2.f32 %v6653_v3  ;;  %2293 = vmatpush.bf16.msra.mxu2 %v5965_v24  ;;  %2195 = vmatpush.bf16.msra.mxu0 %v5961_v20  ;;  %v3439_v58 = vsel %vm8804_vm15, %v8612_v44, %v3435_v51  ;;  %v12916_v3 = vld [vmem:[#allocation27_spill] sm:$0xff] }
 0x218   :  { %v8773_v18 = vpop.f32.mrf.mxu1  ;;  %v7457_v7 = vpop.eup %7456  ;;  %v3510_v42 = vadd.f32 %v8665_v56, %v3509_v46  ;;  %7466 = vpow2.f32 %v6658_v47  ;;  %v3429_v52 = vsel %vm8724_vm9, %v3428_v61, %v3424_v45  ;;  %v3523_v36 = vsub.f32 1.0, %v3522_v55  ;;  %v12917_v44 = vld [vmem:[#allocation35_spill] sm:$0xff]  ;;  %v6344_v61 = vld [vmem:[#allocation5 + $0x3e0] sm:$0xf] }
 0x219   :  { %12907 = vst [vmem:[#allocation122_spill] sm:$0xff] %v8773_v18  ;;  %v7218_v18 = vld [vmem:[#allocation5 + $0x3e4] sm:$0xf]  ;;  %v3532_v15 = vand.u32 2147483648, %v8669_v9  ;;  %v3597_v11 = vmul.f32 %v8790_v50, %v8701_v62  ;;  %vm3511_vm2 = vweird.f32 %v8569_v59  ;;  %v3518_v46 = vor.u32 1.1754944e-38, %v3517_v27  ;;  %v12919_v51 = vld [vmem:[#allocation31_spill] sm:$0xff] }
 0x21a   :  { %v6349_v40 = vor.u32 %v7218_v18, %v6346_v57  ;;  %v8824_v35 = vpop.eup %7458  ;;  %v8827_v47 = vadd.f32 1.0, %v7457_v7  ;;  %v8831_v45 = vadd.f32 %v12918_v13, %v12917_v44  ;;  %v7224_v57 = vld [vmem:[#allocation5 + $0x40c] sm:$0xf0]  ;;  %v8836_v8 = vmul.f32 %v3354_v2, %v12919_v51  ;;  %vm8842_vm3 = vmor %vm3511_vm2, %vm3512_vm0 }
 0x21b   :  { %v8833_v18 = vpop.eup %7460  ;;  %v3444_v34 = vsel %vm8754_vm12, %v3443_v23, %v3439_v58  ;;  %v12923_v27 = vld [vmem:[#allocation38_spill] sm:$0xff]  ;;  %v6345_v55 = vor.u32 %v7224_v57, %v6344_v61  ;;  %v8854_v2 = vmul.f32 %v3429_v52, %v8015_v17  ;;  %v3514_v25 = vsel %vm8842_vm3, %v8665_v56, %v3510_v42 }
 0x21c   :  { %2342 = vmatpush.bf16.msra.mxu3 %v6349_v40  ;;  %12920 = vst [vmem:[#allocation37_spill] sm:$0xff] %v8836_v8  ;;  %v6659_v59 = vmul.f32 -1.442695, %v12923_v27  ;;  %v8851_v32 = vpop.eup %7462  ;;  %vm3526_vm4 = vweird.f32 %v8669_v9  ;;  %v3530_v23 = vand.u32 2147483647, %v8669_v9  ;;  %v3524_v40 = vmul.f32 %v8748_v28, %v3523_v36  ;;  %v12933_v8 = vld [vmem:[#allocation41_spill] sm:$0xff] }
 0x21d   :  { %12924 = vst [vmem:[#allocation35_spill] sm:$0xff] %v8854_v2  ;;  %v7465_v58 = vpop.eup %7464  ;;  %v8862_v44 = vor.u32 1.1754944e-38, %v3532_v15  ;;  %v3598_v13 = vsub.f32 1.0, %v3597_v11  ;;  %v3612_v61 = vmul.f32 %v8824_v35, %v8730_v6  ;;  %2244 = vmatpush.bf16.msra.mxu1 %v6345_v55  ;;  %v8871_v56 = vmul.f32 %v3444_v34, %v8021_v30  ;;  %v7110_v2 = vld [vmem:[#allocation5 + $0x84] sm:$0xf] }
 0x21e   :  { %v8847_v24 = vpop.f32.mrf.mxu2  ;;  %v8866_v17 = vpop.f32.mrf.mxu0  ;;  %v3607_v42 = vand.u32 2147483648, %v8701_v62  ;;  %7468 = vrcp.f32 %v8827_v47  ;;  %v6664_v36 = vmul.f32 -1.442695, %v8831_v45  ;;  %v3519_v15 = vsel %vm8809_vm1, %v3518_v46, %v3514_v25 }
 0x21f   :  { %v8849_v20 = vpop.f32.mrf.mxu3  ;;  %v7467_v57 = vpop.eup %7466  ;;  %12925 = vst [vmem:[#allocation36_spill] sm:$0xff] %v8871_v56  ;;  %v3622_v11 = vand.u32 2147483648, %v8730_v6  ;;  %v3687_v51 = vmul.f32 %v8833_v18, %v8742_v1  ;;  %7470 = vpow2.f32 %v6659_v59  ;;  %vm3527_vm5 = vweird.f32 %v8748_v28 }
 0x220   :  { %v8868_v52 = vpop.f32.mrf.mxu1  ;;  %vm8883_vm6 = vcmp.eq.f32.partialorder %v3530_v23, 8.507059e+37  ;;  %vm3601_vm7 = vweird.f32 %v8701_v62  ;;  %v3605_v34 = vand.u32 2147483647, %v8701_v62  ;;  %v3702_v53 = vmul.f32 %v8851_v32, %v8759_v63  ;;  %vm8913_vm10 = vmor %vm3526_vm4, %vm3527_vm5 }
 0x221   :  { %2037 = vmatmul.bf16.gmra.mxu0 %v12911_v26  ;;  %v8891_v46 = vadd.f32 1.0, %v7465_v58  ;;  %v3525_v7 = vadd.f32 %v8748_v28, %v3524_v40  ;;  %v3599_v59 = vmul.f32 %v8790_v50, %v3598_v13  ;;  %v3613_v55 = vsub.f32 1.0, %v3612_v61  ;;  %v5914_v13 = vld [vmem:[#allocation5 + $0xb0] sm:$0xf0] }
 0x222   :  { %v8895_v25 = vadd.f32 1.0, %v7467_v57  ;;  %v8898_v23 = vmul.f32 %v3519_v15, %v8023_v31  ;;  %7472 = vpow2.f32 %v6664_v36  ;;  %vm3602_vm8 = vweird.f32 %v8790_v50  ;;  %v7116_v36 = vld [vmem:[#allocation5 + $0xac] sm:$0xf0] }
 0x223   :  { %2135 = vmatmul.bf16.gmra.mxu2 %v12911_v26  ;;  %2086 = vmatmul.bf16.gmra.mxu1 %v12916_v3  ;;  %v3620_v26 = vand.u32 2147483647, %v8730_v6  ;;  %vm3616_vm9 = vweird.f32 %v8730_v6  ;;  %v8905_v58 = vor.u32 1.1754944e-38, %v3622_v11  ;;  %v3688_v40 = vsub.f32 1.0, %v3687_v51  ;;  %vm8968_vm0 = vmor %vm3601_vm7, %vm3602_vm8 }
 0x224   :  { %2184 = vmatmul.bf16.gmra.mxu3 %v12916_v3  ;;  %12928 = vst [vmem:[#allocation31_spill] sm:$0xff] %v8898_v23  ;;  %v8900_v3 = vor.u32 1.1754944e-38, %v3607_v42  ;;  %v8907_v61 = vpop.eup %7468  ;;  %vm8917_vm11 = vcmp.eq.f32.partialorder %v3605_v34, 8.507059e+37  ;;  %v3695_v42 = vand.u32 2147483647, %v8742_v1  ;;  %v3703_v15 = vsub.f32 1.0, %v3702_v53 }
 0x225   :  { %7474 = vrcp.f32 %v8891_v46  ;;  %v7471_v9 = vpop.eup %7470  ;;  %v3529_v23 = vsel %vm8913_vm10, %v8748_v28, %v3525_v7  ;;  %v3600_v34 = vadd.f32 %v8790_v50, %v3599_v59  ;;  %v3614_v56 = vmul.f32 %v8824_v35, %v3613_v55  ;;  %v5912_v53 = vld [vmem:[#allocation5 + $0x80] sm:$0xf]  ;;  %v6298_v59 = vld [vmem:[#allocation5 + $0x3b0] sm:$0xf0] }
 0x226   :  { %v8924_v11 = vpop.f32.mrf.mxu2  ;;  %vm3691_vm12 = vweird.f32 %v8742_v1  ;;  %7476 = vrcp.f32 %v8895_v25  ;;  %v6665_v60 = vmul.f32 -1.442695, %v12933_v8  ;;  %v8938_v41 = vadd.f32 %v12935_v22, %v12934_v48  ;;  %v8944_v55 = vpop.f32.mrf.mxu0  ;;  %v12941_v48 = vld [vmem:[#allocation42_spill] sm:$0xff] }
 0x227   :  { %v8926_v51 = vpop.f32.mrf.mxu3  ;;  %v8942_v28 = vadd.f32 %v8690_v38, %v8688_v29  ;;  %v5917_v7 = vor.u32 %v7110_v2, %v5914_v13  ;;  %12937 = vst [vmem:[#allocation39_spill] sm:$0xff] %v8944_v55  ;;  %vm3617_vm13 = vweird.f32 %v8824_v35  ;;  %vm8949_vm14 = vcmp.eq.f32.partialorder %v3620_v26, 8.507059e+37 }
 0x228   :  { %v8946_v31 = vpop.f32.mrf.mxu1  ;;  %v3689_v8 = vmul.f32 %v8833_v18, %v3688_v40  ;;  %v3710_v22 = vand.u32 2147483647, %v8759_v63  ;;  %v6670_v14 = vmul.f32 -1.442695, %v12941_v48  ;;  %v7473_v29 = vpop.eup %7472  ;;  %vm3706_vm15 = vweird.f32 %v8759_v63  ;;  %vm8999_vm3 = vmor %vm3616_vm9, %vm3617_vm13 }
 0x229   :  { %12936 = vst [vmem:[#allocation38_spill] sm:$0xff] %v8942_v28  ;;  %v3777_v38 = vmul.f32 %v8907_v61, %v8827_v47  ;;  %v8959_v2 = vadd.f32 1.0, %v7471_v9  ;;  %2294 = vmatpush.bf16.msra.mxu2 %v5917_v7  ;;  %v5913_v13 = vor.u32 %v7116_v36, %v5912_v53  ;;  %v6301_v26 = vor.u32 %v7206_v37, %v6298_v59  ;;  %v12946_v37 = vld [vmem:[#allocation43_spill] sm:$0xff]  ;;  %v6296_v59 = vld [vmem:[#allocation5 + $0x380] sm:$0xf] }
 0x22a   :  { %12938 = vst [vmem:[#allocation40_spill] sm:$0xff] %v8946_v31  ;;  %v3534_v31 = vsel %vm8883_vm6, %v8862_v44, %v3529_v23  ;;  %v3615_v55 = vadd.f32 %v8824_v35, %v3614_v56  ;;  %vm3692_vm1 = vweird.f32 %v8833_v18  ;;  %vm8974_vm2 = vcmp.eq.f32.partialorder %v3695_v42, 8.507059e+37 }
 0x22b   :  { %v6671_v36 = vmul.f32 -1.442695, %v12946_v37  ;;  %v8979_v30 = vpop.eup %7474  ;;  %v3604_v62 = vsel %vm8968_vm0, %v8790_v50, %v3600_v34  ;;  %v3704_v44 = vmul.f32 %v8851_v32, %v3703_v15  ;;  %7478 = vpow2.f32 %v6665_v60  ;;  %2196 = vmatpush.bf16.msra.mxu0 %v5913_v13  ;;  %2343 = vmatpush.bf16.msra.mxu3 %v6301_v26  ;;  %v7212_v50 = vld [vmem:[#allocation5 + $0x3ac] sm:$0xf0]  ;;  %vm9017_vm5 = vmor %vm3691_vm12, %vm3692_vm1 }
 0x22c   :  { %v6676_v23 = vmul.f32 -1.442695, %v8938_v41  ;;  %v8986_v56 = vpop.eup %7476  ;;  %v3690_v42 = vadd.f32 %v8833_v18, %v3689_v8  ;;  %v8989_v53 = vadd.f32 1.0, %v7473_v29  ;;  %7480 = vpow2.f32 %v6670_v14 }
 0x22d   :  { %v8993_v7 = vadd.f32 %v8746_v21, %v8744_v0  ;;  %v3712_v15 = vand.u32 2147483648, %v8759_v63  ;;  %v3778_v8 = vsub.f32 1.0, %v3777_v38  ;;  %v3785_v34 = vand.u32 2147483647, %v8827_v47 }
 0x22e   :  { %7482 = vrcp.f32 %v8959_v2  ;;  %v3609_v14 = vsel %vm8917_vm11, %v8900_v3, %v3604_v62  ;;  %v3619_v0 = vsel %vm8999_vm3, %v8824_v35, %v3615_v55  ;;  %vm3707_vm4 = vweird.f32 %v8851_v32  ;;  %v9024_v29 = vpop.f32.mrf.mxu2 }
 0x22f   :  { %12947 = vst [vmem:[#allocation42_spill] sm:$0xff] %v8993_v7  ;;  %7484 = vpow2.f32 %v6671_v36  ;;  %v3705_v21 = vadd.f32 %v8851_v32, %v3704_v44  ;;  %v3792_v3 = vmul.f32 %v8979_v30, %v8891_v46  ;;  %v6297_v57 = vor.u32 %v7212_v50, %v6296_v59  ;;  %v9026_v35 = vpop.f32.mrf.mxu3  ;;  %vm9059_vm7 = vmor %vm3706_vm15, %vm3707_vm4 }
 0x230   :  { %7486 = vpow2.f32 %v6676_v23  ;;  %v3694_v55 = vsel %vm9017_vm5, %v8833_v18, %v3690_v42  ;;  %v3787_v38 = vand.u32 2147483648, %v8827_v47  ;;  %v3867_v13 = vmul.f32 %v8986_v56, %v8895_v25  ;;  %v9045_v23 = vpop.f32.mrf.mxu0  ;;  %v9047_v42 = vpop.f32.mrf.mxu1 }
 0x231   :  { %7488 = vrcp.f32 %v8989_v53  ;;  %v7479_v26 = vpop.eup %7478  ;;  %v3624_v40 = vsel %vm8949_vm14, %v8905_v58, %v3619_v0  ;;  %v12952_v36 = vand.u32 2147483648, %v8742_v1  ;;  %vm9040_vm6 = vcmp.eq.f32.partialorder %v3710_v22, 8.507059e+37  ;;  %2245 = vmatpush.bf16.msra.mxu1 %v6297_v57 }
 0x232   :  { %v3779_v18 = vmul.f32 %v8907_v61, %v3778_v8  ;;  %v7481_v59 = vpop.eup %7480  ;;  %v9050_v50 = vmul.f32 %v3534_v31, %v8025_v39  ;;  %v9053_v33 = vmul.f32 %v3609_v14, %v8030_v4  ;;  %v3713_v58 = vor.u32 1.1754944e-38, %v3712_v15 }
 0x233   :  { %v3698_v62 = vor.u32 1.1754944e-38, %v12952_v36  ;;  %vm3781_vm8 = vweird.f32 %v8827_v47  ;;  %v3709_v4 = vsel %vm9059_vm7, %v8851_v32, %v3705_v21  ;;  %v3793_v31 = vsub.f32 1.0, %v3792_v3 }
 0x234   :  { %v9064_v22 = vpop.eup %7482  ;;  %v3802_v60 = vand.u32 2147483648, %v8891_v46  ;;  %v9073_v8 = vmul.f32 %v3624_v40, %v8032_v5  ;;  %vm3782_vm9 = vweird.f32 %v8907_v61  ;;  %vm9076_vm10 = vcmp.eq.f32.partialorder %v3785_v34, 8.507059e+37  ;;  %v5866_v40 = vld [vmem:[#allocation5 + $0x50] sm:$0xf0] }
 0x235   :  { %v3699_v39 = vsel %vm8974_vm2, %v3698_v62, %v3694_v55  ;;  %v7485_v63 = vpop.eup %7484  ;;  %v3788_v14 = vor.u32 1.1754944e-38, %v3787_v38  ;;  %v3868_v9 = vsub.f32 1.0, %v3867_v13  ;;  %v3780_v6 = vadd.f32 %v8907_v61, %v3779_v18  ;;  %vm9113_vm12 = vmor %vm3781_vm8, %vm3782_vm9 }
 0x236   :  { %v7487_v0 = vpop.eup %7486  ;;  %v3800_v32 = vand.u32 2147483647, %v8891_v46  ;;  %v9082_v21 = vadd.f32 1.0, %v7479_v26  ;;  %v9086_v3 = vadd.f32 %v8849_v20, %v8847_v24  ;;  %v9091_v34 = vmul.f32 %v3699_v39, %v8039_v12  ;;  %v7098_v26 = vld [vmem:[#allocation5 + $0x24] sm:$0xf]  ;;  %v9105_v12 = vpop.f32.mrf.mxu2 }
 0x237   :  { %v9088_v5 = vpop.eup %7488  ;;  %v3714_v57 = vsel %vm9040_vm6, %v3713_v58, %v3709_v4  ;;  %vm3796_vm11 = vweird.f32 %v8891_v46  ;;  %v9096_v55 = vadd.f32 1.0, %v7481_v59  ;;  %v3794_v38 = vmul.f32 %v8979_v30, %v3793_v31  ;;  %v9107_v36 = vpop.f32.mrf.mxu3  ;;  %v5864_v58 = vld [vmem:[#allocation5 + $0x20] sm:$0xf]  ;;  %v12983_v4 = vld [vmem:[#allocation50_spill] sm:$0xff] }
 0x238   :  { %12959 = vst [vmem:[#allocation43_spill] sm:$0xff] %v9086_v3  ;;  %v9099_v13 = vor.u32 1.1754944e-38, %v3802_v60  ;;  %v3882_v24 = vmul.f32 %v9064_v22, %v8959_v2  ;;  %v9103_v20 = vadd.f32 1.0, %v7485_v63  ;;  %v3869_v44 = vmul.f32 %v8986_v56, %v3868_v9  ;;  %v7104_v60 = vld [vmem:[#allocation5 + $0x4c] sm:$0xf0] }
 0x239   :  { %12960 = vst [vmem:[#allocation123_spill] sm:$0xff] %v9091_v34  ;;  %v3875_v18 = vand.u32 2147483647, %v8895_v25  ;;  %v3877_v59 = vand.u32 2147483648, %v8895_v25  ;;  %v9120_v1 = vadd.f32 1.0, %v7487_v0  ;;  %v9123_v39 = vmul.f32 %v3714_v57, %v8041_v19  ;;  %v9135_v0 = vpop.f32.mrf.mxu0  ;;  %v9137_v19 = vpop.f32.mrf.mxu1  ;;  %v12967_v3 = vld [vmem:[#allocation46_spill] sm:$0xff] }
 0x23a   :  { %v3784_v47 = vsel %vm9113_vm12, %v8907_v61, %v3780_v6  ;;  %vm9128_vm13 = vcmp.eq.f32.partialorder %v3800_v32, 8.507059e+37  ;;  %v3957_v31 = vmul.f32 %v9088_v5, %v8989_v53  ;;  %7490 = vrcp.f32 %v9082_v21  ;;  %v7194_v63 = vld [vmem:[#allocation5 + $0x324] sm:$0xf]  ;;  %v6250_v9 = vld [vmem:[#allocation5 + $0x350] sm:$0xf0] }
 0x23b   :  { %12963 = vst [vmem:[#allocation124_spill] sm:$0xff] %v9123_v39  ;;  %vm3797_vm14 = vweird.f32 %v8979_v30  ;;  %7492 = vrcp.f32 %v9096_v55  ;;  %v9143_v61 = vadd.f32 %v8868_v52, %v8866_v17  ;;  %v5869_v6 = vor.u32 %v7098_v26, %v5866_v40 }
 0x23c   :  { %v3795_v32 = vadd.f32 %v8979_v30, %v3794_v38  ;;  %vm3872_vm15 = vweird.f32 %v8986_v56  ;;  %v3883_v57 = vsub.f32 1.0, %v3882_v24  ;;  %7494 = vrcp.f32 %v9103_v20  ;;  %vm9158_vm1 = vmor %vm3796_vm11, %vm3797_vm14 }
 0x23d   :  { %12966 = vst [vmem:[#allocation125_spill] sm:$0xff] %v9143_v61  ;;  %v3870_v62 = vadd.f32 %v8986_v56, %v3869_v44  ;;  %v6677_v7 = vmul.f32 -1.442695, %v12967_v3  ;;  %2295 = vmatpush.bf16.msra.mxu2 %v5869_v6  ;;  %v5865_v28 = vor.u32 %v7104_v60, %v5864_v58  ;;  %v6253_v39 = vor.u32 %v7194_v63, %v6250_v9  ;;  %v12975_v58 = vld [vmem:[#allocation12_spill] sm:$0xff] }
 0x23e   :  { %v3789_v34 = vsel %vm9076_vm10, %v3788_v14, %v3784_v47  ;;  %vm3871_vm0 = vweird.f32 %v8895_v25  ;;  %v3958_v17 = vsub.f32 1.0, %v3957_v31  ;;  %7496 = vrcp.f32 %v9120_v1 }
 0x23f   :  { %vm9162_vm2 = vcmp.eq.f32.partialorder %v3875_v18, 8.507059e+37  ;;  %v3878_v24 = vor.u32 1.1754944e-38, %v3877_v59  ;;  %v3890_v15 = vand.u32 2147483647, %v8959_v2  ;;  %v3892_v25 = vand.u32 2147483648, %v8959_v2  ;;  %2197 = vmatpush.bf16.msra.mxu0 %v5865_v28  ;;  %2344 = vmatpush.bf16.msra.mxu3 %v6253_v39  ;;  %vm9175_vm3 = vmor %vm3871_vm0, %vm3872_vm15  ;;  %v9186_v39 = vpop.f32.mrf.mxu2 }
 0x240   :  { %v9168_v14 = vpop.eup %7490  ;;  %v3799_v46 = vsel %vm9158_vm1, %v8979_v30, %v3795_v32  ;;  %v3884_v40 = vmul.f32 %v9064_v22, %v3883_v57  ;;  %v3965_v44 = vand.u32 2147483647, %v8989_v53  ;;  %v9183_v28 = vadd.f32 %v8926_v51, %v8924_v11  ;;  %v6248_v18 = vld [vmem:[#allocation5 + $0x320] sm:$0xf]  ;;  %v7200_v59 = vld [vmem:[#allocation5 + $0x34c] sm:$0xf0]  ;;  %2296 = vmatmul.bf16.vlgmr.msra.gmra.mxu2 %v12975_v58  ;;  %v9188_v30 = vpop.f32.mrf.mxu3 }
 0x241   :  { %v9190_v47 = vpop.eup %7492  ;;  %v9193_v31 = vmul.f32 %v3789_v34, %v8679_v54  ;;  %v3874_v60 = vsel %vm9175_vm3, %v8986_v56, %v3870_v62  ;;  %7498 = vpow2.f32 %v6677_v7  ;;  %v12977_v11 = vld [vmem:[#allocation47_spill] sm:$0xff]  ;;  %vm3886_vm4 = vweird.f32 %v8959_v2  ;;  %v12978_v54 = vld [vmem:[#allocation13_spill] sm:$0xff]  ;;  %v9207_v34 = vpop.f32.mrf.mxu0 }
 0x242   :  { %12974 = vst [vmem:[#allocation46_spill] sm:$0xff] %v9183_v28  ;;  %v6682_v51 = vmul.f32 -1.442695, %v12977_v11  ;;  %v9199_v63 = vpop.eup %7494  ;;  %v3959_v9 = vmul.f32 %v9088_v5, %v3958_v17  ;;  %vm3961_vm5 = vweird.f32 %v8989_v53  ;;  %v3967_v6 = vand.u32 2147483648, %v8989_v53  ;;  %2198 = vmatmul.bf16.vlgmr.msra.gmra.mxu0 %v12975_v58  ;;  %2345 = vmatmul.bf16.vlgmr.msra.gmra.mxu3 %v12978_v54  ;;  %v9209_v56 = vpop.f32.mrf.mxu1  ;;  %v7189_v32 = vld [vmem:[#allocation5 + $0x2f4] sm:$0xf0] }
 0x243   :  { %12976 = vst [vmem:[#allocation126_spill] sm:$0xff] %v9193_v31  ;;  %v3804_v7 = vsel %vm9128_vm13, %v9099_v13, %v3799_v46  ;;  %vm3887_vm6 = vweird.f32 %v9064_v22  ;;  %vm9215_vm7 = vcmp.eq.f32.partialorder %v3890_v15, 8.507059e+37  ;;  %v3893_v57 = vor.u32 1.1754944e-38, %v3892_v25 }
 0x244   :  { %v6249_v62 = vor.u32 %v7200_v59, %v6248_v18  ;;  %v9219_v17 = vpop.eup %7496  ;;  %v3879_v52 = vsel %vm9162_vm2, %v3878_v24, %v3874_v60  ;;  %v3885_v26 = vadd.f32 %v9064_v22, %v3884_v40  ;;  %vm9224_vm8 = vcmp.eq.f32.partialorder %v3965_v44, 8.507059e+37  ;;  %v12984_v44 = vld [vmem:[#allocation44_spill] sm:$0xff]  ;;  %v12985_v18 = vld [vmem:[#allocation45_spill] sm:$0xff]  ;;  %vm9249_vm10 = vmor %vm3886_vm4, %vm3887_vm6 }
 0x245   :  { %v3982_v13 = vand.u32 2147483648, %v9082_v21  ;;  %v6683_v15 = vmul.f32 -1.442695, %v12983_v4  ;;  %v3972_v46 = vmul.f32 %v9168_v14, %v9082_v21  ;;  %v4047_v25 = vmul.f32 %v9190_v47, %v9096_v55 }
 0x246   :  { %v4062_v38 = vmul.f32 %v9199_v63, %v9103_v20  ;;  %7500 = vpow2.f32 %v6682_v51  ;;  %2246 = vmatpush.bf16.msra.mxu1 %v6249_v62  ;;  %v3960_v24 = vadd.f32 %v9088_v5, %v3959_v9  ;;  %vm3962_vm9 = vweird.f32 %v9088_v5 }
 0x247   :  { %v3968_v40 = vor.u32 1.1754944e-38, %v3967_v6  ;;  %v9240_v59 = vadd.f32 %v12985_v18, %v12984_v44  ;;  %v7499_v60 = vpop.eup %7498  ;;  %v9243_v61 = vmul.f32 %v3804_v7, %v12903_v16  ;;  %v3980_v9 = vand.u32 2147483647, %v9082_v21  ;;  %v9266_v2 = vpop.f32.mrf.mxu2  ;;  %vm9274_vm11 = vmor %vm3961_vm5, %vm3962_vm9 }
 0x248   :  { %v4057_v6 = vand.u32 2147483648, %v9096_v55  ;;  %v4137_v62 = vmul.f32 %v9219_v17, %v9120_v1  ;;  %v9258_v44 = vmul.f32 %v3879_v52, %v12908_v10  ;;  %v3889_v16 = vsel %vm9249_vm10, %v9064_v22, %v3885_v26  ;;  %v9268_v18 = vpop.f32.mrf.mxu3 }
 0x249   :  { %12986 = vst [vmem:[#allocation44_spill] sm:$0xff] %v9240_v59  ;;  %v9263_v7 = vor.u32 1.1754944e-38, %v3982_v13  ;;  %7502 = vpow2.f32 %v6683_v15  ;;  %2247 = vmatmul.bf16.vlgmr.msra.gmra.mxu1 %v12978_v54  ;;  %v3973_v52 = vsub.f32 1.0, %v3972_v46  ;;  %v4048_v51 = vsub.f32 1.0, %v4047_v25  ;;  %v9290_v54 = vpop.f32.mrf.mxu0 }
 0x24a   :  { %12987 = vst [vmem:[#allocation45_spill] sm:$0xff] %v9243_v61  ;;  %v4063_v22 = vsub.f32 1.0, %v4062_v38  ;;  %v9280_v26 = vadd.f32 %v9026_v35, %v9024_v29  ;;  %v3964_v13 = vsel %vm9274_vm11, %v9088_v5, %v3960_v24  ;;  %vm3976_vm12 = vweird.f32 %v9082_v21  ;;  %v9292_v46 = vpop.f32.mrf.mxu1  ;;  %v7183_v5 = vld [vmem:[#allocation5 + $0x2cc] sm:$0xf]  ;;  %v6210_v38 = vld [vmem:[#allocation5 + $0x2f8] sm:$0xf0] }
 0x24b   :  { %12990 = vst [vmem:[#allocation127_spill] sm:$0xff] %v9258_v44  ;;  %v4055_v15 = vand.u32 2147483647, %v9096_v55  ;;  %v9287_v53 = vadd.f32 1.0, %v7499_v60  ;;  %v6688_v31 = vmul.f32 -1.442695, %v9240_v59  ;;  %vm3977_vm13 = vweird.f32 %v9168_v14 }
 0x24c   :  { %12993 = vst [vmem:[#allocation128_spill] sm:$0xff] %v9280_v26  ;;  %v7501_v25 = vpop.eup %7500  ;;  %vm4051_vm14 = vweird.f32 %v9096_v55  ;;  %v9296_v29 = vor.u32 1.1754944e-38, %v4057_v6  ;;  %v4138_v35 = vsub.f32 1.0, %v4137_v62  ;;  %v9300_v24 = vsel %vm9215_vm7, %v3893_v57, %v3889_v16  ;;  %v6208_v59 = vld [vmem:[#allocation5 + $0x2c8] sm:$0xf]  ;;  %vm9358_vm6 = vmor %vm3976_vm12, %vm3977_vm13 }
 0x24d   :  { %vm4066_vm15 = vweird.f32 %v9103_v20  ;;  %v4070_v60 = vand.u32 2147483647, %v9103_v20  ;;  %v4072_v10 = vand.u32 2147483648, %v9103_v20  ;;  %v9307_v26 = vsel %vm9224_vm8, %v3968_v40, %v3964_v13  ;;  %v7279_v57 = vld [vmem:[#allocation5 + $0x5cc] sm:$0xf] }
 0x24e   :  { %v3974_v6 = vmul.f32 %v9168_v14, %v3973_v52  ;;  %v4049_v62 = vmul.f32 %v9190_v47, %v4048_v51  ;;  %v4064_v58 = vmul.f32 %v9199_v63, %v4063_v22  ;;  %v6594_v16 = vld [vmem:[#allocation5 + $0x5f8] sm:$0xf0]  ;;  %7504 = vrcp.f32 %v9287_v53  ;;  %v7177_v51 = vld [vmem:[#allocation5 + $0x294] sm:$0xf0] }
 0x24f   :  { %v7503_v44 = vpop.eup %7502  ;;  %v9313_v61 = vadd.f32 1.0, %v7501_v25  ;;  %v2053_v4 = vadd.f32 %v9047_v42, %v9045_v23  ;;  %v6213_v28 = vor.u32 %v7183_v5, %v6210_v38  ;;  %vm4052_vm0 = vweird.f32 %v9190_v47  ;;  %v6592_v42 = vld [vmem:[#allocation5 + $0x5c8] sm:$0xf]  ;;  %v7285_v5 = vld [vmem:[#allocation5 + $0x5f4] sm:$0xf0]  ;;  %v9328_v38 = vpop.f32.mrf.mxu2 }
 0x250   :  { %v4139_v40 = vmul.f32 %v9219_v17, %v4138_v35  ;;  %v4145_v52 = vand.u32 2147483647, %v9120_v1  ;;  %7506 = vpow2.f32 %v6688_v31  ;;  %vm9320_vm1 = vcmp.eq.f32.partialorder %v3980_v9, 8.507059e+37  ;;  %v9330_v35 = vpop.f32.mrf.mxu3  ;;  %vm9374_vm7 = vmor %vm4051_vm14, %vm4052_vm0  ;;  %v6162_v21 = vld [vmem:[#allocation5 + $0x298] sm:$0xf0] }
 0x251   :  { %v4147_v22 = vand.u32 2147483648, %v9120_v1  ;;  %v9326_v13 = vmul.f32 %v8412_v49, %v2053_v4  ;;  %2484 = vmatpush.bf16.msrb.mxu2 %v6213_v28  ;;  %v6209_v25 = vor.u32 %v7189_v32, %v6208_v59  ;;  %v6597_v23 = vor.u32 %v7279_v57, %v6594_v16  ;;  %v13000_v59 = vld [vmem:[#allocation14_spill] sm:$0xff] }
 0x252   :  { %v3975_v31 = vadd.f32 %v9168_v14, %v3974_v6  ;;  %v4050_v9 = vadd.f32 %v9190_v47, %v4049_v62  ;;  %vm9334_vm2 = vcmp.eq.f32.partialorder %v4055_v15, 8.507059e+37  ;;  %vm4067_vm3 = vweird.f32 %v9199_v63  ;;  %2301 = vmatmul.bf16.gmra.mxu2 %v13000_v59  ;;  %v13001_v15 = vld [vmem:[#allocation51_spill] sm:$0xff]  ;;  %v9350_v62 = vpop.f32.mrf.mxu0  ;;  %2203 = vmatmul.bf16.gmra.mxu0 %v13000_v59  ;;  %v13019_v49 = vld [vmem:[#allocation110_spill] sm:$0xff] }
 0x253   :  { %vm9339_vm4 = vcmp.eq.f32.partialorder %v4070_v60, 8.507059e+37  ;;  %v9343_v4 = vadd.f32 1.0, %v7503_v44  ;;  %v4065_v32 = vadd.f32 %v9199_v63, %v4064_v58  ;;  %vm4142_vm5 = vweird.f32 %v9219_v17  ;;  %2386 = vmatpush.bf16.msrb.mxu0 %v6209_v25  ;;  %2533 = vmatpush.bf16.msrb.mxu3 %v6597_v23  ;;  %v9352_v60 = vpop.f32.mrf.mxu1  ;;  %v13004_v25 = vld [vmem:[#allocation15_spill] sm:$0xff]  ;;  %vm9391_vm10 = vmor %vm4066_vm15, %vm4067_vm3  ;;  %v13021_v44 = vld [vmem:[#allocation113_spill] sm:$0xff] }
 0x254   :  { %7508 = vrcp.f32 %v9313_v61  ;;  %v6689_v6 = vmul.f32 -1.442695, %v13001_v15  ;;  %v4140_v58 = vadd.f32 %v9219_v17, %v4139_v40  ;;  %v4162_v57 = vand.u32 2147483648, %v9287_v53  ;;  %2350 = vmatmul.bf16.gmra.mxu3 %v13004_v25  ;;  %v9368_v23 = vpop.eup %7504 }
 0x255   :  { %v2151_v16 = vadd.f32 %v9107_v36, %v9105_v12  ;;  %v6593_v28 = vor.u32 %v7285_v5, %v6592_v42  ;;  %v4073_v40 = vor.u32 1.1754944e-38, %v4072_v10  ;;  %vm4141_vm8 = vweird.f32 %v9120_v1  ;;  %v13011_v10 = vld [vmem:[#allocation52_spill] sm:$0xff] }
 0x256   :  { %vm9379_vm9 = vcmp.eq.f32.partialorder %v4145_v52, 8.507059e+37  ;;  %v4237_v36 = vand.u32 2147483648, %v9313_v61  ;;  %v7507_v42 = vpop.eup %7506  ;;  %v3979_v5 = vsel %vm9358_vm6, %v9168_v14, %v3975_v31  ;;  %v4148_v1 = vor.u32 1.1754944e-38, %v4147_v22  ;;  %vm9405_vm11 = vmor %vm4141_vm8, %vm4142_vm5 }
 0x257   :  { %7510 = vrcp.f32 %v9343_v4  ;;  %v6600_v52 = vmul.f32 -1.442695, %v13011_v10  ;;  %2435 = vmatpush.bf16.msrb.mxu1 %v6593_v28  ;;  %v4054_v59 = vsel %vm9374_vm7, %v9190_v47, %v4050_v9  ;;  %v4069_v14 = vsel %vm9391_vm10, %v9199_v63, %v4065_v32  ;;  %v6544_v10 = vld [vmem:[#allocation5 + $0x568] sm:$0xf] }
 0x258   :  { %7512 = vpow2.f32 %v6689_v6  ;;  %v4503_v22 = vmul.f32 %v8496_v43, %v2151_v16  ;;  %v4144_v31 = vsel %vm9405_vm11, %v9219_v17, %v4140_v58  ;;  %v9414_v47 = vor.u32 1.1754944e-38, %v4162_v57  ;;  %v9428_v17 = vpop.f32.mrf.mxu2  ;;  %v9430_v58 = vpop.f32.mrf.mxu3  ;;  %v7171_v16 = vld [vmem:[#allocation5 + $0x26c] sm:$0xf] }
 0x259   :  { %v2055_v63 = vadd.f32 %v9137_v19, %v9135_v0  ;;  %v4152_v32 = vmul.f32 %v9368_v23, %v9287_v53  ;;  %v9423_v28 = vor.u32 1.1754944e-38, %v4237_v36  ;;  %v9425_v43 = vadd.f32 1.0, %v7507_v42  ;;  %2252 = vmatmul.bf16.gmra.mxu1 %v13004_v25  ;;  %v6160_v36 = vld [vmem:[#allocation5 + $0x268] sm:$0xf] }
 0x25a   :  { %v9418_v9 = vpop.eup %7508  ;;  %v9434_v0 = vmul.f32 %v9300_v24, %v12923_v27  ;;  %v9438_v19 = vmul.f32 %v9307_v26, %v8831_v45  ;;  %v3984_v57 = vsel %vm9320_vm1, %v9263_v7, %v3979_v5  ;;  %7514 = vpow2.f32 %v6600_v52  ;;  %v13016_v45 = vld [vmem:[#allocation48_spill] sm:$0xff]  ;;  %v13017_v26 = vld [vmem:[#allocation49_spill] sm:$0xff]  ;;  %v6546_v5 = vld [vmem:[#allocation5 + $0x598] sm:$0xf0]  ;;  %v9454_v52 = vpop.f32.mrf.mxu0 }
 0x25b   :  { %v4059_v42 = vsel %vm9334_vm2, %v9296_v29, %v4054_v59  ;;  %v4074_v27 = vsel %vm9339_vm4, %v4073_v40, %v4069_v14  ;;  %v4149_v24 = vsel %vm9379_vm9, %v4148_v1, %v4144_v31  ;;  %v9452_v55 = vadd.f32 %v13017_v26, %v13016_v45  ;;  %v7267_v7 = vld [vmem:[#allocation5 + $0x56c] sm:$0xf]  ;;  %v9456_v20 = vpop.f32.mrf.mxu1 }
 0x25c   :  { %13014 = vst [vmem:[#allocation51_spill] sm:$0xff] %v9434_v0  ;;  %v9462_v11 = vmul.f32 %v9418_v9, %v9313_v61  ;;  %v4508_v59 = vmul.f32 %v13019_v49, %v2055_v63  ;;  %v2153_v40 = vadd.f32 %v9188_v30, %v9186_v39  ;;  %v4153_v1 = vsub.f32 1.0, %v4152_v32  ;;  %v7273_v63 = vld [vmem:[#allocation5 + $0x594] sm:$0xf0]  ;;  %v13022_v30 = vld [vmem:[#allocation53_spill] sm:$0xff]  ;;  %v13023_v49 = vld [vmem:[#allocation118_spill] sm:$0xff] }
 0x25d   :  { %13015 = vst [vmem:[#allocation129_spill] sm:$0xff] %v9438_v19  ;;  %v9458_v6 = vpop.eup %7510  ;;  %v2058_v31 = vadd.f32 %v9209_v56, %v9207_v34  ;;  %v6165_v45 = vor.u32 %v7171_v16, %v6162_v21  ;;  %v6161_v25 = vor.u32 %v7177_v51, %v6160_v36  ;;  %v6549_v29 = vor.u32 %v7267_v7, %v6546_v5  ;;  %v13025_v36 = vld [vmem:[#allocation41_spill] sm:$0xff] }
 0x25e   :  { %13018 = vst [vmem:[#allocation48_spill] sm:$0xff] %v9452_v55  ;;  %v7513_v12 = vpop.eup %7512  ;;  %v9472_v26 = vpack.c.bf16 %v4508_v59, %v9326_v13  ;;  %v4509_v19 = vmul.f32 %v13021_v44, %v2153_v40  ;;  %v9477_v39 = vmul.f32 %v9458_v6, %v9343_v4  ;;  %7516 = vrcp.f32 %v9425_v43  ;;  %v7159_v40 = vld [vmem:[#allocation5 + $0x20c] sm:$0xf] }
 0x25f   :  { %v6601_v32 = vmul.f32 -1.442695, %v13022_v30  ;;  %v9482_v34 = vmul.f32 %v13023_v49, %v2058_v31  ;;  %2485 = vmatpush.bf16.msrb.mxu2 %v6165_v45  ;;  %v9485_v44 = vadd.f32 1.0, %v7513_v12  ;;  %2387 = vmatpush.bf16.msrb.mxu0 %v6161_v25  ;;  %v2156_v21 = vadd.f32 %v9268_v18, %v9266_v2  ;;  %v6114_v12 = vld [vmem:[#allocation5 + $0x238] sm:$0xf0] }
 0x260   :  { %13020 = vst [vmem:[#allocation49_spill] sm:$0xff] %v9472_v26  ;;  %v7515_v56 = vpop.eup %7514  ;;  %v9487_v16 = vpack.c.bf16 %v4509_v19, %v4503_v22  ;;  %2534 = vmatpush.bf16.msrb.mxu3 %v6549_v29  ;;  %v9492_v51 = vmul.f32 %v3984_v57, %v13025_v36  ;;  %v9495_v7 = vmul.f32 %v4059_v42, %v12941_v48  ;;  %v6112_v31 = vld [vmem:[#allocation5 + $0x208] sm:$0xf]  ;;  %v2113_v22 = vpop.f32.mrf.mxu2  ;;  %v13030_v18 = vld [vmem:[#allocation119_spill] sm:$0xff]  ;;  %v13031_v42 = vld [vmem:[#allocation16_spill] sm:$0xff]  ;;  %vm4157_vm12 = vweird.f32 %v9368_v23 }
 0x261   :  { %v9498_v5 = vmul.f32 %v4074_v27, %v12946_v37  ;;  %v6545_v59 = vor.u32 %v7273_v63, %v6544_v10  ;;  %v2162_v19 = vpop.f32.mrf.mxu3  ;;  %v9501_v25 = vmul.f32 %v4149_v24, %v8938_v41  ;;  %v4154_v2 = vmul.f32 %v9368_v23, %v4153_v1  ;;  %v7165_v37 = vld [vmem:[#allocation5 + $0x234] sm:$0xf0]  ;;  %v7255_v10 = vld [vmem:[#allocation5 + $0x50c] sm:$0xf]  ;;  %v6498_v27 = vld [vmem:[#allocation5 + $0x538] sm:$0xf0] }
 0x262   :  { %13024 = vst [vmem:[#allocation110_spill] sm:$0xff] %v9487_v16  ;;  %v9505_v57 = vmul.f32 %v13030_v18, %v2156_v21  ;;  %v2158_v48 = vadd.f32 %v9330_v35, %v9328_v38  ;;  %2306 = vmatmul.bf16.gmra.mxu2 %v13031_v42  ;;  %v9512_v45 = vadd.f32 1.0, %v7515_v56  ;;  %7518 = vpow2.f32 %v6601_v32  ;;  %v6496_v24 = vld [vmem:[#allocation5 + $0x508] sm:$0xf]  ;;  %v7261_v1 = vld [vmem:[#allocation5 + $0x534] sm:$0xf0]  ;;  %v2018_v63 = vpop.f32.mrf.mxu0  ;;  %2208 = vmatmul.bf16.gmra.mxu0 %v13031_v42 }
 0x263   :  { %13026 = vst [vmem:[#allocation113_spill] sm:$0xff] %v9492_v51  ;;  %2436 = vmatpush.bf16.msrb.mxu1 %v6545_v59  ;;  %v2063_v41 = vadd.f32 %v9352_v60, %v9350_v62  ;;  %v2067_v38 = vpop.f32.mrf.mxu1  ;;  %v6606_v35 = vmul.f32 -1.442695, %v9452_v55  ;;  %v13032_v49 = vld [vmem:[#allocation55_spill] sm:$0xff]  ;;  %v13033_v36 = vld [vmem:[#allocation33_spill] sm:$0xff]  ;;  %v6117_v32 = vor.u32 %v7159_v40, %v6114_v12  ;;  %vm4156_vm13 = vweird.f32 %v9287_v53  ;;  %v13035_v60 = vld [vmem:[#allocation28_spill] sm:$0xff] }
 0x264   :  { %13027 = vst [vmem:[#allocation118_spill] sm:$0xff] %v9495_v7  ;;  %v6607_v21 = vmul.f32 -1.442695, %v13032_v49  ;;  %v9519_v18 = vmul.f32 %v13033_v36, %v2158_v48  ;;  %v13034_v56 = vld [vmem:[#allocation17_spill] sm:$0xff]  ;;  %v9523_v59 = vpop.eup %7516  ;;  %v2060_v62 = vadd.f32 %v9292_v46, %v9290_v54  ;;  %v6113_v29 = vor.u32 %v7165_v37, %v6112_v31  ;;  %v7153_v37 = vld [vmem:[#allocation5 + $0x1d4] sm:$0xf0]  ;;  %vm9579_vm2 = vmor %vm4156_vm13, %vm4157_vm12 }
 0x265   :  { %13028 = vst [vmem:[#allocation41_spill] sm:$0xff] %v9498_v5  ;;  %2355 = vmatmul.bf16.gmra.mxu3 %v13034_v56  ;;  %v9529_v14 = vmul.f32 %v13035_v60, %v2063_v41  ;;  %v6501_v13 = vor.u32 %v7255_v10, %v6498_v27  ;;  %7520 = vrcp.f32 %v9485_v44  ;;  %2486 = vmatpush.bf16.msrb.mxu2 %v6117_v32  ;;  %v7147_v12 = vld [vmem:[#allocation5 + $0x1ac] sm:$0xf]  ;;  %v6064_v16 = vld [vmem:[#allocation5 + $0x1a8] sm:$0xf]  ;;  %vm4232_vm15 = vweird.f32 %v9418_v9 }
 0x266   :  { %13029 = vst [vmem:[#allocation130_spill] sm:$0xff] %v9501_v25  ;;  %v2161_v48 = vadd.f32 %v9430_v58, %v9428_v17  ;;  %v6497_v36 = vor.u32 %v7261_v1, %v6496_v24  ;;  %v2065_v40 = vadd.f32 %v9456_v20, %v9454_v52  ;;  %v6066_v25 = vld [vmem:[#allocation5 + $0x1d8] sm:$0xf0]  ;;  %v9537_v54 = vadd.f32 %v9368_v23, %v4154_v2  ;;  %v7243_v10 = vld [vmem:[#allocation5 + $0x4ac] sm:$0xf]  ;;  %v13036_v58 = vld [vmem:[#allocation56_spill] sm:$0xff] }
 0x267   :  { %7522 = vrcp.f32 %v9512_v45  ;;  %2388 = vmatpush.bf16.msrb.mxu0 %v6113_v29  ;;  %2535 = vmatpush.bf16.msrb.mxu3 %v6501_v13  ;;  %v2163_v46 = vadd.f32 %v2162_v19, %v2113_v22  ;;  %v2068_v31 = vadd.f32 %v2067_v38, %v2018_v63  ;;  %v6450_v27 = vld [vmem:[#allocation5 + $0x4d8] sm:$0xf0]  ;;  %v9542_v17 = vmul.f32 %v9523_v59, %v9425_v43  ;;  %v13037_v20 = vld [vmem:[#allocation37_spill] sm:$0xff]  ;;  %v7249_v24 = vld [vmem:[#allocation5 + $0x4d4] sm:$0xf0] }
 0x268   :  { %7524 = vpow2.f32 %v6606_v35  ;;  %v6612_v52 = vmul.f32 -1.442695, %v13036_v58  ;;  %v4527_v41 = vmul.f32 %v13037_v20, %v2161_v48  ;;  %2437 = vmatpush.bf16.msrb.mxu1 %v6497_v36  ;;  %v6448_v2 = vld [vmem:[#allocation5 + $0x4a8] sm:$0xf]  ;;  %v7519_v1 = vpop.eup %7518  ;;  %v13038_v13 = vand.u32 2147483647, %v9287_v53  ;;  %v2116_v60 = vpop.f32.mrf.mxu2 }
 0x269   :  { %7526 = vpow2.f32 %v6607_v21  ;;  %v13041_v19 = vld [vmem:[#allocation32_spill] sm:$0xff]  ;;  %2257 = vmatmul.bf16.gmra.mxu1 %v13034_v56  ;;  %v13043_v35 = vld [vmem:[#allocation31_spill] sm:$0xff]  ;;  %v2165_v48 = vpop.f32.mrf.mxu3  ;;  %v7135_v36 = vld [vmem:[#allocation5 + $0x14c] sm:$0xf]  ;;  %v6069_v58 = vor.u32 %v7147_v12, %v6066_v25  ;;  %v6065_v5 = vor.u32 %v7153_v37, %v6064_v16  ;;  %v6453_v21 = vor.u32 %v7243_v10, %v6450_v27 }
 0x26a   :  { %vm9548_vm14 = vcmp.eq.f32.partialorder %v13038_v13, 8.507059e+37  ;;  %v4520_v29 = vmul.f32 %v13041_v19, %v2060_v62  ;;  %v13042_v63 = vld [vmem:[#allocation36_spill] sm:$0xff]  ;;  %v4538_v32 = vmul.f32 %v13043_v35, %v2068_v31  ;;  %v6018_v20 = vld [vmem:[#allocation5 + $0x178] sm:$0xf0]  ;;  %v6016_v26 = vld [vmem:[#allocation5 + $0x148] sm:$0xf]  ;;  %v2166_v56 = vadd.f32 %v2165_v48, %v2116_v60 }
 0x26b   :  { %v4533_v38 = vmul.f32 %v13042_v63, %v2163_v46  ;;  %v13044_v13 = vld [vmem:[#allocation35_spill] sm:$0xff]  ;;  %v7231_v62 = vld [vmem:[#allocation5 + $0x44c] sm:$0xf]  ;;  %v6449_v7 = vor.u32 %v7249_v24, %v6448_v2  ;;  %v2020_v46 = vpop.f32.mrf.mxu0  ;;  %v2069_v63 = vpop.f32.mrf.mxu1  ;;  %v6021_v31 = vor.u32 %v7135_v36, %v6018_v20  ;;  %v6400_v55 = vld [vmem:[#allocation5 + $0x448] sm:$0xf]  ;;  %vm4231_vm0 = vweird.f32 %v9313_v61  ;;  %2487 = vmatpush.bf16.msrb.mxu2 %v6069_v58  ;;  %2389 = vmatpush.bf16.msrb.mxu0 %v6065_v5 }
 0x26c   :  { %v4532_v42 = vmul.f32 %v13044_v13, %v2065_v40  ;;  %v7141_v49 = vld [vmem:[#allocation5 + $0x174] sm:$0xf0]  ;;  %v6402_v19 = vld [vmem:[#allocation5 + $0x478] sm:$0xf0]  ;;  %v9558_v30 = vpop.eup %7520  ;;  %v9561_v0 = vadd.f32 1.0, %v7519_v1  ;;  %v2070_v16 = vadd.f32 %v2069_v63, %v2020_v46  ;;  %vm4246_vm1 = vweird.f32 %v9343_v4  ;;  %2536 = vmatpush.bf16.msrb.mxu3 %v6453_v21  ;;  %v13061_v60 = vld [vmem:[#allocation18_spill] sm:$0xff] }
 0x26d   :  { %v6017_v35 = vor.u32 %v7141_v49, %v6016_v26  ;;  %v7237_v51 = vld [vmem:[#allocation5 + $0x474] sm:$0xf0]  ;;  %v6405_v25 = vor.u32 %v7231_v62, %v6402_v19  ;;  %v9563_v12 = vpop.eup %7522  ;;  %v4327_v37 = vand.u32 2147483648, %v9425_v43  ;;  %v4539_v26 = vmul.f32 %v9050_v50, %v2166_v56  ;;  %2438 = vmatpush.bf16.msrb.mxu1 %v6449_v7  ;;  %v13062_v19 = vld [vmem:[#allocation54_spill] sm:$0xff]  ;;  %v13063_v46 = vld [vmem:[#allocation57_spill] sm:$0xff] }
 0x26e   :  { %v6401_v40 = vor.u32 %v7237_v51, %v6400_v55  ;;  %v9569_v49 = vpack.c.bf16 %v4520_v29, %v9482_v34  ;;  %v9573_v10 = vpack.c.bf16 %v9519_v18, %v9505_v57  ;;  %v7525_v5 = vpop.eup %7524  ;;  %v13049_v51 = vsub.f32 1.0, %v9462_v11  ;;  %vm9654_vm7 = vmor %vm4231_vm0, %vm4232_vm15  ;;  %v13067_v55 = vld [vmem:[#allocation58_spill] sm:$0xff] }
 0x26f   :  { %v4544_v34 = vmul.f32 %v9053_v33, %v2070_v16  ;;  %v9588_v7 = vpack.c.bf16 %v4532_v42, %v9529_v14  ;;  %v9590_v57 = vpack.c.bf16 %v4533_v38, %v4527_v41  ;;  %v7527_v18 = vpop.eup %7526  ;;  %v4159_v53 = vsel %vm9579_vm2, %v9368_v23, %v9537_v54  ;;  %2488 = vmatpush.bf16.msrb.mxu2 %v6021_v31  ;;  %v13064_v31 = vld [vmem:[#allocation19_spill] sm:$0xff] }
 0x270   :  { %13045 = vst [vmem:[#allocation119_spill] sm:$0xff] %v9569_v49  ;;  %v4229_v50 = vmul.f32 %v9418_v9, %v13049_v51  ;;  %v13052_v56 = vsub.f32 1.0, %v9477_v39  ;;  %v4332_v11 = vmul.f32 %v9558_v30, %v9485_v44  ;;  %7528 = vpow2.f32 %v6612_v52  ;;  %2390 = vmatpush.bf16.msrb.mxu0 %v6017_v35  ;;  %v2118_v2 = vpop.f32.mrf.mxu2  ;;  %2537 = vmatpush.bf16.msrb.mxu3 %v6405_v25 }
 0x271   :  { %13046 = vst [vmem:[#allocation33_spill] sm:$0xff] %v9573_v10  ;;  %v13053_v33 = vand.u32 2147483648, %v9343_v4  ;;  %v4325_v42 = vand.u32 2147483647, %v9425_v43  ;;  %7530 = vrcp.f32 %v9561_v0  ;;  %v9607_v58 = vpack.c.bf16 %v4544_v34, %v4538_v32  ;;  %v2167_v24 = vpop.f32.mrf.mxu3  ;;  %2439 = vmatpush.bf16.msrb.mxu1 %v6401_v40  ;;  %v13070_v34 = vld [vmem:[#allocation123_spill] sm:$0xff]  ;;  %v13080_v32 = vld [vmem:[#allocation124_spill] sm:$0xff] }
 0x272   :  { %13050 = vst [vmem:[#allocation28_spill] sm:$0xff] %v9588_v7  ;;  %v4244_v27 = vmul.f32 %v9458_v6, %v13052_v56  ;;  %v13055_v23 = vand.u32 2147483647, %v9313_v61  ;;  %vm4247_vm4 = vweird.f32 %v9458_v6  ;;  %v4318_v54 = vsub.f32 1.0, %v9542_v17  ;;  %2311 = vmatmul.bf16.gmra.mxu2 %v13061_v60  ;;  %2213 = vmatmul.bf16.gmra.mxu0 %v13061_v60 }
 0x273   :  { %13051 = vst [vmem:[#allocation37_spill] sm:$0xff] %v9590_v57  ;;  %v9603_v14 = vor.u32 1.1754944e-38, %v13053_v33  ;;  %v9617_v52 = vor.u32 1.1754944e-38, %v4327_v37  ;;  %v9619_v41 = vadd.f32 1.0, %v7525_v5  ;;  %v4164_v1 = vsel %vm9548_vm14, %v9414_v47, %v4159_v53  ;;  %v2023_v13 = vpop.f32.mrf.mxu0  ;;  %v2072_v21 = vpop.f32.mrf.mxu1  ;;  %vm9670_vm8 = vmor %vm4246_vm1, %vm4247_vm4  ;;  %v6352_v37 = vld [vmem:[#allocation5 + $0x3e8] sm:$0xf] }
 0x274   :  { %13054 = vst [vmem:[#allocation32_spill] sm:$0xff] %v9607_v58  ;;  %vm9611_vm3 = vcmp.eq.f32.partialorder %v13055_v23, 8.507059e+37  ;;  %v4230_v29 = vadd.f32 %v9418_v9, %v4229_v50  ;;  %v13058_v38 = vand.u32 2147483647, %v9343_v4  ;;  %v4340_v17 = vand.u32 2147483647, %v9485_v44 }
 0x275   :  { %v2168_v48 = vadd.f32 %v2167_v24, %v2118_v2  ;;  %v4245_v36 = vadd.f32 %v9458_v6, %v4244_v27  ;;  %vm4321_vm6 = vweird.f32 %v9425_v43  ;;  %v4333_v20 = vsub.f32 1.0, %v4332_v11  ;;  %2360 = vmatmul.bf16.gmra.mxu3 %v13064_v31  ;;  %v13075_v23 = vld [vmem:[#allocation59_spill] sm:$0xff] }
 0x276   :  { %vm9627_vm5 = vcmp.eq.f32.partialorder %v13058_v38, 8.507059e+37  ;;  %v4342_v47 = vand.u32 2147483648, %v9485_v44  ;;  %v2997_v22 = vmul.f32 %v9563_v12, %v9512_v45  ;;  %v9638_v62 = vadd.f32 1.0, %v7527_v18  ;;  %v7529_v25 = vpop.eup %7528  ;;  %v5968_v38 = vld [vmem:[#allocation5 + $0xe8] sm:$0xf] }
 0x277   :  { %v9642_v63 = vadd.f32 %v13063_v46, %v13062_v19  ;;  %v4545_v35 = vmul.f32 %v9073_v8, %v2168_v48  ;;  %v2073_v16 = vadd.f32 %v2072_v21, %v2023_v13  ;;  %v9648_v40 = vmul.f32 %v4164_v1, %v12967_v3  ;;  %v9661_v8 = vpop.eup %7530  ;;  %v7123_v1 = vld [vmem:[#allocation5 + $0xec] sm:$0xf]  ;;  %v6354_v21 = vld [vmem:[#allocation5 + $0x418] sm:$0xf0] }
 0x278   :  { %v4319_v5 = vmul.f32 %v9523_v59, %v4318_v54  ;;  %7532 = vrcp.f32 %v9619_v41  ;;  %v6613_v51 = vmul.f32 -1.442695, %v13067_v55  ;;  %v4234_v3 = vsel %vm9654_vm7, %v9418_v9, %v4230_v29  ;;  %v5970_v29 = vld [vmem:[#allocation5 + $0x118] sm:$0xf0]  ;;  %v7219_v13 = vld [vmem:[#allocation5 + $0x3ec] sm:$0xf] }
 0x279   :  { %vm4336_vm9 = vweird.f32 %v9485_v44  ;;  %v3005_v50 = vand.u32 2147483647, %v9512_v45  ;;  %v9677_v18 = vmul.f32 %v13070_v34, %v2073_v16  ;;  %v9679_v53 = vpack.c.bf16 %v4545_v35, %v4539_v26  ;;  %2262 = vmatmul.bf16.gmra.mxu1 %v13064_v31  ;;  %v2170_v24 = vpop.f32.mrf.mxu3  ;;  %v7111_v44 = vld [vmem:[#allocation5 + $0x8c] sm:$0xf]  ;;  %v6258_v58 = vld [vmem:[#allocation5 + $0x358] sm:$0xf0] }
 0x27a   :  { %v4249_v9 = vsel %vm9670_vm8, %v9458_v6, %v4245_v36  ;;  %vm9684_vm10 = vcmp.eq.f32.partialorder %v4325_v42, 8.507059e+37  ;;  %v4334_v4 = vmul.f32 %v9558_v30, %v4333_v20  ;;  %v2998_v27 = vsub.f32 1.0, %v2997_v22  ;;  %v2121_v42 = vpop.f32.mrf.mxu2  ;;  %v7129_v22 = vld [vmem:[#allocation5 + $0x114] sm:$0xf0] }
 0x27b   :  { %13071 = vst [vmem:[#allocation36_spill] sm:$0xff] %v9677_v18  ;;  %v3007_v11 = vand.u32 2147483648, %v9512_v45  ;;  %7534 = vrcp.f32 %v9638_v62  ;;  %v9691_v33 = vadd.f32 1.0, %v7529_v25  ;;  %v6618_v26 = vmul.f32 -1.442695, %v9642_v63  ;;  %v9710_v16 = vpop.f32.mrf.mxu0  ;;  %v9712_v25 = vpop.f32.mrf.mxu1 }
 0x27c   :  { %13072 = vst [vmem:[#allocation31_spill] sm:$0xff] %v9679_v53  ;;  %v6619_v54 = vmul.f32 -1.442695, %v13075_v23  ;;  %v4320_v2 = vadd.f32 %v9523_v59, %v4319_v5  ;;  %vm4322_vm11 = vweird.f32 %v9523_v59  ;;  %v3012_v6 = vmul.f32 %v9661_v8, %v9561_v0  ;;  %v7225_v5 = vld [vmem:[#allocation5 + $0x414] sm:$0xf0] }
 0x27d   :  { %7536 = vpow2.f32 %v6613_v51  ;;  %v4239_v48 = vsel %vm9611_vm3, %v9423_v28, %v4234_v3  ;;  %vm4337_vm12 = vweird.f32 %v9558_v30  ;;  %v2171_v36 = vadd.f32 %v2170_v24, %v2121_v42  ;;  %13076 = vst [vmem:[#allocation35_spill] sm:$0xff] %v9710_v16  ;;  %vm9718_vm13 = vmor %vm4321_vm6, %vm4322_vm11  ;;  %v7105_v16 = vld [vmem:[#allocation5 + $0x54] sm:$0xf0]  ;;  %v7195_v53 = vld [vmem:[#allocation5 + $0x32c] sm:$0xf] }
 0x27e   :  { %v5973_v20 = vor.u32 %v7123_v1, %v5970_v29  ;;  %v9704_v19 = vpop.eup %7532  ;;  %v4254_v46 = vsel %vm9627_vm5, %v9603_v14, %v4249_v9  ;;  %v4335_v35 = vadd.f32 %v9558_v30, %v4334_v4  ;;  %13077 = vst [vmem:[#allocation18_spill] sm:$0xff] %v9712_v25  ;;  %v5969_v28 = vor.u32 %v7129_v22, %v5968_v38  ;;  %vm9751_vm0 = vmor %vm4336_vm9, %vm4337_vm12  ;;  %v13095_v9 = vld [vmem:[#allocation45_spill] sm:$0xff]  ;;  %v7317_v31 = vld [vmem:[#allocation7 + $0xf4] sm:$0xf0] }
 0x27f   :  { %v6357_v39 = vor.u32 %v7219_v13, %v6354_v21  ;;  %v2999_v14 = vmul.f32 %v9563_v12, %v2998_v27  ;;  %7538 = vpow2.f32 %v6618_v26  ;;  %v4551_v3 = vmul.f32 %v13080_v32, %v2171_v36  ;;  %v13083_v26 = vld [vmem:[#allocation47_spill] sm:$0xff] }
 0x280   :  { %2489 = vmatpush.bf16.msrb.mxu2 %v5973_v20  ;;  %v6353_v61 = vor.u32 %v7225_v5, %v6352_v37  ;;  %v4324_v34 = vsel %vm9718_vm13, %v9523_v59, %v4320_v2  ;;  %vm9729_vm14 = vcmp.eq.f32.partialorder %v4340_v17, 8.507059e+37  ;;  %v3013_v43 = vsub.f32 1.0, %v3012_v6  ;;  %2391 = vmatpush.bf16.msrb.mxu0 %v5969_v28  ;;  %v13084_v6 = vld [vmem:[#allocation50_spill] sm:$0xff] }
 0x281   :  { %7540 = vrcp.f32 %v9691_v33  ;;  %2538 = vmatpush.bf16.msrb.mxu3 %v6357_v39  ;;  %v9734_v4 = vpop.eup %7534  ;;  %v4343_v27 = vor.u32 1.1754944e-38, %v4342_v47  ;;  %vm3001_vm15 = vweird.f32 %v9512_v45  ;;  %v3087_v59 = vmul.f32 %v9704_v19, %v9619_v41  ;;  %v2172_v20 = vpop.f32.mrf.mxu3  ;;  %v13094_v45 = vld [vmem:[#allocation21_spill] sm:$0xff]  ;;  %v13098_v47 = vld [vmem:[#allocation127_spill] sm:$0xff] }
 0x282   :  { %7542 = vpow2.f32 %v6619_v54  ;;  %2440 = vmatpush.bf16.msrb.mxu1 %v6353_v61  ;;  %v9742_v2 = vmul.f32 %v4239_v48, %v13083_v26  ;;  %v9745_v42 = vmul.f32 %v4254_v46, %v13084_v6  ;;  %v3008_v24 = vor.u32 1.1754944e-38, %v3007_v11  ;;  %v13090_v48 = vld [vmem:[#allocation60_spill] sm:$0xff] }
 0x283   :  { %v7537_v17 = vpop.eup %7536  ;;  %v3022_v1 = vand.u32 2147483648, %v9561_v0  ;;  %v9759_v54 = vsel %vm9684_vm10, %v9617_v52, %v4324_v34  ;;  %v4339_v29 = vsel %vm9751_vm0, %v9558_v30, %v4335_v35  ;;  %v3000_v38 = vadd.f32 %v9563_v12, %v2999_v14  ;;  %v2123_v30 = vpop.f32.mrf.mxu2 }
 0x284   :  { %13087 = vst [vmem:[#allocation54_spill] sm:$0xff] %v9759_v54  ;;  %vm3002_vm1 = vweird.f32 %v9563_v12  ;;  %vm9768_vm2 = vcmp.eq.f32.partialorder %v3005_v50, 8.507059e+37  ;;  %v3014_v11 = vmul.f32 %v9661_v8, %v3013_v43  ;;  %v3020_v56 = vand.u32 2147483647, %v9561_v0  ;;  %v13091_v50 = vld [vmem:[#allocation20_spill] sm:$0xff]  ;;  %v2028_v51 = vpop.f32.mrf.mxu0  ;;  %v2077_v14 = vpop.f32.mrf.mxu1 }
 0x285   :  { %v3102_v52 = vmul.f32 %v9734_v4, %v9638_v62  ;;  %v6624_v36 = vmul.f32 -1.442695, %v13090_v48  ;;  %v7539_v22 = vpop.eup %7538  ;;  %vm3016_vm3 = vweird.f32 %v9561_v0  ;;  %v3088_v13 = vsub.f32 1.0, %v3087_v59  ;;  %2316 = vmatmul.bf16.gmra.mxu2 %v13091_v50  ;;  %vm9789_vm4 = vmor %vm3001_vm15, %vm3002_vm1  ;;  %2218 = vmatmul.bf16.gmra.mxu0 %v13091_v50  ;;  %v6816_v50 = vld [vmem:[#allocation7 + $0xf0] sm:$0xf] }
 0x286   :  { %v9778_v21 = vadd.f32 1.0, %v7537_v17  ;;  %v2173_v46 = vadd.f32 %v2172_v20, %v2123_v30  ;;  %v4344_v28 = vsel %vm9729_vm14, %v4343_v27, %v4339_v29  ;;  %vm3017_vm5 = vweird.f32 %v9661_v8  ;;  %2365 = vmatmul.bf16.gmra.mxu3 %v13094_v45  ;;  %v13104_v20 = vld [vmem:[#allocation62_spill] sm:$0xff]  ;;  %v13113_v17 = vld [vmem:[#allocation63_spill] sm:$0xff] }
 0x287   :  { %v9781_v35 = vpop.eup %7540  ;;  %v9794_v37 = vor.u32 1.1754944e-38, %v3022_v1  ;;  %v3095_v5 = vand.u32 2147483647, %v9619_v41  ;;  %v3004_v61 = vsel %vm9789_vm4, %v9563_v12, %v3000_v38  ;;  %v3097_v34 = vand.u32 2147483648, %v9619_v41  ;;  %vm9830_vm7 = vmor %vm3016_vm3, %vm3017_vm5 }
 0x288   :  { %v7543_v32 = vpop.eup %7542  ;;  %v4557_v43 = vmul.f32 %v13095_v9, %v2173_v46  ;;  %v2078_v27 = vadd.f32 %v2077_v14, %v2028_v51  ;;  %v3015_v59 = vadd.f32 %v9661_v8, %v3014_v11  ;;  %vm9805_vm6 = vcmp.eq.f32.partialorder %v3020_v56, 8.507059e+37  ;;  %v5920_v51 = vld [vmem:[#allocation5 + $0x88] sm:$0xf]  ;;  %v6306_v9 = vld [vmem:[#allocation5 + $0x3b8] sm:$0xf0] }
 0x289   :  { %v3103_v26 = vsub.f32 1.0, %v3102_v52  ;;  %v9809_v6 = vadd.f32 1.0, %v7539_v22  ;;  %7544 = vpow2.f32 %v6624_v36  ;;  %v3089_v12 = vmul.f32 %v9704_v19, %v3088_v13  ;;  %2267 = vmatmul.bf16.gmra.mxu1 %v13094_v45  ;;  %v2175_v39 = vpop.f32.mrf.mxu3 }
 0x28a   :  { %7546 = vrcp.f32 %v9778_v21  ;;  %v9814_v1 = vmul.f32 %v13098_v47, %v2078_v27  ;;  %v9816_v29 = vpack.c.bf16 %v4557_v43, %v4551_v3  ;;  %v9819_v38 = vmul.f32 %v4344_v28, %v13001_v15  ;;  %v13103_v15 = vld [vmem:[#allocation61_spill] sm:$0xff] }
 0x28b   :  { %v3110_v11 = vand.u32 2147483647, %v9638_v62  ;;  %v3177_v56 = vmul.f32 %v9781_v35, %v9691_v33  ;;  %v9824_v52 = vadd.f32 1.0, %v7543_v32  ;;  %vm3091_vm8 = vweird.f32 %v9619_v41  ;;  %v2126_v28 = vpop.f32.mrf.mxu2 }
 0x28c   :  { %13099 = vst [vmem:[#allocation57_spill] sm:$0xff] %v9814_v1  ;;  %v9835_v3 = vor.u32 1.1754944e-38, %v3097_v34  ;;  %v6625_v30 = vmul.f32 -1.442695, %v13103_v15  ;;  %v6630_v22 = vmul.f32 -1.442695, %v13104_v20  ;;  %v3009_v13 = vsel %vm9768_vm2, %v3008_v24, %v3004_v61  ;;  %v9857_v47 = vpop.f32.mrf.mxu1 }
 0x28d   :  { %13100 = vst [vmem:[#allocation58_spill] sm:$0xff] %v9816_v29  ;;  %v3019_v46 = vsel %vm9830_vm7, %v9661_v8, %v3015_v59  ;;  %vm3092_vm9 = vweird.f32 %v9704_v19  ;;  %vm9845_vm10 = vcmp.eq.f32.partialorder %v3095_v5, 8.507059e+37  ;;  %vm3106_vm11 = vweird.f32 %v9638_v62  ;;  %v5922_v24 = vld [vmem:[#allocation5 + $0xb8] sm:$0xf0]  ;;  %v7117_v61 = vld [vmem:[#allocation5 + $0xb4] sm:$0xf0]  ;;  %v9855_v59 = vpop.f32.mrf.mxu0 }
 0x28e   :  { %7548 = vrcp.f32 %v9809_v6  ;;  %v3090_v14 = vadd.f32 %v9704_v19, %v3089_v12  ;;  %v3104_v8 = vmul.f32 %v9734_v4, %v3103_v26  ;;  %v2176_v32 = vadd.f32 %v2175_v39, %v2126_v28  ;;  %v7207_v34 = vld [vmem:[#allocation5 + $0x38c] sm:$0xf]  ;;  %13107 = vst [vmem:[#allocation123_spill] sm:$0xff] %v9855_v59  ;;  %v6304_v1 = vld [vmem:[#allocation5 + $0x388] sm:$0xf]  ;;  %v13109_v28 = vld [vmem:[#allocation51_spill] sm:$0xff] }
 0x28f   :  { %v5925_v5 = vor.u32 %v7111_v44, %v5922_v24  ;;  %v7545_v43 = vpop.eup %7544  ;;  %v3178_v27 = vsub.f32 1.0, %v3177_v56  ;;  %7550 = vrcp.f32 %v9824_v52  ;;  %13108 = vst [vmem:[#allocation59_spill] sm:$0xff] %v9857_v47  ;;  %v5921_v36 = vor.u32 %v7117_v61, %v5920_v51  ;;  %v7213_v29 = vld [vmem:[#allocation5 + $0x3b4] sm:$0xf0]  ;;  %v13110_v56 = vld [vmem:[#allocation52_spill] sm:$0xff]  ;;  %vm9876_vm13 = vmor %vm3091_vm8, %vm3092_vm9 }
 0x290   :  { %v6309_v54 = vor.u32 %v7207_v34, %v6306_v9  ;;  %v9859_v12 = vpop.eup %7546  ;;  %v3112_v26 = vand.u32 2147483648, %v9638_v62  ;;  %7552 = vpow2.f32 %v6625_v30  ;;  %v4563_v39 = vmul.f32 %v13109_v28, %v2176_v32  ;;  %v13117_v9 = vld [vmem:[#allocation53_spill] sm:$0xff]  ;;  %v13123_v59 = vld [vmem:[#allocation23_spill] sm:$0xff] }
 0x291   :  { %2490 = vmatpush.bf16.msrb.mxu2 %v5925_v5  ;;  %v6305_v44 = vor.u32 %v7213_v29, %v6304_v1  ;;  %v9864_v24 = vmul.f32 %v3009_v13, %v13110_v56  ;;  %vm3107_vm12 = vweird.f32 %v9734_v4  ;;  %v3185_v47 = vand.u32 2147483647, %v9691_v33  ;;  %2392 = vmatpush.bf16.msrb.mxu0 %v5921_v36  ;;  %v2177_v36 = vpop.f32.mrf.mxu3  ;;  %v13122_v56 = vld [vmem:[#allocation22_spill] sm:$0xff] }
 0x292   :  { %v3187_v51 = vand.u32 2147483648, %v9691_v33  ;;  %2539 = vmatpush.bf16.msrb.mxu3 %v6309_v54  ;;  %v3024_v61 = vsel %vm9805_vm6, %v9794_v37, %v3019_v46  ;;  %v3105_v29 = vadd.f32 %v9734_v4, %v3104_v8  ;;  %v9881_v30 = vadd.f32 1.0, %v7545_v43  ;;  %vm9916_vm2 = vmor %vm3106_vm11, %vm3107_vm12 }
 0x293   :  { %7554 = vpow2.f32 %v6630_v22  ;;  %2441 = vmatpush.bf16.msrb.mxu1 %v6305_v44  ;;  %v3094_v54 = vsel %vm9876_vm13, %v9704_v19, %v3090_v14  ;;  %v3179_v37 = vmul.f32 %v9781_v35, %v3178_v27  ;;  %v3192_v41 = vmul.f32 %v9859_v12, %v9778_v21  ;;  %v13116_v22 = vld [vmem:[#allocation64_spill] sm:$0xff]  ;;  %v2128_v27 = vpop.f32.mrf.mxu2 }
 0x294   :  { %v9883_v13 = vpop.eup %7548  ;;  %v6631_v46 = vmul.f32 -1.442695, %v13113_v17  ;;  %vm9892_vm14 = vcmp.eq.f32.partialorder %v3110_v11, 8.507059e+37  ;;  %v3113_v8 = vor.u32 1.1754944e-38, %v3112_v26  ;;  %vm3181_vm15 = vweird.f32 %v9691_v33  ;;  %v2082_v1 = vpop.f32.mrf.mxu1  ;;  %v13125_v44 = vld [vmem:[#allocation48_spill] sm:$0xff] }
 0x295   :  { %v6636_v5 = vmul.f32 -1.442695, %v13116_v22  ;;  %v9898_v34 = vpop.eup %7550  ;;  %v9901_v19 = vmul.f32 %v3024_v61, %v13117_v9  ;;  %vm3182_vm0 = vweird.f32 %v9781_v35  ;;  %vm9904_vm1 = vcmp.eq.f32.partialorder %v3185_v47, 8.507059e+37  ;;  %2321 = vmatmul.bf16.gmra.mxu2 %v13122_v56  ;;  %v2033_v62 = vpop.f32.mrf.mxu0  ;;  %2223 = vmatmul.bf16.gmra.mxu0 %v13122_v56 }
 0x296   :  { %v3188_v11 = vor.u32 1.1754944e-38, %v3187_v51  ;;  %v3202_v43 = vand.u32 2147483648, %v9778_v21  ;;  %v7553_v26 = vpop.eup %7552  ;;  %v3099_v28 = vsel %vm9845_vm10, %v9835_v3, %v3094_v54  ;;  %v3267_v47 = vmul.f32 %v9883_v13, %v9809_v6  ;;  %2370 = vmatmul.bf16.gmra.mxu3 %v13123_v59  ;;  %vm9947_vm3 = vmor %vm3181_vm15, %vm3182_vm0 }
 0x297   :  { %7556 = vrcp.f32 %v9881_v30  ;;  %v2178_v51 = vadd.f32 %v2177_v36, %v2128_v27  ;;  %v3109_v3 = vsel %vm9916_vm2, %v9734_v4, %v3105_v29  ;;  %v3180_v0 = vadd.f32 %v9781_v35, %v3179_v37  ;;  %v13124_v27 = vld [vmem:[#allocation113_spill] sm:$0xff] }
 0x298   :  { %v3193_v61 = vsub.f32 1.0, %v3192_v41  ;;  %7558 = vpow2.f32 %v6631_v46  ;;  %v3282_v9 = vmul.f32 %v9898_v34, %v9824_v52  ;;  %v2083_v18 = vadd.f32 %v2082_v1, %v2033_v62 }
 0x299   :  { %v7555_v54 = vpop.eup %7554  ;;  %7560 = vpow2.f32 %v6636_v5  ;;  %v4569_v36 = vmul.f32 %v13124_v27, %v2178_v51  ;;  %v9934_v4 = vmul.f32 %v3099_v28, %v13125_v44  ;;  %v3200_v29 = vand.u32 2147483647, %v9778_v21  ;;  %v13128_v51 = vld [vmem:[#allocation118_spill] sm:$0xff]  ;;  %v13131_v27 = vld [vmem:[#allocation65_spill] sm:$0xff]  ;;  %v13132_v44 = vld [vmem:[#allocation55_spill] sm:$0xff]  ;;  %2272 = vmatmul.bf16.gmra.mxu1 %v13123_v59 }
 0x29a   :  { %v9937_v37 = vor.u32 1.1754944e-38, %v3202_v43  ;;  %v9939_v41 = vadd.f32 1.0, %v7553_v26  ;;  %v3114_v46 = vsel %vm9892_vm14, %v3113_v8, %v3109_v3  ;;  %vm3196_vm4 = vweird.f32 %v9778_v21 }
 0x29b   :  { %v3268_v28 = vsub.f32 1.0, %v3267_v47  ;;  %v9953_v62 = vmul.f32 %v13128_v51, %v2083_v18  ;;  %v9955_v43 = vpack.c.bf16 %v4569_v36, %v4563_v39  ;;  %v3184_v32 = vsel %vm9947_vm3, %v9781_v35, %v3180_v0  ;;  %v2131_v35 = vpop.f32.mrf.mxu2  ;;  %v2180_v0 = vpop.f32.mrf.mxu3 }
 0x29c   :  { %v3275_v8 = vand.u32 2147483647, %v9809_v6  ;;  %v3277_v33 = vand.u32 2147483648, %v9809_v6  ;;  %v9962_v26 = vadd.f32 1.0, %v7555_v54  ;;  %v3194_v1 = vmul.f32 %v9859_v12, %v3193_v61  ;;  %v7099_v61 = vld [vmem:[#allocation5 + $0x2c] sm:$0xf]  ;;  %v9987_v10 = vpop.f32.mrf.mxu1 }
 0x29d   :  { %13129 = vst [vmem:[#allocation124_spill] sm:$0xff] %v9953_v62  ;;  %v9964_v3 = vpop.eup %7556  ;;  %v3283_v47 = vsub.f32 1.0, %v3282_v9  ;;  %v3290_v18 = vand.u32 2147483647, %v9824_v52  ;;  %v6637_v39 = vmul.f32 -1.442695, %v13131_v27  ;;  %v9970_v51 = vmul.f32 %v3114_v46, %v13132_v44  ;;  %v9985_v7 = vpop.f32.mrf.mxu0 }
 0x29e   :  { %13130 = vst [vmem:[#allocation47_spill] sm:$0xff] %v9955_v43  ;;  %v7559_v36 = vpop.eup %7558  ;;  %vm3197_vm5 = vweird.f32 %v9859_v12  ;;  %vm3271_vm6 = vweird.f32 %v9809_v6  ;;  %7562 = vrcp.f32 %v9939_v41  ;;  %v5874_v54 = vld [vmem:[#allocation5 + $0x58] sm:$0xf0]  ;;  %v5872_v9 = vld [vmem:[#allocation5 + $0x28] sm:$0xf]  ;;  %v3189_v62 = vsel %vm9904_vm1, %v3188_v11, %v3184_v32  ;;  %v13152_v46 = vld [vmem:[#allocation72_spill] sm:$0xff] }
 0x29f   :  { %v7561_v5 = vpop.eup %7560  ;;  %vm9978_vm7 = vcmp.eq.f32.partialorder %v3200_v29, 8.507059e+37  ;;  %v3269_v44 = vmul.f32 %v9883_v13, %v3268_v28  ;;  %v2181_v43 = vadd.f32 %v2180_v0, %v2131_v35  ;;  %v5877_v25 = vor.u32 %v7099_v61, %v5874_v54  ;;  %13135 = vst [vmem:[#allocation50_spill] sm:$0xff] %v9985_v7  ;;  %v6256_v29 = vld [vmem:[#allocation5 + $0x328] sm:$0xf]  ;;  %v7201_v32 = vld [vmem:[#allocation5 + $0x354] sm:$0xf0]  ;;  %vm10014_vm10 = vmor %vm3196_vm4, %vm3197_vm5 }
 0x2a0   :  { %v3292_v57 = vand.u32 2147483648, %v9824_v52  ;;  %7564 = vrcp.f32 %v9962_v26  ;;  %13136 = vst [vmem:[#allocation60_spill] sm:$0xff] %v9987_v10  ;;  %v5873_v14 = vor.u32 %v7105_v16, %v5872_v9  ;;  %v6261_v11 = vor.u32 %v7195_v53, %v6258_v58  ;;  %v13137_v35 = vld [vmem:[#allocation41_spill] sm:$0xff]  ;;  %v13140_v16 = vld [vmem:[#allocation70_spill] sm:$0xff] }
 0x2a1   :  { %v3195_v49 = vadd.f32 %v9859_v12, %v3194_v1  ;;  %v9990_v28 = vadd.f32 1.0, %v7559_v36  ;;  %v4575_v0 = vmul.f32 %v13137_v35, %v2181_v43  ;;  %2491 = vmatpush.bf16.msrb.mxu2 %v5877_v25  ;;  %v6257_v61 = vor.u32 %v7201_v32, %v6256_v29  ;;  %v13141_v1 = vld [vmem:[#allocation56_spill] sm:$0xff]  ;;  %v13144_v36 = vld [vmem:[#allocation71_spill] sm:$0xff] }
 0x2a2   :  { %v3284_v54 = vmul.f32 %v9898_v34, %v3283_v47  ;;  %v3357_v59 = vmul.f32 %v9964_v3, %v9881_v30  ;;  %v9996_v7 = vadd.f32 1.0, %v7561_v5  ;;  %7566 = vpow2.f32 %v6637_v39  ;;  %2393 = vmatpush.bf16.msrb.mxu0 %v5873_v14  ;;  %2540 = vmatpush.bf16.msrb.mxu3 %v6261_v11  ;;  %v13149_v29 = vld [vmem:[#allocation24_spill] sm:$0xff]  ;;  %v13153_v39 = vld [vmem:[#allocation25_spill] sm:$0xff] }
 0x2a3   :  { %v3270_v58 = vadd.f32 %v9883_v13, %v3269_v44  ;;  %vm3272_vm8 = vweird.f32 %v9883_v13  ;;  %vm10000_vm9 = vcmp.eq.f32.partialorder %v3275_v8, 8.507059e+37  ;;  %v6642_v25 = vmul.f32 -1.442695, %v13140_v16  ;;  %2442 = vmatpush.bf16.msrb.mxu1 %v6257_v61 }
 0x2a4   :  { %v10005_v43 = vpop.eup %7562  ;;  %v10008_v47 = vmul.f32 %v3189_v62, %v13141_v1  ;;  %v3278_v8 = vor.u32 1.1754944e-38, %v3277_v33  ;;  %vm3286_vm11 = vweird.f32 %v9824_v52  ;;  %v6643_v9 = vmul.f32 -1.442695, %v13144_v36  ;;  %vm10035_vm13 = vmor %vm3271_vm6, %vm3272_vm8 }
 0x2a5   :  { %v3199_v5 = vsel %vm10014_vm10, %v9859_v12, %v3195_v49  ;;  %vm10023_vm12 = vcmp.eq.f32.partialorder %v3290_v18, 8.507059e+37  ;;  %v3293_v44 = vor.u32 1.1754944e-38, %v3292_v57  ;;  %v3367_v21 = vand.u32 2147483648, %v9881_v30  ;;  %v2133_v57 = vpop.f32.mrf.mxu2  ;;  %v2182_v18 = vpop.f32.mrf.mxu3  ;;  %2326 = vmatmul.bf16.gmra.mxu2 %v13149_v29  ;;  %2228 = vmatmul.bf16.gmra.mxu0 %v13149_v29 }
 0x2a6   :  { %7568 = vrcp.f32 %v9990_v28  ;;  %v10029_v14 = vpop.eup %7564  ;;  %v3285_v49 = vadd.f32 %v9898_v34, %v3284_v54  ;;  %vm3287_vm14 = vweird.f32 %v9898_v34  ;;  %v3358_v12 = vsub.f32 1.0, %v3357_v59  ;;  %2375 = vmatmul.bf16.gmra.mxu3 %v13153_v39 }
 0x2a7   :  { %7570 = vrcp.f32 %v9996_v7  ;;  %v3274_v11 = vsel %vm10035_vm13, %v9883_v13, %v3270_v58  ;;  %v3372_v6 = vmul.f32 %v10005_v43, %v9939_v41  ;;  %v2183_v32 = vadd.f32 %v2182_v18, %v2133_v57  ;;  %v2038_v13 = vpop.f32.mrf.mxu0  ;;  %v2087_v58 = vpop.f32.mrf.mxu1  ;;  %vm10058_vm0 = vmor %vm3286_vm11, %vm3287_vm14 }
 0x2a8   :  { %7572 = vpow2.f32 %v6642_v25  ;;  %v7567_v35 = vpop.eup %7566  ;;  %v3204_v59 = vsel %vm9978_vm7, %v9937_v37, %v3199_v5  ;;  %vm3361_vm15 = vweird.f32 %v9881_v30  ;;  %v3365_v61 = vand.u32 2147483647, %v9881_v30  ;;  %v7333_v25 = vld [vmem:[#allocation7 + $0x174] sm:$0xf0] }
 0x2a9   :  { %v3382_v54 = vand.u32 2147483648, %v9939_v41  ;;  %7574 = vpow2.f32 %v6643_v9  ;;  %v10064_v37 = vmul.f32 %v10029_v14, %v9962_v26  ;;  %v6648_v1 = vmul.f32 -1.442695, %v13152_v46  ;;  %2277 = vmatmul.bf16.gmra.mxu1 %v13153_v39 }
 0x2aa   :  { %v4581_v9 = vmul.f32 %v9648_v40, %v2183_v32  ;;  %v2088_v5 = vadd.f32 %v2087_v58, %v2038_v13  ;;  %v3279_v52 = vsel %vm10000_vm9, %v3278_v8, %v3274_v11  ;;  %v3289_v33 = vsel %vm10058_vm0, %v9898_v34, %v3285_v49  ;;  %v13158_v11 = vld [vmem:[#allocation73_spill] sm:$0xff]  ;;  %v6880_v58 = vld [vmem:[#allocation7 + $0x170] sm:$0xf] }
 0x2ab   :  { %v3359_v57 = vmul.f32 %v9964_v3, %v3358_v12  ;;  %v10076_v18 = vor.u32 1.1754944e-38, %v3367_v21  ;;  %v3373_v56 = vsub.f32 1.0, %v3372_v6  ;;  %v10080_v29 = vadd.f32 1.0, %v7567_v35 }
 0x2ac   :  { %v10078_v10 = vpop.eup %7568  ;;  %v10083_v45 = vmul.f32 %v9742_v2, %v2088_v5  ;;  %v10085_v40 = vpack.c.bf16 %v4581_v9, %v4575_v0  ;;  %v10090_v8 = vmul.f32 %v3204_v59, %v13067_v55  ;;  %vm3362_vm1 = vweird.f32 %v9964_v3  ;;  %v6944_v9 = vld [vmem:[#allocation7 + $0x1f0] sm:$0xf]  ;;  %v7349_v5 = vld [vmem:[#allocation7 + $0x1f4] sm:$0xf0] }
 0x2ad   :  { %v10087_v53 = vpop.eup %7570  ;;  %vm10093_vm2 = vcmp.eq.f32.partialorder %v3365_v61, 8.507059e+37  ;;  %v3380_v21 = vand.u32 2147483647, %v9939_v41  ;;  %v10098_v49 = vor.u32 1.1754944e-38, %v3382_v54  ;;  %v3448_v2 = vsub.f32 1.0, %v10064_v37  ;;  %v2136_v54 = vpop.f32.mrf.mxu2  ;;  %vm10125_vm4 = vmor %vm3361_vm15, %vm3362_vm1 }
 0x2ae   :  { %13154 = vst [vmem:[#allocation45_spill] sm:$0xff] %v10083_v45  ;;  %v7573_v12 = vpop.eup %7572  ;;  %v3455_v0 = vand.u32 2147483647, %v9962_v26  ;;  %7576 = vpow2.f32 %v6648_v1  ;;  %v6649_v6 = vmul.f32 -1.442695, %v13158_v11  ;;  %v10104_v32 = vmul.f32 %v3279_v52, %v9642_v63  ;;  %v2185_v13 = vpop.f32.mrf.mxu3 }
 0x2af   :  { %13155 = vst [vmem:[#allocation127_spill] sm:$0xff] %v10085_v40  ;;  %v7575_v55 = vpop.eup %7574  ;;  %v3294_v35 = vsel %vm10023_vm12, %v3293_v44, %v3289_v33  ;;  %v3360_v59 = vadd.f32 %v9964_v3, %v3359_v57  ;;  %v3462_v61 = vmul.f32 %v10078_v10, %v9990_v28  ;;  %v6752_v37 = vld [vmem:[#allocation7 + $0x70] sm:$0xf]  ;;  %v3374_v1 = vmul.f32 %v10005_v43, %v3373_v56  ;;  %v7301_v44 = vld [vmem:[#allocation7 + $0x74] sm:$0xf0] }
 0x2b0   :  { %vm3376_vm3 = vweird.f32 %v9939_v41  ;;  %7578 = vrcp.f32 %v10080_v29  ;;  %v2186_v63 = vadd.f32 %v2185_v13, %v2136_v54  ;;  %v6881_v62 = vor.u32 %v7333_v25, %v6880_v58  ;;  %v13159_v33 = vld [vmem:[#allocation66_spill] sm:$0xff]  ;;  %v13160_v57 = vld [vmem:[#allocation67_spill] sm:$0xff]  ;;  %v13164_v13 = vld [vmem:[#allocation69_spill] sm:$0xff] }
 0x2b1   :  { %v10115_v52 = vadd.f32 1.0, %v7573_v12  ;;  %v10119_v45 = vadd.f32 %v13160_v57, %v13159_v33  ;;  %v6753_v40 = vor.u32 %v7301_v44, %v6752_v37  ;;  %v6945_v39 = vor.u32 %v7349_v5, %v6944_v9  ;;  %v13163_v12 = vld [vmem:[#allocation68_spill] sm:$0xff]  ;;  %v13169_v57 = vld [vmem:[#allocation26_spill] sm:$0xff] }
 0x2b2   :  { %v10129_v54 = vadd.f32 1.0, %v7575_v55  ;;  %v10133_v58 = vadd.f32 %v13164_v13, %v13163_v12  ;;  %v4587_v25 = vmul.f32 %v9745_v42, %v2186_v63  ;;  %5224 = vmatpush.bf16.msra.mxu2 %v6881_v62  ;;  %v6817_v37 = vor.u32 %v7317_v31, %v6816_v50  ;;  %v13183_v31 = vld [vmem:[#allocation78_spill] sm:$0xff]  ;;  %v6872_v56 = vld [vmem:[#allocation7 + $0x160] sm:$0xf] }
 0x2b3   :  { %v3364_v44 = vsel %vm10125_vm4, %v9964_v3, %v3360_v59  ;;  %v3457_v30 = vand.u32 2147483648, %v9962_v26  ;;  %v3463_v9 = vsub.f32 1.0, %v3462_v61  ;;  %v3537_v5 = vmul.f32 %v10087_v53, %v9996_v7  ;;  %5126 = vmatpush.bf16.msra.mxu0 %v6753_v40  ;;  %5273 = vmatpush.bf16.msra.mxu3 %v6945_v39 }
 0x2b4   :  { %v7577_v55 = vpop.eup %7576  ;;  %v10143_v33 = vmul.f32 %v3294_v35, %v13075_v23  ;;  %vm3377_vm5 = vweird.f32 %v10005_v43  ;;  %vm10146_vm6 = vcmp.eq.f32.partialorder %v3380_v21, 8.507059e+37  ;;  %vm3451_vm7 = vweird.f32 %v9962_v26  ;;  %5175 = vmatpush.bf16.msra.mxu1 %v6817_v37 }
 0x2b5   :  { %7580 = vpow2.f32 %v6649_v6  ;;  %v3449_v42 = vmul.f32 %v10029_v14, %v3448_v2  ;;  %vm3466_vm8 = vweird.f32 %v9990_v28  ;;  %v3470_v50 = vand.u32 2147483647, %v9990_v28  ;;  %v2138_v63 = vpop.f32.mrf.mxu2  ;;  %2331 = vmatmul.bf16.gmra.mxu2 %v13169_v57  ;;  %vm10179_vm10 = vmor %vm3376_vm3, %vm3377_vm5  ;;  %2233 = vmatmul.bf16.gmra.mxu0 %v13169_v57  ;;  %v6808_v57 = vld [vmem:[#allocation7 + $0xe0] sm:$0xf] }
 0x2b6   :  { %7582 = vrcp.f32 %v10115_v52  ;;  %v6654_v23 = vmul.f32 -1.442695, %v10119_v45  ;;  %v10156_v3 = vpop.eup %7578  ;;  %v3369_v39 = vsel %vm10093_vm2, %v10076_v18, %v3364_v44  ;;  %v3375_v40 = vadd.f32 %v10005_v43, %v3374_v1  ;;  %v2187_v62 = vpop.f32.mrf.mxu3 }
 0x2b7   :  { %7584 = vrcp.f32 %v10129_v54  ;;  %v6655_v21 = vmul.f32 -1.442695, %v10133_v58  ;;  %vm10164_vm9 = vcmp.eq.f32.partialorder %v3455_v0, 8.507059e+37  ;;  %v3458_v6 = vor.u32 1.1754944e-38, %v3457_v30  ;;  %v13172_v30 = vld [vmem:[#allocation27_spill] sm:$0xff] }
 0x2b8   :  { %v3464_v35 = vmul.f32 %v10078_v10, %v3463_v9  ;;  %v3538_v59 = vsub.f32 1.0, %v3537_v5  ;;  %v10169_v61 = vadd.f32 1.0, %v7577_v55  ;;  %v3472_v18 = vand.u32 2147483648, %v9990_v28  ;;  %2380 = vmatmul.bf16.gmra.mxu3 %v13172_v30 }
 0x2b9   :  { %v3545_v34 = vand.u32 2147483647, %v9996_v7  ;;  %v3547_v1 = vand.u32 2147483648, %v9996_v7  ;;  %v2188_v0 = vadd.f32 %v2187_v62, %v2138_v63  ;;  %v3450_v12 = vadd.f32 %v10029_v14, %v3449_v42  ;;  %2282 = vmatmul.bf16.gmra.mxu1 %v13172_v30 }
 0x2ba   :  { %vm3452_vm11 = vweird.f32 %v10029_v14  ;;  %v3552_v13 = vmul.f32 %v10156_v3, %v10080_v29  ;;  %7586 = vpow2.f32 %v6654_v23  ;;  %v10188_v44 = vmul.f32 %v3369_v39, %v13090_v48 }
 0x2bb   :  { %v7581_v37 = vpop.eup %7580  ;;  %v3379_v41 = vsel %vm10179_vm10, %v10005_v43, %v3375_v40  ;;  %7588 = vpow2.f32 %v6655_v21  ;;  %v4593_v9 = vmul.f32 %v9819_v38, %v2188_v0  ;;  %v3465_v55 = vadd.f32 %v10078_v10, %v3464_v35  ;;  %vm10208_vm13 = vmor %vm3451_vm7, %vm3452_vm11  ;;  %v10216_v40 = vpop.f32.mrf.mxu0  ;;  %v7347_v43 = vld [vmem:[#allocation7 + $0x1e4] sm:$0xf0] }
 0x2bc   :  { %v10196_v5 = vpop.eup %7582  ;;  %vm3467_vm12 = vweird.f32 %v10078_v10  ;;  %v3539_v48 = vmul.f32 %v10087_v53, %v3538_v59  ;;  %7590 = vrcp.f32 %v10169_v61  ;;  %vm10212_vm14 = vcmp.eq.f32.partialorder %v3470_v50, 8.507059e+37  ;;  %13177 = vst [vmem:[#allocation61_spill] sm:$0xff] %v10216_v40 }
 0x2bd   :  { %v10202_v42 = vpop.eup %7584  ;;  %v3473_v23 = vor.u32 1.1754944e-38, %v3472_v18  ;;  %v3548_v39 = vor.u32 1.1754944e-38, %v3547_v1  ;;  %v10218_v21 = vpack.c.bf16 %v4593_v9, %v4587_v25  ;;  %v3384_v35 = vsel %vm10146_vm6, %v10098_v49, %v3379_v41  ;;  %vm10236_vm0 = vmor %vm3466_vm8, %vm3467_vm12 }
 0x2be   :  { %v3454_v26 = vsel %vm10208_vm13, %v10029_v14, %v3450_v12  ;;  %vm10226_vm15 = vcmp.eq.f32.partialorder %v3545_v34, 8.507059e+37  ;;  %v3553_v50 = vsub.f32 1.0, %v3552_v13  ;;  %v10230_v63 = vadd.f32 1.0, %v7581_v37  ;;  %v7331_v12 = vld [vmem:[#allocation7 + $0x164] sm:$0xf0] }
 0x2bf   :  { %13178 = vst [vmem:[#allocation62_spill] sm:$0xff] %v10218_v21  ;;  %vm3542_vm1 = vweird.f32 %v10087_v53  ;;  %v3560_v49 = vand.u32 2147483647, %v10080_v29  ;;  %v3562_v14 = vand.u32 2147483648, %v10080_v29  ;;  %v6660_v62 = vmul.f32 -1.442695, %v13183_v31 }
 0x2c0   :  { %v7587_v18 = vpop.eup %7586  ;;  %v3469_v34 = vsel %vm10236_vm0, %v10078_v10, %v3465_v55  ;;  %v3540_v1 = vadd.f32 %v10087_v53, %v3539_v48  ;;  %v3627_v28 = vmul.f32 %v10196_v5, %v10115_v52  ;;  %v3642_v0 = vmul.f32 %v10202_v42, %v10129_v54  ;;  %v6744_v13 = vld [vmem:[#allocation7 + $0x60] sm:$0xf]  ;;  %v7299_v55 = vld [vmem:[#allocation7 + $0x64] sm:$0xf0] }
 0x2c1   :  { %v7589_v37 = vpop.eup %7588  ;;  %v10254_v41 = vmul.f32 %v3384_v35, %v13103_v15  ;;  %v3459_v10 = vsel %vm10164_vm9, %v3458_v6, %v3454_v26  ;;  %vm3541_vm2 = vweird.f32 %v9996_v7  ;;  %v6873_v9 = vor.u32 %v7331_v12, %v6872_v56  ;;  %v6936_v48 = vld [vmem:[#allocation7 + $0x1e0] sm:$0xf]  ;;  %v7315_v15 = vld [vmem:[#allocation7 + $0xe4] sm:$0xf0]  ;;  %v10274_v35 = vpop.f32.mrf.mxu1 }
 0x2c2   :  { %v10259_v25 = vpop.eup %7590  ;;  %v3554_v21 = vmul.f32 %v10156_v3, %v3553_v50  ;;  %7592 = vrcp.f32 %v10230_v63  ;;  %v6745_v40 = vor.u32 %v7299_v55, %v6744_v13  ;;  %v6937_v30 = vor.u32 %v7347_v43, %v6936_v48  ;;  %vm10267_vm3 = vmor %vm3541_vm2, %vm3542_vm1  ;;  %13186 = vst [vmem:[#allocation51_spill] sm:$0xff] %v10274_v35  ;;  %v13192_v13 = vld [vmem:[#allocation75_spill] sm:$0xff] }
 0x2c3   :  { %v3474_v2 = vsel %vm10212_vm14, %v3473_v23, %v3469_v34  ;;  %vm3556_vm4 = vweird.f32 %v10080_v29  ;;  %v10272_v6 = vadd.f32 1.0, %v7587_v18  ;;  %5225 = vmatpush.bf16.msra.mxu2 %v6873_v9  ;;  %v6809_v26 = vor.u32 %v7315_v15, %v6808_v57  ;;  %v13195_v48 = vld [vmem:[#allocation79_spill] sm:$0xff] }
 0x2c4   :  { %v3544_v50 = vsel %vm10267_vm3, %v10087_v53, %v3540_v1  ;;  %vm10279_vm5 = vcmp.eq.f32.partialorder %v3560_v49, 8.507059e+37  ;;  %v3628_v23 = vsub.f32 1.0, %v3627_v28  ;;  %v3643_v34 = vsub.f32 1.0, %v3642_v0  ;;  %5127 = vmatpush.bf16.msra.mxu0 %v6745_v40  ;;  %5274 = vmatpush.bf16.msra.mxu3 %v6937_v30  ;;  %v13191_v0 = vld [vmem:[#allocation74_spill] sm:$0xff] }
 0x2c5   :  { %v10283_v56 = vadd.f32 1.0, %v7589_v37  ;;  %v10286_v18 = vmul.f32 %v3459_v10, %v13104_v20  ;;  %v3563_v12 = vor.u32 1.1754944e-38, %v3562_v14  ;;  %v3717_v57 = vmul.f32 %v10259_v25, %v10169_v61  ;;  %5176 = vmatpush.bf16.msra.mxu1 %v6809_v26  ;;  %v2199_v14 = vpop.f32.mrf.mxu0  ;;  %v13193_v10 = vld [vmem:[#allocation12_spill] sm:$0xff] }
 0x2c6   :  { %7594 = vpow2.f32 %v6660_v62  ;;  %v10291_v53 = vmul.f32 %v3474_v2, %v13113_v17  ;;  %v3555_v49 = vadd.f32 %v10156_v3, %v3554_v21  ;;  %vm3557_vm6 = vweird.f32 %v10156_v3  ;;  %2492 = vmatmul.bf16.vlgmr.msrb.gmra.mxu2 %v13193_v10  ;;  %v13198_v26 = vld [vmem:[#allocation76_spill] sm:$0xff]  ;;  %2394 = vmatmul.bf16.vlgmr.msrb.gmra.mxu0 %v13193_v10  ;;  %v6736_v10 = vld [vmem:[#allocation7 + $0x50] sm:$0xf] }
 0x2c7   :  { %v3637_v1 = vand.u32 2147483648, %v10115_v52  ;;  %v3549_v30 = vsel %vm10226_vm15, %v3548_v39, %v3544_v50  ;;  %v3635_v20 = vand.u32 2147483647, %v10115_v52  ;;  %v3652_v40 = vand.u32 2147483648, %v10129_v54  ;;  %vm10309_vm7 = vmor %vm3556_vm4, %vm3557_vm6  ;;  %v13199_v50 = vld [vmem:[#allocation77_spill] sm:$0xff] }
 0x2c8   :  { %7596 = vrcp.f32 %v10272_v6  ;;  %v10301_v62 = vpop.eup %7592  ;;  %v3629_v17 = vmul.f32 %v10196_v5, %v3628_v23  ;;  %v3644_v21 = vmul.f32 %v10202_v42, %v3643_v34  ;;  %v3650_v28 = vand.u32 2147483647, %v10129_v54  ;;  %v13201_v23 = vld [vmem:[#allocation13_spill] sm:$0xff]  ;;  %v2297_v34 = vpop.f32.mrf.mxu2 }
 0x2c9   :  { %7598 = vrcp.f32 %v10283_v56  ;;  %vm3631_vm8 = vweird.f32 %v10115_v52  ;;  %vm3646_vm9 = vweird.f32 %v10129_v54  ;;  %v3718_v59 = vsub.f32 1.0, %v3717_v57  ;;  %2541 = vmatmul.bf16.vlgmr.msrb.gmra.mxu3 %v13201_v23  ;;  %2443 = vmatmul.bf16.vlgmr.msrb.gmra.mxu1 %v13201_v23 }
 0x2ca   :  { %v10317_v37 = vadd.f32 %v13192_v13, %v13191_v0  ;;  %v10321_v9 = vmul.f32 %v3549_v30, %v13116_v22  ;;  %v3559_v29 = vsel %vm10309_vm7, %v10156_v3, %v3555_v49  ;;  %v10326_v55 = vor.u32 1.1754944e-38, %v3637_v1  ;;  %v2248_v0 = vpop.f32.mrf.mxu1  ;;  %v13212_v1 = vld [vmem:[#allocation82_spill] sm:$0xff] }
 0x2cb   :  { %v6661_v43 = vmul.f32 -1.442695, %v13195_v48  ;;  %vm3632_vm10 = vweird.f32 %v10196_v5  ;;  %vm10330_vm11 = vcmp.eq.f32.partialorder %v3635_v20, 8.507059e+37  ;;  %v10334_v7 = vor.u32 1.1754944e-38, %v3652_v40 }
 0x2cc   :  { %13194 = vst [vmem:[#allocation52_spill] sm:$0xff] %v10321_v9  ;;  %v7595_v15 = vpop.eup %7594  ;;  %v10338_v22 = vmul.f32 %v10301_v62, %v10230_v63  ;;  %v10342_v3 = vadd.f32 %v13199_v50, %v13198_v26  ;;  %v3630_v57 = vadd.f32 %v10196_v5, %v3629_v17  ;;  %v3645_v49 = vadd.f32 %v10202_v42, %v3644_v21  ;;  %vm10368_vm15 = vmor %vm3631_vm8, %vm3632_vm10 }
 0x2cd   :  { %vm3647_vm12 = vweird.f32 %v10202_v42  ;;  %vm10349_vm13 = vcmp.eq.f32.partialorder %v3650_v28, 8.507059e+37  ;;  %vm3721_vm14 = vweird.f32 %v10169_v61  ;;  %v3725_v30 = vand.u32 2147483647, %v10169_v61  ;;  %v2346_v28 = vpop.f32.mrf.mxu3  ;;  %v2201_v50 = vpop.f32.mrf.mxu0 }
 0x2ce   :  { %13200 = vst [vmem:[#allocation63_spill] sm:$0xff] %v10342_v3  ;;  %v10355_v20 = vpop.eup %7596  ;;  %v3564_v40 = vsel %vm10279_vm5, %v3563_v12, %v3559_v29  ;;  %v3719_v39 = vmul.f32 %v10259_v25, %v3718_v59  ;;  %v3727_v17 = vand.u32 2147483648, %v10169_v61  ;;  %v6666_v21 = vmul.f32 -1.442695, %v10317_v37  ;;  %vm10378_vm0 = vmor %vm3646_vm9, %vm3647_vm12  ;;  %v7313_v29 = vld [vmem:[#allocation7 + $0xd4] sm:$0xf0] }
 0x2cf   :  { %v10362_v13 = vpop.eup %7598  ;;  %v10372_v38 = vadd.f32 1.0, %v7595_v15  ;;  %7600 = vpow2.f32 %v6661_v43  ;;  %v2249_v12 = vadd.f32 %v2248_v0, %v2199_v14  ;;  %v2347_v59 = vadd.f32 %v2346_v28, %v2297_v34  ;;  %v6864_v0 = vld [vmem:[#allocation7 + $0x150] sm:$0xf]  ;;  %v7329_v28 = vld [vmem:[#allocation7 + $0x154] sm:$0xf0] }
 0x2d0   :  { %vm3722_vm1 = vweird.f32 %v10259_v25  ;;  %v3733_v52 = vsub.f32 1.0, %v10338_v22  ;;  %v3742_v26 = vand.u32 2147483648, %v10230_v63  ;;  %v6667_v15 = vmul.f32 -1.442695, %v10342_v3  ;;  %v2299_v9 = vpop.f32.mrf.mxu2 }
 0x2d1   :  { %v3634_v14 = vsel %vm10368_vm15, %v10196_v5, %v3630_v57  ;;  %v3649_v54 = vsel %vm10378_vm0, %v10202_v42, %v3645_v49  ;;  %vm10392_vm2 = vcmp.eq.f32.partialorder %v3725_v30, 8.507059e+37  ;;  %v10397_v34 = vmul.f32 %v9864_v24, %v2249_v12  ;;  %v7297_v49 = vld [vmem:[#allocation7 + $0x54] sm:$0xf0]  ;;  %v6928_v30 = vld [vmem:[#allocation7 + $0x1d0] sm:$0xf]  ;;  %vm10430_vm4 = vmor %vm3721_vm14, %vm3722_vm1 }
 0x2d2   :  { %v10401_v22 = vmul.f32 %v9901_v19, %v2347_v59  ;;  %v3807_v5 = vmul.f32 %v10355_v20, %v10272_v6  ;;  %v3822_v42 = vmul.f32 %v10362_v13, %v10283_v56  ;;  %7602 = vpow2.f32 %v6666_v21  ;;  %v7345_v24 = vld [vmem:[#allocation7 + $0x1d4] sm:$0xf0]  ;;  %v6800_v59 = vld [vmem:[#allocation7 + $0xd0] sm:$0xf] }
 0x2d3   :  { %v6865_v57 = vor.u32 %v7329_v28, %v6864_v0  ;;  %v3720_v12 = vadd.f32 %v10259_v25, %v3719_v39  ;;  %7604 = vrcp.f32 %v10372_v38  ;;  %v6737_v19 = vor.u32 %v7297_v49, %v6736_v10 }
 0x2d4   :  { %v6929_v23 = vor.u32 %v7345_v24, %v6928_v30  ;;  %v10410_v35 = vmul.f32 %v3564_v40, %v13131_v27  ;;  %v3728_v3 = vor.u32 1.1754944e-38, %v3727_v17  ;;  %7606 = vpow2.f32 %v6667_v15 }
 0x2d5   :  { %5226 = vmatpush.bf16.msra.mxu2 %v6865_v57  ;;  %v6801_v21 = vor.u32 %v7313_v29, %v6800_v59  ;;  %v7601_v0 = vpop.eup %7600  ;;  %v10415_v28 = vsel %vm10330_vm11, %v10326_v55, %v3634_v14  ;;  %vm3736_vm3 = vweird.f32 %v10230_v63  ;;  %v3740_v39 = vand.u32 2147483647, %v10230_v63  ;;  %5128 = vmatpush.bf16.msra.mxu0 %v6737_v19  ;;  %v2348_v15 = vpop.f32.mrf.mxu3  ;;  %v13219_v55 = vld [vmem:[#allocation81_spill] sm:$0xff]  ;;  %v13236_v63 = vld [vmem:[#allocation87_spill] sm:$0xff] }
 0x2d6   :  { %v10419_v10 = vor.u32 1.1754944e-38, %v3742_v26  ;;  %5275 = vmatpush.bf16.msra.mxu3 %v6929_v23  ;;  %v10424_v27 = vsel %vm10349_vm13, %v10334_v7, %v3649_v54  ;;  %v3734_v2 = vmul.f32 %v10301_v62, %v3733_v52  ;;  %v3808_v40 = vsub.f32 1.0, %v3807_v5  ;;  %v2250_v26 = vpop.f32.mrf.mxu1 }
 0x2d7   :  { %v3823_v17 = vsub.f32 1.0, %v3822_v42  ;;  %5177 = vmatpush.bf16.msra.mxu1 %v6801_v21  ;;  %v3724_v7 = vsel %vm10430_vm4, %v10259_v25, %v3720_v12  ;;  %v6672_v14 = vmul.f32 -1.442695, %v13212_v1  ;;  %v2251_v54 = vadd.f32 %v2250_v26, %v2201_v50  ;;  %v13215_v21 = vld [vmem:[#allocation14_spill] sm:$0xff] }
 0x2d8   :  { %v2349_v57 = vadd.f32 %v2348_v15, %v2299_v9  ;;  %v7603_v61 = vpop.eup %7602  ;;  %vm3811_vm5 = vweird.f32 %v10272_v6  ;;  %v3815_v49 = vand.u32 2147483647, %v10272_v6  ;;  %v3817_v52 = vand.u32 2147483648, %v10272_v6  ;;  %v2204_v9 = vpop.f32.mrf.mxu0  ;;  %2497 = vmatmul.bf16.gmra.mxu2 %v13215_v21  ;;  %2399 = vmatmul.bf16.gmra.mxu0 %v13215_v21 }
 0x2d9   :  { %v10442_v5 = vadd.f32 1.0, %v7601_v0  ;;  %v10444_v42 = vpop.eup %7604  ;;  %vm3737_vm6 = vweird.f32 %v10301_v62  ;;  %v3830_v30 = vand.u32 2147483647, %v10283_v56  ;;  %v4510_v25 = vmul.f32 %v9934_v4, %v2251_v54  ;;  %v2302_v15 = vpop.f32.mrf.mxu2 }
 0x2da   :  { %v4511_v50 = vmul.f32 %v9970_v51, %v2349_v57  ;;  %v7607_v24 = vpop.eup %7606  ;;  %v3729_v12 = vsel %vm10392_vm2, %v3728_v3, %v3724_v7  ;;  %v3735_v19 = vadd.f32 %v10301_v62, %v3734_v2  ;;  %vm10453_vm7 = vcmp.eq.f32.partialorder %v3740_v39, 8.507059e+37  ;;  %v13218_v39 = vld [vmem:[#allocation80_spill] sm:$0xff]  ;;  %vm10483_vm8 = vmor %vm3736_vm3, %vm3737_vm6 }
 0x2db   :  { %v3809_v59 = vmul.f32 %v10355_v20, %v3808_v40  ;;  %v3824_v29 = vmul.f32 %v10362_v13, %v3823_v17  ;;  %v10460_v4 = vadd.f32 1.0, %v7603_v61  ;;  %7608 = vpow2.f32 %v6672_v14  ;;  %v13220_v40 = vld [vmem:[#allocation15_spill] sm:$0xff] }
 0x2dc   :  { %v10463_v51 = vpack.c.bf16 %v4510_v25, %v10397_v34  ;;  %v10466_v3 = vpack.c.bf16 %v4511_v50, %v10401_v22  ;;  %v10468_v43 = vor.u32 1.1754944e-38, %v3817_v52  ;;  %v3897_v0 = vmul.f32 %v10444_v42, %v10372_v38  ;;  %2546 = vmatmul.bf16.gmra.mxu3 %v13220_v40  ;;  %2448 = vmatmul.bf16.gmra.mxu1 %v13220_v40  ;;  %v6856_v34 = vld [vmem:[#allocation7 + $0x140] sm:$0xf] }
 0x2dd   :  { %7610 = vrcp.f32 %v10442_v5  ;;  %v10475_v2 = vadd.f32 %v13219_v55, %v13218_v39  ;;  %vm3812_vm9 = vweird.f32 %v10355_v20  ;;  %v3832_v22 = vand.u32 2147483648, %v10283_v56 }
 0x2de   :  { %13216 = vst [vmem:[#allocation64_spill] sm:$0xff] %v10463_v51  ;;  %v10490_v26 = vadd.f32 1.0, %v7607_v24  ;;  %v3739_v7 = vsel %vm10483_vm8, %v10301_v62, %v3735_v19  ;;  %v10496_v14 = vadd.f32 %v10355_v20, %v3809_v59  ;;  %vm10498_vm10 = vcmp.eq.f32.partialorder %v3815_v49, 8.507059e+37  ;;  %v2253_v61 = vpop.f32.mrf.mxu1  ;;  %v13227_v62 = vld [vmem:[#allocation85_spill] sm:$0xff]  ;;  %v2351_v49 = vpop.f32.mrf.mxu3  ;;  %vm10515_vm13 = vmor %vm3811_vm5, %vm3812_vm9  ;;  %v13230_v59 = vld [vmem:[#allocation86_spill] sm:$0xff] }
 0x2df   :  { %13217 = vst [vmem:[#allocation53_spill] sm:$0xff] %v10466_v3  ;;  %vm3827_vm11 = vweird.f32 %v10362_v13  ;;  %vm10503_vm12 = vcmp.eq.f32.partialorder %v3830_v30, 8.507059e+37  ;;  %v3907_v57 = vand.u32 2147483648, %v10372_v38  ;;  %v3825_v52 = vadd.f32 %v10362_v13, %v3824_v29 }
 0x2e0   :  { %7612 = vrcp.f32 %v10460_v4  ;;  %v6673_v25 = vmul.f32 -1.442695, %v13227_v62  ;;  %v2254_v50 = vadd.f32 %v2253_v61, %v2204_v9  ;;  %v3898_v24 = vsub.f32 1.0, %v3897_v0  ;;  %v2206_v0 = vpop.f32.mrf.mxu0  ;;  %v7327_v61 = vld [vmem:[#allocation7 + $0x144] sm:$0xf0] }
 0x2e1   :  { %v6678_v19 = vmul.f32 -1.442695, %v10475_v2  ;;  %v6679_v21 = vmul.f32 -1.442695, %v13230_v59  ;;  %v2352_v29 = vadd.f32 %v2351_v49, %v2302_v15  ;;  %v7609_v39 = vpop.eup %7608  ;;  %v10523_v55 = vmul.f32 %v10415_v28, %v13140_v16  ;;  %v6728_v15 = vld [vmem:[#allocation7 + $0x40] sm:$0xf] }
 0x2e2   :  { %v10527_v9 = vmul.f32 %v10424_v27, %v13144_v36  ;;  %7614 = vrcp.f32 %v10490_v26  ;;  %v10531_v6 = vmul.f32 %v10008_v47, %v2254_v50  ;;  %v10537_v16 = vmul.f32 %v3729_v12, %v13152_v46  ;;  %v7295_v27 = vld [vmem:[#allocation7 + $0x44] sm:$0xf0]  ;;  %v6920_v47 = vld [vmem:[#allocation7 + $0x1c0] sm:$0xf] }
 0x2e3   :  { %v10534_v49 = vpop.eup %7610  ;;  %vm3826_vm14 = vweird.f32 %v10283_v56  ;;  %v10541_v36 = vmul.f32 %v10090_v8, %v2352_v29  ;;  %v6857_v28 = vor.u32 %v7327_v61, %v6856_v34  ;;  %v7343_v50 = vld [vmem:[#allocation7 + $0x1c4] sm:$0xf0]  ;;  %v3744_v40 = vsel %vm10453_vm7, %v10419_v10, %v3739_v7  ;;  %v6792_v12 = vld [vmem:[#allocation7 + $0xc0] sm:$0xf] }
 0x2e4   :  { %vm10548_vm15 = vmor %vm3826_vm14, %vm3827_vm11  ;;  %7616 = vpow2.f32 %v6673_v25  ;;  %v6729_v46 = vor.u32 %v7295_v27, %v6728_v15  ;;  %v6921_v56 = vor.u32 %v7343_v50, %v6920_v47  ;;  %v7311_v8 = vld [vmem:[#allocation7 + $0xc4] sm:$0xf0]  ;;  %v3814_v29 = vsel %vm10515_vm13, %v10355_v20, %v10496_v14  ;;  %v2304_v27 = vpop.f32.mrf.mxu2 }
 0x2e5   :  { %v3829_v10 = vsel %vm10548_vm15, %v10362_v13, %v3825_v52  ;;  %v10559_v23 = vadd.f32 1.0, %v7609_v39  ;;  %5227 = vmatpush.bf16.msra.mxu2 %v6857_v28  ;;  %v6793_v7 = vor.u32 %v7311_v8, %v6792_v12  ;;  %v3833_v25 = vor.u32 1.1754944e-38, %v3832_v22  ;;  %v13237_v8 = vld [vmem:[#allocation16_spill] sm:$0xff] }
 0x2e6   :  { %v10561_v34 = vpop.eup %7612  ;;  %v3899_v61 = vmul.f32 %v10444_v42, %v3898_v24  ;;  %v3912_v15 = vmul.f32 %v10534_v49, %v10442_v5  ;;  %7618 = vpow2.f32 %v6678_v19  ;;  %5129 = vmatpush.bf16.msra.mxu0 %v6729_v46  ;;  %5276 = vmatpush.bf16.msra.mxu3 %v6921_v56  ;;  %v10567_v20 = vmul.f32 %v3744_v40, %v13158_v11  ;;  %v2255_v17 = vpop.f32.mrf.mxu1 }
 0x2e7   :  { %vm3901_vm0 = vweird.f32 %v10372_v38  ;;  %v10570_v13 = vor.u32 1.1754944e-38, %v3907_v57  ;;  %7620 = vpow2.f32 %v6679_v21  ;;  %5178 = vmatpush.bf16.msra.mxu1 %v6793_v7  ;;  %v3819_v14 = vsel %vm10498_vm10, %v10468_v43, %v3814_v29  ;;  %v2353_v24 = vpop.f32.mrf.mxu3 }
 0x2e8   :  { %v10572_v22 = vpop.eup %7614  ;;  %v3834_v52 = vsel %vm10503_vm12, %v3833_v25, %v3829_v10  ;;  %v3922_v30 = vand.u32 2147483648, %v10442_v5  ;;  %v2256_v11 = vadd.f32 %v2255_v17, %v2206_v0  ;;  %v13233_v19 = vand.u32 2147483647, %v10372_v38  ;;  %v2209_v50 = vpop.f32.mrf.mxu0  ;;  %2502 = vmatmul.bf16.gmra.mxu2 %v13237_v8  ;;  %2404 = vmatmul.bf16.gmra.mxu0 %v13237_v8 }
 0x2e9   :  { %v3987_v21 = vmul.f32 %v10561_v34, %v10460_v4  ;;  %7622 = vrcp.f32 %v10559_v23  ;;  %v6684_v43 = vmul.f32 -1.442695, %v13236_v63  ;;  %v2354_v39 = vadd.f32 %v2353_v24, %v2304_v27 }
 0x2ea   :  { %vm10582_vm1 = vcmp.eq.f32.partialorder %v13233_v19, 8.507059e+37  ;;  %v7617_v54 = vpop.eup %7616  ;;  %v3900_v28 = vadd.f32 %v10444_v42, %v3899_v61  ;;  %vm3902_vm2 = vweird.f32 %v10444_v42  ;;  %v3913_v0 = vsub.f32 1.0, %v3912_v15 }
 0x2eb   :  { %v4522_v47 = vmul.f32 %v10104_v32, %v2256_v11  ;;  %v3920_v40 = vand.u32 2147483647, %v10442_v5  ;;  %v3997_v46 = vand.u32 2147483648, %v10460_v4  ;;  %v4002_v56 = vmul.f32 %v10572_v22, %v10490_v26  ;;  %vm10615_vm4 = vmor %vm3901_vm0, %vm3902_vm2 }
 0x2ec   :  { %v4523_v12 = vmul.f32 %v10143_v33, %v2354_v39  ;;  %v7619_v29 = vpop.eup %7618  ;;  %v10600_v10 = vmul.f32 %v3819_v14, %v10119_v45  ;;  %v10603_v7 = vmul.f32 %v3834_v52, %v10133_v58  ;;  %vm3916_vm3 = vweird.f32 %v10442_v5  ;;  %v13241_v58 = vld [vmem:[#allocation17_spill] sm:$0xff]  ;;  %v2307_v14 = vpop.f32.mrf.mxu2  ;;  %v13245_v39 = vld [vmem:[#allocation83_spill] sm:$0xff] }
 0x2ed   :  { %v10606_v32 = vor.u32 1.1754944e-38, %v3922_v30  ;;  %v10609_v25 = vpack.c.bf16 %v4522_v47, %v10531_v6  ;;  %v7621_v61 = vpop.eup %7620  ;;  %v3988_v45 = vsub.f32 1.0, %v3987_v21  ;;  %v10619_v15 = vadd.f32 1.0, %v7617_v54  ;;  %2551 = vmatmul.bf16.gmra.mxu3 %v13241_v58  ;;  %v13246_v54 = vld [vmem:[#allocation84_spill] sm:$0xff]  ;;  %2453 = vmatmul.bf16.gmra.mxu1 %v13241_v58  ;;  %v7341_v58 = vld [vmem:[#allocation7 + $0x1b4] sm:$0xf0] }
 0x2ee   :  { %7624 = vpow2.f32 %v6684_v43  ;;  %v10624_v6 = vpack.c.bf16 %v4523_v12, %v10541_v36  ;;  %v3904_v27 = vsel %vm10615_vm4, %v10444_v42, %v3900_v28  ;;  %v3914_v38 = vmul.f32 %v10534_v49, %v3913_v0  ;;  %v2258_v19 = vpop.f32.mrf.mxu1 }
 0x2ef   :  { %13238 = vst [vmem:[#allocation113_spill] sm:$0xff] %v10609_v25  ;;  %vm3917_vm5 = vweird.f32 %v10534_v49  ;;  %v3995_v17 = vand.u32 2147483647, %v10460_v4  ;;  %v10632_v52 = vpop.eup %7622  ;;  %vm3991_vm6 = vweird.f32 %v10460_v4  ;;  %v10635_v30 = vor.u32 1.1754944e-38, %v3997_v46  ;;  %v2356_v47 = vpop.f32.mrf.mxu3  ;;  %v7309_v25 = vld [vmem:[#allocation7 + $0xb4] sm:$0xf0] }
 0x2f0   :  { %13242 = vst [vmem:[#allocation48_spill] sm:$0xff] %v10624_v6  ;;  %v4003_v11 = vsub.f32 1.0, %v4002_v56  ;;  %v4010_v36 = vand.u32 2147483647, %v10490_v26  ;;  %v10638_v24 = vadd.f32 1.0, %v7619_v29  ;;  %vm10640_vm7 = vcmp.eq.f32.partialorder %v3920_v40, 8.507059e+37  ;;  %v2211_v33 = vpop.f32.mrf.mxu0  ;;  %vm10683_vm10 = vmor %vm3916_vm3, %vm3917_vm5 }
 0x2f1   :  { %v4012_v21 = vand.u32 2147483648, %v10490_v26  ;;  %v10645_v43 = vadd.f32 1.0, %v7621_v61  ;;  %v10649_v28 = vadd.f32 %v13246_v54, %v13245_v39  ;;  %v2259_v0 = vadd.f32 %v2258_v19, %v2209_v50  ;;  %v13247_v56 = vld [vmem:[#allocation90_spill] sm:$0xff]  ;;  %v7325_v19 = vld [vmem:[#allocation7 + $0x134] sm:$0xf0] }
 0x2f2   :  { %v3989_v46 = vmul.f32 %v10561_v34, %v3988_v45  ;;  %7626 = vrcp.f32 %v10619_v15  ;;  %v6685_v12 = vmul.f32 -1.442695, %v13247_v56  ;;  %v2357_v40 = vadd.f32 %v2356_v47, %v2307_v14  ;;  %v6848_v45 = vld [vmem:[#allocation7 + $0x130] sm:$0xf] }
 0x2f3   :  { %v3909_v8 = vsel %vm10582_vm1, %v10570_v13, %v3904_v27  ;;  %v3915_v29 = vadd.f32 %v10534_v49, %v3914_v38  ;;  %vm4006_vm8 = vweird.f32 %v10490_v26  ;;  %v4077_v61 = vmul.f32 %v10632_v52, %v10559_v23  ;;  %v6720_v14 = vld [vmem:[#allocation7 + $0x30] sm:$0xf]  ;;  %v7293_v38 = vld [vmem:[#allocation7 + $0x34] sm:$0xf0] }
 0x2f4   :  { %v10662_v50 = vmul.f32 %v10188_v44, %v2259_v0  ;;  %v7625_v39 = vpop.eup %7624  ;;  %vm10665_vm9 = vcmp.eq.f32.partialorder %v3995_v17, 8.507059e+37  ;;  %v4004_v13 = vmul.f32 %v10572_v22, %v4003_v11  ;;  %7628 = vrcp.f32 %v10638_v24  ;;  %v6912_v54 = vld [vmem:[#allocation7 + $0x1b0] sm:$0xf] }
 0x2f5   :  { %v10672_v27 = vmul.f32 %v10254_v41, %v2357_v40  ;;  %v6849_v44 = vor.u32 %v7325_v19, %v6848_v45  ;;  %7630 = vrcp.f32 %v10645_v43  ;;  %v6690_v0 = vmul.f32 -1.442695, %v10649_v28  ;;  %v6784_v6 = vld [vmem:[#allocation7 + $0xb0] sm:$0xf]  ;;  %v2309_v19 = vpop.f32.mrf.mxu2 }
 0x2f6   :  { %v6721_v47 = vor.u32 %v7293_v38, %v6720_v14  ;;  %v6913_v17 = vor.u32 %v7341_v58, %v6912_v54  ;;  %v10677_v3 = vmul.f32 %v3909_v8, %v13183_v31  ;;  %v3990_v11 = vadd.f32 %v10561_v34, %v3989_v46  ;;  %v2260_v38 = vpop.f32.mrf.mxu1 }
 0x2f7   :  { %vm3992_vm11 = vweird.f32 %v10561_v34  ;;  %5228 = vmatpush.bf16.msra.mxu2 %v6849_v44  ;;  %v6785_v40 = vor.u32 %v7309_v25, %v6784_v6  ;;  %v3919_v45 = vsel %vm10683_vm10, %v10534_v49, %v3915_v29  ;;  %vm10692_vm12 = vcmp.eq.f32.partialorder %v4010_v36, 8.507059e+37  ;;  %v13254_v25 = vld [vmem:[#allocation91_spill] sm:$0xff]  ;;  %v2358_v29 = vpop.f32.mrf.mxu3 }
 0x2f8   :  { %v4078_v8 = vsub.f32 1.0, %v4077_v61  ;;  %v10696_v5 = vadd.f32 1.0, %v7625_v39  ;;  %5130 = vmatpush.bf16.msra.mxu0 %v6721_v47  ;;  %5277 = vmatpush.bf16.msra.mxu3 %v6913_v17  ;;  %v10698_v14 = vpop.eup %7626  ;;  %v4013_v46 = vor.u32 1.1754944e-38, %v4012_v21  ;;  %v4085_v44 = vand.u32 2147483647, %v10559_v23  ;;  %vm10706_vm13 = vmor %vm3991_vm6, %vm3992_vm11  ;;  %v2214_v42 = vpop.f32.mrf.mxu0 }
 0x2f9   :  { %7632 = vpow2.f32 %v6685_v12  ;;  %v6691_v6 = vmul.f32 -1.442695, %v13254_v25  ;;  %5179 = vmatpush.bf16.msra.mxu1 %v6785_v40  ;;  %v4005_v36 = vadd.f32 %v10572_v22, %v4004_v13  ;;  %vm4007_vm14 = vweird.f32 %v10572_v22  ;;  %2507 = vmatmul.bf16.gmra.mxu2 %v13061_v60 }
 0x2fa   :  { %7634 = vpow2.f32 %v6690_v0  ;;  %v2261_v21 = vadd.f32 %v2260_v38, %v2211_v33  ;;  %v10712_v12 = vpop.eup %7628  ;;  %v3924_v61 = vsel %vm10640_vm7, %v10606_v32, %v3919_v45  ;;  %v3994_v4 = vsel %vm10706_vm13, %v10561_v34, %v3990_v11  ;;  %vm10732_vm15 = vmor %vm4006_vm8, %vm4007_vm14  ;;  %2409 = vmatmul.bf16.gmra.mxu0 %v13061_v60 }
 0x2fb   :  { %v4087_v39 = vand.u32 2147483648, %v10559_v23  ;;  %v2359_v54 = vadd.f32 %v2358_v29, %v2309_v19  ;;  %v10721_v58 = vpop.eup %7630  ;;  %v4079_v13 = vmul.f32 %v10632_v52, %v4078_v8  ;;  %v4092_v33 = vmul.f32 %v10698_v14, %v10619_v15 }
 0x2fc   :  { %7636 = vrcp.f32 %v10696_v5  ;;  %v4534_v0 = vmul.f32 %v10286_v18, %v2261_v21  ;;  %vm4081_vm0 = vweird.f32 %v10559_v23  ;;  %v4102_v32 = vand.u32 2147483648, %v10619_v15 }
 0x2fd   :  { %7638 = vpow2.f32 %v6691_v6  ;;  %v4535_v47 = vmul.f32 %v10291_v53, %v2359_v54  ;;  %v3999_v18 = vsel %vm10665_vm9, %v10635_v30, %v3994_v4  ;;  %v4009_v26 = vsel %vm10732_vm15, %v10572_v22, %v4005_v36  ;;  %v13262_v22 = vld [vmem:[#allocation19_spill] sm:$0xff]  ;;  %v2312_v6 = vpop.f32.mrf.mxu2 }
 0x2fe   :  { %vm10746_vm1 = vcmp.eq.f32.partialorder %v4085_v44, 8.507059e+37  ;;  %v10752_v41 = vmul.f32 %v10712_v12, %v10638_v24  ;;  %v10755_v53 = vpack.c.bf16 %v4534_v0, %v10662_v50  ;;  %v10758_v40 = vmul.f32 %v3924_v61, %v13195_v48  ;;  %2556 = vmatmul.bf16.gmra.mxu3 %v13262_v22  ;;  %v13264_v48 = vld [vmem:[#allocation92_spill] sm:$0xff]  ;;  %2458 = vmatmul.bf16.gmra.mxu1 %v13262_v22 }
 0x2ff   :  { %v7633_v11 = vpop.eup %7632  ;;  %v4088_v30 = vor.u32 1.1754944e-38, %v4087_v39  ;;  %v10762_v57 = vmul.f32 %v10721_v58, %v10645_v43  ;;  %v10767_v45 = vpack.c.bf16 %v4535_v47, %v10672_v27  ;;  %v4080_v50 = vadd.f32 %v10632_v52, %v4079_v13  ;;  %v2263_v27 = vpop.f32.mrf.mxu1 }
 0x300   :  { %13261 = vst [vmem:[#allocation118_spill] sm:$0xff] %v10755_v53  ;;  %v7635_v8 = vpop.eup %7634  ;;  %vm4082_vm2 = vweird.f32 %v10632_v52  ;;  %v4093_v19 = vsub.f32 1.0, %v4092_v33  ;;  %v6602_v44 = vmul.f32 -1.442695, %v13264_v48  ;;  %v10773_v38 = vmul.f32 %v3999_v18, %v10317_v37  ;;  %v2361_v39 = vpop.f32.mrf.mxu3  ;;  %v6840_v18 = vld [vmem:[#allocation7 + $0x120] sm:$0xf] }
 0x301   :  { %13263 = vst [vmem:[#allocation65_spill] sm:$0xff] %v10767_v45  ;;  %v4014_v60 = vsel %vm10692_vm12, %v4013_v46, %v4009_v26  ;;  %v4100_v49 = vand.u32 2147483647, %v10619_v15  ;;  %v10778_v36 = vor.u32 1.1754944e-38, %v4102_v32  ;;  %vm4096_vm3 = vweird.f32 %v10619_v15  ;;  %vm10790_vm4 = vmor %vm4081_vm0, %vm4082_vm2  ;;  %v13267_v32 = vld [vmem:[#allocation52_spill] sm:$0xff]  ;;  %v2216_v47 = vpop.f32.mrf.mxu0 }
 0x302   :  { %v10780_v21 = vpop.eup %7636  ;;  %v4168_v29 = vsub.f32 1.0, %v10752_v41  ;;  %v4175_v61 = vand.u32 2147483647, %v10638_v24  ;;  %v4177_v4 = vand.u32 2147483648, %v10638_v24  ;;  %v2264_v37 = vadd.f32 %v2263_v27, %v2214_v42  ;;  %v7323_v26 = vld [vmem:[#allocation7 + $0x124] sm:$0xf0] }
 0x303   :  { %v7639_v54 = vpop.eup %7638  ;;  %v4183_v46 = vsub.f32 1.0, %v10762_v57  ;;  %v10795_v13 = vadd.f32 1.0, %v7633_v11  ;;  %v10797_v33 = vadd.f32 1.0, %v7635_v8  ;;  %v2362_v0 = vadd.f32 %v2361_v39, %v2312_v6  ;;  %v6712_v41 = vld [vmem:[#allocation7 + $0x20] sm:$0xf]  ;;  %v13268_v11 = vld [vmem:[#allocation63_spill] sm:$0xff] }
 0x304   :  { %v4084_v42 = vsel %vm10790_vm4, %v10632_v52, %v4080_v50  ;;  %v4094_v34 = vmul.f32 %v10698_v14, %v4093_v19  ;;  %7640 = vpow2.f32 %v6602_v44  ;;  %v10804_v23 = vmul.f32 %v13267_v32, %v2264_v37  ;;  %v7291_v19 = vld [vmem:[#allocation7 + $0x24] sm:$0xf0]  ;;  %v6904_v44 = vld [vmem:[#allocation7 + $0x1a0] sm:$0xf]  ;;  %v7072_v45 = vld [vmem:[#allocation7 + $0x2f0] sm:$0xf] }
 0x305   :  { %v10808_v57 = vmul.f32 %v4014_v60, %v13268_v11  ;;  %v4257_v8 = vmul.f32 %v10780_v21, %v10696_v5  ;;  %v10813_v52 = vmul.f32 %v10410_v35, %v2362_v0  ;;  %v6841_v50 = vor.u32 %v7323_v26, %v6840_v18  ;;  %v7339_v6 = vld [vmem:[#allocation7 + $0x1a4] sm:$0xf0]  ;;  %v6776_v60 = vld [vmem:[#allocation7 + $0xa0] sm:$0xf]  ;;  %v2314_v17 = vpop.f32.mrf.mxu2  ;;  %v7381_v53 = vld [vmem:[#allocation7 + $0x2f4] sm:$0xf0] }
 0x306   :  { %vm4097_vm5 = vweird.f32 %v10698_v14  ;;  %vm4171_vm6 = vweird.f32 %v10638_v24  ;;  %v10817_v22 = vadd.f32 1.0, %v7639_v54  ;;  %v6713_v27 = vor.u32 %v7291_v19, %v6712_v41  ;;  %v7307_v39 = vld [vmem:[#allocation7 + $0xa4] sm:$0xf0] }
 0x307   :  { %v6905_v37 = vor.u32 %v7339_v6, %v6904_v44  ;;  %v10821_v31 = vsel %vm10746_vm1, %v4088_v30, %v4084_v42  ;;  %vm10823_vm7 = vcmp.eq.f32.partialorder %v4100_v49, 8.507059e+37  ;;  %vm4186_vm8 = vweird.f32 %v10645_v43  ;;  %5229 = vmatpush.bf16.msra.mxu2 %v6841_v50  ;;  %v2265_v41 = vpop.f32.mrf.mxu1  ;;  %vm10847_vm9 = vmor %vm4096_vm3, %vm4097_vm5  ;;  %v13275_v6 = vld [vmem:[#allocation93_spill] sm:$0xff] }
 0x308   :  { %v4190_v0 = vand.u32 2147483647, %v10645_v43  ;;  %v6777_v32 = vor.u32 %v7307_v39, %v6776_v60  ;;  %v4095_v54 = vadd.f32 %v10698_v14, %v4094_v34  ;;  %v4169_v18 = vmul.f32 %v10712_v12, %v4168_v29  ;;  %5131 = vmatpush.bf16.msra.mxu0 %v6713_v27  ;;  %v13271_v29 = vld [vmem:[#allocation88_spill] sm:$0xff]  ;;  %v2363_v44 = vpop.f32.mrf.mxu3 }
 0x309   :  { %v10831_v26 = vor.u32 1.1754944e-38, %v4177_v4  ;;  %7642 = vrcp.f32 %v10795_v13  ;;  %5278 = vmatpush.bf16.msra.mxu3 %v6905_v37  ;;  %v4184_v30 = vmul.f32 %v10721_v58, %v4183_v46  ;;  %v4192_v49 = vand.u32 2147483648, %v10645_v43  ;;  %v13272_v4 = vld [vmem:[#allocation89_spill] sm:$0xff]  ;;  %v6832_v46 = vld [vmem:[#allocation7 + $0x110] sm:$0xf] }
 0x30a   :  { %v4258_v42 = vsub.f32 1.0, %v4257_v8  ;;  %7644 = vrcp.f32 %v10797_v33  ;;  %5180 = vmatpush.bf16.msra.mxu1 %v6777_v32  ;;  %v7641_v11 = vpop.eup %7640  ;;  %v4265_v34 = vand.u32 2147483647, %v10696_v5  ;;  %v10841_v50 = vadd.f32 %v13272_v4, %v13271_v29  ;;  %v2219_v32 = vpop.f32.mrf.mxu0 }
 0x30b   :  { %7646 = vrcp.f32 %v10817_v22  ;;  %v2266_v19 = vadd.f32 %v2265_v41, %v2216_v47  ;;  %vm4172_vm10 = vweird.f32 %v10712_v12  ;;  %v4267_v8 = vand.u32 2147483648, %v10696_v5 }
 0x30c   :  { %v6603_v27 = vmul.f32 -1.442695, %v13275_v6  ;;  %v2364_v37 = vadd.f32 %v2363_v44, %v2314_v17  ;;  %v4099_v47 = vsel %vm10847_vm9, %v10698_v14, %v4095_v54  ;;  %v4170_v60 = vadd.f32 %v10712_v12, %v4169_v18  ;;  %v13278_v54 = vld [vmem:[#allocation20_spill] sm:$0xff]  ;;  %vm10888_vm14 = vmor %vm4171_vm6, %vm4172_vm10 }
 0x30d   :  { %vm10860_vm11 = vcmp.eq.f32.partialorder %v4175_v61, 8.507059e+37  ;;  %vm4187_vm12 = vweird.f32 %v10721_v58  ;;  %v4546_v39 = vmul.f32 %v10523_v55, %v2266_v19  ;;  %v4185_v41 = vadd.f32 %v10721_v58, %v4184_v30  ;;  %2512 = vmatmul.bf16.gmra.mxu2 %v13278_v54  ;;  %2414 = vmatmul.bf16.gmra.mxu0 %v13278_v54 }
 0x30e   :  { %v4259_v17 = vmul.f32 %v10780_v21, %v4258_v42  ;;  %v10868_v29 = vadd.f32 1.0, %v7641_v11  ;;  %v4547_v14 = vmul.f32 %v10527_v9, %v2364_v37  ;;  %vm10874_vm13 = vcmp.eq.f32.partialorder %v4190_v0, 8.507059e+37  ;;  %v13284_v42 = vld [vmem:[#allocation96_spill] sm:$0xff]  ;;  %v13285_v11 = vld [vmem:[#allocation21_spill] sm:$0xff]  ;;  %vm10909_vm15 = vmor %vm4186_vm8, %vm4187_vm12 }
 0x30f   :  { %v10872_v18 = vpop.eup %7642  ;;  %v4193_v4 = vor.u32 1.1754944e-38, %v4192_v49  ;;  %v6608_v55 = vmul.f32 -1.442695, %v10841_v50  ;;  %v10880_v19 = vpack.c.bf16 %v4546_v39, %v10804_v23  ;;  %v10892_v0 = vor.u32 1.1754944e-38, %v4267_v8  ;;  %2561 = vmatmul.bf16.gmra.mxu3 %v13285_v11  ;;  %2463 = vmatmul.bf16.gmra.mxu1 %v13285_v11 }
 0x310   :  { %v10882_v30 = vpop.eup %7644  ;;  %7648 = vpow2.f32 %v6603_v27  ;;  %v6609_v49 = vmul.f32 -1.442695, %v13284_v42  ;;  %v10898_v23 = vpack.c.bf16 %v4547_v14, %v10813_v52  ;;  %v4104_v24 = vsel %vm10823_vm7, %v10778_v36, %v4099_v47  ;;  %v2317_v27 = vpop.f32.mrf.mxu2 }
 0x311   :  { %13281 = vst [vmem:[#allocation55_spill] sm:$0xff] %v10880_v19  ;;  %v10900_v44 = vpop.eup %7646  ;;  %vm4262_vm0 = vweird.f32 %v10780_v21  ;;  %v4282_v52 = vand.u32 2147483648, %v10795_v13  ;;  %v4174_v35 = vsel %vm10888_vm14, %v10712_v12, %v4170_v60  ;;  %v4189_v36 = vsel %vm10909_vm15, %v10721_v58, %v4185_v41  ;;  %v2268_v47 = vpop.f32.mrf.mxu1  ;;  %v6760_v19 = vld [vmem:[#allocation7 + $0x80] sm:$0xf] }
 0x312   :  { %13286 = vst [vmem:[#allocation41_spill] sm:$0xff] %v10898_v23  ;;  %v4260_v43 = vadd.f32 %v10780_v21, %v4259_v17  ;;  %vm10923_vm1 = vcmp.eq.f32.partialorder %v4265_v34, 8.507059e+37  ;;  %7650 = vrcp.f32 %v10868_v29  ;;  %v4272_v39 = vmul.f32 %v10872_v18, %v10795_v13  ;;  %v2366_v60 = vpop.f32.mrf.mxu3  ;;  %v13291_v34 = vld [vmem:[#allocation97_spill] sm:$0xff] }
 0x313   :  { %v4347_v14 = vmul.f32 %v10882_v30, %v10797_v33  ;;  %7652 = vpow2.f32 %v6608_v55  ;;  %v2269_v12 = vadd.f32 %v2268_v47, %v2219_v32  ;;  %v4362_v58 = vmul.f32 %v10900_v44, %v10817_v22  ;;  %v2221_v32 = vpop.f32.mrf.mxu0  ;;  %v6704_v47 = vld [vmem:[#allocation7 + $0x10] sm:$0xf] }
 0x314   :  { %7654 = vpow2.f32 %v6609_v49  ;;  %v6614_v41 = vmul.f32 -1.442695, %v13291_v34  ;;  %v2367_v17 = vadd.f32 %v2366_v60, %v2317_v27  ;;  %v10937_v54 = vmul.f32 %v10821_v31, %v13212_v1  ;;  %v7321_v49 = vld [vmem:[#allocation7 + $0x114] sm:$0xf0]  ;;  %v6896_v27 = vld [vmem:[#allocation7 + $0x190] sm:$0xf] }
 0x315   :  { %v10940_v9 = vmul.f32 %v4104_v24, %v13227_v62  ;;  %vm4261_vm2 = vweird.f32 %v10696_v5  ;;  %v10944_v55 = vmul.f32 %v10537_v16, %v2269_v12  ;;  %v4179_v1 = vsel %vm10860_vm11, %v10831_v26, %v4174_v35  ;;  %v7289_v16 = vld [vmem:[#allocation7 + $0x14] sm:$0xf0]  ;;  %v6768_v35 = vld [vmem:[#allocation7 + $0x90] sm:$0xf] }
 0x316   :  { %v7649_v8 = vpop.eup %7648  ;;  %v4194_v62 = vsel %vm10874_vm13, %v4193_v4, %v4189_v36  ;;  %v10953_v31 = vmul.f32 %v10567_v20, %v2367_v17  ;;  %v6833_v24 = vor.u32 %v7321_v49, %v6832_v46  ;;  %v7337_v12 = vld [vmem:[#allocation7 + $0x194] sm:$0xf0]  ;;  %vm10959_vm3 = vmor %vm4261_vm2, %vm4262_vm0  ;;  %v4273_v15 = vsub.f32 1.0, %v4272_v39 }
 0x317   :  { %v10963_v26 = vor.u32 1.1754944e-38, %v4282_v52  ;;  %v6705_v61 = vor.u32 %v7289_v16, %v6704_v47  ;;  %v6897_v4 = vor.u32 %v7337_v12, %v6896_v27  ;;  %v7305_v20 = vld [vmem:[#allocation7 + $0x94] sm:$0xf0]  ;;  %v4264_v60 = vsel %vm10959_vm3, %v10780_v21, %v4260_v43 }
 0x318   :  { %v10965_v36 = vpop.eup %7650  ;;  %v4348_v17 = vsub.f32 1.0, %v4347_v14  ;;  %v4363_v46 = vsub.f32 1.0, %v4362_v58  ;;  %5230 = vmatpush.bf16.msra.mxu2 %v6833_v24  ;;  %v6769_v5 = vor.u32 %v7305_v20, %v6768_v35  ;;  %v10971_v23 = vmul.f32 %v4179_v1, %v10475_v2  ;;  %v2319_v47 = vpop.f32.mrf.mxu2 }
 0x319   :  { %v7653_v49 = vpop.eup %7652  ;;  %v10974_v52 = vmul.f32 %v4194_v62, %v13230_v59  ;;  %vm4276_vm4 = vweird.f32 %v10795_v13  ;;  %v10977_v39 = vadd.f32 1.0, %v7649_v8  ;;  %7656 = vpow2.f32 %v6614_v41  ;;  %5132 = vmatpush.bf16.msra.mxu0 %v6705_v61  ;;  %5279 = vmatpush.bf16.msra.mxu3 %v6897_v4  ;;  %v2270_v14 = vpop.f32.mrf.mxu1 }
 0x31a   :  { %v7655_v21 = vpop.eup %7654  ;;  %vm4277_vm5 = vweird.f32 %v10872_v18  ;;  %vm4351_vm6 = vweird.f32 %v10797_v33  ;;  %v4355_v43 = vand.u32 2147483647, %v10797_v33  ;;  %v4357_v2 = vand.u32 2147483648, %v10797_v33  ;;  %5181 = vmatpush.bf16.msra.mxu1 %v6769_v5  ;;  %v2368_v1 = vpop.f32.mrf.mxu3  ;;  %v13301_v5 = vld [vmem:[#allocation95_spill] sm:$0xff] }
 0x31b   :  { %v4269_v59 = vsel %vm10923_vm1, %v10892_v0, %v4264_v60  ;;  %v4274_v8 = vmul.f32 %v10872_v18, %v4273_v15  ;;  %vm4366_vm7 = vweird.f32 %v10817_v22  ;;  %v4370_v58 = vand.u32 2147483647, %v10817_v22  ;;  %v2224_v11 = vpop.f32.mrf.mxu0  ;;  %v13297_v60 = vld [vmem:[#allocation22_spill] sm:$0xff]  ;;  %vm11041_vm12 = vmor %vm4276_vm4, %vm4277_vm5 }
 0x31c   :  { %v2271_v41 = vadd.f32 %v2270_v14, %v2221_v32  ;;  %v4349_v62 = vmul.f32 %v10882_v30, %v4348_v17  ;;  %v4364_v24 = vmul.f32 %v10900_v44, %v4363_v46  ;;  %v10991_v16 = vadd.f32 1.0, %v7653_v49  ;;  %v13300_v46 = vld [vmem:[#allocation94_spill] sm:$0xff] }
 0x31d   :  { %v2369_v27 = vadd.f32 %v2368_v1, %v2319_v47  ;;  %v3027_v12 = vmul.f32 %v10965_v36, %v10868_v29  ;;  %7658 = vrcp.f32 %v10977_v39  ;;  %v10996_v0 = vadd.f32 1.0, %v7655_v21  ;;  %2517 = vmatmul.bf16.gmra.mxu2 %v13297_v60  ;;  %2419 = vmatmul.bf16.gmra.mxu0 %v13297_v60  ;;  %v13303_v21 = vld [vmem:[#allocation23_spill] sm:$0xff] }
 0x31e   :  { %v4558_v37 = vmul.f32 %v10600_v10, %v2271_v41  ;;  %v11000_v32 = vmul.f32 %v4269_v59, %v13236_v63  ;;  %v13294_v15 = vand.u32 2147483647, %v10795_v13  ;;  %v11008_v4 = vor.u32 1.1754944e-38, %v4357_v2  ;;  %v13314_v60 = vld [vmem:[#allocation99_spill] sm:$0xff] }
 0x31f   :  { %v4372_v35 = vand.u32 2147483648, %v10817_v22  ;;  %v4559_v20 = vmul.f32 %v10603_v7, %v2369_v27  ;;  %v7657_v17 = vpop.eup %7656  ;;  %v4275_v10 = vadd.f32 %v10872_v18, %v4274_v8  ;;  %vm4352_vm9 = vweird.f32 %v10882_v30  ;;  %2566 = vmatmul.bf16.gmra.mxu3 %v13303_v21  ;;  %2468 = vmatmul.bf16.gmra.mxu1 %v13303_v21 }
 0x320   :  { %vm11004_vm8 = vcmp.eq.f32.partialorder %v13294_v15, 8.507059e+37  ;;  %vm11015_vm10 = vcmp.eq.f32.partialorder %v4355_v43, 8.507059e+37  ;;  %v11021_v49 = vadd.f32 %v13301_v5, %v13300_v46  ;;  %v11024_v47 = vpack.c.bf16 %v4558_v37, %v10944_v55  ;;  %v13305_v55 = vld [vmem:[#allocation98_spill] sm:$0xff]  ;;  %v2322_v8 = vpop.f32.mrf.mxu2  ;;  %vm11061_vm14 = vmor %vm4351_vm6, %vm4352_vm9 }
 0x321   :  { %v4350_v7 = vadd.f32 %v10882_v30, %v4349_v62  ;;  %vm4367_vm11 = vweird.f32 %v10900_v44  ;;  %7660 = vrcp.f32 %v10991_v16  ;;  %v11032_v43 = vpack.c.bf16 %v4559_v20, %v10953_v31  ;;  %v2273_v27 = vpop.f32.mrf.mxu1 }
 0x322   :  { %13302 = vst [vmem:[#allocation70_spill] sm:$0xff] %v11024_v47  ;;  %v4365_v2 = vadd.f32 %v10900_v44, %v4364_v24  ;;  %v3028_v14 = vsub.f32 1.0, %v3027_v12  ;;  %7662 = vrcp.f32 %v10996_v0  ;;  %v6615_v59 = vmul.f32 -1.442695, %v13305_v55  ;;  %v2371_v20 = vpop.f32.mrf.mxu3  ;;  %vm11075_vm0 = vmor %vm4366_vm7, %vm4367_vm11 }
 0x323   :  { %13304 = vst [vmem:[#allocation56_spill] sm:$0xff] %v11032_v43  ;;  %vm11045_vm13 = vcmp.eq.f32.partialorder %v4370_v58, 8.507059e+37  ;;  %v4373_v31 = vor.u32 1.1754944e-38, %v4372_v35  ;;  %v3035_v62 = vand.u32 2147483647, %v10868_v29  ;;  %v11050_v24 = vadd.f32 1.0, %v7657_v17  ;;  %v11052_v12 = vpop.eup %7658  ;;  %v2226_v22 = vpop.f32.mrf.mxu0 }
 0x324   :  { %v4279_v13 = vsel %vm11041_vm12, %v10872_v18, %v4275_v10  ;;  %vm3031_vm15 = vweird.f32 %v10868_v29  ;;  %v3037_v37 = vand.u32 2147483648, %v10868_v29  ;;  %v6620_v15 = vmul.f32 -1.442695, %v11021_v49  ;;  %v13315_v10 = vld [vmem:[#allocation100_spill] sm:$0xff] }
 0x325   :  { %v2274_v35 = vadd.f32 %v2273_v27, %v2224_v11  ;;  %v4354_v18 = vsel %vm11061_vm14, %v10882_v30, %v4350_v7  ;;  %v6621_v17 = vmul.f32 -1.442695, %v13314_v60  ;;  %v6626_v46 = vmul.f32 -1.442695, %v13315_v10  ;;  %v6824_v7 = vld [vmem:[#allocation7 + $0x100] sm:$0xf] }
 0x326   :  { %v2372_v5 = vadd.f32 %v2371_v20, %v2322_v8  ;;  %v4369_v11 = vsel %vm11075_vm0, %v10900_v44, %v4365_v2  ;;  %v3029_v41 = vmul.f32 %v10965_v36, %v3028_v14  ;;  %7664 = vpow2.f32 %v6615_v59  ;;  %v7319_v27 = vld [vmem:[#allocation7 + $0x104] sm:$0xf0]  ;;  %v6696_v58 = vld [vmem:[#allocation7] sm:$0xf] }
 0x327   :  { %v11086_v30 = vmul.f32 %v10677_v3, %v2274_v35  ;;  %v11089_v43 = vpop.eup %7660  ;;  %v3042_v8 = vmul.f32 %v11052_v12, %v10977_v39  ;;  %7666 = vrcp.f32 %v11050_v24  ;;  %v6825_v2 = vor.u32 %v7319_v27, %v6824_v7  ;;  %v7287_v14 = vld [vmem:[#allocation7 + $0x4] sm:$0xf0]  ;;  %v6888_v3 = vld [vmem:[#allocation7 + $0x180] sm:$0xf] }
 0x328   :  { %v11095_v44 = vmul.f32 %v10758_v40, %v2372_v5  ;;  %v7335_v59 = vld [vmem:[#allocation7 + $0x184] sm:$0xf0]  ;;  %v11097_v35 = vpop.eup %7662  ;;  %v4284_v21 = vsel %vm11004_vm8, %v10963_v26, %v4279_v13  ;;  %vm11102_vm1 = vcmp.eq.f32.partialorder %v3035_v62, 8.507059e+37  ;;  %7668 = vpow2.f32 %v6620_v15  ;;  %v2324_v13 = vpop.f32.mrf.mxu2 }
 0x329   :  { %v6697_v33 = vor.u32 %v7287_v14, %v6696_v58  ;;  %v6889_v47 = vor.u32 %v7335_v59, %v6888_v3  ;;  %v7303_v40 = vld [vmem:[#allocation7 + $0x84] sm:$0xf0]  ;;  %v4359_v5 = vsel %vm11015_vm10, %v11008_v4, %v4354_v18  ;;  %v3052_v7 = vand.u32 2147483648, %v10977_v39  ;;  %5231 = vmatpush.bf16.msra.mxu2 %v6825_v2 }
 0x32a   :  { %7670 = vpow2.f32 %v6621_v17  ;;  %v6761_v27 = vor.u32 %v7303_v40, %v6760_v19  ;;  %v4374_v26 = vsel %vm11045_vm13, %v4373_v31, %v4369_v11  ;;  %v3030_v61 = vadd.f32 %v10965_v36, %v3029_v41  ;;  %v2275_v19 = vpop.f32.mrf.mxu1  ;;  %v2373_v11 = vpop.f32.mrf.mxu3  ;;  %v13320_v40 = vld [vmem:[#allocation24_spill] sm:$0xff] }
 0x32b   :  { %vm3032_vm2 = vweird.f32 %v10965_v36  ;;  %v3117_v62 = vmul.f32 %v11089_v43, %v10991_v16  ;;  %5133 = vmatpush.bf16.msra.mxu0 %v6697_v33  ;;  %5280 = vmatpush.bf16.msra.mxu3 %v6889_v47  ;;  %v3038_v63 = vor.u32 1.1754944e-38, %v3037_v37  ;;  %v3043_v4 = vsub.f32 1.0, %v3042_v8  ;;  %v2229_v14 = vpop.f32.mrf.mxu0 }
 0x32c   :  { %v3132_v15 = vmul.f32 %v11097_v35, %v10996_v0  ;;  %7672 = vpow2.f32 %v6626_v46  ;;  %5182 = vmatpush.bf16.msra.mxu1 %v6761_v27  ;;  %v7665_v1 = vpop.eup %7664  ;;  %v11119_v31 = vmul.f32 %v4284_v21, %v13247_v56  ;;  %vm3046_vm3 = vweird.f32 %v10977_v39  ;;  %vm11135_vm4 = vmor %vm3031_vm15, %vm3032_vm2  ;;  %v13328_v56 = vld [vmem:[#allocation101_spill] sm:$0xff] }
 0x32d   :  { %v3050_v18 = vand.u32 2147483647, %v10977_v39  ;;  %v2276_v17 = vadd.f32 %v2275_v19, %v2226_v22  ;;  %v11123_v41 = vpop.eup %7666  ;;  %v11126_v47 = vmul.f32 %v4359_v5, %v10649_v28  ;;  %v11129_v37 = vmul.f32 %v4374_v26, %v13254_v25  ;;  %2522 = vmatmul.bf16.gmra.mxu2 %v13320_v40  ;;  %2424 = vmatmul.bf16.gmra.mxu0 %v13320_v40  ;;  %v7300_v40 = vld [vmem:[#allocation7 + $0x74] sm:$0xf] }
 0x32e   :  { %v11139_v46 = vor.u32 1.1754944e-38, %v3052_v7  ;;  %v2374_v22 = vadd.f32 %v2373_v11, %v2324_v13  ;;  %v7669_v58 = vpop.eup %7668  ;;  %v3034_v28 = vsel %vm11135_vm4, %v10965_v36, %v3030_v61  ;;  %v3118_v8 = vsub.f32 1.0, %v3117_v62  ;;  %v13324_v62 = vld [vmem:[#allocation25_spill] sm:$0xff] }
 0x32f   :  { %v3127_v25 = vand.u32 2147483648, %v10991_v16  ;;  %v4570_v2 = vmul.f32 %v10773_v38, %v2276_v17  ;;  %v3044_v29 = vmul.f32 %v11052_v12, %v3043_v4  ;;  %v3133_v59 = vsub.f32 1.0, %v3132_v15  ;;  %2571 = vmatmul.bf16.gmra.mxu3 %v13324_v62  ;;  %2473 = vmatmul.bf16.gmra.mxu1 %v13324_v62 }
 0x330   :  { %v7671_v3 = vpop.eup %7670  ;;  %v11147_v21 = vadd.f32 1.0, %v7665_v1  ;;  %v4571_v33 = vmul.f32 %v10808_v57, %v2374_v22  ;;  %vm3047_vm5 = vweird.f32 %v11052_v12  ;;  %vm3121_vm6 = vweird.f32 %v10991_v16  ;;  %v2327_v15 = vpop.f32.mrf.mxu2 }
 0x331   :  { %v3125_v36 = vand.u32 2147483647, %v10991_v16  ;;  %v11156_v38 = vmul.f32 %v11123_v41, %v11050_v24  ;;  %v11159_v5 = vpack.c.bf16 %v4570_v2, %v11086_v30  ;;  %v3039_v27 = vsel %vm11102_vm1, %v3038_v63, %v3034_v28  ;;  %vm11198_vm11 = vmor %vm3046_vm3, %vm3047_vm5 }
 0x332   :  { %v7673_v7 = vpop.eup %7672  ;;  %vm11163_vm7 = vcmp.eq.f32.partialorder %v3050_v18, 8.507059e+37  ;;  %vm3136_vm8 = vweird.f32 %v10996_v0  ;;  %v3140_v26 = vand.u32 2147483647, %v10996_v0  ;;  %v11169_v61 = vadd.f32 1.0, %v7669_v58  ;;  %v2278_v18 = vpop.f32.mrf.mxu1 }
 0x333   :  { %13321 = vst [vmem:[#allocation71_spill] sm:$0xff] %v11159_v5  ;;  %v11174_v30 = vpack.c.bf16 %v4571_v33, %v11095_v44  ;;  %v3119_v20 = vmul.f32 %v11089_v43, %v3118_v8  ;;  %v11177_v13 = vor.u32 1.1754944e-38, %v3127_v25  ;;  %v3142_v63 = vand.u32 2147483648, %v10996_v0  ;;  %v2376_v28 = vpop.f32.mrf.mxu3  ;;  %v13331_v25 = vld [vmem:[#allocation102_spill] sm:$0xff]  ;;  %v2231_v39 = vpop.f32.mrf.mxu0 }
 0x334   :  { %v11180_v4 = vadd.f32 1.0, %v7671_v3  ;;  %v3045_v19 = vadd.f32 %v11052_v12, %v3044_v29  ;;  %vm3122_vm9 = vweird.f32 %v11089_v43  ;;  %v3134_v1 = vmul.f32 %v11097_v35, %v3133_v59  ;;  %v13332_v3 = vld [vmem:[#allocation103_spill] sm:$0xff] }
 0x335   :  { %13325 = vst [vmem:[#allocation72_spill] sm:$0xff] %v11174_v30  ;;  %7674 = vrcp.f32 %v11147_v21  ;;  %vm11186_vm10 = vcmp.eq.f32.partialorder %v3125_v36, 8.507059e+37  ;;  %v3208_v17 = vsub.f32 1.0, %v11156_v38  ;;  %v11191_v11 = vadd.f32 1.0, %v7673_v7  ;;  %v6754_v36 = vld [vmem:[#allocation7 + $0x78] sm:$0xf0]  ;;  %vm11230_vm13 = vmor %vm3121_vm6, %vm3122_vm9 }
 0x336   :  { %v6627_v22 = vmul.f32 -1.442695, %v13328_v56  ;;  %v2279_v58 = vadd.f32 %v2278_v18, %v2229_v14  ;;  %7676 = vrcp.f32 %v11169_v61  ;;  %v6632_v2 = vmul.f32 -1.442695, %v13331_v25  ;;  %v7008_v38 = vld [vmem:[#allocation7 + $0x270] sm:$0xf] }
 0x337   :  { %v6633_v29 = vmul.f32 -1.442695, %v13332_v3  ;;  %v2377_v59 = vadd.f32 %v2376_v28, %v2327_v15  ;;  %v3120_v33 = vadd.f32 %v11089_v43, %v3119_v20  ;;  %vm3137_vm12 = vweird.f32 %v11097_v35  ;;  %v7365_v28 = vld [vmem:[#allocation7 + $0x274] sm:$0xf0]  ;;  %v7316_v30 = vld [vmem:[#allocation7 + $0xf4] sm:$0xf] }
 0x338   :  { %7678 = vrcp.f32 %v11180_v4  ;;  %v11209_v14 = vmul.f32 %v10937_v54, %v2279_v58  ;;  %v3049_v7 = vsel %vm11198_vm11, %v11052_v12, %v3045_v19  ;;  %v3135_v15 = vadd.f32 %v11097_v35, %v3134_v1  ;;  %v6818_v54 = vld [vmem:[#allocation7 + $0xf8] sm:$0xf0]  ;;  %vm11245_vm14 = vmor %vm3136_vm8, %vm3137_vm12 }
 0x339   :  { %v11217_v20 = vmul.f32 %v10940_v9, %v2377_v59  ;;  %v6757_v18 = vor.u32 %v7300_v40, %v6754_v36  ;;  %v3217_v58 = vand.u32 2147483648, %v11050_v24  ;;  %7680 = vrcp.f32 %v11191_v11  ;;  %v13341_v40 = vld [vmem:[#allocation104_spill] sm:$0xff] }
 0x33a   :  { %v7009_v62 = vor.u32 %v7365_v28, %v7008_v38  ;;  %v6821_v5 = vor.u32 %v7316_v30, %v6818_v54  ;;  %v11224_v12 = vmul.f32 %v3039_v27, %v13264_v48  ;;  %v3215_v19 = vand.u32 2147483647, %v11050_v24  ;;  %v2280_v57 = vpop.f32.mrf.mxu1  ;;  %v13342_v28 = vld [vmem:[#allocation26_spill] sm:$0xff] }
 0x33b   :  { %v11221_v3 = vpop.eup %7674  ;;  %7682 = vpow2.f32 %v6627_v22  ;;  %5420 = vmatpush.bf16.msrb.mxu2 %v6757_v18  ;;  %v7073_v30 = vor.u32 %v7381_v53, %v7072_v45  ;;  %v3054_v1 = vsel %vm11163_vm7, %v11139_v46, %v3049_v7  ;;  %v3124_v48 = vsel %vm11230_vm13, %v11089_v43, %v3120_v33  ;;  %v2329_v53 = vpop.f32.mrf.mxu2 }
 0x33c   :  { %vm11249_vm15 = vcmp.eq.f32.partialorder %v3140_v26, 8.507059e+37  ;;  %7684 = vpow2.f32 %v6632_v2  ;;  %5322 = vmatpush.bf16.msrb.mxu0 %v7009_v62  ;;  %5469 = vmatpush.bf16.msrb.mxu3 %v6821_v5  ;;  %v11253_v45 = vpop.eup %7676  ;;  %v3139_v43 = vsel %vm11245_vm14, %v11097_v35, %v3135_v15  ;;  %v3143_v46 = vor.u32 1.1754944e-38, %v3142_v63  ;;  %v2378_v2 = vpop.f32.mrf.mxu3 }
 0x33d   :  { %v3209_v0 = vmul.f32 %v11123_v41, %v3208_v17  ;;  %7686 = vpow2.f32 %v6633_v29  ;;  %5371 = vmatpush.bf16.msrb.mxu1 %v7073_v30  ;;  %vm3211_vm0 = vweird.f32 %v11050_v24  ;;  %v3218_v22 = vor.u32 1.1754944e-38, %v3217_v58  ;;  %v2234_v44 = vpop.f32.mrf.mxu0  ;;  %2527 = vmatmul.bf16.gmra.mxu2 %v13342_v28 }
 0x33e   :  { %v11259_v26 = vpop.eup %7678  ;;  %v3232_v8 = vand.u32 2147483648, %v11147_v21  ;;  %v2281_v5 = vadd.f32 %v2280_v57, %v2231_v39  ;;  %v11264_v59 = vmul.f32 %v3054_v1, %v13275_v6  ;;  %v3129_v35 = vsel %vm11186_vm10, %v11177_v13, %v3124_v48  ;;  %2429 = vmatmul.bf16.gmra.mxu0 %v13342_v28  ;;  %v7363_v28 = vld [vmem:[#allocation7 + $0x264] sm:$0xf0] }
 0x33f   :  { %vm11269_vm1 = vcmp.eq.f32.partialorder %v3215_v19, 8.507059e+37  ;;  %v3222_v17 = vmul.f32 %v11221_v3, %v11147_v21  ;;  %v2379_v29 = vadd.f32 %v2378_v2, %v2329_v53  ;;  %v11275_v33 = vpop.eup %7680  ;;  %v3144_v39 = vsel %vm11249_vm15, %v3143_v46, %v3139_v43 }
 0x340   :  { %v3297_v6 = vmul.f32 %v11253_v45, %v11169_v61  ;;  %v6638_v36 = vmul.f32 -1.442695, %v13341_v40  ;;  %v4582_v13 = vmul.f32 %v10971_v23, %v2281_v5  ;;  %v3210_v7 = vadd.f32 %v11123_v41, %v3209_v0 }
 0x341   :  { %v7683_v38 = vpop.eup %7682  ;;  %vm3212_vm2 = vweird.f32 %v11123_v41  ;;  %v3312_v15 = vmul.f32 %v11259_v26, %v11180_v4  ;;  %v4583_v18 = vmul.f32 %v10974_v52, %v2379_v29  ;;  %v11290_v58 = vmul.f32 %v3129_v35, %v10841_v50  ;;  %v13343_v50 = vld [vmem:[#allocation27_spill] sm:$0xff] }
 0x342   :  { %v7685_v54 = vpop.eup %7684  ;;  %v3230_v62 = vand.u32 2147483647, %v11147_v21  ;;  %v11293_v23 = vor.u32 1.1754944e-38, %v3232_v8  ;;  %v11296_v9 = vpack.c.bf16 %v4582_v13, %v11209_v14  ;;  %v11299_v30 = vmul.f32 %v3144_v39, %v13284_v42  ;;  %2576 = vmatmul.bf16.gmra.mxu3 %v13343_v50  ;;  %vm11314_vm3 = vmor %vm3211_vm0, %vm3212_vm2  ;;  %v2283_v46 = vpop.f32.mrf.mxu1  ;;  %2478 = vmatmul.bf16.gmra.mxu1 %v13343_v50  ;;  %v7064_v14 = vld [vmem:[#allocation7 + $0x2e0] sm:$0xf] }
 0x343   :  { %v7687_v19 = vpop.eup %7686  ;;  %v3223_v1 = vsub.f32 1.0, %v3222_v17  ;;  %v11303_v52 = vmul.f32 %v11275_v33, %v11191_v11  ;;  %v11308_v48 = vpack.c.bf16 %v4583_v18, %v11217_v20  ;;  %v3298_v42 = vsub.f32 1.0, %v3297_v6  ;;  %v2332_v53 = vpop.f32.mrf.mxu2  ;;  %v13346_v17 = vld [vmem:[#allocation105_spill] sm:$0xff] }
 0x344   :  { %v3305_v16 = vand.u32 2147483647, %v11169_v61  ;;  %v11319_v27 = vadd.f32 1.0, %v7683_v38  ;;  %7688 = vpow2.f32 %v6638_v36  ;;  %v3214_v20 = vsel %vm11314_vm3, %v11123_v41, %v3210_v7  ;;  %v2381_v2 = vpop.f32.mrf.mxu3  ;;  %v7298_v38 = vld [vmem:[#allocation7 + $0x64] sm:$0xf] }
 0x345   :  { %vm3226_vm4 = vweird.f32 %v11147_v21  ;;  %vm3227_vm5 = vweird.f32 %v11221_v3  ;;  %v3313_v24 = vsub.f32 1.0, %v3312_v15  ;;  %v11326_v43 = vadd.f32 1.0, %v7685_v54  ;;  %v6746_v7 = vld [vmem:[#allocation7 + $0x68] sm:$0xf0]  ;;  %v7000_v15 = vld [vmem:[#allocation7 + $0x260] sm:$0xf] }
 0x346   :  { %vm3301_vm6 = vweird.f32 %v11169_v61  ;;  %v3307_v0 = vand.u32 2147483648, %v11169_v61  ;;  %v3320_v57 = vand.u32 2147483647, %v11180_v4  ;;  %v11331_v8 = vadd.f32 1.0, %v7687_v19  ;;  %v7314_v54 = vld [vmem:[#allocation7 + $0xe4] sm:$0xf]  ;;  %vm11382_vm13 = vmor %vm3226_vm4, %vm3227_vm5 }
 0x347   :  { %v2284_v5 = vadd.f32 %v2283_v46, %v2234_v44  ;;  %v3224_v41 = vmul.f32 %v11221_v3, %v3223_v1  ;;  %vm3316_vm7 = vweird.f32 %v11180_v4  ;;  %v3388_v35 = vsub.f32 1.0, %v11303_v52  ;;  %v2236_v44 = vpop.f32.mrf.mxu0  ;;  %v6810_v19 = vld [vmem:[#allocation7 + $0xe8] sm:$0xf0] }
 0x348   :  { %v6639_v29 = vmul.f32 -1.442695, %v13346_v17  ;;  %v2382_v39 = vadd.f32 %v2381_v2, %v2332_v53  ;;  %v3219_v6 = vsel %vm11269_vm1, %v3218_v22, %v3214_v20  ;;  %v3299_v36 = vmul.f32 %v11253_v45, %v3298_v42  ;;  %v7379_v42 = vld [vmem:[#allocation7 + $0x2e4] sm:$0xf0] }
 0x349   :  { %7690 = vrcp.f32 %v11319_v27  ;;  %v11342_v13 = vmul.f32 %v11000_v32, %v2284_v5  ;;  %v3314_v18 = vmul.f32 %v11259_v26, %v3313_v24  ;;  %v6749_v22 = vor.u32 %v7298_v38, %v6746_v7  ;;  %v13355_v7 = vld [vmem:[#allocation111_spill] sm:$0xff] }
 0x34a   :  { %7692 = vrcp.f32 %v11326_v43  ;;  %v11348_v63 = vmul.f32 %v11119_v31, %v2382_v39  ;;  %v7689_v1 = vpop.eup %7688  ;;  %v3322_v32 = vand.u32 2147483648, %v11180_v4  ;;  %v7001_v52 = vor.u32 %v7363_v28, %v7000_v15 }
 0x34b   :  { %7694 = vrcp.f32 %v11331_v8  ;;  %v6813_v50 = vor.u32 %v7314_v54, %v6810_v19  ;;  %v11353_v53 = vmul.f32 %v3219_v6, %v13291_v34  ;;  %v3225_v20 = vadd.f32 %v11221_v3, %v3224_v41  ;;  %5421 = vmatpush.bf16.msrb.mxu2 %v6749_v22  ;;  %v2334_v41 = vpop.f32.mrf.mxu2  ;;  %v2285_v6 = vpop.f32.mrf.mxu1  ;;  %v13358_v54 = vld [vmem:[#allocation112_spill] sm:$0xff] }
 0x34c   :  { %vm11356_vm8 = vcmp.eq.f32.partialorder %v3230_v62, 8.507059e+37  ;;  %vm11360_vm9 = vcmp.eq.f32.partialorder %v3305_v16, 8.507059e+37  ;;  %v3308_v46 = vor.u32 1.1754944e-38, %v3307_v0  ;;  %v7065_v5 = vor.u32 %v7379_v42, %v7064_v14  ;;  %5323 = vmatpush.bf16.msrb.mxu0 %v7001_v52 }
 0x34d   :  { %v3300_v2 = vadd.f32 %v11253_v45, %v3299_v36  ;;  %vm3302_vm10 = vweird.f32 %v11253_v45  ;;  %vm3317_vm11 = vweird.f32 %v11259_v26  ;;  %vm11367_vm12 = vcmp.eq.f32.partialorder %v3320_v57, 8.507059e+37  ;;  %5470 = vmatpush.bf16.msrb.mxu3 %v6813_v50  ;;  %5232 = vmatmul.bf16.vlgmr.msra.gmra.mxu2 %v10463_v51  ;;  %v7375_v51 = vld [vmem:[#allocation7 + $0x2c4] sm:$0xf0] }
 0x34e   :  { %v3395_v62 = vand.u32 2147483647, %v11191_v11  ;;  %v3315_v16 = vadd.f32 %v11259_v26, %v3314_v18  ;;  %v3389_v0 = vmul.f32 %v11275_v33, %v3388_v35  ;;  %v11374_v39 = vadd.f32 1.0, %v7689_v1  ;;  %5372 = vmatpush.bf16.msrb.mxu1 %v7065_v5  ;;  %v2383_v18 = vpop.f32.mrf.mxu3  ;;  %vm11397_vm15 = vmor %vm3301_vm6, %vm3302_vm10 }
 0x34f   :  { %7696 = vpow2.f32 %v6639_v29  ;;  %v11376_v36 = vpop.eup %7690  ;;  %v3323_v38 = vor.u32 1.1754944e-38, %v3322_v32  ;;  %vm3391_vm14 = vweird.f32 %v11191_v11  ;;  %v6644_v35 = vmul.f32 -1.442695, %v13355_v7  ;;  %vm11412_vm0 = vmor %vm3316_vm7, %vm3317_vm11  ;;  %v2395_v14 = vpop.f32.mrf.mxu0 }
 0x350   :  { %v2286_v15 = vadd.f32 %v2285_v6, %v2236_v44  ;;  %v11388_v29 = vpop.eup %7692  ;;  %v3229_v22 = vsel %vm11382_vm13, %v11221_v3, %v3225_v20  ;;  %v3397_v28 = vand.u32 2147483648, %v11191_v11  ;;  %v6645_v19 = vmul.f32 -1.442695, %v13358_v54  ;;  %v7056_v3 = vld [vmem:[#allocation7 + $0x2d0] sm:$0xf] }
 0x351   :  { %v2384_v44 = vadd.f32 %v2383_v18, %v2334_v41  ;;  %v11403_v1 = vpop.eup %7694  ;;  %v3304_v32 = vsel %vm11397_vm15, %v11253_v45, %v3300_v2  ;;  %vm3392_vm1 = vweird.f32 %v11275_v33  ;;  %vm11417_vm2 = vcmp.eq.f32.partialorder %v3395_v62, 8.507059e+37  ;;  %v13364_v41 = vld [vmem:[#allocation49_spill] sm:$0xff] }
 0x352   :  { %v3412_v52 = vand.u32 2147483648, %v11319_v27  ;;  %v4594_v50 = vmul.f32 %v11126_v47, %v2286_v15  ;;  %v3319_v45 = vsel %vm11412_vm0, %v11259_v26, %v3315_v16  ;;  %v3390_v4 = vadd.f32 %v11275_v33, %v3389_v0  ;;  %5134 = vmatmul.bf16.vlgmr.msra.gmra.mxu0 %v13364_v41  ;;  %v13365_v16 = vld [vmem:[#allocation53_spill] sm:$0xff]  ;;  %vm11461_vm3 = vmor %vm3391_vm14, %vm3392_vm1 }
 0x353   :  { %7698 = vrcp.f32 %v11374_v39  ;;  %v4595_v42 = vmul.f32 %v11129_v37, %v2384_v44  ;;  %v3402_v20 = vmul.f32 %v11376_v36, %v11319_v27  ;;  %v11434_v5 = vmul.f32 %v11388_v29, %v11326_v43  ;;  %v13363_v37 = vld [vmem:[#allocation114_spill] sm:$0xff]  ;;  %5281 = vmatmul.bf16.vlgmr.msra.gmra.mxu3 %v13365_v16  ;;  %v2493_v15 = vpop.f32.mrf.mxu2  ;;  %v7048_v16 = vld [vmem:[#allocation7 + $0x2c0] sm:$0xf] }
 0x354   :  { %7700 = vpow2.f32 %v6644_v35  ;;  %v11437_v47 = vpack.c.bf16 %v4594_v50, %v11342_v13  ;;  %v11441_v2 = vmul.f32 %v11403_v1, %v11331_v8  ;;  %v6650_v62 = vmul.f32 -1.442695, %v13363_v37 }
 0x355   :  { %v7697_v26 = vpop.eup %7696  ;;  %7702 = vpow2.f32 %v6645_v19  ;;  %v11447_v0 = vpack.c.bf16 %v4595_v42, %v11348_v63  ;;  %v3234_v13 = vsel %vm11356_vm8, %v11293_v23, %v3229_v22  ;;  %v3309_v6 = vsel %vm11360_vm9, %v3308_v46, %v3304_v32  ;;  %v2444_v46 = vpop.f32.mrf.mxu1  ;;  %v7296_v42 = vld [vmem:[#allocation7 + $0x54] sm:$0xf] }
 0x356   :  { %v3398_v57 = vor.u32 1.1754944e-38, %v3397_v28  ;;  %v3410_v35 = vand.u32 2147483647, %v11319_v27  ;;  %v3324_v18 = vsel %vm11367_vm12, %v3323_v38, %v3319_v45  ;;  %v11465_v31 = vor.u32 1.1754944e-38, %v3412_v52  ;;  %v2542_v11 = vpop.f32.mrf.mxu3  ;;  %v13368_v45 = vld [vmem:[#allocation110_spill] sm:$0xff] }
 0x357   :  { %v3485_v23 = vand.u32 2147483647, %v11326_v43  ;;  %v3487_v24 = vand.u32 2147483648, %v11326_v43  ;;  %v3394_v34 = vsel %vm11461_vm3, %v11275_v33, %v3390_v4  ;;  %v3403_v38 = vsub.f32 1.0, %v3402_v20  ;;  %5183 = vmatmul.bf16.vlgmr.msra.gmra.mxu1 %v13368_v45  ;;  %v2397_v4 = vpop.f32.mrf.mxu0  ;;  %v6738_v20 = vld [vmem:[#allocation7 + $0x58] sm:$0xf0] }
 0x358   :  { %v11472_v22 = vadd.f32 1.0, %v7697_v26  ;;  %v2445_v21 = vadd.f32 %v2444_v46, %v2395_v14  ;;  %v3478_v19 = vsub.f32 1.0, %v11434_v5  ;;  %v3493_v44 = vsub.f32 1.0, %v11441_v2  ;;  %v6992_v5 = vld [vmem:[#allocation7 + $0x250] sm:$0xf] }
 0x359   :  { %v11474_v28 = vpop.eup %7698  ;;  %7704 = vpow2.f32 %v6650_v62  ;;  %v2543_v32 = vadd.f32 %v2542_v11, %v2493_v15  ;;  %v11479_v52 = vmul.f32 %v3234_v13, %v13305_v55  ;;  %v11482_v50 = vmul.f32 %v3309_v6, %v11021_v49  ;;  %v7361_v2 = vld [vmem:[#allocation7 + $0x254] sm:$0xf0]  ;;  %v6802_v62 = vld [vmem:[#allocation7 + $0xd8] sm:$0xf0] }
 0x35a   :  { %v7701_v61 = vpop.eup %7700  ;;  %v11485_v33 = vmul.f32 %v3324_v18, %v13314_v60  ;;  %v11488_v14 = vmul.f32 %v11224_v12, %v2445_v21  ;;  %v3399_v55 = vsel %vm11417_vm2, %v3398_v57, %v3394_v34  ;;  %vm3406_vm4 = vweird.f32 %v11319_v27  ;;  %v7312_v12 = vld [vmem:[#allocation7 + $0xd4] sm:$0xf]  ;;  %v7377_v57 = vld [vmem:[#allocation7 + $0x2d4] sm:$0xf0] }
 0x35b   :  { %v7703_v26 = vpop.eup %7702  ;;  %vm3407_vm5 = vweird.f32 %v11376_v36  ;;  %v4507_v49 = vmul.f32 %v11264_v59, %v2543_v32  ;;  %v6741_v60 = vor.u32 %v7296_v42, %v6738_v20  ;;  %v3404_v13 = vmul.f32 %v11376_v36, %v3403_v38  ;;  %v2495_v11 = vpop.f32.mrf.mxu2 }
 0x35c   :  { %vm3481_vm6 = vweird.f32 %v11326_v43  ;;  %7706 = vrcp.f32 %v11472_v22  ;;  %v6993_v6 = vor.u32 %v7361_v2, %v6992_v5  ;;  %v6805_v15 = vor.u32 %v7312_v12, %v6802_v62  ;;  %v13371_v5 = vld [vmem:[#allocation106_spill] sm:$0xff]  ;;  %vm11553_vm12 = vmor %vm3406_vm4, %vm3407_vm5  ;;  %v6730_v43 = vld [vmem:[#allocation7 + $0x48] sm:$0xf0] }
 0x35d   :  { %vm3496_vm7 = vweird.f32 %v11331_v8  ;;  %v3500_v18 = vand.u32 2147483647, %v11331_v8  ;;  %v11501_v63 = vadd.f32 1.0, %v7701_v61  ;;  %5422 = vmatpush.bf16.msrb.mxu2 %v6741_v60  ;;  %v7057_v59 = vor.u32 %v7377_v57, %v7056_v3  ;;  %v13372_v60 = vld [vmem:[#allocation107_spill] sm:$0xff] }
 0x35e   :  { %v11503_v46 = vor.u32 1.1754944e-38, %v3487_v24  ;;  %v3502_v34 = vand.u32 2147483648, %v11331_v8  ;;  %v3567_v38 = vmul.f32 %v11474_v28, %v11374_v39  ;;  %v11508_v21 = vadd.f32 1.0, %v7703_v26  ;;  %5324 = vmatpush.bf16.msrb.mxu0 %v6993_v6  ;;  %5471 = vmatpush.bf16.msrb.mxu3 %v6805_v15  ;;  %v2446_v26 = vpop.f32.mrf.mxu1  ;;  %v2544_v6 = vpop.f32.mrf.mxu3 }
 0x35f   :  { %v7705_v32 = vpop.eup %7704  ;;  %v11511_v42 = vmul.f32 %v3399_v55, %v13315_v10  ;;  %vm11513_vm8 = vcmp.eq.f32.partialorder %v3410_v35, 8.507059e+37  ;;  %v3479_v24 = vmul.f32 %v11388_v29, %v3478_v19  ;;  %v3494_v20 = vmul.f32 %v11403_v1, %v3493_v44  ;;  %5373 = vmatpush.bf16.msrb.mxu1 %v7057_v59  ;;  %v13373_v10 = vld [vmem:[#allocation108_spill] sm:$0xff]  ;;  %v13374_v55 = vld [vmem:[#allocation109_spill] sm:$0xff]  ;;  %v13377_v44 = vld [vmem:[#allocation115_spill] sm:$0xff] }
 0x360   :  { %v11521_v2 = vadd.f32 %v13372_v60, %v13371_v5  ;;  %v3405_v12 = vadd.f32 %v11376_v36, %v3404_v13  ;;  %vm3482_vm9 = vweird.f32 %v11388_v29  ;;  %v11527_v35 = vadd.f32 %v13374_v55, %v13373_v10  ;;  %v13378_v55 = vld [vmem:[#allocation113_spill] sm:$0xff] }
 0x361   :  { %v2447_v62 = vadd.f32 %v2446_v26, %v2397_v4  ;;  %vm11531_vm10 = vcmp.eq.f32.partialorder %v3485_v23, 8.507059e+37  ;;  %vm3497_vm11 = vweird.f32 %v11403_v1  ;;  %7708 = vrcp.f32 %v11501_v63  ;;  %v2400_v23 = vpop.f32.mrf.mxu0  ;;  %5237 = vmatmul.bf16.gmra.mxu2 %v13378_v55  ;;  %vm11573_vm14 = vmor %vm3481_vm6, %vm3482_vm9 }
 0x362   :  { %v6651_v13 = vmul.f32 -1.442695, %v13377_v44  ;;  %v2545_v15 = vadd.f32 %v2544_v6, %v2495_v11  ;;  %v11538_v3 = vpop.eup %7706  ;;  %v3568_v57 = vsub.f32 1.0, %v3567_v38  ;;  %7710 = vrcp.f32 %v11508_v21  ;;  %vm11589_vm15 = vmor %vm3496_vm7, %vm3497_vm11 }
 0x363   :  { %v11541_v4 = vadd.f32 1.0, %v7705_v32  ;;  %v4512_v59 = vmul.f32 %v11290_v58, %v2447_v62  ;;  %v3480_v5 = vadd.f32 %v11388_v29, %v3479_v24  ;;  %v3495_v60 = vadd.f32 %v11403_v1, %v3494_v20  ;;  %v13387_v62 = vld [vmem:[#allocation48_spill] sm:$0xff] }
 0x364   :  { %v6656_v26 = vmul.f32 -1.442695, %v11521_v2  ;;  %v4513_v10 = vmul.f32 %v11299_v30, %v2545_v15  ;;  %vm11557_vm13 = vcmp.eq.f32.partialorder %v3500_v18, 8.507059e+37  ;;  %v3575_v11 = vand.u32 2147483647, %v11374_v39  ;;  %5286 = vmatmul.bf16.gmra.mxu3 %v13387_v62 }
 0x365   :  { %v6657_v32 = vmul.f32 -1.442695, %v11527_v35  ;;  %v11564_v30 = vpack.c.bf16 %v4512_v59, %v11488_v14  ;;  %v3409_v24 = vsel %vm11553_vm12, %v11376_v36, %v3405_v12  ;;  %v11579_v18 = vmul.f32 %v11538_v3, %v11472_v22  ;;  %v13386_v14 = vld [vmem:[#allocation119_spill] sm:$0xff] }
 0x366   :  { %7712 = vpow2.f32 %v6651_v13  ;;  %v11581_v20 = vpack.c.bf16 %v4513_v10, %v4507_v49  ;;  %5139 = vmatmul.bf16.gmra.mxu0 %v13386_v14  ;;  %v3503_v36 = vor.u32 1.1754944e-38, %v3502_v34  ;;  %v3569_v12 = vmul.f32 %v11474_v28, %v3568_v57  ;;  %v2498_v49 = vpop.f32.mrf.mxu2  ;;  %v2449_v34 = vpop.f32.mrf.mxu1 }
 0x367   :  { %vm3571_vm0 = vweird.f32 %v11374_v39  ;;  %7714 = vrcp.f32 %v11541_v4  ;;  %v11596_v6 = vpop.eup %7708  ;;  %v3484_v13 = vsel %vm11573_vm14, %v11388_v29, %v3480_v5  ;;  %v3499_v8 = vsel %vm11589_vm15, %v11403_v1, %v3495_v60  ;;  %v2547_v38 = vpop.f32.mrf.mxu3  ;;  %v13392_v60 = vld [vmem:[#allocation29_spill] sm:$0xff] }
 0x368   :  { %13385 = vst [vmem:[#allocation73_spill] sm:$0xff] %v11581_v20  ;;  %v3577_v15 = vand.u32 2147483648, %v11374_v39  ;;  %7716 = vpow2.f32 %v6656_v26  ;;  %v11605_v57 = vpop.eup %7710  ;;  %v3414_v59 = vsel %vm11513_vm8, %v11465_v31, %v3409_v24  ;;  %vm3572_vm1 = vweird.f32 %v11474_v28 }
 0x369   :  { %7718 = vpow2.f32 %v6657_v32  ;;  %v2450_v10 = vadd.f32 %v2449_v34, %v2400_v23  ;;  %vm11611_vm2 = vcmp.eq.f32.partialorder %v3575_v11, 8.507059e+37  ;;  %v3583_v1 = vsub.f32 1.0, %v11579_v18  ;;  %v13393_v32 = vld [vmem:[#allocation33_spill] sm:$0xff]  ;;  %v2402_v24 = vpop.f32.mrf.mxu0  ;;  %v7294_v18 = vld [vmem:[#allocation7 + $0x44] sm:$0xf]  ;;  %vm11647_vm3 = vmor %vm3571_vm0, %vm3572_vm1 }
 0x36a   :  { %v3592_v5 = vand.u32 2147483648, %v11472_v22  ;;  %v6662_v26 = vmul.f32 -1.442695, %v13392_v60  ;;  %v2548_v27 = vadd.f32 %v2547_v38, %v2498_v49  ;;  %v3489_v31 = vsel %vm11531_vm10, %v11503_v46, %v3484_v13  ;;  %5188 = vmatmul.bf16.gmra.mxu1 %v13393_v32  ;;  %v6984_v34 = vld [vmem:[#allocation7 + $0x240] sm:$0xf] }
 0x36b   :  { %v3504_v61 = vsel %vm11557_vm13, %v3503_v36, %v3499_v8  ;;  %v3570_v23 = vadd.f32 %v11474_v28, %v3569_v12  ;;  %v11625_v11 = vmul.f32 %v11353_v53, %v2450_v10  ;;  %v3657_v49 = vmul.f32 %v11596_v6, %v11501_v63  ;;  %v7359_v36 = vld [vmem:[#allocation7 + $0x244] sm:$0xf0]  ;;  %v7310_v53 = vld [vmem:[#allocation7 + $0xc4] sm:$0xf]  ;;  %v6794_v12 = vld [vmem:[#allocation7 + $0xc8] sm:$0xf0] }
 0x36c   :  { %v7713_v62 = vpop.eup %7712  ;;  %v3672_v46 = vmul.f32 %v11605_v57, %v11508_v21  ;;  %v11633_v19 = vmul.f32 %v11479_v52, %v2548_v27  ;;  %v6733_v58 = vor.u32 %v7294_v18, %v6730_v43  ;;  %v11638_v8 = vmul.f32 %v3414_v59, %v13328_v56  ;;  %v13396_v18 = vld [vmem:[#allocation103_spill] sm:$0xff] }
 0x36d   :  { %v11635_v13 = vpop.eup %7714  ;;  %v3578_v10 = vor.u32 1.1754944e-38, %v3577_v15  ;;  %v6985_v38 = vor.u32 %v7359_v36, %v6984_v34  ;;  %v6797_v55 = vor.u32 %v7310_v53, %v6794_v12  ;;  %v11641_v14 = vmul.f32 %v3489_v31, %v13331_v25 }
 0x36e   :  { %v7717_v32 = vpop.eup %7716  ;;  %vm3586_vm4 = vweird.f32 %v11472_v22  ;;  %v3590_v56 = vand.u32 2147483647, %v11472_v22  ;;  %v11653_v15 = vor.u32 1.1754944e-38, %v3592_v5  ;;  %5423 = vmatpush.bf16.msrb.mxu2 %v6733_v58  ;;  %v7049_v59 = vor.u32 %v7375_v51, %v7048_v16  ;;  %v2500_v34 = vpop.f32.mrf.mxu2 }
 0x36f   :  { %v7719_v27 = vpop.eup %7718  ;;  %v11656_v25 = vmul.f32 %v3504_v61, %v13396_v18  ;;  %v3574_v39 = vsel %vm11647_vm3, %v11474_v28, %v3570_v23  ;;  %v3665_v31 = vand.u32 2147483647, %v11501_v63  ;;  %v11662_v43 = vadd.f32 1.0, %v7713_v62  ;;  %5325 = vmatpush.bf16.msrb.mxu0 %v6985_v38  ;;  %5472 = vmatpush.bf16.msrb.mxu3 %v6797_v55  ;;  %v2451_v51 = vpop.f32.mrf.mxu1  ;;  %v13426_v55 = vld [vmem:[#allocation34_spill] sm:$0xff] }
 0x370   :  { %v3584_v5 = vmul.f32 %v11538_v3, %v3583_v1  ;;  %v3658_v36 = vsub.f32 1.0, %v3657_v49  ;;  %v3673_v58 = vsub.f32 1.0, %v3672_v46  ;;  %7720 = vpow2.f32 %v6662_v26  ;;  %5374 = vmatpush.bf16.msrb.mxu1 %v7049_v59  ;;  %v2549_v61 = vpop.f32.mrf.mxu3  ;;  %v13399_v59 = vld [vmem:[#allocation118_spill] sm:$0xff] }
 0x371   :  { %vm3587_vm5 = vweird.f32 %v11538_v3  ;;  %vm3661_vm6 = vweird.f32 %v11501_v63  ;;  %v3747_v16 = vmul.f32 %v11635_v13, %v11541_v4  ;;  %v11669_v28 = vadd.f32 1.0, %v7717_v32  ;;  %5242 = vmatmul.bf16.gmra.mxu2 %v13399_v59  ;;  %v7292_v59 = vld [vmem:[#allocation7 + $0x34] sm:$0xf] }
 0x372   :  { %v2452_v62 = vadd.f32 %v2451_v51, %v2402_v24  ;;  %vm11671_vm7 = vcmp.eq.f32.partialorder %v3590_v56, 8.507059e+37  ;;  %v3667_v1 = vand.u32 2147483648, %v11501_v63  ;;  %v3680_v26 = vand.u32 2147483647, %v11508_v21  ;;  %v2405_v24 = vpop.f32.mrf.mxu0  ;;  %vm11717_vm10 = vmor %vm3586_vm4, %vm3587_vm5 }
 0x373   :  { %v11677_v23 = vadd.f32 1.0, %v7719_v27  ;;  %v2550_v49 = vadd.f32 %v2549_v61, %v2500_v34  ;;  %v3579_v46 = vsel %vm11611_vm2, %v3578_v10, %v3574_v39  ;;  %v3682_v53 = vand.u32 2147483648, %v11508_v21  ;;  %v13400_v10 = vld [vmem:[#allocation30_spill] sm:$0xff]  ;;  %v13404_v34 = vld [vmem:[#allocation116_spill] sm:$0xff] }
 0x374   :  { %7722 = vrcp.f32 %v11662_v43  ;;  %v4524_v32 = vmul.f32 %v11482_v50, %v2452_v62  ;;  %v3585_v12 = vadd.f32 %v11538_v3, %v3584_v5  ;;  %v3659_v38 = vmul.f32 %v11596_v6, %v3658_v36  ;;  %v13405_v5 = vld [vmem:[#allocation117_spill] sm:$0xff]  ;;  %v13406_v36 = vld [vmem:[#allocation120_spill] sm:$0xff] }
 0x375   :  { %v3674_v52 = vmul.f32 %v11605_v57, %v3673_v58  ;;  %vm3676_vm8 = vweird.f32 %v11508_v21  ;;  %v4525_v56 = vmul.f32 %v11485_v33, %v2550_v49  ;;  %v3748_v29 = vsub.f32 1.0, %v3747_v16  ;;  %v13407_v58 = vld [vmem:[#allocation121_spill] sm:$0xff]  ;;  %v13408_v16 = vld [vmem:[#allocation28_spill] sm:$0xff] }
 0x376   :  { %7724 = vrcp.f32 %v11669_v28  ;;  %v6663_v27 = vmul.f32 -1.442695, %v13400_v10  ;;  %v11693_v50 = vpack.c.bf16 %v4524_v32, %v11625_v11  ;;  %v7721_v18 = vpop.eup %7720  ;;  %vm11695_vm9 = vcmp.eq.f32.partialorder %v3665_v31, 8.507059e+37  ;;  %5144 = vmatmul.bf16.gmra.mxu0 %v13408_v16  ;;  %v13409_v62 = vld [vmem:[#allocation65_spill] sm:$0xff]  ;;  %v6722_v16 = vld [vmem:[#allocation7 + $0x38] sm:$0xf0] }
 0x377   :  { %7726 = vrcp.f32 %v11677_v23  ;;  %v11702_v33 = vadd.f32 %v13405_v5, %v13404_v34  ;;  %v11706_v51 = vadd.f32 %v13407_v58, %v13406_v36  ;;  %5291 = vmatmul.bf16.gmra.mxu3 %v13409_v62  ;;  %v11711_v11 = vpack.c.bf16 %v4525_v56, %v11633_v19  ;;  %v2503_v34 = vpop.f32.mrf.mxu2 }
 0x378   :  { %13401 = vst [vmem:[#allocation66_spill] sm:$0xff] %v11693_v50  ;;  %vm3662_vm11 = vweird.f32 %v11596_v6  ;;  %v3668_v61 = vor.u32 1.1754944e-38, %v3667_v1  ;;  %v11722_v49 = vor.u32 1.1754944e-38, %v3682_v53  ;;  %v3755_v32 = vand.u32 2147483647, %v11541_v4  ;;  %v2454_v1 = vpop.f32.mrf.mxu1 }
 0x379   :  { %13410 = vst [vmem:[#allocation67_spill] sm:$0xff] %v11711_v11  ;;  %v3589_v19 = vsel %vm11717_vm10, %v11538_v3, %v3585_v12  ;;  %v3660_v56 = vadd.f32 %v11596_v6, %v3659_v38  ;;  %vm3677_vm12 = vweird.f32 %v11605_v57  ;;  %vm11730_vm13 = vcmp.eq.f32.partialorder %v3680_v26, 8.507059e+37  ;;  %v2552_v3 = vpop.f32.mrf.mxu3  ;;  %vm11744_vm14 = vmor %vm3661_vm6, %vm3662_vm11 }
 0x37a   :  { %v3757_v5 = vand.u32 2147483648, %v11541_v4  ;;  %v11735_v53 = vpop.eup %7722  ;;  %v3675_v36 = vadd.f32 %v11605_v57, %v3674_v52  ;;  %v11738_v58 = vadd.f32 1.0, %v7721_v18  ;;  %7728 = vpow2.f32 %v6663_v27  ;;  %vm11782_vm1 = vmor %vm3676_vm8, %vm3677_vm12 }
 0x37b   :  { %v2455_v31 = vadd.f32 %v2454_v1, %v2405_v24  ;;  %v3749_v12 = vmul.f32 %v11635_v13, %v3748_v29  ;;  %v6668_v38 = vmul.f32 -1.442695, %v11702_v33  ;;  %v6669_v62 = vmul.f32 -1.442695, %v11706_v51  ;;  %v13417_v29 = vld [vmem:[#allocation37_spill] sm:$0xff]  ;;  %v2407_v1 = vpop.f32.mrf.mxu0 }
 0x37c   :  { %v2553_v52 = vadd.f32 %v2552_v3, %v2503_v34  ;;  %v11751_v18 = vpop.eup %7724  ;;  %v11754_v24 = vmul.f32 %v3579_v46, %v13341_v40  ;;  %v3594_v63 = vsel %vm11671_vm7, %v11653_v15, %v3589_v19  ;;  %vm3751_vm15 = vweird.f32 %v11541_v4  ;;  %5193 = vmatmul.bf16.gmra.mxu1 %v13417_v29  ;;  %v6976_v34 = vld [vmem:[#allocation7 + $0x230] sm:$0xf]  ;;  %v7357_v19 = vld [vmem:[#allocation7 + $0x234] sm:$0xf0]  ;;  %v6786_v29 = vld [vmem:[#allocation7 + $0xb8] sm:$0xf0] }
 0x37d   :  { %v11761_v27 = vmul.f32 %v11511_v42, %v2455_v31  ;;  %v11764_v3 = vpop.eup %7726  ;;  %v3664_v40 = vsel %vm11744_vm14, %v11596_v6, %v3660_v56  ;;  %vm11769_vm0 = vcmp.eq.f32.partialorder %v3755_v32, 8.507059e+37  ;;  %v3762_v42 = vmul.f32 %v11735_v53, %v11662_v43  ;;  %v7308_v31 = vld [vmem:[#allocation7 + $0xb4] sm:$0xf] }
 0x37e   :  { %v11776_v15 = vmul.f32 %v11638_v8, %v2553_v52  ;;  %v6725_v46 = vor.u32 %v7292_v59, %v6722_v16  ;;  %v3772_v32 = vand.u32 2147483648, %v11662_v43  ;;  %7730 = vrcp.f32 %v11738_v58  ;;  %v7040_v8 = vld [vmem:[#allocation7 + $0x2b0] sm:$0xf]  ;;  %v7373_v52 = vld [vmem:[#allocation7 + $0x2b4] sm:$0xf0] }
 0x37f   :  { %v6977_v56 = vor.u32 %v7357_v19, %v6976_v34  ;;  %v6789_v26 = vor.u32 %v7308_v31, %v6786_v29  ;;  %v3679_v59 = vsel %vm11782_vm1, %v11605_v57, %v3675_v36  ;;  %v3750_v16 = vadd.f32 %v11635_v13, %v3749_v12  ;;  %v2505_v19 = vpop.f32.mrf.mxu2 }
 0x380   :  { %vm3752_vm2 = vweird.f32 %v11635_v13  ;;  %5424 = vmatpush.bf16.msrb.mxu2 %v6725_v46  ;;  %v7041_v21 = vor.u32 %v7373_v52, %v7040_v8  ;;  %v7729_v11 = vpop.eup %7728  ;;  %v3669_v50 = vsel %vm11695_vm9, %v3668_v61, %v3664_v40  ;;  %v3837_v34 = vmul.f32 %v11751_v18, %v11669_v28  ;;  %v2456_v46 = vpop.f32.mrf.mxu1 }
 0x381   :  { %v3852_v29 = vmul.f32 %v11764_v3, %v11677_v23  ;;  %7732 = vpow2.f32 %v6668_v38  ;;  %5326 = vmatpush.bf16.msrb.mxu0 %v6977_v56  ;;  %5473 = vmatpush.bf16.msrb.mxu3 %v6789_v26  ;;  %v11800_v57 = vmul.f32 %v3594_v63, %v13346_v17  ;;  %v3758_v36 = vor.u32 1.1754944e-38, %v3757_v5  ;;  %vm11809_vm3 = vmor %vm3751_vm15, %vm3752_vm2 }
 0x382   :  { %v3763_v12 = vsub.f32 1.0, %v3762_v42  ;;  %7734 = vpow2.f32 %v6669_v62  ;;  %5375 = vmatpush.bf16.msrb.mxu1 %v7041_v21  ;;  %v3684_v39 = vsel %vm11730_vm13, %v11722_v49, %v3679_v59  ;;  %v3770_v17 = vand.u32 2147483647, %v11662_v43  ;;  %v2554_v62 = vpop.f32.mrf.mxu3  ;;  %v13427_v59 = vld [vmem:[#allocation122_spill] sm:$0xff]  ;;  %v13428_v21 = vld [vmem:[#allocation32_spill] sm:$0xff] }
 0x383   :  { %v11814_v38 = vor.u32 1.1754944e-38, %v3772_v32  ;;  %v2457_v5 = vadd.f32 %v2456_v46, %v2407_v1  ;;  %v11817_v63 = vmul.f32 %v3669_v50, %v13355_v7  ;;  %v3754_v49 = vsel %vm11809_vm3, %v11635_v13, %v3750_v16  ;;  %v2410_v1 = vpop.f32.mrf.mxu0 }
 0x384   :  { %v11822_v22 = vadd.f32 1.0, %v7729_v11  ;;  %v2555_v4 = vadd.f32 %v2554_v62, %v2505_v19  ;;  %v11824_v40 = vpop.eup %7730  ;;  %v3838_v42 = vsub.f32 1.0, %v3837_v34  ;;  %v3847_v31 = vand.u32 2147483648, %v11669_v28  ;;  %v13424_v11 = vld [vmem:[#allocation55_spill] sm:$0xff]  ;;  %v13429_v34 = vld [vmem:[#allocation41_spill] sm:$0xff] }
 0x385   :  { %v3853_v6 = vsub.f32 1.0, %v3852_v29  ;;  %v4536_v32 = vmul.f32 %v11641_v14, %v2457_v5  ;;  %v11829_v56 = vmul.f32 %v3684_v39, %v13358_v54  ;;  %v3764_v7 = vmul.f32 %v11735_v53, %v3763_v12  ;;  %5247 = vmatmul.bf16.gmra.mxu2 %v13424_v11  ;;  %v13431_v12 = vld [vmem:[#allocation38_spill] sm:$0xff]  ;;  %v13438_v11 = vld [vmem:[#allocation35_spill] sm:$0xff] }
 0x386   :  { %vm3766_vm4 = vweird.f32 %v11662_v43  ;;  %v3845_v13 = vand.u32 2147483647, %v11669_v28  ;;  %v4537_v50 = vmul.f32 %v11656_v25, %v2555_v4  ;;  %v3759_v8 = vsel %vm11769_vm0, %v3758_v36, %v3754_v49  ;;  %5149 = vmatmul.bf16.gmra.mxu0 %v13428_v21  ;;  %v13442_v21 = vld [vmem:[#allocation43_spill] sm:$0xff] }
 0x387   :  { %v7733_v26 = vpop.eup %7732  ;;  %vm3767_vm5 = vweird.f32 %v11735_v53  ;;  %vm3841_vm6 = vweird.f32 %v11669_v28  ;;  %v3860_v54 = vand.u32 2147483647, %v11677_v23  ;;  %v11842_v14 = vpack.c.bf16 %v4536_v32, %v11761_v27  ;;  %5296 = vmatmul.bf16.gmra.mxu3 %v13429_v34  ;;  %v2508_v39 = vpop.f32.mrf.mxu2  ;;  %v6968_v34 = vld [vmem:[#allocation7 + $0x220] sm:$0xf] }
 0x388   :  { %v7735_v52 = vpop.eup %7734  ;;  %vm3856_vm7 = vweird.f32 %v11677_v23  ;;  %v11847_v25 = vmul.f32 %v11824_v40, %v11738_v58  ;;  %7736 = vrcp.f32 %v11822_v22  ;;  %v11852_v16 = vadd.f32 %v13427_v59, %v13426_v55  ;;  %v7290_v59 = vld [vmem:[#allocation7 + $0x24] sm:$0xf]  ;;  %vm11906_vm12 = vmor %vm3766_vm4, %vm3767_vm5 }
 0x389   :  { %13425 = vst [vmem:[#allocation68_spill] sm:$0xff] %v11842_v14  ;;  %v11857_v27 = vpack.c.bf16 %v4537_v50, %v11776_v15  ;;  %v3839_v29 = vmul.f32 %v11751_v18, %v3838_v42  ;;  %v11860_v19 = vor.u32 1.1754944e-38, %v3847_v31  ;;  %v3854_v36 = vmul.f32 %v11764_v3, %v3853_v6  ;;  %v2459_v15 = vpop.f32.mrf.mxu1  ;;  %v7367_v14 = vld [vmem:[#allocation7 + $0x284] sm:$0xf0] }
 0x38a   :  { %v6674_v46 = vmul.f32 -1.442695, %v13431_v12  ;;  %v11865_v61 = vmul.f32 %v3759_v8, %v13363_v37  ;;  %v11868_v5 = vadd.f32 %v11735_v53, %v3764_v7  ;;  %v3862_v62 = vand.u32 2147483648, %v11677_v23  ;;  %v2557_v31 = vpop.f32.mrf.mxu3  ;;  %v13436_v7 = vld [vmem:[#allocation42_spill] sm:$0xff] }
 0x38b   :  { %13430 = vst [vmem:[#allocation69_spill] sm:$0xff] %v11857_v27  ;;  %v11871_v49 = vadd.f32 1.0, %v7733_v26  ;;  %vm11873_vm8 = vcmp.eq.f32.partialorder %v3770_v17, 8.507059e+37  ;;  %vm3842_vm9 = vweird.f32 %v11751_v18  ;;  %vm3857_vm10 = vweird.f32 %v11764_v3 }
 0x38c   :  { %v11879_v42 = vadd.f32 1.0, %v7735_v52  ;;  %v2460_v37 = vadd.f32 %v2459_v15, %v2410_v1  ;;  %vm11881_vm11 = vcmp.eq.f32.partialorder %v3845_v13, 8.507059e+37  ;;  %v3928_v32 = vsub.f32 1.0, %v11847_v25  ;;  %v13437_v1 = vld [vmem:[#allocation31_spill] sm:$0xff]  ;;  %v2412_v13 = vpop.f32.mrf.mxu0  ;;  %v6714_v15 = vld [vmem:[#allocation7 + $0x28] sm:$0xf0]  ;;  %vm11916_vm13 = vmor %vm3841_vm6, %vm3842_vm9 }
 0x38d   :  { %v6675_v50 = vmul.f32 -1.442695, %v13436_v7  ;;  %v6680_v17 = vmul.f32 -1.442695, %v11852_v16  ;;  %v2558_v26 = vadd.f32 %v2557_v31, %v2508_v39  ;;  %v3840_v8 = vadd.f32 %v11751_v18, %v3839_v29  ;;  %5198 = vmatmul.bf16.gmra.mxu1 %v13437_v1  ;;  %v13439_v39 = vld [vmem:[#allocation18_spill] sm:$0xff]  ;;  %vm11936_vm15 = vmor %vm3856_vm7, %vm3857_vm10 }
 0x38e   :  { %v3855_v55 = vadd.f32 %v11764_v3, %v3854_v36  ;;  %7738 = vpow2.f32 %v6674_v46  ;;  %v11891_v52 = vmul.f32 %v11754_v24, %v2460_v37  ;;  %v11894_v25 = vpop.eup %7736  ;;  %v2075_v31 = vadd.f32 %v13439_v39, %v13438_v11  ;;  %v7355_v46 = vld [vmem:[#allocation7 + $0x224] sm:$0xf0]  ;;  %v7306_v24 = vld [vmem:[#allocation7 + $0xa4] sm:$0xf]  ;;  %v6778_v37 = vld [vmem:[#allocation7 + $0xa8] sm:$0xf0] }
 0x38f   :  { %7740 = vrcp.f32 %v11871_v49  ;;  %v11900_v29 = vmul.f32 %v11800_v57, %v2558_v26  ;;  %v6717_v36 = vor.u32 %v7290_v59, %v6714_v15  ;;  %v6681_v27 = vmul.f32 -1.442695, %v13442_v21  ;;  %v7032_v57 = vld [vmem:[#allocation7 + $0x2a0] sm:$0xf]  ;;  %v7371_v26 = vld [vmem:[#allocation7 + $0x2a4] sm:$0xf0] }
 0x390   :  { %7742 = vrcp.f32 %v11879_v42  ;;  %v6969_v11 = vor.u32 %v7355_v46, %v6968_v34  ;;  %v6781_v39 = vor.u32 %v7306_v24, %v6778_v37  ;;  %vm11920_vm14 = vcmp.eq.f32.partialorder %v3860_v54, 8.507059e+37  ;;  %v2510_v24 = vpop.f32.mrf.mxu2 }
 0x391   :  { %v3935_v15 = vand.u32 2147483647, %v11738_v58  ;;  %7744 = vpow2.f32 %v6675_v50  ;;  %5425 = vmatpush.bf16.msrb.mxu2 %v6717_v36  ;;  %v7033_v34 = vor.u32 %v7371_v26, %v7032_v57  ;;  %v3769_v46 = vsel %vm11906_vm12, %v11735_v53, %v11868_v5  ;;  %v13449_v5 = vld [vmem:[#allocation126_spill] sm:$0xff] }
 0x392   :  { %v3844_v28 = vsel %vm11916_vm13, %v11751_v18, %v3840_v8  ;;  %v3863_v50 = vor.u32 1.1754944e-38, %v3862_v62  ;;  %v3942_v36 = vmul.f32 %v11894_v25, %v11822_v22  ;;  %5327 = vmatpush.bf16.msrb.mxu0 %v6969_v11  ;;  %5474 = vmatpush.bf16.msrb.mxu3 %v6781_v39  ;;  %v3859_v53 = vsel %vm11936_vm15, %v11764_v3, %v3855_v55  ;;  %v2461_v8 = vpop.f32.mrf.mxu1  ;;  %v2559_v11 = vpop.f32.mrf.mxu3 }
 0x393   :  { %v3929_v18 = vmul.f32 %v11824_v40, %v3928_v32  ;;  %7746 = vpow2.f32 %v6680_v17  ;;  %v4556_v23 = vmul.f32 %v13449_v5, %v2075_v31  ;;  %5376 = vmatpush.bf16.msrb.mxu1 %v7033_v34  ;;  %vm3931_vm0 = vweird.f32 %v11738_v58 }
 0x394   :  { %v7739_v1 = vpop.eup %7738  ;;  %v3937_v62 = vand.u32 2147483648, %v11738_v58  ;;  %7748 = vpow2.f32 %v6681_v27  ;;  %v2462_v37 = vadd.f32 %v2461_v8, %v2412_v13  ;;  %v3774_v3 = vsel %vm11873_vm8, %v11814_v38, %v3769_v46  ;;  %v2415_v57 = vpop.f32.mrf.mxu0  ;;  %v13452_v46 = vld [vmem:[#allocation36_spill] sm:$0xff] }
 0x395   :  { %v11949_v39 = vpop.eup %7740  ;;  %vm3932_vm1 = vweird.f32 %v11824_v40  ;;  %vm11955_vm2 = vcmp.eq.f32.partialorder %v3935_v15, 8.507059e+37  ;;  %v3952_v17 = vand.u32 2147483648, %v11822_v22  ;;  %v2560_v55 = vadd.f32 %v2559_v11, %v2510_v24  ;;  %v13454_v24 = vld [vmem:[#allocation70_spill] sm:$0xff] }
 0x396   :  { %v11960_v31 = vpop.eup %7742  ;;  %v3849_v27 = vsel %vm11881_vm11, %v11860_v19, %v3844_v28  ;;  %v3864_v13 = vsel %vm11920_vm14, %v3863_v50, %v3859_v53  ;;  %v3943_v4 = vsub.f32 1.0, %v3942_v36  ;;  %v4548_v38 = vmul.f32 %v11817_v63, %v2462_v37  ;;  %5252 = vmatmul.bf16.gmra.mxu2 %v13454_v24  ;;  %vm12007_vm4 = vmor %vm3931_vm0, %vm3932_vm1 }
 0x397   :  { %v7745_v26 = vpop.eup %7744  ;;  %v3930_v59 = vadd.f32 %v11824_v40, %v3929_v18  ;;  %v11969_v15 = vadd.f32 1.0, %v7739_v1  ;;  %v4549_v34 = vmul.f32 %v11829_v56, %v2560_v55  ;;  %v11973_v54 = vpack.c.bf16 %v4556_v23, %v13452_v46  ;;  %v13464_v46 = vld [vmem:[#allocation58_spill] sm:$0xff]  ;;  %v13466_v23 = vld [vmem:[#allocation59_spill] sm:$0xff] }
 0x398   :  { %v4459_v19 = vmul.f32 %v3774_v3, %v13377_v44  ;;  %v3938_v6 = vor.u32 1.1754944e-38, %v3937_v62  ;;  %v11979_v43 = vmul.f32 %v11949_v39, %v11871_v49  ;;  %v11982_v63 = vpack.c.bf16 %v4548_v38, %v11891_v52  ;;  %v13456_v44 = vld [vmem:[#allocation56_spill] sm:$0xff]  ;;  %v13461_v3 = vld [vmem:[#allocation46_spill] sm:$0xff] }
 0x399   :  { %13453 = vst [vmem:[#allocation78_spill] sm:$0xff] %v11973_v54  ;;  %v7747_v28 = vpop.eup %7746  ;;  %vm3946_vm3 = vweird.f32 %v11822_v22  ;;  %v3950_v56 = vand.u32 2147483647, %v11822_v22  ;;  %v11986_v50 = vor.u32 1.1754944e-38, %v3952_v17  ;;  %v11990_v36 = vmul.f32 %v11960_v31, %v11879_v42  ;;  %5154 = vmatmul.bf16.gmra.mxu0 %v11973_v54  ;;  %5301 = vmatmul.bf16.gmra.mxu3 %v13456_v44  ;;  %v7369_v54 = vld [vmem:[#allocation7 + $0x294] sm:$0xf0] }
 0x39a   :  { %13455 = vst [vmem:[#allocation74_spill] sm:$0xff] %v11982_v63  ;;  %v11995_v53 = vpack.c.bf16 %v4549_v34, %v11900_v29  ;;  %v7749_v52 = vpop.eup %7748  ;;  %v11998_v18 = vmul.f32 %v3849_v27, %v11521_v2  ;;  %v12001_v5 = vmul.f32 %v3864_v13, %v11527_v35  ;;  %v3944_v8 = vmul.f32 %v11894_v25, %v3943_v4  ;;  %v2513_v29 = vpop.f32.mrf.mxu2  ;;  %v13460_v35 = vld [vmem:[#allocation125_spill] sm:$0xff]  ;;  %v7016_v63 = vld [vmem:[#allocation7 + $0x280] sm:$0xf] }
 0x39b   :  { %v12012_v1 = vadd.f32 1.0, %v7745_v26  ;;  %v3934_v2 = vsel %vm12007_vm4, %v11824_v40, %v3930_v59  ;;  %vm3947_vm5 = vweird.f32 %v11894_v25  ;;  %7750 = vrcp.f32 %v11969_v15  ;;  %v2464_v58 = vpop.f32.mrf.mxu1  ;;  %v2562_v27 = vpop.f32.mrf.mxu3 }
 0x39c   :  { %13457 = vst [vmem:[#allocation75_spill] sm:$0xff] %v11995_v53  ;;  %v6686_v62 = vmul.f32 -1.442695, %v13460_v35  ;;  %v4018_v37 = vsub.f32 1.0, %v11979_v43  ;;  %v4027_v11 = vand.u32 2147483648, %v11871_v49  ;;  %v2465_v55 = vadd.f32 %v2464_v58, %v2415_v57  ;;  %v2417_v43 = vpop.f32.mrf.mxu0  ;;  %vm12060_vm8 = vmor %vm3946_vm3, %vm3947_vm5 }
 0x39d   :  { %v6687_v17 = vmul.f32 -1.442695, %v13461_v3  ;;  %vm12023_vm6 = vcmp.eq.f32.partialorder %v3950_v56, 8.507059e+37  ;;  %v4033_v40 = vsub.f32 1.0, %v11990_v36  ;;  %v12028_v4 = vadd.f32 1.0, %v7747_v28  ;;  %5203 = vmatmul.bf16.gmra.mxu1 %v13464_v46 }
 0x39e   :  { %v12030_v38 = vadd.f32 1.0, %v7749_v52  ;;  %v2563_v26 = vadd.f32 %v2562_v27, %v2513_v29  ;;  %v3939_v59 = vsel %vm11955_vm2, %v3938_v6, %v3934_v2  ;;  %v3945_v34 = vadd.f32 %v11894_v25, %v3944_v8  ;;  %v7288_v56 = vld [vmem:[#allocation7 + $0x14] sm:$0xf]  ;;  %v6706_v36 = vld [vmem:[#allocation7 + $0x18] sm:$0xf0] }
 0x39f   :  { %7752 = vrcp.f32 %v12012_v1  ;;  %v12037_v57 = vmul.f32 %v11865_v61, %v2465_v55  ;;  %v6960_v28 = vld [vmem:[#allocation7 + $0x210] sm:$0xf]  ;;  %v13465_v52 = vld [vmem:[#allocation123_spill] sm:$0xff]  ;;  %v6709_v32 = vor.u32 %v7288_v56, %v6706_v36  ;;  %v7304_v8 = vld [vmem:[#allocation7 + $0x94] sm:$0xf]  ;;  %vm4021_vm7 = vweird.f32 %v11871_v49 }
 0x3a0   :  { %7754 = vpow2.f32 %v6686_v62  ;;  %v2080_v29 = vadd.f32 %v13466_v23, %v13465_v52  ;;  %v12042_v58 = vmul.f32 %v4459_v19, %v2563_v26  ;;  %v7353_v6 = vld [vmem:[#allocation7 + $0x214] sm:$0xf0]  ;;  %v6770_v2 = vld [vmem:[#allocation7 + $0x98] sm:$0xf0]  ;;  %v13468_v61 = vld [vmem:[#allocation40_spill] sm:$0xff]  ;;  %v4019_v36 = vmul.f32 %v11949_v39, %v4018_v37 }
 0x3a1   :  { %7756 = vpow2.f32 %v6687_v17  ;;  %v13467_v27 = vld [vmem:[#allocation39_spill] sm:$0xff]  ;;  %v6961_v44 = vor.u32 %v7353_v6, %v6960_v28  ;;  %v6773_v24 = vor.u32 %v7304_v8, %v6770_v2  ;;  %v7024_v46 = vld [vmem:[#allocation7 + $0x290] sm:$0xf]  ;;  %v12048_v53 = vpop.eup %7750  ;;  %v4025_v19 = vand.u32 2147483647, %v11871_v49  ;;  %5426 = vmatpush.bf16.msrb.mxu2 %v6709_v32 }
 0x3a2   :  { %v12046_v55 = vadd.f32 %v13468_v61, %v13467_v27  ;;  %v4040_v62 = vand.u32 2147483647, %v11879_v42  ;;  %v7025_v26 = vor.u32 %v7369_v54, %v7024_v46  ;;  %v12054_v17 = vmul.f32 %v3939_v59, %v13392_v60  ;;  %v2515_v54 = vpop.f32.mrf.mxu2  ;;  %v13471_v59 = vld [vmem:[#allocation129_spill] sm:$0xff] }
 0x3a3   :  { %v12065_v28 = vor.u32 1.1754944e-38, %v4027_v11  ;;  %vm4036_vm9 = vweird.f32 %v11879_v42  ;;  %v4042_v52 = vand.u32 2147483648, %v11879_v42  ;;  %5328 = vmatpush.bf16.msrb.mxu0 %v6961_v44  ;;  %5475 = vmatpush.bf16.msrb.mxu3 %v6773_v24  ;;  %v3949_v60 = vsel %vm12060_vm8, %v11894_v25, %v3945_v34  ;;  %v2466_v37 = vpop.f32.mrf.mxu1  ;;  %v2564_v32 = vpop.f32.mrf.mxu3 }
 0x3a4   :  { %v4034_v22 = vmul.f32 %v11960_v31, %v4033_v40  ;;  %7758 = vrcp.f32 %v12028_v4  ;;  %v4568_v46 = vmul.f32 %v13471_v59, %v2080_v29  ;;  %5377 = vmatpush.bf16.msrb.mxu1 %v7025_v26  ;;  %v4107_v23 = vmul.f32 %v12048_v53, %v11969_v15  ;;  %v13474_v29 = vld [vmem:[#allocation128_spill] sm:$0xff]  ;;  %v13490_v40 = vld [vmem:[#allocation50_spill] sm:$0xff] }
 0x3a5   :  { %v12075_v11 = vpop.eup %7752  ;;  %7760 = vrcp.f32 %v12030_v38  ;;  %v6692_v24 = vmul.f32 -1.442695, %v12046_v55  ;;  %v2467_v44 = vadd.f32 %v2466_v37, %v2417_v43  ;;  %vm4022_vm10 = vweird.f32 %v11949_v39 }
 0x3a6   :  { %v7755_v25 = vpop.eup %7754  ;;  %vm12082_vm11 = vcmp.eq.f32.partialorder %v4025_v19, 8.507059e+37  ;;  %v4117_v34 = vand.u32 2147483648, %v11969_v15  ;;  %v6693_v6 = vmul.f32 -1.442695, %v13474_v29  ;;  %v2565_v8 = vadd.f32 %v2564_v32, %v2515_v54  ;;  %v2420_v19 = vpop.f32.mrf.mxu0  ;;  %v13475_v54 = vld [vmem:[#allocation57_spill] sm:$0xff]  ;;  %v13477_v32 = vld [vmem:[#allocation71_spill] sm:$0xff]  ;;  %vm12127_vm14 = vmor %vm4021_vm7, %vm4022_vm10 }
 0x3a7   :  { %v7757_v2 = vpop.eup %7756  ;;  %v3954_v27 = vsel %vm12023_vm6, %v11986_v50, %v3949_v60  ;;  %v4020_v43 = vadd.f32 %v11949_v39, %v4019_v36  ;;  %vm4037_vm12 = vweird.f32 %v11960_v31  ;;  %v4560_v61 = vmul.f32 %v11998_v18, %v2467_v44  ;;  %5257 = vmatmul.bf16.gmra.mxu2 %v13477_v32 }
 0x3a8   :  { %v4035_v26 = vadd.f32 %v11960_v31, %v4034_v22  ;;  %v4122_v56 = vmul.f32 %v12075_v11, %v12012_v1  ;;  %v4561_v59 = vmul.f32 %v12001_v5, %v2565_v8  ;;  %v12099_v37 = vpack.c.bf16 %v4568_v46, %v13475_v54  ;;  %v13481_v5 = vld [vmem:[#allocation72_spill] sm:$0xff]  ;;  %vm12141_vm15 = vmor %vm4036_vm9, %vm4037_vm12 }
 0x3a9   :  { %v4108_v50 = vsub.f32 1.0, %v4107_v23  ;;  %v12102_v13 = vadd.f32 1.0, %v7755_v25  ;;  %7762 = vpow2.f32 %v6692_v24  ;;  %v12105_v36 = vpack.c.bf16 %v4560_v61, %v12037_v57  ;;  %5306 = vmatmul.bf16.gmra.mxu3 %v13481_v5 }
 0x3aa   :  { %13476 = vst [vmem:[#allocation12_spill] sm:$0xff] %v12099_v37  ;;  %v12107_v18 = vpop.eup %7758  ;;  %vm12109_vm13 = vcmp.eq.f32.partialorder %v4040_v62, 8.507059e+37  ;;  %v12113_v22 = vadd.f32 1.0, %v7757_v2  ;;  %7764 = vpow2.f32 %v6693_v6  ;;  %5159 = vmatmul.bf16.gmra.mxu0 %v12099_v37  ;;  %v12118_v46 = vpack.c.bf16 %v4561_v59, %v12042_v58  ;;  %v2518_v6 = vpop.f32.mrf.mxu2  ;;  %v6698_v62 = vld [vmem:[#allocation7 + $0x8] sm:$0xf0] }
 0x3ab   :  { %13478 = vst [vmem:[#allocation79_spill] sm:$0xff] %v12105_v36  ;;  %v12120_v23 = vpop.eup %7760  ;;  %v4471_v57 = vmul.f32 %v3954_v27, %v13400_v10  ;;  %v4043_v24 = vor.u32 1.1754944e-38, %v4042_v52  ;;  %v4115_v44 = vand.u32 2147483647, %v11969_v15  ;;  %v12132_v25 = vor.u32 1.1754944e-38, %v4117_v34  ;;  %v2469_v34 = vpop.f32.mrf.mxu1 }
 0x3ac   :  { %13482 = vst [vmem:[#allocation76_spill] sm:$0xff] %v12118_v46  ;;  %v4024_v58 = vsel %vm12127_vm14, %v11949_v39, %v4020_v43  ;;  %v4123_v49 = vsub.f32 1.0, %v4122_v56  ;;  %v4130_v52 = vand.u32 2147483647, %v12012_v1  ;;  %v4132_v8 = vand.u32 2147483648, %v12012_v1  ;;  %v2567_v42 = vpop.f32.mrf.mxu3 }
 0x3ad   :  { %v4039_v2 = vsel %vm12141_vm15, %v11960_v31, %v4035_v26  ;;  %v4109_v39 = vmul.f32 %v12048_v53, %v4108_v50  ;;  %7766 = vrcp.f32 %v12102_v13  ;;  %v2470_v27 = vadd.f32 %v2469_v34, %v2420_v19  ;;  %v13487_v26 = vld [vmem:[#allocation47_spill] sm:$0xff]  ;;  %v7286_v50 = vld [vmem:[#allocation7 + $0x4] sm:$0xf]  ;;  %v6952_v10 = vld [vmem:[#allocation7 + $0x200] sm:$0xf] }
 0x3ae   :  { %v4197_v43 = vmul.f32 %v12107_v18, %v12028_v4  ;;  %v4212_v61 = vmul.f32 %v12120_v23, %v12030_v38  ;;  %7768 = vrcp.f32 %v12113_v22  ;;  %v2568_v56 = vadd.f32 %v2567_v42, %v2518_v6  ;;  %5208 = vmatmul.bf16.gmra.mxu1 %v13487_v26  ;;  %v2422_v54 = vpop.f32.mrf.mxu0  ;;  %v6762_v37 = vld [vmem:[#allocation7 + $0x88] sm:$0xf0] }
 0x3af   :  { %v7763_v59 = vpop.eup %7762  ;;  %v4029_v31 = vsel %vm12082_vm11, %v12065_v28, %v4024_v58  ;;  %vm4111_vm0 = vweird.f32 %v11969_v15  ;;  %vm4112_vm1 = vweird.f32 %v12048_v53  ;;  %v12163_v19 = vmul.f32 %v12054_v17, %v2470_v27  ;;  %v13491_v58 = vld [vmem:[#allocation60_spill] sm:$0xff]  ;;  %v7351_v17 = vld [vmem:[#allocation7 + $0x204] sm:$0xf0] }
 0x3b0   :  { %v7765_v34 = vpop.eup %7764  ;;  %vm12166_vm2 = vcmp.eq.f32.partialorder %v4115_v44, 8.507059e+37  ;;  %v4124_v28 = vmul.f32 %v12075_v11, %v4123_v49  ;;  %v2085_v42 = vadd.f32 %v13491_v58, %v13490_v40  ;;  %v4567_v5 = vmul.f32 %v4471_v57, %v2568_v56  ;;  %v7302_v27 = vld [vmem:[#allocation7 + $0x84] sm:$0xf]  ;;  %vm12194_vm5 = vmor %vm4111_vm0, %vm4112_vm1 }
 0x3b1   :  { %v6701_v32 = vor.u32 %v7286_v50, %v6698_v62  ;;  %v4044_v26 = vsel %vm12109_vm13, %v4043_v24, %v4039_v2  ;;  %v4110_v46 = vadd.f32 %v12048_v53, %v4109_v39  ;;  %v6953_v36 = vor.u32 %v7351_v17, %v6952_v10  ;;  %v13510_v62 = vld [vmem:[#allocation127_spill] sm:$0xff] }
 0x3b2   :  { %v6765_v44 = vor.u32 %v7302_v27, %v6762_v37  ;;  %v4198_v20 = vsub.f32 1.0, %v4197_v43  ;;  %v4213_v45 = vsub.f32 1.0, %v4212_v61  ;;  %v12176_v49 = vadd.f32 1.0, %v7763_v59  ;;  %v2520_v37 = vpop.f32.mrf.mxu2 }
 0x3b3   :  { %5427 = vmatpush.bf16.msrb.mxu2 %v6701_v32  ;;  %v7017_v40 = vor.u32 %v7367_v14, %v7016_v63  ;;  %v12178_v57 = vpop.eup %7766  ;;  %vm4126_vm3 = vweird.f32 %v12012_v1  ;;  %vm12181_vm4 = vcmp.eq.f32.partialorder %v4130_v52, 8.507059e+37  ;;  %v4133_v60 = vor.u32 1.1754944e-38, %v4132_v8  ;;  %5329 = vmatpush.bf16.msrb.mxu0 %v6953_v36  ;;  %v13496_v32 = vld [vmem:[#allocation130_spill] sm:$0xff]  ;;  %v2471_v36 = vpop.f32.mrf.mxu1 }
 0x3b4   :  { %v12185_v24 = vadd.f32 1.0, %v7765_v34  ;;  %5476 = vmatpush.bf16.msrb.mxu3 %v6765_v44  ;;  %v12187_v2 = vpop.eup %7768  ;;  %v4476_v39 = vmul.f32 %v4029_v31, %v11702_v33  ;;  %v4125_v63 = vadd.f32 %v12075_v11, %v4124_v28  ;;  %vm4127_vm6 = vweird.f32 %v12075_v11  ;;  %v2569_v61 = vpop.f32.mrf.mxu3 }
 0x3b5   :  { %v4580_v52 = vmul.f32 %v13496_v32, %v2085_v42  ;;  %5378 = vmatpush.bf16.msrb.mxu1 %v7017_v40  ;;  %v4477_v8 = vmul.f32 %v4044_v26, %v11706_v51  ;;  %v4114_v33 = vsel %vm12194_vm5, %v12048_v53, %v4110_v46  ;;  %v4205_v15 = vand.u32 2147483647, %v12028_v4  ;;  %vm12211_vm7 = vmor %vm4126_vm3, %vm4127_vm6  ;;  %v13500_v40 = vld [vmem:[#allocation44_spill] sm:$0xff] }
 0x3b6   :  { %v2472_v43 = vadd.f32 %v2471_v36, %v2422_v54  ;;  %v4199_v59 = vmul.f32 %v12107_v18, %v4198_v20  ;;  %v4214_v31 = vmul.f32 %v12120_v23, %v4213_v45  ;;  %7770 = vrcp.f32 %v12176_v49  ;;  %v2425_v46 = vpop.f32.mrf.mxu0  ;;  %v13499_v54 = vld [vmem:[#allocation124_spill] sm:$0xff] }
 0x3b7   :  { %v2570_v50 = vadd.f32 %v2569_v61, %v2520_v37  ;;  %v4287_v51 = vmul.f32 %v12178_v57, %v12102_v13  ;;  %v4302_v53 = vmul.f32 %v12187_v2, %v12113_v22  ;;  %7772 = vrcp.f32 %v12185_v24  ;;  %5262 = vmatmul.bf16.gmra.mxu2 %v11296_v9  ;;  %v13501_v37 = vld [vmem:[#allocation54_spill] sm:$0xff] }
 0x3b8   :  { %v4572_v20 = vmul.f32 %v4476_v39, %v2472_v43  ;;  %v4129_v45 = vsel %vm12211_vm7, %v12075_v11, %v4125_v63  ;;  %v4207_v1 = vand.u32 2147483648, %v12028_v4  ;;  %v12225_v10 = vpack.c.bf16 %v4580_v52, %v13499_v54  ;;  %v6882_v54 = vld [vmem:[#allocation7 + $0x178] sm:$0xf0] }
 0x3b9   :  { %v4573_v26 = vmul.f32 %v4477_v8, %v2570_v50  ;;  %v4119_v34 = vsel %vm12166_vm2, %v12132_v25, %v4114_v33  ;;  %vm4202_vm8 = vweird.f32 %v12107_v18  ;;  %v4220_v28 = vand.u32 2147483647, %v12030_v38  ;;  %5311 = vmatmul.bf16.gmra.mxu3 %v11308_v48 }
 0x3ba   :  { %v12234_v58 = vpack.c.bf16 %v4572_v20, %v12163_v19  ;;  %v4200_v11 = vadd.f32 %v12107_v18, %v4199_v59  ;;  %v4215_v42 = vadd.f32 %v12120_v23, %v4214_v31  ;;  %vm4217_vm9 = vweird.f32 %v12120_v23  ;;  %5164 = vmatmul.bf16.gmra.mxu0 %v12225_v10  ;;  %v2523_v27 = vpop.f32.mrf.mxu2  ;;  %v7332_v20 = vld [vmem:[#allocation7 + $0x174] sm:$0xf] }
 0x3bb   :  { %v12241_v17 = vpack.c.bf16 %v4573_v26, %v4567_v5  ;;  %v4134_v25 = vsel %vm12181_vm4, %v4133_v60, %v4129_v45  ;;  %vm4201_vm10 = vweird.f32 %v12028_v4  ;;  %v4288_v6 = vsub.f32 1.0, %v4287_v51  ;;  %v2474_v4 = vpop.f32.mrf.mxu1  ;;  %v7364_v51 = vld [vmem:[#allocation7 + $0x274] sm:$0xf] }
 0x3bc   :  { %v4303_v19 = vsub.f32 1.0, %v4302_v53  ;;  %v12246_v44 = vpop.eup %7770  ;;  %v4496_v39 = vmul.f32 %v13501_v37, %v13500_v40  ;;  %vm12252_vm11 = vmor %vm4201_vm10, %vm4202_vm8  ;;  %vm12256_vm12 = vcmp.eq.f32.partialorder %v4205_v15, 8.507059e+37  ;;  %v4208_v56 = vor.u32 1.1754944e-38, %v4207_v1  ;;  %v2572_v33 = vpop.f32.mrf.mxu3  ;;  %v7010_v53 = vld [vmem:[#allocation7 + $0x278] sm:$0xf0] }
 0x3bd   :  { %vm4216_vm13 = vweird.f32 %v12030_v38  ;;  %v12261_v60 = vpop.eup %7772  ;;  %v4482_v63 = vmul.f32 %v4119_v34, %v13431_v12  ;;  %vm12270_vm15 = vcmp.eq.f32.partialorder %v4220_v28, 8.507059e+37  ;;  %v4222_v36 = vand.u32 2147483648, %v12030_v38  ;;  %v7380_v34 = vld [vmem:[#allocation7 + $0x2f4] sm:$0xf]  ;;  %v7074_v28 = vld [vmem:[#allocation7 + $0x2f8] sm:$0xf0] }
 0x3be   :  { %vm12266_vm14 = vmor %vm4216_vm13, %vm4217_vm9  ;;  %v2475_v8 = vadd.f32 %v2474_v4, %v2425_v46  ;;  %v4483_v15 = vmul.f32 %v4134_v25, %v13436_v7  ;;  %v4204_v12 = vsel %vm12252_vm11, %v12107_v18, %v4200_v11  ;;  %v2573_v61 = vadd.f32 %v2572_v33, %v2523_v27  ;;  %5213 = vmatmul.bf16.gmra.mxu1 %v13510_v62  ;;  %v2427_v7 = vpop.f32.mrf.mxu0  ;;  %v13511_v46 = vld [vmem:[#allocation61_spill] sm:$0xff] }
 0x3bf   :  { %v4219_v43 = vsel %vm12266_vm14, %v12120_v23, %v4215_v42  ;;  %v4289_v59 = vmul.f32 %v12178_v57, %v4288_v6  ;;  %v4304_v31 = vmul.f32 %v12187_v2, %v4303_v19  ;;  %v4377_v38 = vmul.f32 %v12246_v44, %v12176_v49  ;;  %v13512_v23 = vld [vmem:[#allocation51_spill] sm:$0xff]  ;;  %v7348_v6 = vld [vmem:[#allocation7 + $0x1f4] sm:$0xf] }
 0x3c0   :  { %v4578_v50 = vmul.f32 %v4482_v63, %v2475_v8  ;;  %v4392_v18 = vmul.f32 %v12261_v60, %v12185_v24  ;;  %v2090_v45 = vadd.f32 %v13512_v23, %v13511_v46  ;;  %v4579_v1 = vmul.f32 %v4483_v15, %v2573_v61  ;;  %v6946_v19 = vld [vmem:[#allocation7 + $0x1f8] sm:$0xf0] }
 0x3c1   :  { %v7013_v26 = vor.u32 %v7364_v51, %v7010_v53  ;;  %v4223_v11 = vor.u32 1.1754944e-38, %v4222_v36  ;;  %vm4291_vm0 = vweird.f32 %v12102_v13  ;;  %v6885_v42 = vor.u32 %v7332_v20, %v6882_v54 }
 0x3c2   :  { %v7077_v25 = vor.u32 %v7380_v34, %v7074_v28  ;;  %v4209_v27 = vsel %vm12256_vm12, %v4208_v56, %v4204_v12  ;;  %v4295_v40 = vand.u32 2147483647, %v12102_v13  ;;  %v4297_v37 = vand.u32 2147483648, %v12102_v13  ;;  %v2525_v36 = vpop.f32.mrf.mxu2 }
 0x3c3   :  { %5616 = vmatpush.bf16.msra.mxu2 %v7013_v26  ;;  %v6949_v14 = vor.u32 %v7348_v6, %v6946_v19  ;;  %v4224_v4 = vsel %vm12270_vm15, %v4223_v11, %v4219_v43  ;;  %v4290_v63 = vadd.f32 %v12178_v57, %v4289_v59  ;;  %vm4292_vm1 = vweird.f32 %v12178_v57  ;;  %5518 = vmatpush.bf16.msra.mxu0 %v6885_v42  ;;  %v2476_v33 = vpop.f32.mrf.mxu1  ;;  %v6994_v6 = vld [vmem:[#allocation7 + $0x258] sm:$0xf0] }
 0x3c4   :  { %v4378_v32 = vsub.f32 1.0, %v4377_v38  ;;  %5665 = vmatpush.bf16.msra.mxu3 %v7077_v25  ;;  %v4305_v5 = vadd.f32 %v12187_v2, %v4304_v31  ;;  %vm4307_vm2 = vweird.f32 %v12187_v2  ;;  %v4393_v56 = vsub.f32 1.0, %v4392_v18  ;;  %v2574_v61 = vpop.f32.mrf.mxu3  ;;  %vm12310_vm3 = vmor %vm4291_vm0, %vm4292_vm1  ;;  %v13517_v18 = vld [vmem:[#allocation45_spill] sm:$0xff] }
 0x3c5   :  { %v4592_v8 = vmul.f32 %v4496_v39, %v2090_v45  ;;  %5567 = vmatpush.bf16.msra.mxu1 %v6949_v14  ;;  %v4488_v15 = vmul.f32 %v4209_v27, %v11852_v16  ;;  %v4310_v52 = vand.u32 2147483647, %v12113_v22  ;;  %v4312_v12 = vand.u32 2147483648, %v12113_v22  ;;  %v6938_v31 = vld [vmem:[#allocation7 + $0x1e8] sm:$0xf0] }
 0x3c6   :  { %v2477_v43 = vadd.f32 %v2476_v33, %v2427_v7  ;;  %v4489_v59 = vmul.f32 %v4224_v4, %v13442_v21  ;;  %vm4306_vm4 = vweird.f32 %v12113_v22  ;;  %v2575_v39 = vadd.f32 %v2574_v61, %v2525_v36  ;;  %v2430_v51 = vpop.f32.mrf.mxu0 }
 0x3c7   :  { %v4294_v16 = vsel %vm12310_vm3, %v12178_v57, %v4290_v63  ;;  %v4298_v38 = vor.u32 1.1754944e-38, %v4297_v37  ;;  %vm12320_vm5 = vmor %vm4306_vm4, %vm4307_vm2  ;;  %v4379_v13 = vmul.f32 %v12246_v44, %v4378_v32  ;;  %v4394_v53 = vmul.f32 %v12261_v60, %v4393_v56  ;;  %5267 = vmatmul.bf16.gmra.mxu2 %v11437_v47  ;;  %v13522_v32 = vld [vmem:[#allocation62_spill] sm:$0xff]  ;;  %v7002_v56 = vld [vmem:[#allocation7 + $0x268] sm:$0xf0] }
 0x3c8   :  { %v4584_v7 = vmul.f32 %v4488_v15, %v2477_v43  ;;  %v4309_v22 = vsel %vm12320_vm5, %v12187_v2, %v4305_v5  ;;  %v4585_v20 = vmul.f32 %v4489_v59, %v2575_v39  ;;  %v12330_v57 = vpack.c.bf16 %v4592_v8, %v13517_v18  ;;  %v7362_v5 = vld [vmem:[#allocation7 + $0x264] sm:$0xf] }
 0x3c9   :  { %vm4296_vm6 = vcmp.eq.f32.partialorder %v4295_v40, 8.507059e+37  ;;  %vm4311_vm7 = vcmp.eq.f32.partialorder %v4310_v52, 8.507059e+37  ;;  %v4313_v46 = vor.u32 1.1754944e-38, %v4312_v12  ;;  %vm4382_vm8 = vweird.f32 %v12246_v44  ;;  %5316 = vmatmul.bf16.gmra.mxu3 %v11447_v0  ;;  %v7330_v8 = vld [vmem:[#allocation7 + $0x164] sm:$0xf] }
 0x3ca   :  { %v12333_v23 = vpack.c.bf16 %v4584_v7, %v4578_v50  ;;  %v4299_v45 = vsel %vm4296_vm6, %v4298_v38, %v4294_v16  ;;  %v4387_v26 = vand.u32 2147483648, %v12176_v49  ;;  %5169 = vmatmul.bf16.gmra.mxu0 %v12330_v57  ;;  %v12339_v2 = vpack.c.bf16 %v4585_v20, %v4579_v1  ;;  %v2528_v28 = vpop.f32.mrf.mxu2  ;;  %v6874_v52 = vld [vmem:[#allocation7 + $0x168] sm:$0xf0]  ;;  %v7346_v59 = vld [vmem:[#allocation7 + $0x1e4] sm:$0xf] }
 0x3cb   :  { %v4314_v54 = vsel %vm4311_vm7, %v4313_v46, %v4309_v22  ;;  %v4380_v34 = vadd.f32 %v12246_v44, %v4379_v13  ;;  %vm4397_vm9 = vweird.f32 %v12261_v60  ;;  %vm4381_vm10 = vweird.f32 %v12176_v49  ;;  %v2479_v42 = vpop.f32.mrf.mxu1  ;;  %v7066_v12 = vld [vmem:[#allocation7 + $0x2e8] sm:$0xf0] }
 0x3cc   :  { %v4385_v50 = vand.u32 2147483647, %v12176_v49  ;;  %v4395_v11 = vadd.f32 %v12261_v60, %v4394_v53  ;;  %v4494_v25 = vmul.f32 %v4299_v45, %v13460_v35  ;;  %vm12347_vm11 = vmor %vm4381_vm10, %vm4382_vm8  ;;  %vm4396_vm12 = vweird.f32 %v12185_v24  ;;  %v2577_v27 = vpop.f32.mrf.mxu3 }
 0x3cd   :  { %v4402_v1 = vand.u32 2147483648, %v12185_v24  ;;  %v2480_v19 = vadd.f32 %v2479_v42, %v2430_v51  ;;  %v4495_v40 = vmul.f32 %v4314_v54, %v13461_v3  ;;  %v4388_v37 = vor.u32 1.1754944e-38, %v4387_v26  ;;  %vm12354_vm13 = vmor %vm4396_vm12, %vm4397_vm9  ;;  %v13523_v26 = vld [vmem:[#allocation110_spill] sm:$0xff] }
 0x3ce   :  { %v4400_v14 = vand.u32 2147483647, %v12185_v24  ;;  %v2578_v35 = vadd.f32 %v2577_v27, %v2528_v28  ;;  %v4384_v4 = vsel %vm12347_vm11, %v12246_v44, %v4380_v34  ;;  %5218 = vmatmul.bf16.gmra.mxu1 %v13522_v32  ;;  %v2432_v36 = vpop.f32.mrf.mxu0  ;;  %v4399_v3 = vsel %vm12354_vm13, %v12261_v60, %v4395_v11  ;;  %v7378_v24 = vld [vmem:[#allocation7 + $0x2e4] sm:$0xf]  ;;  %v13524_v11 = vld [vmem:[#allocation73_spill] sm:$0xff] }
 0x3cf   :  { %v4590_v63 = vmul.f32 %v4494_v25, %v2480_v19  ;;  %v7005_v15 = vor.u32 %v7362_v5, %v7002_v56  ;;  %vm4386_vm14 = vcmp.eq.f32.partialorder %v4385_v50, 8.507059e+37  ;;  %v4403_v43 = vor.u32 1.1754944e-38, %v4402_v1  ;;  %v7360_v25 = vld [vmem:[#allocation7 + $0x254] sm:$0xf]  ;;  %v6866_v19 = vld [vmem:[#allocation7 + $0x158] sm:$0xf0] }
 0x3d0   :  { %v4591_v33 = vmul.f32 %v4495_v40, %v2578_v35  ;;  %v6877_v61 = vor.u32 %v7330_v8, %v6874_v52  ;;  %v7069_v44 = vor.u32 %v7378_v24, %v7066_v12  ;;  %v4389_v39 = vsel %vm4386_vm14, %v4388_v37, %v4384_v4  ;;  %v7328_v1 = vld [vmem:[#allocation7 + $0x154] sm:$0xf]  ;;  %v7058_v40 = vld [vmem:[#allocation7 + $0x2d8] sm:$0xf0]  ;;  %v13527_v12 = vld [vmem:[#allocation33_spill] sm:$0xff] }
 0x3d1   :  { %vm4401_vm15 = vcmp.eq.f32.partialorder %v4400_v14, 8.507059e+37  ;;  %5617 = vmatpush.bf16.msra.mxu2 %v7005_v15  ;;  %v6941_v16 = vor.u32 %v7346_v59, %v6938_v31  ;;  %v4500_v13 = vmul.f32 %v4389_v39, %v12046_v55  ;;  %v7376_v27 = vld [vmem:[#allocation7 + $0x2d4] sm:$0xf]  ;;  %v6869_v49 = vor.u32 %v7328_v1, %v6866_v19  ;;  %v6930_v4 = vld [vmem:[#allocation7 + $0x1d8] sm:$0xf0]  ;;  %v13531_v19 = vld [vmem:[#allocation37_spill] sm:$0xff] }
 0x3d2   :  { %v4404_v38 = vsel %vm4401_vm15, %v4403_v43, %v4399_v3  ;;  %v2530_v21 = vpop.f32.mrf.mxu2  ;;  %5519 = vmatpush.bf16.msra.mxu0 %v6877_v61  ;;  %5666 = vmatpush.bf16.msra.mxu3 %v7069_v44  ;;  %v7061_v14 = vor.u32 %v7376_v27, %v7058_v40  ;;  %v7344_v35 = vld [vmem:[#allocation7 + $0x1d4] sm:$0xf]  ;;  %v13525_v15 = vld [vmem:[#allocation119_spill] sm:$0xff] }
 0x3d3   :  { %v2481_v60 = vpop.f32.mrf.mxu1  ;;  %5568 = vmatpush.bf16.msra.mxu1 %v6941_v16  ;;  %v4501_v22 = vmul.f32 %v4404_v38, %v13474_v29  ;;  %v13526_v24 = vld [vmem:[#allocation66_spill] sm:$0xff]  ;;  %v13528_v31 = vld [vmem:[#allocation67_spill] sm:$0xff]  ;;  %v7358_v38 = vld [vmem:[#allocation7 + $0x244] sm:$0xf] }
 0x3d4   :  { %v2482_v7 = vadd.f32 %v2481_v60, %v2432_v36  ;;  %v2579_v51 = vpop.f32.mrf.mxu3  ;;  %v7326_v60 = vld [vmem:[#allocation7 + $0x144] sm:$0xf] }
 0x3d5   :  { %v2580_v53 = vadd.f32 %v2579_v51, %v2530_v21  ;;  %v6986_v21 = vld [vmem:[#allocation7 + $0x248] sm:$0xf0]  ;;  %v7374_v51 = vld [vmem:[#allocation7 + $0x2c4] sm:$0xf] }
 0x3d6   :  { %v4596_v20 = vmul.f32 %v4500_v13, %v2482_v7  ;;  %v5135_v18 = vpop.f32.mrf.mxu0  ;;  %5520 = vmatpush.bf16.msra.mxu0 %v6869_v49  ;;  %5667 = vmatpush.bf16.msra.mxu3 %v7061_v14  ;;  %v6989_v13 = vor.u32 %v7358_v38, %v6986_v21  ;;  %v6858_v7 = vld [vmem:[#allocation7 + $0x148] sm:$0xf0] }
 0x3d7   :  { %v4597_v46 = vmul.f32 %v4501_v22, %v2580_v53  ;;  %5428 = vmatmul.bf16.vlgmr.msrb.gmra.mxu2 %v13364_v41  ;;  %v6997_v41 = vor.u32 %v7360_v25, %v6994_v6  ;;  %v7050_v22 = vld [vmem:[#allocation7 + $0x2c8] sm:$0xf0]  ;;  %v13529_v6 = vld [vmem:[#allocation28_spill] sm:$0xff] }
 0x3d8   :  { %v12369_v45 = vpack.c.bf16 %v4596_v20, %v4590_v63  ;;  %v6933_v63 = vor.u32 %v7344_v35, %v6930_v4  ;;  %v6861_v20 = vor.u32 %v7326_v60, %v6858_v7  ;;  %v13532_v35 = vld [vmem:[#allocation69_spill] sm:$0xff] }
 0x3d9   :  { %5477 = vmatmul.bf16.vlgmr.msrb.gmra.mxu3 %v13523_v26  ;;  %v12373_v54 = vpack.c.bf16 %v4597_v46, %v4591_v33  ;;  %5618 = vmatpush.bf16.msra.mxu2 %v6997_v41  ;;  %v7342_v46 = vld [vmem:[#allocation7 + $0x1c4] sm:$0xf]  ;;  %v6922_v26 = vld [vmem:[#allocation7 + $0x1c8] sm:$0xf0] }
 0x3da   :  { %5330 = vmatmul.bf16.vlgmr.msrb.gmra.mxu0 %v11564_v30  ;;  %v5233_v34 = vpop.f32.mrf.mxu2  ;;  %5569 = vmatpush.bf16.msra.mxu1 %v6933_v63  ;;  %v13530_v41 = vld [vmem:[#allocation68_spill] sm:$0xff] }
 0x3db   :  { %v5184_v55 = vpop.f32.mrf.mxu1  ;;  %5521 = vmatpush.bf16.msra.mxu0 %v6861_v20  ;;  %v13534_v20 = vld [vmem:[#allocation74_spill] sm:$0xff] }
 0x3dc   :  { %v5185_v28 = vadd.f32 %v5184_v55, %v5135_v18  ;;  %v5282_v50 = vpop.f32.mrf.mxu3  ;;  %v7053_v18 = vor.u32 %v7374_v51, %v7050_v22  ;;  %v13533_v51 = vld [vmem:[#allocation32_spill] sm:$0xff] }
 0x3dd   :  { %5619 = vmatpush.bf16.msra.mxu2 %v6989_v13 }
 0x3de   :  { %5379 = vmatmul.bf16.vlgmr.msrb.gmra.mxu1 %v13524_v11  ;;  %v5234_v29 = vadd.f32 %v5233_v34, %v5185_v28  ;;  %v5137_v42 = vpop.f32.mrf.mxu0  ;;  %v6925_v34 = vor.u32 %v7342_v46, %v6922_v26  ;;  %5668 = vmatpush.bf16.msra.mxu3 %v7053_v18  ;;  %v13535_v18 = vld [vmem:[#allocation31_spill] sm:$0xff] }
 0x3e0   :  { %v12376_v37 = vadd.f32 %v5282_v50, %v5234_v29  ;;  %5570 = vmatpush.bf16.msra.mxu1 %v6925_v34 }
 0x3e2   :  { %v5235_v36 = vpop.f32.mrf.mxu2 }
 0x3e3   :  { %v5186_v5 = vpop.f32.mrf.mxu1 }
 0x3e4   :  { %v5187_v56 = vadd.f32 %v5186_v5, %v5137_v42  ;;  %v5284_v8 = vpop.f32.mrf.mxu3  ;;  %v6978_v5 = vld [vmem:[#allocation7 + $0x238] sm:$0xf0] }
 0x3e6   :  { %v5236_v3 = vadd.f32 %v5235_v36, %v5187_v56  ;;  %v5140_v33 = vpop.f32.mrf.mxu0  ;;  %v7356_v36 = vld [vmem:[#allocation7 + $0x234] sm:$0xf] }
 0x3e7   :  { %5433 = vmatmul.bf16.gmra.mxu2 %v13525_v15  ;;  %v7324_v56 = vld [vmem:[#allocation7 + $0x134] sm:$0xf]  ;;  %v7042_v15 = vld [vmem:[#allocation7 + $0x2b8] sm:$0xf0] }
 0x3e8   :  { %v12379_v52 = vadd.f32 %v5284_v8, %v5236_v3  ;;  %v6981_v8 = vor.u32 %v7356_v36, %v6978_v5  ;;  %v6850_v3 = vld [vmem:[#allocation7 + $0x138] sm:$0xf0]  ;;  %v7338_v36 = vld [vmem:[#allocation7 + $0x1a4] sm:$0xf]  ;;  %v6906_v5 = vld [vmem:[#allocation7 + $0x1a8] sm:$0xf0] }
 0x3e9   :  { %5482 = vmatmul.bf16.gmra.mxu3 %v13527_v12 }
 0x3ea   :  { %5335 = vmatmul.bf16.gmra.mxu0 %v13526_v24  ;;  %v5238_v43 = vpop.f32.mrf.mxu2  ;;  %5620 = vmatpush.bf16.msra.mxu2 %v6981_v8 }
 0x3eb   :  { %v5189_v61 = vpop.f32.mrf.mxu1 }
 0x3ec   :  { %v5190_v44 = vadd.f32 %v5189_v61, %v5140_v33  ;;  %v5287_v59 = vpop.f32.mrf.mxu3  ;;  %v7372_v33 = vld [vmem:[#allocation7 + $0x2b4] sm:$0xf] }
 0x3ed   :  { %v7045_v61 = vor.u32 %v7372_v33, %v7042_v15 }
 0x3ee   :  { %5384 = vmatmul.bf16.gmra.mxu1 %v13528_v31  ;;  %v5239_v39 = vadd.f32 %v5238_v43, %v5190_v44  ;;  %v5142_v16 = vpop.f32.mrf.mxu0  ;;  %v6853_v43 = vor.u32 %v7324_v56, %v6850_v3  ;;  %v7340_v44 = vld [vmem:[#allocation7 + $0x1b4] sm:$0xf]  ;;  %v6909_v56 = vor.u32 %v7338_v36, %v6906_v5 }
 0x3ef   :  { %5669 = vmatpush.bf16.msra.mxu3 %v7045_v61 }
 0x3f0   :  { %v12384_v53 = vadd.f32 %v5287_v59, %v5239_v39  ;;  %v6914_v59 = vld [vmem:[#allocation7 + $0x1b8] sm:$0xf0]  ;;  %5522 = vmatpush.bf16.msra.mxu0 %v6853_v43 }
 0x3f1   :  { %v6917_v39 = vor.u32 %v7340_v44, %v6914_v59  ;;  %v13537_v44 = vld [vmem:[#allocation78_spill] sm:$0xff] }
 0x3f2   :  { %v5240_v55 = vpop.f32.mrf.mxu2 }
 0x3f3   :  { %v5191_v28 = vpop.f32.mrf.mxu1  ;;  %5571 = vmatpush.bf16.msra.mxu1 %v6917_v39  ;;  %v13538_v39 = vld [vmem:[#allocation79_spill] sm:$0xff] }
 0x3f4   :  { %v5192_v50 = vadd.f32 %v5191_v28, %v5142_v16  ;;  %v5289_v29 = vpop.f32.mrf.mxu3  ;;  %v13536_v28 = vld [vmem:[#allocation75_spill] sm:$0xff] }
 0x3f6   :  { %v5241_v42 = vadd.f32 %v5240_v55, %v5192_v50  ;;  %v5145_v25 = vpop.f32.mrf.mxu0 }
 0x3f7   :  { %5438 = vmatmul.bf16.gmra.mxu2 %v13529_v6  ;;  %v7322_v6 = vld [vmem:[#allocation7 + $0x124] sm:$0xf]  ;;  %5572 = vmatpush.bf16.msra.mxu1 %v6909_v56 }
 0x3f8   :  { %v12387_v1 = vadd.f32 %v5289_v29, %v5241_v42  ;;  %v7354_v42 = vld [vmem:[#allocation7 + $0x224] sm:$0xf] }
 0x3f9   :  { %5487 = vmatmul.bf16.gmra.mxu3 %v13531_v19 }
 0x3fa   :  { %5340 = vmatmul.bf16.gmra.mxu0 %v13530_v41  ;;  %v5243_v27 = vpop.f32.mrf.mxu2 }
 0x3fb   :  { %v5194_v40 = vpop.f32.mrf.mxu1 }
 0x3fc   :  { %v5195_v49 = vadd.f32 %v5194_v40, %v5145_v25  ;;  %v5292_v14 = vpop.f32.mrf.mxu3  ;;  %v6970_v25 = vld [vmem:[#allocation7 + $0x228] sm:$0xf0]  ;;  %v7370_v40 = vld [vmem:[#allocation7 + $0x2a4] sm:$0xf] }
 0x3fd   :  { %v6973_v19 = vor.u32 %v7354_v42, %v6970_v25  ;;  %v7026_v42 = vld [vmem:[#allocation7 + $0x298] sm:$0xf0] }
 0x3fe   :  { %5389 = vmatmul.bf16.gmra.mxu1 %v13532_v35  ;;  %v5244_v4 = vadd.f32 %v5243_v27, %v5195_v49  ;;  %v5147_v63 = vpop.f32.mrf.mxu0  ;;  %v6842_v27 = vld [vmem:[#allocation7 + $0x128] sm:$0xf0] }
 0x3ff   :  { %v7034_v49 = vld [vmem:[#allocation7 + $0x2a8] sm:$0xf0]  ;;  %5621 = vmatpush.bf16.msra.mxu2 %v6973_v19 }
 0x400   :  { %v12392_v12 = vadd.f32 %v5292_v14, %v5244_v4  ;;  %v6845_v4 = vor.u32 %v7322_v6, %v6842_v27  ;;  %v7336_v27 = vld [vmem:[#allocation7 + $0x194] sm:$0xf] }
 0x402   :  { %v5245_v16 = vpop.f32.mrf.mxu2  ;;  %5523 = vmatpush.bf16.msra.mxu0 %v6845_v4 }
 0x403   :  { %v5196_v38 = vpop.f32.mrf.mxu1 }
 0x404   :  { %v5197_v21 = vadd.f32 %v5196_v38, %v5147_v63  ;;  %v5294_v60 = vpop.f32.mrf.mxu3  ;;  %v7037_v63 = vor.u32 %v7370_v40, %v7034_v49  ;;  %v6898_v40 = vld [vmem:[#allocation7 + $0x198] sm:$0xf0] }
 0x405   :  { %v6901_v49 = vor.u32 %v7336_v27, %v6898_v40 }
 0x406   :  { %v5246_v13 = vadd.f32 %v5245_v16, %v5197_v21  ;;  %v5150_v7 = vpop.f32.mrf.mxu0  ;;  %5670 = vmatpush.bf16.msra.mxu3 %v7037_v63  ;;  %v13539_v16 = vld [vmem:[#allocation58_spill] sm:$0xff] }
 0x407   :  { %5443 = vmatmul.bf16.gmra.mxu2 %v13533_v51  ;;  %5573 = vmatpush.bf16.msra.mxu1 %v6901_v49 }
 0x408   :  { %v12395_v22 = vadd.f32 %v5294_v60, %v5246_v13 }
 0x409   :  { %5492 = vmatmul.bf16.gmra.mxu3 %v13535_v18 }
 0x40a   :  { %5345 = vmatmul.bf16.gmra.mxu0 %v13534_v20  ;;  %v5248_v46 = vpop.f32.mrf.mxu2 }
 0x40b   :  { %v5199_v26 = vpop.f32.mrf.mxu1 }
 0x40c   :  { %v5200_v34 = vadd.f32 %v5199_v26, %v5150_v7  ;;  %v5297_v55 = vpop.f32.mrf.mxu3  ;;  %v13540_v7 = vld [vmem:[#allocation76_spill] sm:$0xff]  ;;  %v6962_v26 = vld [vmem:[#allocation7 + $0x218] sm:$0xf0] }
 0x40e   :  { %5394 = vmatmul.bf16.gmra.mxu1 %v13536_v28  ;;  %v5249_v50 = vadd.f32 %v5248_v46, %v5200_v34  ;;  %v5152_v29 = vpop.f32.mrf.mxu0  ;;  %v7352_v46 = vld [vmem:[#allocation7 + $0x214] sm:$0xf] }
 0x40f   :  { %v7320_v34 = vld [vmem:[#allocation7 + $0x114] sm:$0xf] }
 0x410   :  { %v12400_v14 = vadd.f32 %v5297_v55, %v5249_v50  ;;  %v6965_v55 = vor.u32 %v7352_v46, %v6962_v26  ;;  %v6834_v50 = vld [vmem:[#allocation7 + $0x118] sm:$0xf0]  ;;  %v6826_v46 = vld [vmem:[#allocation7 + $0x108] sm:$0xf0]  ;;  %v7366_v26 = vld [vmem:[#allocation7 + $0x284] sm:$0xf] }
 0x411   :  { %v6837_v6 = vor.u32 %v7320_v34, %v6834_v50  ;;  %v7018_v34 = vld [vmem:[#allocation7 + $0x288] sm:$0xf0] }
 0x412   :  { %v5250_v8 = vpop.f32.mrf.mxu2  ;;  %5622 = vmatpush.bf16.msra.mxu2 %v6965_v55 }
 0x413   :  { %v5201_v3 = vpop.f32.mrf.mxu1  ;;  %5524 = vmatpush.bf16.msra.mxu0 %v6837_v6  ;;  %v6890_v6 = vld [vmem:[#allocation7 + $0x188] sm:$0xf0] }
 0x414   :  { %v5202_v33 = vadd.f32 %v5201_v3, %v5152_v29  ;;  %v5299_v15 = vpop.f32.mrf.mxu3  ;;  %v7368_v29 = vld [vmem:[#allocation7 + $0x294] sm:$0xf]  ;;  %v13541_v3 = vld [vmem:[#allocation12_spill] sm:$0xff] }
 0x415   :  { %v7029_v19 = vor.u32 %v7368_v29, %v7026_v42  ;;  %v7021_v29 = vor.u32 %v7366_v26, %v7018_v34  ;;  %v7334_v42 = vld [vmem:[#allocation7 + $0x184] sm:$0xf] }
 0x416   :  { %v5251_v43 = vadd.f32 %v5250_v8, %v5202_v33  ;;  %v5155_v61 = vpop.f32.mrf.mxu0 }
 0x417   :  { %5448 = vmatmul.bf16.gmra.mxu2 %v13537_v44  ;;  %5671 = vmatpush.bf16.msra.mxu3 %v7029_v19  ;;  %v6893_v19 = vor.u32 %v7334_v42, %v6890_v6 }
 0x418   :  { %v12403_v59 = vadd.f32 %v5299_v15, %v5251_v43  ;;  %v13542_v15 = vld [vmem:[#allocation47_spill] sm:$0xff] }
 0x419   :  { %5497 = vmatmul.bf16.gmra.mxu3 %v13539_v16  ;;  %5574 = vmatpush.bf16.msra.mxu1 %v6893_v19 }
 0x41a   :  { %5350 = vmatmul.bf16.gmra.mxu0 %v13538_v39  ;;  %v5253_v38 = vpop.f32.mrf.mxu2 }
 0x41b   :  { %v5204_v21 = vpop.f32.mrf.mxu1  ;;  %5672 = vmatpush.bf16.msra.mxu3 %v7021_v29 }
 0x41c   :  { %v5205_v60 = vadd.f32 %v5204_v21, %v5155_v61  ;;  %v5302_v13 = vpop.f32.mrf.mxu3 }
 0x41e   :  { %5399 = vmatmul.bf16.gmra.mxu1 %v13540_v7  ;;  %v5254_v51 = vadd.f32 %v5253_v38, %v5205_v60  ;;  %v5157_v18 = vpop.f32.mrf.mxu0  ;;  %v7350_v60 = vld [vmem:[#allocation7 + $0x204] sm:$0xf] }
 0x420   :  { %v12408_v25 = vadd.f32 %v5302_v13, %v5254_v51  ;;  %v6954_v13 = vld [vmem:[#allocation7 + $0x208] sm:$0xf0]  ;;  %v7318_v51 = vld [vmem:[#allocation7 + $0x104] sm:$0xf] }
 0x421   :  { %v6829_v50 = vor.u32 %v7318_v51, %v6826_v46 }
 0x422   :  { %v5255_v4 = vpop.f32.mrf.mxu2 }
 0x423   :  { %v5206_v63 = vpop.f32.mrf.mxu1  ;;  %5525 = vmatpush.bf16.msra.mxu0 %v6829_v50 }
 0x424   :  { %v5207_v36 = vadd.f32 %v5206_v63, %v5157_v18  ;;  %v5304_v5 = vpop.f32.mrf.mxu3  ;;  %v6957_v18 = vor.u32 %v7350_v60, %v6954_v13 }
 0x426   :  { %v5256_v56 = vadd.f32 %v5255_v4, %v5207_v36  ;;  %5623 = vmatpush.bf16.msra.mxu2 %v6957_v18 }
 0x427   :  { %v5160_v8 = vpop.f32.mrf.mxu0  ;;  %5453 = vmatmul.bf16.gmra.mxu2 %v13541_v3 }
 0x428   :  { %v12411_v33 = vadd.f32 %v5304_v5, %v5256_v56 }
 0x429   :  { %5502 = vmatmul.bf16.gmra.mxu3 %v13542_v15 }
 0x42a   :  { %5355 = vmatmul.bf16.gmra.mxu0 %v12234_v58  ;;  %v5258_v43 = vpop.f32.mrf.mxu2 }
 0x42b   :  { %v5209_v61 = vpop.f32.mrf.mxu1 }
 0x42c   :  { %v5210_v44 = vadd.f32 %v5209_v61, %v5160_v8  ;;  %v5307_v16 = vpop.f32.mrf.mxu3 }
 0x42e   :  { %5404 = vmatmul.bf16.gmra.mxu1 %v12241_v17  ;;  %v5259_v38 = vadd.f32 %v5258_v43, %v5210_v44 }
 0x42f   :  { %v5162_v21 = vpop.f32.mrf.mxu0 }
 0x430   :  { %v12416_v55 = vadd.f32 %v5307_v16, %v5259_v38 }
 0x432   :  { %v5260_v27 = vpop.f32.mrf.mxu2 }
 0x433   :  { %v5211_v40 = vpop.f32.mrf.mxu1 }
 0x434   :  { %v5212_v49 = vadd.f32 %v5211_v40, %v5162_v21  ;;  %v5309_v4 = vpop.f32.mrf.mxu3 }
 0x436   :  { %v5261_v63 = vadd.f32 %v5260_v27, %v5212_v49 }
 0x437   :  { %v5165_v36 = vpop.f32.mrf.mxu0  ;;  %5458 = vmatmul.bf16.gmra.mxu2 %v12225_v10 }
 0x438   :  { %v12419_v5 = vadd.f32 %v5309_v4, %v5261_v63  ;;  %v13543_v4 = vld [vmem:[#allocation64_spill] sm:$0xff] }
 0x439   :  { %5507 = vmatmul.bf16.gmra.mxu3 %v13510_v62 }
 0x43a   :  { %5360 = vmatmul.bf16.gmra.mxu0 %v12333_v23  ;;  %v5263_v56 = vpop.f32.mrf.mxu2 }
 0x43b   :  { %v5214_v8 = vpop.f32.mrf.mxu1 }
 0x43c   :  { %v5215_v3 = vadd.f32 %v5214_v8, %v5165_v36  ;;  %v5312_v15 = vpop.f32.mrf.mxu3 }
 0x43e   :  { %5409 = vmatmul.bf16.gmra.mxu1 %v12339_v2  ;;  %v5264_v43 = vadd.f32 %v5263_v56, %v5215_v3 }
 0x43f   :  { %v5167_v61 = vpop.f32.mrf.mxu0 }
 0x440   :  { %v12424_v44 = vadd.f32 %v5312_v15, %v5264_v43  ;;  %v13544_v15 = vld [vmem:[#allocation53_spill] sm:$0xff] }
 0x442   :  { %v5265_v16 = vpop.f32.mrf.mxu2 }
 0x443   :  { %v5216_v38 = vpop.f32.mrf.mxu1 }
 0x444   :  { %v5217_v21 = vadd.f32 %v5216_v38, %v5167_v61  ;;  %v5314_v10 = vpop.f32.mrf.mxu3 }
 0x446   :  { %v5266_v60 = vadd.f32 %v5265_v16, %v5217_v21 }
 0x447   :  { %v5170_v13 = vpop.f32.mrf.mxu0  ;;  %5463 = vmatmul.bf16.gmra.mxu2 %v12330_v57 }
 0x448   :  { %v12427_v51 = vadd.f32 %v5314_v10, %v5266_v60  ;;  %v13545_v60 = vld [vmem:[#allocation113_spill] sm:$0xff] }
 0x449   :  { %5512 = vmatmul.bf16.gmra.mxu3 %v13522_v32 }
 0x44a   :  { %5365 = vmatmul.bf16.gmra.mxu0 %v12369_v45  ;;  %v5268_v62 = vpop.f32.mrf.mxu2 }
 0x44b   :  { %v5219_v18 = vpop.f32.mrf.mxu1 }
 0x44c   :  { %v5220_v46 = vadd.f32 %v5219_v18, %v5170_v13  ;;  %v5317_v26 = vpop.f32.mrf.mxu3 }
 0x44e   :  { %5414 = vmatmul.bf16.gmra.mxu1 %v12373_v54  ;;  %v5269_v34 = vadd.f32 %v5268_v62, %v5220_v46 }
 0x44f   :  { %v5172_v50 = vpop.f32.mrf.mxu0 }
 0x450   :  { %v12432_v29 = vadd.f32 %v5317_v26, %v5269_v34  ;;  %v13546_v26 = vld [vmem:[#allocation48_spill] sm:$0xff] }
 0x452   :  { %v5270_v42 = vpop.f32.mrf.mxu2 }
 0x453   :  { %v5221_v6 = vpop.f32.mrf.mxu1 }
 0x454   :  { %v5222_v19 = vadd.f32 %v5221_v6, %v5172_v50  ;;  %v5319_v57 = vpop.f32.mrf.mxu3 }
 0x456   :  { %v5271_v27 = vadd.f32 %v5270_v42, %v5222_v19 }
 0x457   :  { %v5331_v40 = vpop.f32.mrf.mxu0  ;;  %5624 = vmatmul.bf16.vlgmr.msra.gmra.mxu2 %v11564_v30 }
 0x458   :  { %v5332_v49 = vadd.f32 %v5331_v40, %v12376_v37  ;;  %v12436_v32 = vadd.f32 %v5319_v57, %v5271_v27  ;;  %v13547_v27 = vld [vmem:[#allocation118_spill] sm:$0xff] }
 0x459   :  { %5673 = vmatmul.bf16.vlgmr.msra.gmra.mxu3 %v13524_v11 }
 0x45a   :  { %5526 = vmatmul.bf16.vlgmr.msra.gmra.mxu0 %v13543_v4  ;;  %v5429_v63 = vpop.f32.mrf.mxu2 }
 0x45b   :  { %v5380_v36 = vpop.f32.mrf.mxu1 }
 0x45c   :  { %v12440_v56 = vadd.f32 %v5380_v36, %v5332_v49  ;;  %v5478_v8 = vpop.f32.mrf.mxu3  ;;  %v13548_v36 = vld [vmem:[#allocation65_spill] sm:$0xff] }
 0x45d   :  { %v12442_v3 = vadd.f32 %v5478_v8, %v5429_v63 }
 0x45e   :  { %5575 = vmatmul.bf16.vlgmr.msra.gmra.mxu1 %v13544_v15 }
 0x45f   :  { %v5333_v43 = vpop.f32.mrf.mxu0 }
 0x460   :  { %v5334_v37 = vadd.f32 %v5333_v43, %v12379_v52 }
 0x462   :  { %v5431_v61 = vpop.f32.mrf.mxu2 }
 0x463   :  { %v5382_v30 = vpop.f32.mrf.mxu1 }
 0x464   :  { %v12446_v16 = vadd.f32 %v5382_v30, %v5334_v37  ;;  %v5480_v38 = vpop.f32.mrf.mxu3 }
 0x465   :  { %v12448_v21 = vadd.f32 %v5480_v38, %v5431_v61  ;;  %v13549_v38 = vld [vmem:[#allocation55_spill] sm:$0xff] }
 0x467   :  { %v5336_v11 = vpop.f32.mrf.mxu0  ;;  %5629 = vmatmul.bf16.gmra.mxu2 %v13526_v24 }
 0x468   :  { %v5337_v10 = vadd.f32 %v5336_v11, %v12384_v53 }
 0x469   :  { %5678 = vmatmul.bf16.gmra.mxu3 %v13528_v31 }
 0x46a   :  { %5531 = vmatmul.bf16.gmra.mxu0 %v13545_v60  ;;  %v5434_v13 = vpop.f32.mrf.mxu2 }
 0x46b   :  { %v5385_v62 = vpop.f32.mrf.mxu1 }
 0x46c   :  { %v12454_v18 = vadd.f32 %v5385_v62, %v5337_v10  ;;  %v5483_v52 = vpop.f32.mrf.mxu3  ;;  %v13550_v62 = vld [vmem:[#allocation41_spill] sm:$0xff] }
 0x46d   :  { %v12456_v46 = vadd.f32 %v5483_v52, %v5434_v13 }
 0x46e   :  { %5580 = vmatmul.bf16.gmra.mxu1 %v13546_v26 }
 0x46f   :  { %v5338_v34 = vpop.f32.mrf.mxu0 }
 0x470   :  { %v5339_v50 = vadd.f32 %v5338_v34, %v12387_v1 }
 0x472   :  { %v5436_v42 = vpop.f32.mrf.mxu2 }
 0x473   :  { %v5387_v53 = vpop.f32.mrf.mxu1 }
 0x474   :  { %v12460_v6 = vadd.f32 %v5387_v53, %v5339_v50  ;;  %v5485_v24 = vpop.f32.mrf.mxu3 }
 0x475   :  { %v12462_v19 = vadd.f32 %v5485_v24, %v5436_v42  ;;  %v13551_v24 = vld [vmem:[#allocation70_spill] sm:$0xff] }
 0x477   :  { %v5341_v31 = vpop.f32.mrf.mxu0  ;;  %5634 = vmatmul.bf16.gmra.mxu2 %v13530_v41 }
 0x478   :  { %v5342_v57 = vadd.f32 %v5341_v31, %v12392_v12 }
 0x479   :  { %5683 = vmatmul.bf16.gmra.mxu3 %v13532_v35 }
 0x47a   :  { %5536 = vmatmul.bf16.gmra.mxu0 %v13547_v27  ;;  %v5439_v40 = vpop.f32.mrf.mxu2 }
 0x47b   :  { %v5390_v49 = vpop.f32.mrf.mxu1 }
 0x47c   :  { %v12468_v4 = vadd.f32 %v5390_v49, %v5342_v57  ;;  %v5488_v1 = vpop.f32.mrf.mxu3  ;;  %v13552_v49 = vld [vmem:[#allocation56_spill] sm:$0xff] }
 0x47d   :  { %v12470_v63 = vadd.f32 %v5488_v1, %v5439_v40 }
 0x47e   :  { %5585 = vmatmul.bf16.gmra.mxu1 %v13548_v36 }
 0x47f   :  { %v5343_v8 = vpop.f32.mrf.mxu0 }
 0x480   :  { %v5344_v15 = vadd.f32 %v5343_v8, %v12395_v22 }
 0x482   :  { %v5441_v43 = vpop.f32.mrf.mxu2 }
 0x483   :  { %v5392_v12 = vpop.f32.mrf.mxu1 }
 0x484   :  { %v12474_v37 = vadd.f32 %v5392_v12, %v5344_v15  ;;  %v5490_v41 = vpop.f32.mrf.mxu3 }
 0x485   :  { %v12476_v61 = vadd.f32 %v5490_v41, %v5441_v43  ;;  %v13553_v41 = vld [vmem:[#allocation71_spill] sm:$0xff] }
 0x487   :  { %v5346_v35 = vpop.f32.mrf.mxu0  ;;  %5639 = vmatmul.bf16.gmra.mxu2 %v13534_v20 }
 0x488   :  { %v5347_v30 = vadd.f32 %v5346_v35, %v12400_v14 }
 0x489   :  { %5688 = vmatmul.bf16.gmra.mxu3 %v13536_v28 }
 0x48a   :  { %5541 = vmatmul.bf16.gmra.mxu0 %v13549_v38  ;;  %v5444_v11 = vpop.f32.mrf.mxu2 }
 0x48b   :  { %v5395_v10 = vpop.f32.mrf.mxu1 }
 0x48c   :  { %v12482_v60 = vadd.f32 %v5395_v10, %v5347_v30  ;;  %v5493_v22 = vpop.f32.mrf.mxu3  ;;  %v13554_v10 = vld [vmem:[#allocation72_spill] sm:$0xff] }
 0x48d   :  { %v12484_v13 = vadd.f32 %v5493_v22, %v5444_v11 }
 0x48e   :  { %5590 = vmatmul.bf16.gmra.mxu1 %v13550_v62 }
 0x48f   :  { %v5348_v52 = vpop.f32.mrf.mxu0 }
 0x490   :  { %v5349_v26 = vadd.f32 %v5348_v52, %v12403_v59 }
 0x492   :  { %v5446_v34 = vpop.f32.mrf.mxu2 }
 0x493   :  { %v5397_v14 = vpop.f32.mrf.mxu1 }
 0x494   :  { %v12488_v50 = vadd.f32 %v5397_v14, %v5349_v26  ;;  %v5495_v20 = vpop.f32.mrf.mxu3 }
 0x495   :  { %v12490_v42 = vadd.f32 %v5495_v20, %v5446_v34 }
 0x497   :  { %v5351_v28 = vpop.f32.mrf.mxu0  ;;  %5644 = vmatmul.bf16.gmra.mxu2 %v13538_v39 }
 0x498   :  { %v5352_v53 = vadd.f32 %v5351_v28, %v12408_v25 }
 0x499   :  { %5693 = vmatmul.bf16.gmra.mxu3 %v13540_v7 }
 0x49a   :  { %5546 = vmatmul.bf16.gmra.mxu0 %v13551_v24  ;;  %v5449_v31 = vpop.f32.mrf.mxu2 }
 0x49b   :  { %v5400_v57 = vpop.f32.mrf.mxu1 }
 0x49c   :  { %v12496_v27 = vadd.f32 %v5400_v57, %v5352_v53  ;;  %v5498_v59 = vpop.f32.mrf.mxu3 }
 0x49d   :  { %v12498_v40 = vadd.f32 %v5498_v59, %v5449_v31 }
 0x49e   :  { %5595 = vmatmul.bf16.gmra.mxu1 %v13552_v49 }
 0x49f   :  { %v5353_v1 = vpop.f32.mrf.mxu0 }
 0x4a0   :  { %v5354_v36 = vadd.f32 %v5353_v1, %v12411_v33 }
 0x4a2   :  { %v5451_v8 = vpop.f32.mrf.mxu2 }
 0x4a3   :  { %v5402_v25 = vpop.f32.mrf.mxu1 }
 0x4a4   :  { %v12502_v15 = vadd.f32 %v5402_v25, %v5354_v36  ;;  %v5500_v39 = vpop.f32.mrf.mxu3 }
 0x4a5   :  { %v12504_v43 = vadd.f32 %v5500_v39, %v5451_v8 }
 0x4a7   :  { %v5356_v7 = vpop.f32.mrf.mxu0  ;;  %5649 = vmatmul.bf16.gmra.mxu2 %v12234_v58 }
 0x4a8   :  { %v5357_v12 = vadd.f32 %v5356_v7, %v12416_v55 }
 0x4a9   :  { %5698 = vmatmul.bf16.gmra.mxu3 %v12241_v17 }
 0x4aa   :  { %5551 = vmatmul.bf16.gmra.mxu0 %v13553_v41  ;;  %v5454_v35 = vpop.f32.mrf.mxu2 }
 0x4ab   :  { %v5405_v30 = vpop.f32.mrf.mxu1 }
 0x4ac   :  { %v12510_v38 = vadd.f32 %v5405_v30, %v5357_v12  ;;  %v5503_v33 = vpop.f32.mrf.mxu3 }
 0x4ad   :  { %v12512_v11 = vadd.f32 %v5503_v33, %v5454_v35 }
 0x4ae   :  { %5600 = vmatmul.bf16.gmra.mxu1 %v13554_v10 }
 0x4af   :  { %v5358_v22 = vpop.f32.mrf.mxu0 }
 0x4b0   :  { %v5359_v62 = vadd.f32 %v5358_v22, %v12419_v5 }
 0x4b2   :  { %v5456_v52 = vpop.f32.mrf.mxu2 }
 0x4b3   :  { %v5407_v55 = vpop.f32.mrf.mxu1 }
 0x4b4   :  { %v12516_v26 = vadd.f32 %v5407_v55, %v5359_v62  ;;  %v5505_v58 = vpop.f32.mrf.mxu3 }
 0x4b5   :  { %v12518_v34 = vadd.f32 %v5505_v58, %v5456_v52 }
 0x4b7   :  { %v5361_v17 = vpop.f32.mrf.mxu0  ;;  %5654 = vmatmul.bf16.gmra.mxu2 %v12333_v23 }
 0x4b8   :  { %v5362_v14 = vadd.f32 %v5361_v17, %v12424_v44 }
 0x4b9   :  { %5703 = vmatmul.bf16.gmra.mxu3 %v12339_v2 }
 0x4ba   :  { %5556 = vmatmul.bf16.gmra.mxu0 %v11296_v9  ;;  %v5459_v20 = vpop.f32.mrf.mxu2 }
 0x4bb   :  { %v5410_v28 = vpop.f32.mrf.mxu1 }
 0x4bc   :  { %v12524_v53 = vadd.f32 %v5410_v28, %v5362_v14  ;;  %v5508_v5 = vpop.f32.mrf.mxu3 }
 0x4bd   :  { %v12526_v24 = vadd.f32 %v5508_v5, %v5459_v20 }
 0x4be   :  { %5605 = vmatmul.bf16.gmra.mxu1 %v11308_v48 }
 0x4bf   :  { %v5363_v31 = vpop.f32.mrf.mxu0 }
 0x4c0   :  { %v5364_v57 = vadd.f32 %v5363_v31, %v12427_v51 }
 0x4c2   :  { %v5461_v59 = vpop.f32.mrf.mxu2 }
 0x4c3   :  { %v5412_v44 = vpop.f32.mrf.mxu1 }
 0x4c4   :  { %v12530_v49 = vadd.f32 %v5412_v44, %v5364_v57  ;;  %v5510_v23 = vpop.f32.mrf.mxu3 }
 0x4c5   :  { %v12532_v9 = vadd.f32 %v5510_v23, %v5461_v59 }
 0x4c7   :  { %v5366_v2 = vpop.f32.mrf.mxu0  ;;  %5659 = vmatmul.bf16.gmra.mxu2 %v12369_v45 }
 0x4c8   :  { %v5367_v1 = vadd.f32 %v5366_v2, %v12432_v29 }
 0x4c9   :  { %5708 = vmatmul.bf16.gmra.mxu3 %v12373_v54 }
 0x4ca   :  { %5561 = vmatmul.bf16.gmra.mxu0 %v11437_v47  ;;  %v5464_v48 = vpop.f32.mrf.mxu2 }
 0x4cb   :  { %v5415_v36 = vpop.f32.mrf.mxu1 }
 0x4cc   :  { %v12538_v8 = vadd.f32 %v5415_v36, %v5367_v1  ;;  %v5513_v51 = vpop.f32.mrf.mxu3 }
 0x4cd   :  { %v12540_v25 = vadd.f32 %v5513_v51, %v5464_v48 }
 0x4ce   :  { %5610 = vmatmul.bf16.gmra.mxu1 %v11447_v0 }
 0x4cf   :  { %v5368_v39 = vpop.f32.mrf.mxu0 }
 0x4d0   :  { %v5369_v7 = vadd.f32 %v5368_v39, %v12436_v32 }
 0x4d2   :  { %v5466_v12 = vpop.f32.mrf.mxu2 }
 0x4d3   :  { %v5417_v29 = vpop.f32.mrf.mxu1 }
 0x4d4   :  { %v12544_v41 = vadd.f32 %v5417_v29, %v5369_v7  ;;  %v5515_v45 = vpop.f32.mrf.mxu3 }
 0x4d5   :  { %v12546_v47 = vadd.f32 %v5515_v45, %v5466_v12 }
 0x4d7   :  { %v5527_v54 = vpop.f32.mrf.mxu0 }
 0x4d8   :  { %v5528_v35 = vadd.f32 %v5527_v54, %v12442_v3 }
 0x4da   :  { %v5625_v30 = vpop.f32.mrf.mxu2 }
 0x4db   :  { %v5576_v33 = vpop.f32.mrf.mxu1 }
 0x4dc   :  { %v5577_v10 = vadd.f32 %v5576_v33, %v5528_v35  ;;  %v5674_v22 = vpop.f32.mrf.mxu3 }
 0x4de   :  { %v5626_v62 = vadd.f32 %v5625_v30, %v5577_v10 }
 0x4df   :  { %v5529_v52 = vpop.f32.mrf.mxu0 }
 0x4e0   :  { %v5675_v0 = vadd.f32 %v5674_v22, %v5626_v62  ;;  %v5530_v55 = vadd.f32 %v5529_v52, %v12448_v21 }
 0x4e2   :  { %v5714_v32 = vpack.c.bf16 %v5675_v0, %v12440_v56  ;;  %v5627_v58 = vpop.f32.mrf.mxu2 }
 0x4e3   :  { %v5578_v17 = vpop.f32.mrf.mxu1 }
 0x4e4   :  { %5730 = vst [vmem:[#allocation8] sm:$0xff] %v5714_v32  ;;  %v5579_v14 = vadd.f32 %v5578_v17, %v5530_v55  ;;  %v5676_v20 = vpop.f32.mrf.mxu3 }
 0x4e6   :  { %v5628_v28 = vadd.f32 %v5627_v58, %v5579_v14 }
 0x4e7   :  { %v5532_v5 = vpop.f32.mrf.mxu0 }
 0x4e8   :  { %v5677_v31 = vadd.f32 %v5676_v20, %v5628_v28  ;;  %v5533_v3 = vadd.f32 %v5532_v5, %v12456_v46 }
 0x4ea   :  { %v5715_v57 = vpack.c.bf16 %v5677_v31, %v12446_v16  ;;  %v5630_v59 = vpop.f32.mrf.mxu2 }
 0x4eb   :  { %v5581_v44 = vpop.f32.mrf.mxu1 }
 0x4ec   :  { %5731 = vst [vmem:[#allocation8 + $0x8] sm:$0xff] %v5715_v57  ;;  %v5582_v23 = vadd.f32 %v5581_v44, %v5533_v3  ;;  %v5679_v2 = vpop.f32.mrf.mxu3 }
 0x4ee   :  { %v5631_v21 = vadd.f32 %v5630_v59, %v5582_v23 }
 0x4ef   :  { %v5534_v1 = vpop.f32.mrf.mxu0 }
 0x4f0   :  { %v5680_v56 = vadd.f32 %v5679_v2, %v5631_v21  ;;  %v5535_v48 = vadd.f32 %v5534_v1, %v12462_v19 }
 0x4f2   :  { %v5716_v36 = vpack.c.bf16 %v5680_v56, %v12454_v18  ;;  %v5632_v51 = vpop.f32.mrf.mxu2 }
 0x4f3   :  { %v5583_v39 = vpop.f32.mrf.mxu1 }
 0x4f4   :  { %5732 = vst [vmem:[#allocation8 + $0x10] sm:$0xff] %v5716_v36  ;;  %v5584_v7 = vadd.f32 %v5583_v39, %v5535_v48  ;;  %v5681_v12 = vpop.f32.mrf.mxu3 }
 0x4f6   :  { %v5633_v46 = vadd.f32 %v5632_v51, %v5584_v7 }
 0x4f7   :  { %v5537_v29 = vpop.f32.mrf.mxu0 }
 0x4f8   :  { %v5682_v16 = vadd.f32 %v5681_v12, %v5633_v46  ;;  %v5538_v45 = vadd.f32 %v5537_v29, %v12470_v63 }
 0x4fa   :  { %v5717_v54 = vpack.c.bf16 %v5682_v16, %v12460_v6  ;;  %v5635_v35 = vpop.f32.mrf.mxu2 }
 0x4fb   :  { %v5586_v30 = vpop.f32.mrf.mxu1 }
 0x4fc   :  { %5733 = vst [vmem:[#allocation8 + $0x18] sm:$0xff] %v5717_v54  ;;  %v5587_v33 = vadd.f32 %v5586_v30, %v5538_v45  ;;  %v5684_v10 = vpop.f32.mrf.mxu3 }
 0x4fe   :  { %v5636_v19 = vadd.f32 %v5635_v35, %v5587_v33 }
 0x4ff   :  { %v5539_v22 = vpop.f32.mrf.mxu0 }
 0x500   :  { %v5685_v18 = vadd.f32 %v5684_v10, %v5636_v19  ;;  %v5540_v62 = vadd.f32 %v5539_v22, %v12476_v61 }
 0x502   :  { %v5718_v52 = vpack.c.bf16 %v5685_v18, %v12468_v4  ;;  %v5637_v0 = vpop.f32.mrf.mxu2 }
 0x503   :  { %v5588_v55 = vpop.f32.mrf.mxu1 }
 0x504   :  { %5734 = vst [vmem:[#allocation8 + $0x20] sm:$0xff] %v5718_v52  ;;  %v5589_v32 = vadd.f32 %v5588_v55, %v5540_v62  ;;  %v5686_v58 = vpop.f32.mrf.mxu3 }
 0x506   :  { %v5638_v63 = vadd.f32 %v5637_v0, %v5589_v32 }
 0x507   :  { %v5542_v17 = vpop.f32.mrf.mxu0 }
 0x508   :  { %v5687_v6 = vadd.f32 %v5686_v58, %v5638_v63  ;;  %v5543_v14 = vadd.f32 %v5542_v17, %v12484_v13 }
 0x50a   :  { %v5719_v20 = vpack.c.bf16 %v5687_v6, %v12474_v37  ;;  %v5640_v28 = vpop.f32.mrf.mxu2 }
 0x50b   :  { %v5591_v5 = vpop.f32.mrf.mxu1 }
 0x50c   :  { %5735 = vst [vmem:[#allocation8 + $0x28] sm:$0xff] %v5719_v20  ;;  %v5592_v31 = vadd.f32 %v5591_v5, %v5543_v14  ;;  %v5689_v3 = vpop.f32.mrf.mxu3 }
 0x50e   :  { %v5641_v61 = vadd.f32 %v5640_v28, %v5592_v31 }
 0x50f   :  { %v5544_v57 = vpop.f32.mrf.mxu0 }
 0x510   :  { %v5690_v4 = vadd.f32 %v5689_v3, %v5641_v61  ;;  %v5545_v59 = vadd.f32 %v5544_v57, %v12490_v42 }
 0x512   :  { %v5720_v44 = vpack.c.bf16 %v5690_v4, %v12482_v60  ;;  %v5642_v23 = vpop.f32.mrf.mxu2 }
 0x513   :  { %v5593_v2 = vpop.f32.mrf.mxu1 }
 0x514   :  { %5736 = vst [vmem:[#allocation8 + $0x30] sm:$0xff] %v5720_v44  ;;  %v5594_v21 = vadd.f32 %v5593_v2, %v5545_v59  ;;  %v5691_v1 = vpop.f32.mrf.mxu3 }
 0x516   :  { %v5643_v13 = vadd.f32 %v5642_v23, %v5594_v21 }
 0x517   :  { %v5547_v56 = vpop.f32.mrf.mxu0 }
 0x518   :  { %v5692_v37 = vadd.f32 %v5691_v1, %v5643_v13  ;;  %v5548_v48 = vadd.f32 %v5547_v56, %v12498_v40 }
 0x51a   :  { %v5721_v36 = vpack.c.bf16 %v5692_v37, %v12488_v50  ;;  %v5645_v51 = vpop.f32.mrf.mxu2 }
 0x51b   :  { %v5596_v39 = vpop.f32.mrf.mxu1 }
 0x51c   :  { %5737 = vst [vmem:[#allocation8 + $0x38] sm:$0xff] %v5721_v36  ;;  %v5597_v7 = vadd.f32 %v5596_v39, %v5548_v48  ;;  %v5694_v12 = vpop.f32.mrf.mxu3 }
 0x51e   :  { %v5646_v42 = vadd.f32 %v5645_v51, %v5597_v7 }
 0x51f   :  { %v5549_v46 = vpop.f32.mrf.mxu0 }
 0x520   :  { %v5695_v60 = vadd.f32 %v5694_v12, %v5646_v42  ;;  %v5550_v29 = vadd.f32 %v5549_v46, %v12504_v43 }
 0x522   :  { %v5722_v16 = vpack.c.bf16 %v5695_v60, %v12496_v27  ;;  %v5647_v45 = vpop.f32.mrf.mxu2 }
 0x523   :  { %v5598_v54 = vpop.f32.mrf.mxu1 }
 0x524   :  { %5738 = vst [vmem:[#allocation8 + $0x40] sm:$0xff] %v5722_v16  ;;  %v5599_v35 = vadd.f32 %v5598_v54, %v5550_v29  ;;  %v5696_v30 = vpop.f32.mrf.mxu3 }
 0x526   :  { %v5648_v40 = vadd.f32 %v5647_v45, %v5599_v35 }
 0x527   :  { %v5552_v33 = vpop.f32.mrf.mxu0 }
 0x528   :  { %v5697_v50 = vadd.f32 %v5696_v30, %v5648_v40  ;;  %v5553_v10 = vadd.f32 %v5552_v33, %v12512_v11 }
 0x52a   :  { %v5723_v19 = vpack.c.bf16 %v5697_v50, %v12502_v15  ;;  %v5650_v22 = vpop.f32.mrf.mxu2 }
 0x52b   :  { %v5601_v18 = vpop.f32.mrf.mxu1 }
 0x52c   :  { %5739 = vst [vmem:[#allocation8 + $0x48] sm:$0xff] %v5723_v19  ;;  %v5602_v62 = vadd.f32 %v5601_v18, %v5553_v10  ;;  %v5699_v52 = vpop.f32.mrf.mxu3 }
 0x52e   :  { %v5651_v43 = vadd.f32 %v5650_v22, %v5602_v62 }
 0x52f   :  { %v5554_v0 = vpop.f32.mrf.mxu0 }
 0x530   :  { %v5700_v27 = vadd.f32 %v5699_v52, %v5651_v43  ;;  %v5555_v55 = vadd.f32 %v5554_v0, %v12518_v34 }
 0x532   :  { %v5724_v32 = vpack.c.bf16 %v5700_v27, %v12510_v38  ;;  %v5652_v58 = vpop.f32.mrf.mxu2 }
 0x533   :  { %v5603_v63 = vpop.f32.mrf.mxu1 }
 0x534   :  { %5740 = vst [vmem:[#allocation8 + $0x50] sm:$0xff] %v5724_v32  ;;  %v5604_v17 = vadd.f32 %v5603_v63, %v5555_v55  ;;  %v5701_v6 = vpop.f32.mrf.mxu3 }
 0x536   :  { %v5653_v11 = vadd.f32 %v5652_v58, %v5604_v17 }
 0x537   :  { %v5557_v14 = vpop.f32.mrf.mxu0 }
 0x538   :  { %v5702_v15 = vadd.f32 %v5701_v6, %v5653_v11  ;;  %v5558_v20 = vadd.f32 %v5557_v14, %v12526_v24 }
 0x53a   :  { %v5725_v28 = vpack.c.bf16 %v5702_v15, %v12516_v26  ;;  %v5655_v5 = vpop.f32.mrf.mxu2 }
 0x53b   :  { %v5606_v31 = vpop.f32.mrf.mxu1 }
 0x53c   :  { %5741 = vst [vmem:[#allocation8 + $0x58] sm:$0xff] %v5725_v28  ;;  %v5607_v3 = vadd.f32 %v5606_v31, %v5558_v20  ;;  %v5704_v61 = vpop.f32.mrf.mxu3 }
 0x53e   :  { %v5656_v34 = vadd.f32 %v5655_v5, %v5607_v3 }
 0x53f   :  { %v5559_v57 = vpop.f32.mrf.mxu0 }
 0x540   :  { %v5705_v38 = vadd.f32 %v5704_v61, %v5656_v34  ;;  %v5560_v4 = vadd.f32 %v5559_v57, %v12532_v9 }
 0x542   :  { %v5726_v59 = vpack.c.bf16 %v5705_v38, %v12524_v53  ;;  %v5657_v44 = vpop.f32.mrf.mxu2 }
 0x543   :  { %v5608_v23 = vpop.f32.mrf.mxu1 }
 0x544   :  { %5742 = vst [vmem:[#allocation8 + $0x60] sm:$0xff] %v5726_v59  ;;  %v5609_v2 = vadd.f32 %v5608_v23, %v5560_v4  ;;  %v5706_v21 = vpop.f32.mrf.mxu3 }
 0x546   :  { %v5658_v24 = vadd.f32 %v5657_v44, %v5609_v2 }
 0x547   :  { %v5562_v1 = vpop.f32.mrf.mxu0 }
 0x548   :  { %v5707_v26 = vadd.f32 %v5706_v21, %v5658_v24  ;;  %v5563_v13 = vadd.f32 %v5562_v1, %v12540_v25 }
 0x54a   :  { %v5727_v56 = vpack.c.bf16 %v5707_v26, %v12530_v49  ;;  %v5660_v37 = vpop.f32.mrf.mxu2 }
 0x54b   :  { %v5611_v48 = vpop.f32.mrf.mxu1 }
 0x54c   :  { %5743 = vst [vmem:[#allocation8 + $0x68] sm:$0xff] %v5727_v56  ;;  %v5612_v36 = vadd.f32 %v5611_v48, %v5563_v13  ;;  %v5709_v51 = vpop.f32.mrf.mxu3 }
 0x54e   :  { %v5661_v9 = vadd.f32 %v5660_v37, %v5612_v36 }
 0x54f   :  { %v5564_v39 = vpop.f32.mrf.mxu0 }
 0x550   :  { %v5710_v53 = vadd.f32 %v5709_v51, %v5661_v9  ;;  %v5565_v7 = vadd.f32 %v5564_v39, %v12546_v47 }
 0x552   :  { %v5728_v12 = vpack.c.bf16 %v5710_v53, %v12538_v8  ;;  %v5662_v46 = vpop.f32.mrf.mxu2 }
 0x553   :  { %v5613_v42 = vpop.f32.mrf.mxu1 }
 0x554   :  { %5744 = vst [vmem:[#allocation8 + $0x70] sm:$0xff] %v5728_v12  ;;  %v5614_v60 = vadd.f32 %v5613_v42, %v5565_v7  ;;  %v5711_v25 = vpop.f32.mrf.mxu3 }
 0x556   :  { %v5663_v29 = vadd.f32 %v5662_v46, %v5614_v60 }
 0x558   :  { %v5712_v49 = vadd.f32 %v5711_v25, %v5663_v29 }
 0x55a   :  { %v5729_v16 = vpack.c.bf16 %v5712_v49, %v12544_v41 }
 0x55c   :  { %5745 = vst [vmem:[#allocation8 + $0x78] sm:$0xff] %v5729_v16 }
 0x55d   :  { %5758 = dma.vmem_to_hbm [thread:$0]  %s5751_s29, 2048, %s5753_s5, [#allocation4], %s7880_s24, %s7880_s24, %s7881_s25  }
 0x55e   :  { %7874 = dma.done.wait [#allocation4], 2048  }
 0x55f   :  { %7875 = vsyncadd [#allocation4], 4294965248 }
 0x560   :  { %5763 = vsyncpa [#allocation3], 1 }
 0x561   :  { %5764 = vsyncpa [#allocation6], 1 }
 0x562   :  { %5765 = vsyncpa [#allocation4], 1 }

</bundles_post_ra>
